<compile_context>
chip_gen: v7x
topology: tpu7x:2x2x1
jax: 0.10.0
libtpu: 0.0.40
codegen_flags: <defaults>
</compile_context>

<pallas_src>
import functools
import math

import jax
import jax.numpy as jnp
from jax.experimental import pallas as pl
from jax.experimental.pallas import tpu as pltpu


# ----------------------------------------------------------------------------
# Small compat helpers
# ----------------------------------------------------------------------------
_CP = getattr(pltpu, "CompilerParams", None) or getattr(pltpu, "TPUCompilerParams", None)


def _cparams(**kw):
    return _CP(**kw) if _CP is not None else None


def _recip(x):
    if hasattr(pl, "reciprocal"):
        return pl.reciprocal(x, approx=True)
    return 1.0 / x


def _tile(n, pref, align):
    """Largest block <= pref that divides n and is `align`-aligned, else n (full dim)."""
    if n <= pref:
        return n
    t = (pref // align) * align
    while t >= align:
        if n % t == 0:
            return t
        t -= align
    return n


def _group_tile(n, cap=4):
    """Largest divisor of n that is <= cap (amortizes per-grid-step overhead)."""
    for t in range(min(cap, n), 0, -1):
        if n % t == 0:
            return t
    return 1


# ----------------------------------------------------------------------------
# Fused front-end: xEmb -> tanh query -> condition attention -> xEmb+step+cond
# ----------------------------------------------------------------------------
def _frontend_kernel(x_ref, step_ref, cate_ref, ew_ref, eb_ref, qw_ref, qb_ref, o_ref):
    f32 = jnp.float32
    x2 = x_ref[0]                                                       # [TL, C] bf16
    xemb = jnp.dot(x2, ew_ref[...], preferred_element_type=f32)
    xemb = xemb + eb_ref[...].astype(f32)                               # [TL, D]
    q = jnp.dot(xemb.astype(jnp.bfloat16), qw_ref[...], preferred_element_type=f32)
    q = jnp.tanh(q + qb_ref[...].astype(f32)).astype(jnp.bfloat16)      # [TL, D]
    cate = cate_ref[0]                                                  # [K, D] bf16
    # raw softmax(q @ cate^T) (no 1/sqrt(d) scale, matching the reference module);
    # trans_b dot_general avoids materialising a transposed copy of cate.
    s = jax.lax.dot_general(q, cate, (((1,), (1,)), ((), ())),
                            preferred_element_type=f32)                 # [TL, K]
    s = s - jnp.max(s, axis=-1, keepdims=True)
    p = jnp.exp(s)
    p = (p * _recip(jnp.sum(p, axis=-1, keepdims=True))).astype(jnp.bfloat16)
    cond = jnp.dot(p, cate, preferred_element_type=f32)                 # [TL, D]
    enc = xemb + step_ref[0].astype(f32) + cond
    o_ref[0] = enc.astype(o_ref.dtype)


def frontend(x_blc, step_b1d, cate, params):
    B, L, C = x_blc.shape
    D = params["d_model"]
    K = cate.shape[1]
    TL = _tile(L, 256, 8)
    return pl.pallas_call(
        _frontend_kernel,
        out_shape=jax.ShapeDtypeStruct((B, L, D), jnp.bfloat16),
        grid=(B, L // TL),
        in_specs=[
            pl.BlockSpec((1, TL, C), lambda b, l: (b, l, 0)),
            pl.BlockSpec((1, 1, D), lambda b, l: (b, 0, 0)),
            pl.BlockSpec((1, K, D), lambda b, l: (b, 0, 0)),
            pl.BlockSpec((C, D), lambda b, l: (0, 0)),
            pl.BlockSpec((1, D), lambda b, l: (0, 0)),
            pl.BlockSpec((D, D), lambda b, l: (0, 0)),
            pl.BlockSpec((1, D), lambda b, l: (0, 0)),
        ],
        out_specs=pl.BlockSpec((1, TL, D), lambda b, l: (b, l, 0)),
        compiler_params=_cparams(dimension_semantics=("parallel", "parallel")),
    )(x_blc, step_b1d, cate,
      params["emb_w"], params["emb_b"].reshape(1, D),
      params["q_w"], params["q_b"].reshape(1, D))


# ----------------------------------------------------------------------------
# Fully fused encoder layer (per l: QKV + MHA over B + out_proj + LN1 + FFN + LN2)
# ----------------------------------------------------------------------------
def _encoder_layer_kernel(x_ref, inw_ref, inb_ref, opw_ref, opb_ref,
                          g1_ref, be1_ref, w1_ref, fb1_ref, w2_ref, fb2_ref,
                          g2_ref, be2_ref, o_ref, *, nheads, hd, f_chunk, eps):
    f32 = jnp.float32
    bf16 = jnp.bfloat16
    tlg = x_ref.shape[0]
    d = nheads * hd
    dff = w1_ref.shape[1]
    scale = 1.0 / math.sqrt(hd)

    for li in range(tlg):                     # static unroll over the l-group tile
        x = x_ref[li]                                                    # [B, D] bf16
        # -- packed QKV projection (one MXU matmul) --
        qkv = jnp.dot(x, inw_ref[...], preferred_element_type=f32)
        qkv = qkv + inb_ref[...].astype(f32)                             # [B, 3D] f32
        q_all = (qkv[:, :d] * scale).astype(bf16)   # fold 1/sqrt(hd) into q
        k_all = qkv[:, d:2 * d].astype(bf16)
        v_all = qkv[:, 2 * d:].astype(bf16)

        # -- attention over the B axis; fold out_proj per head so the accumulator
        #    stays a lane-dense [B, D] slab (no hd-granularity partial stores) --
        y = x.astype(f32) + opb_ref[...].astype(f32)
        for h in range(nheads):
            sl = slice(h * hd, (h + 1) * hd)
            qh, kh, vh = q_all[:, sl], k_all[:, sl], v_all[:, sl]
            s = jax.lax.dot_general(qh, kh, (((1,), (1,)), ((), ())),
                                    preferred_element_type=f32)          # [B, B]
            s = s - jnp.max(s, axis=-1, keepdims=True)
            p = jnp.exp(s)
            p = (p * _recip(jnp.sum(p, axis=-1, keepdims=True))).astype(bf16)
            oh = jnp.dot(p, vh, preferred_element_type=f32).astype(bf16)  # [B, hd]
            y = y + jnp.dot(oh, opw_ref[sl, :], preferred_element_type=f32)

        # -- LayerNorm 1 (post-norm) --
        mu = jnp.mean(y, axis=-1, keepdims=True)
        yc = y - mu
        var = jnp.mean(yc * yc, axis=-1, keepdims=True)
        y1 = yc * jax.lax.rsqrt(var + eps) * g1_ref[...].astype(f32) + be1_ref[...].astype(f32)
        y1b = y1.astype(bf16)

        # -- FFN (ReLU), K-tiled over dim_ff: bounded live intermediate --
        z = y1 + fb2_ref[...].astype(f32)
        for c0 in range(0, dff, f_chunk):
            csl = slice(c0, c0 + f_chunk)
            hblk = jnp.dot(y1b, w1_ref[:, csl], preferred_element_type=f32)
            hblk = jnp.maximum(hblk + fb1_ref[:, csl].astype(f32), 0.0).astype(bf16)
            z = z + jnp.dot(hblk, w2_ref[csl, :], preferred_element_type=f32)

        # -- LayerNorm 2 --
        mu = jnp.mean(z, axis=-1, keepdims=True)
        zc = z - mu
        var = jnp.mean(zc * zc, axis=-1, keepdims=True)
        z = zc * jax.lax.rsqrt(var + eps) * g2_ref[...].astype(f32) + be2_ref[...].astype(f32)
        o_ref[li] = z.astype(o_ref.dtype)


def _layer_cparams(d, dff, b, tlg, grid_steps):
    # Estimate weight VMEM (double-buffered invariant blocks) and only raise the
    # scoped-VMEM limit when it matters (v5e default scoped limit is 16 MiB).
    wbytes = 2 * (d * 3 * d + d * d + 2 * d * dff)
    est = 2 * wbytes + 4 * (tlg * b * d * 2) + (2 << 20)
    kw = dict(dimension_semantics=("parallel",))
    if est > 14 * 1024 * 1024:
        kw["vmem_limit_bytes"] = int(min(est + (8 << 20), 60 * 1024 * 1024))
    return _cparams(**kw)


def encoder_layer(h_lbd, lp, nheads, hd, eps=1e-5):
    L, B, D = h_lbd.shape
    F = lp["ff_w1"].shape[1]
    TLG = _group_tile(L, cap=4)                  # >=2 grid steps where possible
    f_chunk = _tile(F, 512, 128)
    return pl.pallas_call(
        functools.partial(_encoder_layer_kernel, nheads=nheads, hd=hd,
                          f_chunk=f_chunk, eps=eps),
        out_shape=jax.ShapeDtypeStruct((L, B, D), jnp.bfloat16),
        grid=(L // TLG,),
        in_specs=[
            pl.BlockSpec((TLG, B, D), lambda i: (i, 0, 0)),
            pl.BlockSpec((D, 3 * D), lambda i: (0, 0)),
            pl.BlockSpec((1, 3 * D), lambda i: (0, 0)),
            pl.BlockSpec((D, D), lambda i: (0, 0)),
            pl.BlockSpec((1, D), lambda i: (0, 0)),
            pl.BlockSpec((1, D), lambda i: (0, 0)),
            pl.BlockSpec((1, D), lambda i: (0, 0)),
            pl.BlockSpec((D, F), lambda i: (0, 0)),
            pl.BlockSpec((1, F), lambda i: (0, 0)),
            pl.BlockSpec((F, D), lambda i: (0, 0)),
            pl.BlockSpec((1, D), lambda i: (0, 0)),
            pl.BlockSpec((1, D), lambda i: (0, 0)),
            pl.BlockSpec((1, D), lambda i: (0, 0)),
        ],
        out_specs=pl.BlockSpec((TLG, B, D), lambda i: (i, 0, 0)),
        compiler_params=_layer_cparams(D, F, B, TLG, L // TLG),
    )(h_lbd,
      lp["in_w"], lp["in_b"].reshape(1, 3 * D),
      lp["op_w"], lp["op_b"].reshape(1, D),
      lp["ln1_g"].reshape(1, D), lp["ln1_b"].reshape(1, D),
      lp["ff_w1"], lp["ff_b1"].reshape(1, F),
      lp["ff_w2"], lp["ff_b2"].reshape(1, D),
      lp["ln2_g"].reshape(1, D), lp["ln2_b"].reshape(1, D))


# ----------------------------------------------------------------------------
# Final projection, emitted transposed ([d_output, M]) so stores are lane-dense
# ----------------------------------------------------------------------------
def _final_proj_kernel(x_ref, wt_ref, b_ref, o_ref):
    y = jax.lax.dot_general(wt_ref[...], x_ref[...], (((1,), (1,)), ((), ())),
                            preferred_element_type=jnp.float32)          # [O, TM]
    o_ref[...] = (y + b_ref[...].astype(jnp.float32)).astype(o_ref.dtype)


def final_proj_t(h_md, w_out, b_out):
    m, d = h_md.shape
    o = w_out.shape[1]
    TM = _tile(m, 512, 128)
    w_t = jnp.transpose(w_out)                                           # [O, D]
    return pl.pallas_call(
        _final_proj_kernel,
        out_shape=jax.ShapeDtypeStruct((o, m), jnp.float32),
        grid=(m // TM,),
        in_specs=[
            pl.BlockSpec((TM, d), lambda i: (i, 0)),
            pl.BlockSpec((o, d), lambda i: (0, 0)),
            pl.BlockSpec((o, 1), lambda i: (0, 0)),
        ],
        out_specs=pl.BlockSpec((o, TM), lambda i: (0, i)),
        compiler_params=_cparams(dimension_semantics=("parallel",)),
    )(h_md, w_t, b_out.reshape(o, 1))


# ----------------------------------------------------------------------------
# Host-side glue: sinusoidal embedding, step MLP (tiny, plain XLA), parameters
# ----------------------------------------------------------------------------
def sinusoidal_pos_emb(t, dim, theta=10000.0):
    half = dim // 2
    denom = max(half - 1, 1)
    freqs = jnp.exp(jnp.arange(half, dtype=jnp.float32) * (-math.log(theta) / denom))
    args = t[:, None] * freqs[None, :]
    return jnp.concatenate([jnp.sin(args), jnp.cos(args)], axis=-1)      # [B, dim]


def _dense_init(key, din, dout, scale=0.05):
    kw, kb = jax.random.split(key)
    w = (scale * jax.random.normal(kw, (din, dout), jnp.float32)).astype(jnp.bfloat16)
    b = scale * jax.random.normal(kb, (dout,), jnp.float32)
    return w, b


def init_params(key, d_input, d_model, d_output, d_emb, n_layers, num_category,
                nhead=8, dim_ff=2048):
    assert d_model % nhead == 0
    keys = jax.random.split(key, 8 + n_layers)
    p = {"d_model": d_model, "nhead": nhead}
    p["emb_w"], p["emb_b"] = _dense_init(keys[0], d_input, d_model)        # _embedding
    p["cate_table"] = (0.05 * jax.random.normal(keys[1], (num_category, d_model),
                                                jnp.float32)).astype(jnp.bfloat16)
    p["step_w1"], p["step_b1"] = _dense_init(keys[2], d_model, d_model)    # step_mlp[1]
    p["step_w2"], p["step_b2"] = _dense_init(keys[3], d_model, d_model)    # step_mlp[3]
    p["q_w"], p["q_b"] = _dense_init(keys[4], d_model, d_model)            # forQueryFunc
    p["out_w"], p["out_b"] = _dense_init(keys[5], d_model, d_output)       # _linear
    # emb_linear exists in __init__ but is unused in forward -> omitted.
    layers = []
    for i in range(n_layers):
        lk = jax.random.split(keys[8 + i], 4)
        lp = {}
        lp["in_w"], lp["in_b"] = _dense_init(lk[0], d_model, 3 * d_model)  # packed q,k,v
        lp["op_w"], lp["op_b"] = _dense_init(lk[1], d_model, d_model)      # out_proj
        lp["ff_w1"], lp["ff_b1"] = _dense_init(lk[2], d_model, dim_ff)     # linear1 (relu)
        lp["ff_w2"], lp["ff_b2"] = _dense_init(lk[3], dim_ff, d_model)     # linear2
        lp["ln1_g"] = jnp.ones((d_model,), jnp.float32)
        lp["ln1_b"] = jnp.zeros((d_model,), jnp.float32)
        lp["ln2_g"] = jnp.ones((d_model,), jnp.float32)
        lp["ln2_b"] = jnp.zeros((d_model,), jnp.float32)
        layers.append(lp)
    p["layers"] = layers
    return p


def transformer_denoising_query_once(params, x, t, emb_idx, x_self_cond=None):
    del x_self_cond                                             # self_condition=False
    B, C, L = x.shape
    D = params["d_model"]
    H = params["nhead"]
    hd = D // H
    f32 = jnp.float32

    # step = step_mlp(t): tiny [B, D] matmuls + exact GELU -> plain XLA (no pallas
    # launch overhead, exact erf GELU).
    sin_emb = sinusoidal_pos_emb(t.astype(f32), D)
    s1 = jax.nn.gelu(sin_emb @ params["step_w1"].astype(f32) + params["step_b1"],
                     approximate=False)
    step = (s1 @ params["step_w2"].astype(f32) + params["step_b2"])
    step = step.reshape(B, 1, D).astype(jnp.bfloat16)

    # category embedding lookup (nn.Embedding) — gather done host-side
    cate = jnp.take(params["cate_table"], emb_idx, axis=0)                  # [B, K, D]

    # fused front end: xEmb + step + softmax(tanh(xEmb W) cate^T) cate
    x_blc = jnp.transpose(x, (0, 2, 1)).astype(jnp.bfloat16)                # [B, L, C]
    enc = frontend(x_blc, step, cate, params)                               # [B, L, D]

    # encoder stack in [L, B, D] layout (batch_first=False: attention over B);
    # one fused pallas_call per layer.
    h = jnp.transpose(enc, (1, 0, 2))                                       # [L, B, D]
    for lp in params["layers"]:
        h = encoder_layer(h, lp, H, hd)

    # final projection, lane-dense transposed output [O, M]
    out_t = final_proj_t(h.reshape(L * B, D), params["out_w"], params["out_b"])
    out = out_t.reshape(-1, L, B)                                           # [O, L, B]
    return jnp.transpose(out, (2, 0, 1))                                    # [B, d_output, L]


# ----------------------------------------------------------------------------
if __name__ == "__main__":
    B, C, L = 2, 4, 16          # batch, d_input (channels), sequence length
    D, O, K = 32, 4, 8          # d_model, d_output, number of condition indices (d_emb)
    N_LAYERS, NUM_CAT = 2, 10

    key = jax.random.PRNGKey(0)
    kp, kx, kt, ke = jax.random.split(key, 4)
    params = init_params(kp, C, D, O, K, N_LAYERS, NUM_CAT)

    x = jax.random.normal(kx, (B, C, L), jnp.float32)
    t = jax.random.randint(kt, (B,), 0, 1000).astype(jnp.float32)
    emb = jax.random.randint(ke, (B, K), 0, NUM_CAT)

    fwd = jax.jit(lambda x_, t_, e_: transformer_denoising_query_once(params, x_, t_, e_))
    out = fwd(x, t, emb)
    jax.block_until_ready(out)
    assert out.shape == (B, O, L), out.shape
    assert bool(jnp.all(jnp.isfinite(out)))
    print("KERNEL_OK")
</pallas_src>

<mosaic_0001>
module attributes {stable_mosaic.version = 11 : i64} {
  func.func @_frontend_kernel(%arg0: i32, %arg1: i32, %arg2: memref<1x16x4xbf16, #tpu.memory_space<vmem>>, %arg3: memref<1x1x32xbf16, #tpu.memory_space<vmem>>, %arg4: memref<1x8x32xbf16, #tpu.memory_space<vmem>>, %arg5: memref<4x32xbf16, #tpu.memory_space<vmem>>, %arg6: memref<1x32xf32, #tpu.memory_space<vmem>>, %arg7: memref<32x32xbf16, #tpu.memory_space<vmem>>, %arg8: memref<1x32xf32, #tpu.memory_space<vmem>>, %arg9: memref<1x16x32xbf16, #tpu.memory_space<vmem>>) attributes {dimension_semantics = [#tpu.dimension_semantics<parallel>, #tpu.dimension_semantics<parallel>], iteration_bounds = array<i64: 2, 1>, scalar_prefetch = 0 : i64, scratch_operands = 0 : i64, tpu.core_type = #tpu.core_type<tc>, window_params = [{transform_indices = @transform_0, window_bounds = array<i64: 1, 16, 4>}, {transform_indices = @transform_1, window_bounds = array<i64: 1, 1, 32>}, {transform_indices = @transform_2, window_bounds = array<i64: 1, 8, 32>}, {pipeline_mode = #tpu.pipeline_mode<synchronous>, transform_indices = @transform_3, window_bounds = array<i64: 4, 32>}, {pipeline_mode = #tpu.pipeline_mode<synchronous>, transform_indices = @transform_4, window_bounds = array<i64: 1, 32>}, {pipeline_mode = #tpu.pipeline_mode<synchronous>, transform_indices = @transform_5, window_bounds = array<i64: 32, 32>}, {pipeline_mode = #tpu.pipeline_mode<synchronous>, transform_indices = @transform_6, window_bounds = array<i64: 1, 32>}, {transform_indices = @transform_7, window_bounds = array<i64: 1, 16, 32>}]} {
    %c0 = arith.constant 0 : index
    %c0_0 = arith.constant 0 : index
    %c0_1 = arith.constant 0 : index
    %0 = vector.load %arg2[%c0, %c0_0, %c0_1] : memref<1x16x4xbf16, #tpu.memory_space<vmem>>, vector<1x16x4xbf16>
    %1 = vector.shape_cast %0 : vector<1x16x4xbf16> to vector<16x4xbf16>
    %c0_2 = arith.constant 0 : index
    %c0_3 = arith.constant 0 : index
    %2 = vector.load %arg5[%c0_2, %c0_3] : memref<4x32xbf16, #tpu.memory_space<vmem>>, vector<4x32xbf16>
    %cst = arith.constant dense<0.000000e+00> : vector<16x32xf32>
    %3 = tpu.matmul %1, %2, %cst {dimension_numbers = #tpu.dot_dimension_numbers<[1], [0], [0], [1], [0, 0, 1, 1], [], []>} : vector<16x4xbf16>, vector<4x32xbf16>, vector<16x32xf32> -> vector<16x32xf32>
    %c0_4 = arith.constant 0 : index
    %c0_5 = arith.constant 0 : index
    %4 = vector.load %arg6[%c0_4, %c0_5] : memref<1x32xf32, #tpu.memory_space<vmem>>, vector<1x32xf32>
    %5 = vector.broadcast %4 : vector<1x32xf32> to vector<16x32xf32>
    %6 = arith.addf %3, %5 : vector<16x32xf32>
    %7 = arith.truncf %6 : vector<16x32xf32> to vector<16x32xbf16>
    %c0_6 = arith.constant 0 : index
    %c0_7 = arith.constant 0 : index
    %8 = vector.load %arg7[%c0_6, %c0_7] : memref<32x32xbf16, #tpu.memory_space<vmem>>, vector<32x32xbf16>
    %cst_8 = arith.constant dense<0.000000e+00> : vector<16x32xf32>
    %9 = tpu.matmul %7, %8, %cst_8 {dimension_numbers = #tpu.dot_dimension_numbers<[1], [0], [0], [1], [0, 0, 1, 1], [], []>} : vector<16x32xbf16>, vector<32x32xbf16>, vector<16x32xf32> -> vector<16x32xf32>
    %c0_9 = arith.constant 0 : index
    %c0_10 = arith.constant 0 : index
    %10 = vector.load %arg8[%c0_9, %c0_10] : memref<1x32xf32, #tpu.memory_space<vmem>>, vector<1x32xf32>
    %11 = vector.broadcast %10 : vector<1x32xf32> to vector<16x32xf32>
    %12 = arith.addf %9, %11 : vector<16x32xf32>
    %13 = math.tanh %12 : vector<16x32xf32>
    %14 = arith.truncf %13 : vector<16x32xf32> to vector<16x32xbf16>
    %c0_11 = arith.constant 0 : index
    %c0_12 = arith.constant 0 : index
    %c0_13 = arith.constant 0 : index
    %15 = vector.load %arg4[%c0_11, %c0_12, %c0_13] : memref<1x8x32xbf16, #tpu.memory_space<vmem>>, vector<1x8x32xbf16>
    %16 = vector.shape_cast %15 : vector<1x8x32xbf16> to vector<8x32xbf16>
    %cst_14 = arith.constant dense<0.000000e+00> : vector<16x8xf32>
    %17 = tpu.matmul %14, %16, %cst_14 {dimension_numbers = #tpu.dot_dimension_numbers<[1], [1], [0], [0], [0, 0, 1, 0], [], []>} : vector<16x32xbf16>, vector<8x32xbf16>, vector<16x8xf32> -> vector<16x8xf32>
    %cst_15 = arith.constant dense<0xFF800000> : vector<16xf32>
    %18 = vector.multi_reduction <maximumf>, %17, %cst_15 [1] : vector<16x8xf32> to vector<16xf32>
    %19 = vector.shape_cast %18 : vector<16xf32> to vector<16x1xf32>
    %20 = vector.broadcast %19 : vector<16x1xf32> to vector<16x8xf32>
    %21 = arith.subf %17, %20 : vector<16x8xf32>
    %22 = math.exp %21 : vector<16x8xf32>
    %cst_16 = arith.constant dense<0.000000e+00> : vector<16xf32>
    %23 = vector.multi_reduction <add>, %22, %cst_16 [1] : vector<16x8xf32> to vector<16xf32>
    %24 = vector.shape_cast %23 : vector<16xf32> to vector<16x1xf32>
    %25 = tpu.reciprocal %24 {approx = true} : vector<16x1xf32> -> vector<16x1xf32>
    %26 = vector.broadcast %25 : vector<16x1xf32> to vector<16x8xf32>
    %27 = arith.mulf %22, %26 : vector<16x8xf32>
    %28 = arith.truncf %27 : vector<16x8xf32> to vector<16x8xbf16>
    %cst_17 = arith.constant dense<0.000000e+00> : vector<16x32xf32>
    %29 = tpu.matmul %28, %16, %cst_17 {dimension_numbers = #tpu.dot_dimension_numbers<[1], [0], [0], [1], [0, 0, 1, 1], [], []>} : vector<16x8xbf16>, vector<8x32xbf16>, vector<16x32xf32> -> vector<16x32xf32>
    %c0_18 = arith.constant 0 : index
    %c0_19 = arith.constant 0 : index
    %c0_20 = arith.constant 0 : index
    %30 = vector.load %arg3[%c0_18, %c0_19, %c0_20] : memref<1x1x32xbf16, #tpu.memory_space<vmem>>, vector<1x1x32xbf16>
    %31 = vector.shape_cast %30 : vector<1x1x32xbf16> to vector<1x32xbf16>
    %32 = arith.extf %31 : vector<1x32xbf16> to vector<1x32xf32>
    %33 = vector.broadcast %32 : vector<1x32xf32> to vector<16x32xf32>
    %34 = arith.addf %6, %33 : vector<16x32xf32>
    %35 = arith.addf %34, %29 : vector<16x32xf32>
    %36 = arith.truncf %35 : vector<16x32xf32> to vector<16x32xbf16>
    %c0_21 = arith.constant 0 : index
    %c0_22 = arith.constant 0 : index
    %c0_23 = arith.constant 0 : index
    %37 = vector.load %arg9[%c0_21, %c0_22, %c0_23] : memref<1x16x32xbf16, #tpu.memory_space<vmem>>, vector<1x16x32xbf16>
    %38 = vector.shape_cast %37 : vector<1x16x32xbf16> to vector<16x32xbf16>
    %39 = vector.shape_cast %36 : vector<16x32xbf16> to vector<1x16x32xbf16>
    tpu.vector_store %arg9[%c0_21, %c0_22, %c0_23], %39 {strides = array<i32>} : memref<1x16x32xbf16, #tpu.memory_space<vmem>>, vector<1x16x32xbf16>,
    return
  }
  func.func @transform_0(%arg0: i32, %arg1: i32) -> (i32, i32, i32) {
    %c0_i32 = arith.constant 0 : i32
    %c0_i32_0 = arith.constant 0 : i32
    return %arg0, %arg1, %c0_i32 : i32, i32, i32
  }
  func.func @transform_1(%arg0: i32, %arg1: i32) -> (i32, i32, i32) {
    %c0_i32 = arith.constant 0 : i32
    %c0_i32_0 = arith.constant 0 : i32
    %c0_i32_1 = arith.constant 0 : i32
    return %arg0, %c0_i32, %c0_i32_0 : i32, i32, i32
  }
  func.func @transform_2(%arg0: i32, %arg1: i32) -> (i32, i32, i32) {
    %c0_i32 = arith.constant 0 : i32
    %c0_i32_0 = arith.constant 0 : i32
    %c0_i32_1 = arith.constant 0 : i32
    return %arg0, %c0_i32, %c0_i32_0 : i32, i32, i32
  }
  func.func @transform_3(%arg0: i32, %arg1: i32) -> (i32, i32) {
    %c0_i32 = arith.constant 0 : i32
    %c0_i32_0 = arith.constant 0 : i32
    %c0_i32_1 = arith.constant 0 : i32
    return %c0_i32, %c0_i32_0 : i32, i32
  }
  func.func @transform_4(%arg0: i32, %arg1: i32) -> (i32, i32) {
    %c0_i32 = arith.constant 0 : i32
    %c0_i32_0 = arith.constant 0 : i32
    %c0_i32_1 = arith.constant 0 : i32
    return %c0_i32, %c0_i32_0 : i32, i32
  }
  func.func @transform_5(%arg0: i32, %arg1: i32) -> (i32, i32) {
    %c0_i32 = arith.constant 0 : i32
    %c0_i32_0 = arith.constant 0 : i32
    %c0_i32_1 = arith.constant 0 : i32
    return %c0_i32, %c0_i32_0 : i32, i32
  }
  func.func @transform_6(%arg0: i32, %arg1: i32) -> (i32, i32) {
    %c0_i32 = arith.constant 0 : i32
    %c0_i32_0 = arith.constant 0 : i32
    %c0_i32_1 = arith.constant 0 : i32
    return %c0_i32, %c0_i32_0 : i32, i32
  }
  func.func @transform_7(%arg0: i32, %arg1: i32) -> (i32, i32, i32) {
    %c0_i32 = arith.constant 0 : i32
    %c0_i32_0 = arith.constant 0 : i32
    return %arg0, %arg1, %c0_i32 : i32, i32, i32
  }
}

module attributes {stable_mosaic.version = 11 : i64} {
  func.func @_final_proj_kernel(%arg0: i32, %arg1: memref<32x32xbf16, #tpu.memory_space<vmem>>, %arg2: memref<4x32xbf16, #tpu.memory_space<vmem>>, %arg3: memref<4x1xf32, #tpu.memory_space<vmem>>, %arg4: memref<4x32xf32, #tpu.memory_space<vmem>>) attributes {dimension_semantics = [#tpu.dimension_semantics<parallel>], iteration_bounds = array<i64: 1>, scalar_prefetch = 0 : i64, scratch_operands = 0 : i64, tpu.core_type = #tpu.core_type<tc>, window_params = [{transform_indices = @transform_0, window_bounds = array<i64: 32, 32>}, {pipeline_mode = #tpu.pipeline_mode<synchronous>, transform_indices = @transform_1, window_bounds = array<i64: 4, 32>}, {pipeline_mode = #tpu.pipeline_mode<synchronous>, transform_indices = @transform_2, window_bounds = array<i64: 4, 1>}, {transform_indices = @transform_3, window_bounds = array<i64: 4, 32>}]} {
    %c0 = arith.constant 0 : index
    %c0_0 = arith.constant 0 : index
    %0 = vector.load %arg2[%c0, %c0_0] : memref<4x32xbf16, #tpu.memory_space<vmem>>, vector<4x32xbf16>
    %c0_1 = arith.constant 0 : index
    %c0_2 = arith.constant 0 : index
    %1 = vector.load %arg1[%c0_1, %c0_2] : memref<32x32xbf16, #tpu.memory_space<vmem>>, vector<32x32xbf16>
    %cst = arith.constant dense<0.000000e+00> : vector<4x32xf32>
    %2 = tpu.matmul %0, %1, %cst {dimension_numbers = #tpu.dot_dimension_numbers<[1], [1], [0], [0], [0, 0, 1, 0], [], []>} : vector<4x32xbf16>, vector<32x32xbf16>, vector<4x32xf32> -> vector<4x32xf32>
    %c0_3 = arith.constant 0 : index
    %c0_4 = arith.constant 0 : index
    %3 = vector.load %arg3[%c0_3, %c0_4] : memref<4x1xf32, #tpu.memory_space<vmem>>, vector<4x1xf32>
    %4 = vector.broadcast %3 : vector<4x1xf32> to vector<4x32xf32>
    %5 = arith.addf %2, %4 : vector<4x32xf32>
    %c0_5 = arith.constant 0 : index
    %c0_6 = arith.constant 0 : index
    %6 = vector.load %arg4[%c0_5, %c0_6] : memref<4x32xf32, #tpu.memory_space<vmem>>, vector<4x32xf32>
    tpu.vector_store %arg4[%c0_5, %c0_6], %5 {strides = array<i32>} : memref<4x32xf32, #tpu.memory_space<vmem>>, vector<4x32xf32>,
    return
  }
  func.func @transform_0(%arg0: i32) -> (i32, i32) {
    %c0_i32 = arith.constant 0 : i32
    %c0_i32_0 = arith.constant 0 : i32
    return %arg0, %c0_i32 : i32, i32
  }
  func.func @transform_1(%arg0: i32) -> (i32, i32) {
    %c0_i32 = arith.constant 0 : i32
    %c0_i32_0 = arith.constant 0 : i32
    %c0_i32_1 = arith.constant 0 : i32
    return %c0_i32, %c0_i32_0 : i32, i32
  }
  func.func @transform_2(%arg0: i32) -> (i32, i32) {
    %c0_i32 = arith.constant 0 : i32
    %c0_i32_0 = arith.constant 0 : i32
    %c0_i32_1 = arith.constant 0 : i32
    return %c0_i32, %c0_i32_0 : i32, i32
  }
  func.func @transform_3(%arg0: i32) -> (i32, i32) {
    %c0_i32 = arith.constant 0 : i32
    %c0_i32_0 = arith.constant 0 : i32
    return %c0_i32, %arg0 : i32, i32
  }
}

module attributes {stable_mosaic.version = 11 : i64} {
  func.func @_encoder_layer_kernel(%arg0: i32, %arg1: memref<4x2x32xbf16, #tpu.memory_space<vmem>>, %arg2: memref<32x96xbf16, #tpu.memory_space<vmem>>, %arg3: memref<1x96xf32, #tpu.memory_space<vmem>>, %arg4: memref<32x32xbf16, #tpu.memory_space<vmem>>, %arg5: memref<1x32xf32, #tpu.memory_space<vmem>>, %arg6: memref<1x32xf32, #tpu.memory_space<vmem>>, %arg7: memref<1x32xf32, #tpu.memory_space<vmem>>, %arg8: memref<32x2048xbf16, #tpu.memory_space<vmem>>, %arg9: memref<1x2048xf32, #tpu.memory_space<vmem>>, %arg10: memref<2048x32xbf16, #tpu.memory_space<vmem>>, %arg11: memref<1x32xf32, #tpu.memory_space<vmem>>, %arg12: memref<1x32xf32, #tpu.memory_space<vmem>>, %arg13: memref<1x32xf32, #tpu.memory_space<vmem>>, %arg14: memref<4x2x32xbf16, #tpu.memory_space<vmem>>) attributes {dimension_semantics = [#tpu.dimension_semantics<parallel>], iteration_bounds = array<i64: 4>, scalar_prefetch = 0 : i64, scratch_operands = 0 : i64, tpu.core_type = #tpu.core_type<tc>, window_params = [{transform_indices = @transform_0, window_bounds = array<i64: 4, 2, 32>}, {pipeline_mode = #tpu.pipeline_mode<synchronous>, transform_indices = @transform_1, window_bounds = array<i64: 32, 96>}, {pipeline_mode = #tpu.pipeline_mode<synchronous>, transform_indices = @transform_2, window_bounds = array<i64: 1, 96>}, {pipeline_mode = #tpu.pipeline_mode<synchronous>, transform_indices = @transform_3, window_bounds = array<i64: 32, 32>}, {pipeline_mode = #tpu.pipeline_mode<synchronous>, transform_indices = @transform_4, window_bounds = array<i64: 1, 32>}, {pipeline_mode = #tpu.pipeline_mode<synchronous>, transform_indices = @transform_5, window_bounds = array<i64: 1, 32>}, {pipeline_mode = #tpu.pipeline_mode<synchronous>, transform_indices = @transform_6, window_bounds = array<i64: 1, 32>}, {pipeline_mode = #tpu.pipeline_mode<synchronous>, transform_indices = @transform_7, window_bounds = array<i64: 32, 2048>}, {pipeline_mode = #tpu.pipeline_mode<synchronous>, transform_indices = @transform_8, window_bounds = array<i64: 1, 2048>}, {pipeline_mode = #tpu.pipeline_mode<synchronous>, transform_indices = @transform_9, window_bounds = array<i64: 2048, 32>}, {pipeline_mode = #tpu.pipeline_mode<synchronous>, transform_indices = @transform_10, window_bounds = array<i64: 1, 32>}, {pipeline_mode = #tpu.pipeline_mode<synchronous>, transform_indices = @transform_11, window_bounds = array<i64: 1, 32>}, {pipeline_mode = #tpu.pipeline_mode<synchronous>, transform_indices = @transform_12, window_bounds = array<i64: 1, 32>}, {transform_indices = @transform_13, window_bounds = array<i64: 4, 2, 32>}]} {
    %c0 = arith.constant 0 : index
    %c0_0 = arith.constant 0 : index
    %c0_1 = arith.constant 0 : index
    %0 = vector.load %arg1[%c0, %c0_0, %c0_1] : memref<4x2x32xbf16, #tpu.memory_space<vmem>>, vector<1x2x32xbf16>
    %1 = vector.shape_cast %0 : vector<1x2x32xbf16> to vector<2x32xbf16>
    %c0_2 = arith.constant 0 : index
    %c0_3 = arith.constant 0 : index
    %2 = vector.load %arg2[%c0_2, %c0_3] : memref<32x96xbf16, #tpu.memory_space<vmem>>, vector<32x96xbf16>
    %cst = arith.constant dense<0.000000e+00> : vector<2x96xf32>
    %3 = tpu.matmul %1, %2, %cst {dimension_numbers = #tpu.dot_dimension_numbers<[1], [0], [0], [1], [0, 0, 1, 1], [], []>} : vector<2x32xbf16>, vector<32x96xbf16>, vector<2x96xf32> -> vector<2x96xf32>
    %c0_4 = arith.constant 0 : index
    %c0_5 = arith.constant 0 : index
    %4 = vector.load %arg3[%c0_4, %c0_5] : memref<1x96xf32, #tpu.memory_space<vmem>>, vector<1x96xf32>
    %5 = vector.broadcast %4 : vector<1x96xf32> to vector<2x96xf32>
    %6 = arith.addf %3, %5 : vector<2x96xf32>
    %7 = vector.extract_strided_slice %6 {offsets = [0, 0], sizes = [2, 32], strides = [1, 1]} : vector<2x96xf32> to vector<2x32xf32>
    %cst_6 = arith.constant 5.000000e-01 : f32
    %8 = vector.broadcast %cst_6 : f32 to vector<2x32xf32>
    %9 = arith.mulf %7, %8 : vector<2x32xf32>
    %10 = arith.truncf %9 : vector<2x32xf32> to vector<2x32xbf16>
    %11 = vector.extract_strided_slice %6 {offsets = [0, 32], sizes = [2, 32], strides = [1, 1]} : vector<2x96xf32> to vector<2x32xf32>
    %12 = arith.truncf %11 : vector<2x32xf32> to vector<2x32xbf16>
    %13 = vector.extract_strided_slice %6 {offsets = [0, 64], sizes = [2, 32], strides = [1, 1]} : vector<2x96xf32> to vector<2x32xf32>
    %14 = arith.truncf %13 : vector<2x32xf32> to vector<2x32xbf16>
    %15 = arith.extf %1 : vector<2x32xbf16> to vector<2x32xf32>
    %c0_7 = arith.constant 0 : index
    %c0_8 = arith.constant 0 : index
    %16 = vector.load %arg5[%c0_7, %c0_8] : memref<1x32xf32, #tpu.memory_space<vmem>>, vector<1x32xf32>
    %17 = vector.broadcast %16 : vector<1x32xf32> to vector<2x32xf32>
    %18 = arith.addf %15, %17 : vector<2x32xf32>
    %19 = vector.extract_strided_slice %10 {offsets = [0, 0], sizes = [2, 4], strides = [1, 1]} : vector<2x32xbf16> to vector<2x4xbf16>
    %20 = vector.extract_strided_slice %12 {offsets = [0, 0], sizes = [2, 4], strides = [1, 1]} : vector<2x32xbf16> to vector<2x4xbf16>
    %21 = vector.extract_strided_slice %14 {offsets = [0, 0], sizes = [2, 4], strides = [1, 1]} : vector<2x32xbf16> to vector<2x4xbf16>
    %cst_9 = arith.constant dense<0.000000e+00> : vector<2x2xf32>
    %22 = tpu.matmul %19, %20, %cst_9 {dimension_numbers = #tpu.dot_dimension_numbers<[1], [1], [0], [0], [0, 0, 1, 0], [], []>} : vector<2x4xbf16>, vector<2x4xbf16>, vector<2x2xf32> -> vector<2x2xf32>
    %cst_10 = arith.constant dense<0xFF800000> : vector<2xf32>
    %23 = vector.multi_reduction <maximumf>, %22, %cst_10 [1] : vector<2x2xf32> to vector<2xf32>
    %24 = vector.shape_cast %23 : vector<2xf32> to vector<2x1xf32>
    %25 = vector.broadcast %24 : vector<2x1xf32> to vector<2x2xf32>
    %26 = arith.subf %22, %25 : vector<2x2xf32>
    %27 = math.exp %26 : vector<2x2xf32>
    %cst_11 = arith.constant dense<0.000000e+00> : vector<2xf32>
    %28 = vector.multi_reduction <add>, %27, %cst_11 [1] : vector<2x2xf32> to vector<2xf32>
    %29 = vector.shape_cast %28 : vector<2xf32> to vector<2x1xf32>
    %30 = tpu.reciprocal %29 {approx = true} : vector<2x1xf32> -> vector<2x1xf32>
    %31 = vector.broadcast %30 : vector<2x1xf32> to vector<2x2xf32>
    %32 = arith.mulf %27, %31 : vector<2x2xf32>
    %33 = arith.truncf %32 : vector<2x2xf32> to vector<2x2xbf16>
    %cst_12 = arith.constant dense<0.000000e+00> : vector<2x4xf32>
    %34 = tpu.matmul %33, %21, %cst_12 {dimension_numbers = #tpu.dot_dimension_numbers<[1], [0], [0], [1], [0, 0, 1, 1], [], []>} : vector<2x2xbf16>, vector<2x4xbf16>, vector<2x4xf32> -> vector<2x4xf32>
    %35 = arith.truncf %34 : vector<2x4xf32> to vector<2x4xbf16>
    %c0_13 = arith.constant 0 : index
    %c0_14 = arith.constant 0 : index
    %36 = vector.load %arg4[%c0_13, %c0_14] : memref<32x32xbf16, #tpu.memory_space<vmem>>, vector<4x32xbf16>
    %cst_15 = arith.constant dense<0.000000e+00> : vector<2x32xf32>
    %37 = tpu.matmul %35, %36, %cst_15 {dimension_numbers = #tpu.dot_dimension_numbers<[1], [0], [0], [1], [0, 0, 1, 1], [], []>} : vector<2x4xbf16>, vector<4x32xbf16>, vector<2x32xf32> -> vector<2x32xf32>
    %38 = arith.addf %18, %37 : vector<2x32xf32>
    %39 = vector.extract_strided_slice %10 {offsets = [0, 4], sizes = [2, 4], strides = [1, 1]} : vector<2x32xbf16> to vector<2x4xbf16>
    %40 = vector.extract_strided_slice %12 {offsets = [0, 4], sizes = [2, 4], strides = [1, 1]} : vector<2x32xbf16> to vector<2x4xbf16>
    %41 = vector.extract_strided_slice %14 {offsets = [0, 4], sizes = [2, 4], strides = [1, 1]} : vector<2x32xbf16> to vector<2x4xbf16>
    %cst_16 = arith.constant dense<0.000000e+00> : vector<2x2xf32>
    %42 = tpu.matmul %39, %40, %cst_16 {dimension_numbers = #tpu.dot_dimension_numbers<[1], [1], [0], [0], [0, 0, 1, 0], [], []>} : vector<2x4xbf16>, vector<2x4xbf16>, vector<2x2xf32> -> vector<2x2xf32>
    %cst_17 = arith.constant dense<0xFF800000> : vector<2xf32>
    %43 = vector.multi_reduction <maximumf>, %42, %cst_17 [1] : vector<2x2xf32> to vector<2xf32>
    %44 = vector.shape_cast %43 : vector<2xf32> to vector<2x1xf32>
    %45 = vector.broadcast %44 : vector<2x1xf32> to vector<2x2xf32>
    %46 = arith.subf %42, %45 : vector<2x2xf32>
    %47 = math.exp %46 : vector<2x2xf32>
    %cst_18 = arith.constant dense<0.000000e+00> : vector<2xf32>
    %48 = vector.multi_reduction <add>, %47, %cst_18 [1] : vector<2x2xf32> to vector<2xf32>
    %49 = vector.shape_cast %48 : vector<2xf32> to vector<2x1xf32>
    %50 = tpu.reciprocal %49 {approx = true} : vector<2x1xf32> -> vector<2x1xf32>
    %51 = vector.broadcast %50 : vector<2x1xf32> to vector<2x2xf32>
    %52 = arith.mulf %47, %51 : vector<2x2xf32>
    %53 = arith.truncf %52 : vector<2x2xf32> to vector<2x2xbf16>
    %cst_19 = arith.constant dense<0.000000e+00> : vector<2x4xf32>
    %54 = tpu.matmul %53, %41, %cst_19 {dimension_numbers = #tpu.dot_dimension_numbers<[1], [0], [0], [1], [0, 0, 1, 1], [], []>} : vector<2x2xbf16>, vector<2x4xbf16>, vector<2x4xf32> -> vector<2x4xf32>
    %55 = arith.truncf %54 : vector<2x4xf32> to vector<2x4xbf16>
    %c4 = arith.constant 4 : index
    %c0_20 = arith.constant 0 : index
    %56 = vector.load %arg4[%c4, %c0_20] : memref<32x32xbf16, #tpu.memory_space<vmem>>, vector<4x32xbf16>
    %cst_21 = arith.constant dense<0.000000e+00> : vector<2x32xf32>
    %57 = tpu.matmul %55, %56, %cst_21 {dimension_numbers = #tpu.dot_dimension_numbers<[1], [0], [0], [1], [0, 0, 1, 1], [], []>} : vector<2x4xbf16>, vector<4x32xbf16>, vector<2x32xf32> -> vector<2x32xf32>
    %58 = arith.addf %38, %57 : vector<2x32xf32>
    %59 = vector.extract_strided_slice %10 {offsets = [0, 8], sizes = [2, 4], strides = [1, 1]} : vector<2x32xbf16> to vector<2x4xbf16>
    %60 = vector.extract_strided_slice %12 {offsets = [0, 8], sizes = [2, 4], strides = [1, 1]} : vector<2x32xbf16> to vector<2x4xbf16>
    %61 = vector.extract_strided_slice %14 {offsets = [0, 8], sizes = [2, 4], strides = [1, 1]} : vector<2x32xbf16> to vector<2x4xbf16>
    %cst_22 = arith.constant dense<0.000000e+00> : vector<2x2xf32>
    %62 = tpu.matmul %59, %60, %cst_22 {dimension_numbers = #tpu.dot_dimension_numbers<[1], [1], [0], [0], [0, 0, 1, 0], [], []>} : vector<2x4xbf16>, vector<2x4xbf16>, vector<2x2xf32> -> vector<2x2xf32>
    %cst_23 = arith.constant dense<0xFF800000> : vector<2xf32>
    %63 = vector.multi_reduction <maximumf>, %62, %cst_23 [1] : vector<2x2xf32> to vector<2xf32>
    %64 = vector.shape_cast %63 : vector<2xf32> to vector<2x1xf32>
    %65 = vector.broadcast %64 : vector<2x1xf32> to vector<2x2xf32>
    %66 = arith.subf %62, %65 : vector<2x2xf32>
    %67 = math.exp %66 : vector<2x2xf32>
    %cst_24 = arith.constant dense<0.000000e+00> : vector<2xf32>
    %68 = vector.multi_reduction <add>, %67, %cst_24 [1] : vector<2x2xf32> to vector<2xf32>
    %69 = vector.shape_cast %68 : vector<2xf32> to vector<2x1xf32>
    %70 = tpu.reciprocal %69 {approx = true} : vector<2x1xf32> -> vector<2x1xf32>
    %71 = vector.broadcast %70 : vector<2x1xf32> to vector<2x2xf32>
    %72 = arith.mulf %67, %71 : vector<2x2xf32>
    %73 = arith.truncf %72 : vector<2x2xf32> to vector<2x2xbf16>
    %cst_25 = arith.constant dense<0.000000e+00> : vector<2x4xf32>
    %74 = tpu.matmul %73, %61, %cst_25 {dimension_numbers = #tpu.dot_dimension_numbers<[1], [0], [0], [1], [0, 0, 1, 1], [], []>} : vector<2x2xbf16>, vector<2x4xbf16>, vector<2x4xf32> -> vector<2x4xf32>
    %75 = arith.truncf %74 : vector<2x4xf32> to vector<2x4xbf16>
    %c8 = arith.constant 8 : index
    %c0_26 = arith.constant 0 : index
    %76 = vector.load %arg4[%c8, %c0_26] : memref<32x32xbf16, #tpu.memory_space<vmem>>, vector<4x32xbf16>
    %cst_27 = arith.constant dense<0.000000e+00> : vector<2x32xf32>
    %77 = tpu.matmul %75, %76, %cst_27 {dimension_numbers = #tpu.dot_dimension_numbers<[1], [0], [0], [1], [0, 0, 1, 1], [], []>} : vector<2x4xbf16>, vector<4x32xbf16>, vector<2x32xf32> -> vector<2x32xf32>
    %78 = arith.addf %58, %77 : vector<2x32xf32>
    %79 = vector.extract_strided_slice %10 {offsets = [0, 12], sizes = [2, 4], strides = [1, 1]} : vector<2x32xbf16> to vector<2x4xbf16>
    %80 = vector.extract_strided_slice %12 {offsets = [0, 12], sizes = [2, 4], strides = [1, 1]} : vector<2x32xbf16> to vector<2x4xbf16>
    %81 = vector.extract_strided_slice %14 {offsets = [0, 12], sizes = [2, 4], strides = [1, 1]} : vector<2x32xbf16> to vector<2x4xbf16>
    %cst_28 = arith.constant dense<0.000000e+00> : vector<2x2xf32>
    %82 = tpu.matmul %79, %80, %cst_28 {dimension_numbers = #tpu.dot_dimension_numbers<[1], [1], [0], [0], [0, 0, 1, 0], [], []>} : vector<2x4xbf16>, vector<2x4xbf16>, vector<2x2xf32> -> vector<2x2xf32>
    %cst_29 = arith.constant dense<0xFF800000> : vector<2xf32>
    %83 = vector.multi_reduction <maximumf>, %82, %cst_29 [1] : vector<2x2xf32> to vector<2xf32>
    %84 = vector.shape_cast %83 : vector<2xf32> to vector<2x1xf32>
    %85 = vector.broadcast %84 : vector<2x1xf32> to vector<2x2xf32>
    %86 = arith.subf %82, %85 : vector<2x2xf32>
    %87 = math.exp %86 : vector<2x2xf32>
    %cst_30 = arith.constant dense<0.000000e+00> : vector<2xf32>
    %88 = vector.multi_reduction <add>, %87, %cst_30 [1] : vector<2x2xf32> to vector<2xf32>
    %89 = vector.shape_cast %88 : vector<2xf32> to vector<2x1xf32>
    %90 = tpu.reciprocal %89 {approx = true} : vector<2x1xf32> -> vector<2x1xf32>
    %91 = vector.broadcast %90 : vector<2x1xf32> to vector<2x2xf32>
    %92 = arith.mulf %87, %91 : vector<2x2xf32>
    %93 = arith.truncf %92 : vector<2x2xf32> to vector<2x2xbf16>
    %cst_31 = arith.constant dense<0.000000e+00> : vector<2x4xf32>
    %94 = tpu.matmul %93, %81, %cst_31 {dimension_numbers = #tpu.dot_dimension_numbers<[1], [0], [0], [1], [0, 0, 1, 1], [], []>} : vector<2x2xbf16>, vector<2x4xbf16>, vector<2x4xf32> -> vector<2x4xf32>
    %95 = arith.truncf %94 : vector<2x4xf32> to vector<2x4xbf16>
    %c12 = arith.constant 12 : index
    %c0_32 = arith.constant 0 : index
    %96 = vector.load %arg4[%c12, %c0_32] : memref<32x32xbf16, #tpu.memory_space<vmem>>, vector<4x32xbf16>
    %cst_33 = arith.constant dense<0.000000e+00> : vector<2x32xf32>
    %97 = tpu.matmul %95, %96, %cst_33 {dimension_numbers = #tpu.dot_dimension_numbers<[1], [0], [0], [1], [0, 0, 1, 1], [], []>} : vector<2x4xbf16>, vector<4x32xbf16>, vector<2x32xf32> -> vector<2x32xf32>
    %98 = arith.addf %78, %97 : vector<2x32xf32>
    %99 = vector.extract_strided_slice %10 {offsets = [0, 16], sizes = [2, 4], strides = [1, 1]} : vector<2x32xbf16> to vector<2x4xbf16>
    %100 = vector.extract_strided_slice %12 {offsets = [0, 16], sizes = [2, 4], strides = [1, 1]} : vector<2x32xbf16> to vector<2x4xbf16>
    %101 = vector.extract_strided_slice %14 {offsets = [0, 16], sizes = [2, 4], strides = [1, 1]} : vector<2x32xbf16> to vector<2x4xbf16>
    %cst_34 = arith.constant dense<0.000000e+00> : vector<2x2xf32>
    %102 = tpu.matmul %99, %100, %cst_34 {dimension_numbers = #tpu.dot_dimension_numbers<[1], [1], [0], [0], [0, 0, 1, 0], [], []>} : vector<2x4xbf16>, vector<2x4xbf16>, vector<2x2xf32> -> vector<2x2xf32>
    %cst_35 = arith.constant dense<0xFF800000> : vector<2xf32>
    %103 = vector.multi_reduction <maximumf>, %102, %cst_35 [1] : vector<2x2xf32> to vector<2xf32>
    %104 = vector.shape_cast %103 : vector<2xf32> to vector<2x1xf32>
    %105 = vector.broadcast %104 : vector<2x1xf32> to vector<2x2xf32>
    %106 = arith.subf %102, %105 : vector<2x2xf32>
    %107 = math.exp %106 : vector<2x2xf32>
    %cst_36 = arith.constant dense<0.000000e+00> : vector<2xf32>
    %108 = vector.multi_reduction <add>, %107, %cst_36 [1] : vector<2x2xf32> to vector<2xf32>
    %109 = vector.shape_cast %108 : vector<2xf32> to vector<2x1xf32>
    %110 = tpu.reciprocal %109 {approx = true} : vector<2x1xf32> -> vector<2x1xf32>
    %111 = vector.broadcast %110 : vector<2x1xf32> to vector<2x2xf32>
    %112 = arith.mulf %107, %111 : vector<2x2xf32>
    %113 = arith.truncf %112 : vector<2x2xf32> to vector<2x2xbf16>
    %cst_37 = arith.constant dense<0.000000e+00> : vector<2x4xf32>
    %114 = tpu.matmul %113, %101, %cst_37 {dimension_numbers = #tpu.dot_dimension_numbers<[1], [0], [0], [1], [0, 0, 1, 1], [], []>} : vector<2x2xbf16>, vector<2x4xbf16>, vector<2x4xf32> -> vector<2x4xf32>
    %115 = arith.truncf %114 : vector<2x4xf32> to vector<2x4xbf16>
    %c16 = arith.constant 16 : index
    %c0_38 = arith.constant 0 : index
    %116 = vector.load %arg4[%c16, %c0_38] : memref<32x32xbf16, #tpu.memory_space<vmem>>, vector<4x32xbf16>
    %cst_39 = arith.constant dense<0.000000e+00> : vector<2x32xf32>
    %117 = tpu.matmul %115, %116, %cst_39 {dimension_numbers = #tpu.dot_dimension_numbers<[1], [0], [0], [1], [0, 0, 1, 1], [], []>} : vector<2x4xbf16>, vector<4x32xbf16>, vector<2x32xf32> -> vector<2x32xf32>
    %118 = arith.addf %98, %117 : vector<2x32xf32>
    %119 = vector.extract_strided_slice %10 {offsets = [0, 20], sizes = [2, 4], strides = [1, 1]} : vector<2x32xbf16> to vector<2x4xbf16>
    %120 = vector.extract_strided_slice %12 {offsets = [0, 20], sizes = [2, 4], strides = [1, 1]} : vector<2x32xbf16> to vector<2x4xbf16>
    %121 = vector.extract_strided_slice %14 {offsets = [0, 20], sizes = [2, 4], strides = [1, 1]} : vector<2x32xbf16> to vector<2x4xbf16>
    %cst_40 = arith.constant dense<0.000000e+00> : vector<2x2xf32>
    %122 = tpu.matmul %119, %120, %cst_40 {dimension_numbers = #tpu.dot_dimension_numbers<[1], [1], [0], [0], [0, 0, 1, 0], [], []>} : vector<2x4xbf16>, vector<2x4xbf16>, vector<2x2xf32> -> vector<2x2xf32>
    %cst_41 = arith.constant dense<0xFF800000> : vector<2xf32>
    %123 = vector.multi_reduction <maximumf>, %122, %cst_41 [1] : vector<2x2xf32> to vector<2xf32>
    %124 = vector.shape_cast %123 : vector<2xf32> to vector<2x1xf32>
    %125 = vector.broadcast %124 : vector<2x1xf32> to vector<2x2xf32>
    %126 = arith.subf %122, %125 : vector<2x2xf32>
    %127 = math.exp %126 : vector<2x2xf32>
    %cst_42 = arith.constant dense<0.000000e+00> : vector<2xf32>
    %128 = vector.multi_reduction <add>, %127, %cst_42 [1] : vector<2x2xf32> to vector<2xf32>
    %129 = vector.shape_cast %128 : vector<2xf32> to vector<2x1xf32>
    %130 = tpu.reciprocal %129 {approx = true} : vector<2x1xf32> -> vector<2x1xf32>
    %131 = vector.broadcast %130 : vector<2x1xf32> to vector<2x2xf32>
    %132 = arith.mulf %127, %131 : vector<2x2xf32>
    %133 = arith.truncf %132 : vector<2x2xf32> to vector<2x2xbf16>
    %cst_43 = arith.constant dense<0.000000e+00> : vector<2x4xf32>
    %134 = tpu.matmul %133, %121, %cst_43 {dimension_numbers = #tpu.dot_dimension_numbers<[1], [0], [0], [1], [0, 0, 1, 1], [], []>} : vector<2x2xbf16>, vector<2x4xbf16>, vector<2x4xf32> -> vector<2x4xf32>
    %135 = arith.truncf %134 : vector<2x4xf32> to vector<2x4xbf16>
    %c20 = arith.constant 20 : index
    %c0_44 = arith.constant 0 : index
    %136 = vector.load %arg4[%c20, %c0_44] : memref<32x32xbf16, #tpu.memory_space<vmem>>, vector<4x32xbf16>
    %cst_45 = arith.constant dense<0.000000e+00> : vector<2x32xf32>
    %137 = tpu.matmul %135, %136, %cst_45 {dimension_numbers = #tpu.dot_dimension_numbers<[1], [0], [0], [1], [0, 0, 1, 1], [], []>} : vector<2x4xbf16>, vector<4x32xbf16>, vector<2x32xf32> -> vector<2x32xf32>
    %138 = arith.addf %118, %137 : vector<2x32xf32>
    %139 = vector.extract_strided_slice %10 {offsets = [0, 24], sizes = [2, 4], strides = [1, 1]} : vector<2x32xbf16> to vector<2x4xbf16>
    %140 = vector.extract_strided_slice %12 {offsets = [0, 24], sizes = [2, 4], strides = [1, 1]} : vector<2x32xbf16> to vector<2x4xbf16>
    %141 = vector.extract_strided_slice %14 {offsets = [0, 24], sizes = [2, 4], strides = [1, 1]} : vector<2x32xbf16> to vector<2x4xbf16>
    %cst_46 = arith.constant dense<0.000000e+00> : vector<2x2xf32>
    %142 = tpu.matmul %139, %140, %cst_46 {dimension_numbers = #tpu.dot_dimension_numbers<[1], [1], [0], [0], [0, 0, 1, 0], [], []>} : vector<2x4xbf16>, vector<2x4xbf16>, vector<2x2xf32> -> vector<2x2xf32>
    %cst_47 = arith.constant dense<0xFF800000> : vector<2xf32>
    %143 = vector.multi_reduction <maximumf>, %142, %cst_47 [1] : vector<2x2xf32> to vector<2xf32>
    %144 = vector.shape_cast %143 : vector<2xf32> to vector<2x1xf32>
    %145 = vector.broadcast %144 : vector<2x1xf32> to vector<2x2xf32>
    %146 = arith.subf %142, %145 : vector<2x2xf32>
    %147 = math.exp %146 : vector<2x2xf32>
    %cst_48 = arith.constant dense<0.000000e+00> : vector<2xf32>
    %148 = vector.multi_reduction <add>, %147, %cst_48 [1] : vector<2x2xf32> to vector<2xf32>
    %149 = vector.shape_cast %148 : vector<2xf32> to vector<2x1xf32>
    %150 = tpu.reciprocal %149 {approx = true} : vector<2x1xf32> -> vector<2x1xf32>
    %151 = vector.broadcast %150 : vector<2x1xf32> to vector<2x2xf32>
    %152 = arith.mulf %147, %151 : vector<2x2xf32>
    %153 = arith.truncf %152 : vector<2x2xf32> to vector<2x2xbf16>
    %cst_49 = arith.constant dense<0.000000e+00> : vector<2x4xf32>
    %154 = tpu.matmul %153, %141, %cst_49 {dimension_numbers = #tpu.dot_dimension_numbers<[1], [0], [0], [1], [0, 0, 1, 1], [], []>} : vector<2x2xbf16>, vector<2x4xbf16>, vector<2x4xf32> -> vector<2x4xf32>
    %155 = arith.truncf %154 : vector<2x4xf32> to vector<2x4xbf16>
    %c24 = arith.constant 24 : index
    %c0_50 = arith.constant 0 : index
    %156 = vector.load %arg4[%c24, %c0_50] : memref<32x32xbf16, #tpu.memory_space<vmem>>, vector<4x32xbf16>
    %cst_51 = arith.constant dense<0.000000e+00> : vector<2x32xf32>
    %157 = tpu.matmul %155, %156, %cst_51 {dimension_numbers = #tpu.dot_dimension_numbers<[1], [0], [0], [1], [0, 0, 1, 1], [], []>} : vector<2x4xbf16>, vector<4x32xbf16>, vector<2x32xf32> -> vector<2x32xf32>
    %158 = arith.addf %138, %157 : vector<2x32xf32>
    %159 = vector.extract_strided_slice %10 {offsets = [0, 28], sizes = [2, 4], strides = [1, 1]} : vector<2x32xbf16> to vector<2x4xbf16>
    %160 = vector.extract_strided_slice %12 {offsets = [0, 28], sizes = [2, 4], strides = [1, 1]} : vector<2x32xbf16> to vector<2x4xbf16>
    %161 = vector.extract_strided_slice %14 {offsets = [0, 28], sizes = [2, 4], strides = [1, 1]} : vector<2x32xbf16> to vector<2x4xbf16>
    %cst_52 = arith.constant dense<0.000000e+00> : vector<2x2xf32>
    %162 = tpu.matmul %159, %160, %cst_52 {dimension_numbers = #tpu.dot_dimension_numbers<[1], [1], [0], [0], [0, 0, 1, 0], [], []>} : vector<2x4xbf16>, vector<2x4xbf16>, vector<2x2xf32> -> vector<2x2xf32>
    %cst_53 = arith.constant dense<0xFF800000> : vector<2xf32>
    %163 = vector.multi_reduction <maximumf>, %162, %cst_53 [1] : vector<2x2xf32> to vector<2xf32>
    %164 = vector.shape_cast %163 : vector<2xf32> to vector<2x1xf32>
    %165 = vector.broadcast %164 : vector<2x1xf32> to vector<2x2xf32>
    %166 = arith.subf %162, %165 : vector<2x2xf32>
    %167 = math.exp %166 : vector<2x2xf32>
    %cst_54 = arith.constant dense<0.000000e+00> : vector<2xf32>
    %168 = vector.multi_reduction <add>, %167, %cst_54 [1] : vector<2x2xf32> to vector<2xf32>
    %169 = vector.shape_cast %168 : vector<2xf32> to vector<2x1xf32>
    %170 = tpu.reciprocal %169 {approx = true} : vector<2x1xf32> -> vector<2x1xf32>
    %171 = vector.broadcast %170 : vector<2x1xf32> to vector<2x2xf32>
    %172 = arith.mulf %167, %171 : vector<2x2xf32>
    %173 = arith.truncf %172 : vector<2x2xf32> to vector<2x2xbf16>
    %cst_55 = arith.constant dense<0.000000e+00> : vector<2x4xf32>
    %174 = tpu.matmul %173, %161, %cst_55 {dimension_numbers = #tpu.dot_dimension_numbers<[1], [0], [0], [1], [0, 0, 1, 1], [], []>} : vector<2x2xbf16>, vector<2x4xbf16>, vector<2x4xf32> -> vector<2x4xf32>
    %175 = arith.truncf %174 : vector<2x4xf32> to vector<2x4xbf16>
    %c28 = arith.constant 28 : index
    %c0_56 = arith.constant 0 : index
    %176 = vector.load %arg4[%c28, %c0_56] : memref<32x32xbf16, #tpu.memory_space<vmem>>, vector<4x32xbf16>
    %cst_57 = arith.constant dense<0.000000e+00> : vector<2x32xf32>
    %177 = tpu.matmul %175, %176, %cst_57 {dimension_numbers = #tpu.dot_dimension_numbers<[1], [0], [0], [1], [0, 0, 1, 1], [], []>} : vector<2x4xbf16>, vector<4x32xbf16>, vector<2x32xf32> -> vector<2x32xf32>
    %178 = arith.addf %158, %177 : vector<2x32xf32>
    %cst_58 = arith.constant dense<0.000000e+00> : vector<2xf32>
    %179 = vector.multi_reduction <add>, %178, %cst_58 [1] : vector<2x32xf32> to vector<2xf32>
    %180 = vector.shape_cast %179 : vector<2xf32> to vector<2x1xf32>
    %cst_59 = arith.constant 3.200000e+01 : f32
    %181 = vector.broadcast %cst_59 : f32 to vector<2x1xf32>
    %182 = arith.divf %180, %181 : vector<2x1xf32>
    %183 = vector.broadcast %182 : vector<2x1xf32> to vector<2x32xf32>
    %184 = arith.subf %178, %183 : vector<2x32xf32>
    %185 = arith.mulf %184, %184 : vector<2x32xf32>
    %cst_60 = arith.constant dense<0.000000e+00> : vector<2xf32>
    %186 = vector.multi_reduction <add>, %185, %cst_60 [1] : vector<2x32xf32> to vector<2xf32>
    %187 = vector.shape_cast %186 : vector<2xf32> to vector<2x1xf32>
    %cst_61 = arith.constant 3.200000e+01 : f32
    %188 = vector.broadcast %cst_61 : f32 to vector<2x1xf32>
    %189 = arith.divf %187, %188 : vector<2x1xf32>
    %cst_62 = arith.constant 9.99999974E-6 : f32
    %190 = vector.broadcast %cst_62 : f32 to vector<2x1xf32>
    %191 = arith.addf %189, %190 : vector<2x1xf32>
    %192 = math.rsqrt %191 : vector<2x1xf32>
    %193 = vector.broadcast %192 : vector<2x1xf32> to vector<2x32xf32>
    %194 = arith.mulf %184, %193 : vector<2x32xf32>
    %c0_63 = arith.constant 0 : index
    %c0_64 = arith.constant 0 : index
    %195 = vector.load %arg6[%c0_63, %c0_64] : memref<1x32xf32, #tpu.memory_space<vmem>>, vector<1x32xf32>
    %196 = vector.broadcast %195 : vector<1x32xf32> to vector<2x32xf32>
    %197 = arith.mulf %194, %196 : vector<2x32xf32>
    %c0_65 = arith.constant 0 : index
    %c0_66 = arith.constant 0 : index
    %198 = vector.load %arg7[%c0_65, %c0_66] : memref<1x32xf32, #tpu.memory_space<vmem>>, vector<1x32xf32>
    %199 = vector.broadcast %198 : vector<1x32xf32> to vector<2x32xf32>
    %200 = arith.addf %197, %199 : vector<2x32xf32>
    %201 = arith.truncf %200 : vector<2x32xf32> to vector<2x32xbf16>
    %c0_67 = arith.constant 0 : index
    %c0_68 = arith.constant 0 : index
    %202 = vector.load %arg11[%c0_67, %c0_68] : memref<1x32xf32, #tpu.memory_space<vmem>>, vector<1x32xf32>
    %203 = vector.broadcast %202 : vector<1x32xf32> to vector<2x32xf32>
    %204 = arith.addf %200, %203 : vector<2x32xf32>
    %c0_69 = arith.constant 0 : index
    %c0_70 = arith.constant 0 : index
    %205 = vector.load %arg8[%c0_69, %c0_70] : memref<32x2048xbf16, #tpu.memory_space<vmem>>, vector<32x512xbf16>
    %cst_71 = arith.constant dense<0.000000e+00> : vector<2x512xf32>
    %206 = tpu.matmul %201, %205, %cst_71 {dimension_numbers = #tpu.dot_dimension_numbers<[1], [0], [0], [1], [0, 0, 1, 1], [], []>} : vector<2x32xbf16>, vector<32x512xbf16>, vector<2x512xf32> -> vector<2x512xf32>
    %c0_72 = arith.constant 0 : index
    %c0_73 = arith.constant 0 : index
    %207 = vector.load %arg9[%c0_72, %c0_73] : memref<1x2048xf32, #tpu.memory_space<vmem>>, vector<1x512xf32>
    %208 = vector.broadcast %207 : vector<1x512xf32> to vector<2x512xf32>
    %209 = arith.addf %206, %208 : vector<2x512xf32>
    %cst_74 = arith.constant 0.000000e+00 : f32
    %210 = vector.broadcast %cst_74 : f32 to vector<2x512xf32>
    %211 = arith.maximumf %209, %210 : vector<2x512xf32>
    %212 = arith.truncf %211 : vector<2x512xf32> to vector<2x512xbf16>
    %c0_75 = arith.constant 0 : index
    %c0_76 = arith.constant 0 : index
    %213 = vector.load %arg10[%c0_75, %c0_76] : memref<2048x32xbf16, #tpu.memory_space<vmem>>, vector<512x32xbf16>
    %cst_77 = arith.constant dense<0.000000e+00> : vector<2x32xf32>
    %214 = tpu.matmul %212, %213, %cst_77 {dimension_numbers = #tpu.dot_dimension_numbers<[1], [0], [0], [1], [0, 0, 1, 1], [], []>} : vector<2x512xbf16>, vector<512x32xbf16>, vector<2x32xf32> -> vector<2x32xf32>
    %215 = arith.addf %204, %214 : vector<2x32xf32>
    %c0_78 = arith.constant 0 : index
    %c512 = arith.constant 512 : index
    %216 = vector.load %arg8[%c0_78, %c512] : memref<32x2048xbf16, #tpu.memory_space<vmem>>, vector<32x512xbf16>
    %cst_79 = arith.constant dense<0.000000e+00> : vector<2x512xf32>
    %217 = tpu.matmul %201, %216, %cst_79 {dimension_numbers = #tpu.dot_dimension_numbers<[1], [0], [0], [1], [0, 0, 1, 1], [], []>} : vector<2x32xbf16>, vector<32x512xbf16>, vector<2x512xf32> -> vector<2x512xf32>
    %c0_80 = arith.constant 0 : index
    %c512_81 = arith.constant 512 : index
    %218 = vector.load %arg9[%c0_80, %c512_81] : memref<1x2048xf32, #tpu.memory_space<vmem>>, vector<1x512xf32>
    %219 = vector.broadcast %218 : vector<1x512xf32> to vector<2x512xf32>
    %220 = arith.addf %217, %219 : vector<2x512xf32>
    %cst_82 = arith.constant 0.000000e+00 : f32
    %221 = vector.broadcast %cst_82 : f32 to vector<2x512xf32>
    %222 = arith.maximumf %220, %221 : vector<2x512xf32>
    %223 = arith.truncf %222 : vector<2x512xf32> to vector<2x512xbf16>
    %c512_83 = arith.constant 512 : index
    %c0_84 = arith.constant 0 : index
    %224 = vector.load %arg10[%c512_83, %c0_84] : memref<2048x32xbf16, #tpu.memory_space<vmem>>, vector<512x32xbf16>
    %cst_85 = arith.constant dense<0.000000e+00> : vector<2x32xf32>
    %225 = tpu.matmul %223, %224, %cst_85 {dimension_numbers = #tpu.dot_dimension_numbers<[1], [0], [0], [1], [0, 0, 1, 1], [], []>} : vector<2x512xbf16>, vector<512x32xbf16>, vector<2x32xf32> -> vector<2x32xf32>
    %226 = arith.addf %215, %225 : vector<2x32xf32>
    %c0_86 = arith.constant 0 : index
    %c1024 = arith.constant 1024 : index
    %227 = vector.load %arg8[%c0_86, %c1024] : memref<32x2048xbf16, #tpu.memory_space<vmem>>, vector<32x512xbf16>
    %cst_87 = arith.constant dense<0.000000e+00> : vector<2x512xf32>
    %228 = tpu.matmul %201, %227, %cst_87 {dimension_numbers = #tpu.dot_dimension_numbers<[1], [0], [0], [1], [0, 0, 1, 1], [], []>} : vector<2x32xbf16>, vector<32x512xbf16>, vector<2x512xf32> -> vector<2x512xf32>
    %c0_88 = arith.constant 0 : index
    %c1024_89 = arith.constant 1024 : index
    %229 = vector.load %arg9[%c0_88, %c1024_89] : memref<1x2048xf32, #tpu.memory_space<vmem>>, vector<1x512xf32>
    %230 = vector.broadcast %229 : vector<1x512xf32> to vector<2x512xf32>
    %231 = arith.addf %228, %230 : vector<2x512xf32>
    %cst_90 = arith.constant 0.000000e+00 : f32
    %232 = vector.broadcast %cst_90 : f32 to vector<2x512xf32>
    %233 = arith.maximumf %231, %232 : vector<2x512xf32>
    %234 = arith.truncf %233 : vector<2x512xf32> to vector<2x512xbf16>
    %c1024_91 = arith.constant 1024 : index
    %c0_92 = arith.constant 0 : index
    %235 = vector.load %arg10[%c1024_91, %c0_92] : memref<2048x32xbf16, #tpu.memory_space<vmem>>, vector<512x32xbf16>
    %cst_93 = arith.constant dense<0.000000e+00> : vector<2x32xf32>
    %236 = tpu.matmul %234, %235, %cst_93 {dimension_numbers = #tpu.dot_dimension_numbers<[1], [0], [0], [1], [0, 0, 1, 1], [], []>} : vector<2x512xbf16>, vector<512x32xbf16>, vector<2x32xf32> -> vector<2x32xf32>
    %237 = arith.addf %226, %236 : vector<2x32xf32>
    %c0_94 = arith.constant 0 : index
    %c1536 = arith.constant 1536 : index
    %238 = vector.load %arg8[%c0_94, %c1536] : memref<32x2048xbf16, #tpu.memory_space<vmem>>, vector<32x512xbf16>
    %cst_95 = arith.constant dense<0.000000e+00> : vector<2x512xf32>
    %239 = tpu.matmul %201, %238, %cst_95 {dimension_numbers = #tpu.dot_dimension_numbers<[1], [0], [0], [1], [0, 0, 1, 1], [], []>} : vector<2x32xbf16>, vector<32x512xbf16>, vector<2x512xf32> -> vector<2x512xf32>
    %c0_96 = arith.constant 0 : index
    %c1536_97 = arith.constant 1536 : index
    %240 = vector.load %arg9[%c0_96, %c1536_97] : memref<1x2048xf32, #tpu.memory_space<vmem>>, vector<1x512xf32>
    %241 = vector.broadcast %240 : vector<1x512xf32> to vector<2x512xf32>
    %242 = arith.addf %239, %241 : vector<2x512xf32>
    %cst_98 = arith.constant 0.000000e+00 : f32
    %243 = vector.broadcast %cst_98 : f32 to vector<2x512xf32>
    %244 = arith.maximumf %242, %243 : vector<2x512xf32>
    %245 = arith.truncf %244 : vector<2x512xf32> to vector<2x512xbf16>
    %c1536_99 = arith.constant 1536 : index
    %c0_100 = arith.constant 0 : index
    %246 = vector.load %arg10[%c1536_99, %c0_100] : memref<2048x32xbf16, #tpu.memory_space<vmem>>, vector<512x32xbf16>
    %cst_101 = arith.constant dense<0.000000e+00> : vector<2x32xf32>
    %247 = tpu.matmul %245, %246, %cst_101 {dimension_numbers = #tpu.dot_dimension_numbers<[1], [0], [0], [1], [0, 0, 1, 1], [], []>} : vector<2x512xbf16>, vector<512x32xbf16>, vector<2x32xf32> -> vector<2x32xf32>
    %248 = arith.addf %237, %247 : vector<2x32xf32>
    %cst_102 = arith.constant dense<0.000000e+00> : vector<2xf32>
    %249 = vector.multi_reduction <add>, %248, %cst_102 [1] : vector<2x32xf32> to vector<2xf32>
    %250 = vector.shape_cast %249 : vector<2xf32> to vector<2x1xf32>
    %cst_103 = arith.constant 3.200000e+01 : f32
    %251 = vector.broadcast %cst_103 : f32 to vector<2x1xf32>
    %252 = arith.divf %250, %251 : vector<2x1xf32>
    %253 = vector.broadcast %252 : vector<2x1xf32> to vector<2x32xf32>
    %254 = arith.subf %248, %253 : vector<2x32xf32>
    %255 = arith.mulf %254, %254 : vector<2x32xf32>
    %cst_104 = arith.constant dense<0.000000e+00> : vector<2xf32>
    %256 = vector.multi_reduction <add>, %255, %cst_104 [1] : vector<2x32xf32> to vector<2xf32>
    %257 = vector.shape_cast %256 : vector<2xf32> to vector<2x1xf32>
    %cst_105 = arith.constant 3.200000e+01 : f32
    %258 = vector.broadcast %cst_105 : f32 to vector<2x1xf32>
    %259 = arith.divf %257, %258 : vector<2x1xf32>
    %cst_106 = arith.constant 9.99999974E-6 : f32
    %260 = vector.broadcast %cst_106 : f32 to vector<2x1xf32>
    %261 = arith.addf %259, %260 : vector<2x1xf32>
    %262 = math.rsqrt %261 : vector<2x1xf32>
    %263 = vector.broadcast %262 : vector<2x1xf32> to vector<2x32xf32>
    %264 = arith.mulf %254, %263 : vector<2x32xf32>
    %c0_107 = arith.constant 0 : index
    %c0_108 = arith.constant 0 : index
    %265 = vector.load %arg12[%c0_107, %c0_108] : memref<1x32xf32, #tpu.memory_space<vmem>>, vector<1x32xf32>
    %266 = vector.broadcast %265 : vector<1x32xf32> to vector<2x32xf32>
    %267 = arith.mulf %264, %266 : vector<2x32xf32>
    %c0_109 = arith.constant 0 : index
    %c0_110 = arith.constant 0 : index
    %268 = vector.load %arg13[%c0_109, %c0_110] : memref<1x32xf32, #tpu.memory_space<vmem>>, vector<1x32xf32>
    %269 = vector.broadcast %268 : vector<1x32xf32> to vector<2x32xf32>
    %270 = arith.addf %267, %269 : vector<2x32xf32>
    %271 = arith.truncf %270 : vector<2x32xf32> to vector<2x32xbf16>
    %c0_111 = arith.constant 0 : index
    %c0_112 = arith.constant 0 : index
    %c0_113 = arith.constant 0 : index
    %272 = vector.load %arg14[%c0_111, %c0_112, %c0_113] : memref<4x2x32xbf16, #tpu.memory_space<vmem>>, vector<1x2x32xbf16>
    %273 = vector.shape_cast %272 : vector<1x2x32xbf16> to vector<2x32xbf16>
    %274 = vector.shape_cast %271 : vector<2x32xbf16> to vector<1x2x32xbf16>
    tpu.vector_store %arg14[%c0_111, %c0_112, %c0_113], %274 {strides = array<i32>} : memref<4x2x32xbf16, #tpu.memory_space<vmem>>, vector<1x2x32xbf16>,
    %c1 = arith.constant 1 : index
    %c0_114 = arith.constant 0 : index
    %c0_115 = arith.constant 0 : index
    %275 = vector.load %arg1[%c1, %c0_114, %c0_115] : memref<4x2x32xbf16, #tpu.memory_space<vmem>>, vector<1x2x32xbf16>
    %276 = vector.shape_cast %275 : vector<1x2x32xbf16> to vector<2x32xbf16>
    %c0_116 = arith.constant 0 : index
    %c0_117 = arith.constant 0 : index
    %277 = vector.load %arg2[%c0_116, %c0_117] : memref<32x96xbf16, #tpu.memory_space<vmem>>, vector<32x96xbf16>
    %cst_118 = arith.constant dense<0.000000e+00> : vector<2x96xf32>
    %278 = tpu.matmul %276, %277, %cst_118 {dimension_numbers = #tpu.dot_dimension_numbers<[1], [0], [0], [1], [0, 0, 1, 1], [], []>} : vector<2x32xbf16>, vector<32x96xbf16>, vector<2x96xf32> -> vector<2x96xf32>
    %c0_119 = arith.constant 0 : index
    %c0_120 = arith.constant 0 : index
    %279 = vector.load %arg3[%c0_119, %c0_120] : memref<1x96xf32, #tpu.memory_space<vmem>>, vector<1x96xf32>
    %280 = vector.broadcast %279 : vector<1x96xf32> to vector<2x96xf32>
    %281 = arith.addf %278, %280 : vector<2x96xf32>
    %282 = vector.extract_strided_slice %281 {offsets = [0, 0], sizes = [2, 32], strides = [1, 1]} : vector<2x96xf32> to vector<2x32xf32>
    %cst_121 = arith.constant 5.000000e-01 : f32
    %283 = vector.broadcast %cst_121 : f32 to vector<2x32xf32>
    %284 = arith.mulf %282, %283 : vector<2x32xf32>
    %285 = arith.truncf %284 : vector<2x32xf32> to vector<2x32xbf16>
    %286 = vector.extract_strided_slice %281 {offsets = [0, 32], sizes = [2, 32], strides = [1, 1]} : vector<2x96xf32> to vector<2x32xf32>
    %287 = arith.truncf %286 : vector<2x32xf32> to vector<2x32xbf16>
    %288 = vector.extract_strided_slice %281 {offsets = [0, 64], sizes = [2, 32], strides = [1, 1]} : vector<2x96xf32> to vector<2x32xf32>
    %289 = arith.truncf %288 : vector<2x32xf32> to vector<2x32xbf16>
    %290 = arith.extf %276 : vector<2x32xbf16> to vector<2x32xf32>
    %c0_122 = arith.constant 0 : index
    %c0_123 = arith.constant 0 : index
    %291 = vector.load %arg5[%c0_122, %c0_123] : memref<1x32xf32, #tpu.memory_space<vmem>>, vector<1x32xf32>
    %292 = vector.broadcast %291 : vector<1x32xf32> to vector<2x32xf32>
    %293 = arith.addf %290, %292 : vector<2x32xf32>
    %294 = vector.extract_strided_slice %285 {offsets = [0, 0], sizes = [2, 4], strides = [1, 1]} : vector<2x32xbf16> to vector<2x4xbf16>
    %295 = vector.extract_strided_slice %287 {offsets = [0, 0], sizes = [2, 4], strides = [1, 1]} : vector<2x32xbf16> to vector<2x4xbf16>
    %296 = vector.extract_strided_slice %289 {offsets = [0, 0], sizes = [2, 4], strides = [1, 1]} : vector<2x32xbf16> to vector<2x4xbf16>
    %cst_124 = arith.constant dense<0.000000e+00> : vector<2x2xf32>
    %297 = tpu.matmul %294, %295, %cst_124 {dimension_numbers = #tpu.dot_dimension_numbers<[1], [1], [0], [0], [0, 0, 1, 0], [], []>} : vector<2x4xbf16>, vector<2x4xbf16>, vector<2x2xf32> -> vector<2x2xf32>
    %cst_125 = arith.constant dense<0xFF800000> : vector<2xf32>
    %298 = vector.multi_reduction <maximumf>, %297, %cst_125 [1] : vector<2x2xf32> to vector<2xf32>
    %299 = vector.shape_cast %298 : vector<2xf32> to vector<2x1xf32>
    %300 = vector.broadcast %299 : vector<2x1xf32> to vector<2x2xf32>
    %301 = arith.subf %297, %300 : vector<2x2xf32>
    %302 = math.exp %301 : vector<2x2xf32>
    %cst_126 = arith.constant dense<0.000000e+00> : vector<2xf32>
    %303 = vector.multi_reduction <add>, %302, %cst_126 [1] : vector<2x2xf32> to vector<2xf32>
    %304 = vector.shape_cast %303 : vector<2xf32> to vector<2x1xf32>
    %305 = tpu.reciprocal %304 {approx = true} : vector<2x1xf32> -> vector<2x1xf32>
    %306 = vector.broadcast %305 : vector<2x1xf32> to vector<2x2xf32>
    %307 = arith.mulf %302, %306 : vector<2x2xf32>
    %308 = arith.truncf %307 : vector<2x2xf32> to vector<2x2xbf16>
    %cst_127 = arith.constant dense<0.000000e+00> : vector<2x4xf32>
    %309 = tpu.matmul %308, %296, %cst_127 {dimension_numbers = #tpu.dot_dimension_numbers<[1], [0], [0], [1], [0, 0, 1, 1], [], []>} : vector<2x2xbf16>, vector<2x4xbf16>, vector<2x4xf32> -> vector<2x4xf32>
    %310 = arith.truncf %309 : vector<2x4xf32> to vector<2x4xbf16>
    %c0_128 = arith.constant 0 : index
    %c0_129 = arith.constant 0 : index
    %311 = vector.load %arg4[%c0_128, %c0_129] : memref<32x32xbf16, #tpu.memory_space<vmem>>, vector<4x32xbf16>
    %cst_130 = arith.constant dense<0.000000e+00> : vector<2x32xf32>
    %312 = tpu.matmul %310, %311, %cst_130 {dimension_numbers = #tpu.dot_dimension_numbers<[1], [0], [0], [1], [0, 0, 1, 1], [], []>} : vector<2x4xbf16>, vector<4x32xbf16>, vector<2x32xf32> -> vector<2x32xf32>
    %313 = arith.addf %293, %312 : vector<2x32xf32>
    %314 = vector.extract_strided_slice %285 {offsets = [0, 4], sizes = [2, 4], strides = [1, 1]} : vector<2x32xbf16> to vector<2x4xbf16>
    %315 = vector.extract_strided_slice %287 {offsets = [0, 4], sizes = [2, 4], strides = [1, 1]} : vector<2x32xbf16> to vector<2x4xbf16>
    %316 = vector.extract_strided_slice %289 {offsets = [0, 4], sizes = [2, 4], strides = [1, 1]} : vector<2x32xbf16> to vector<2x4xbf16>
    %cst_131 = arith.constant dense<0.000000e+00> : vector<2x2xf32>
    %317 = tpu.matmul %314, %315, %cst_131 {dimension_numbers = #tpu.dot_dimension_numbers<[1], [1], [0], [0], [0, 0, 1, 0], [], []>} : vector<2x4xbf16>, vector<2x4xbf16>, vector<2x2xf32> -> vector<2x2xf32>
    %cst_132 = arith.constant dense<0xFF800000> : vector<2xf32>
    %318 = vector.multi_reduction <maximumf>, %317, %cst_132 [1] : vector<2x2xf32> to vector<2xf32>
    %319 = vector.shape_cast %318 : vector<2xf32> to vector<2x1xf32>
    %320 = vector.broadcast %319 : vector<2x1xf32> to vector<2x2xf32>
    %321 = arith.subf %317, %320 : vector<2x2xf32>
    %322 = math.exp %321 : vector<2x2xf32>
    %cst_133 = arith.constant dense<0.000000e+00> : vector<2xf32>
    %323 = vector.multi_reduction <add>, %322, %cst_133 [1] : vector<2x2xf32> to vector<2xf32>
    %324 = vector.shape_cast %323 : vector<2xf32> to vector<2x1xf32>
    %325 = tpu.reciprocal %324 {approx = true} : vector<2x1xf32> -> vector<2x1xf32>
    %326 = vector.broadcast %325 : vector<2x1xf32> to vector<2x2xf32>
    %327 = arith.mulf %322, %326 : vector<2x2xf32>
    %328 = arith.truncf %327 : vector<2x2xf32> to vector<2x2xbf16>
    %cst_134 = arith.constant dense<0.000000e+00> : vector<2x4xf32>
    %329 = tpu.matmul %328, %316, %cst_134 {dimension_numbers = #tpu.dot_dimension_numbers<[1], [0], [0], [1], [0, 0, 1, 1], [], []>} : vector<2x2xbf16>, vector<2x4xbf16>, vector<2x4xf32> -> vector<2x4xf32>
    %330 = arith.truncf %329 : vector<2x4xf32> to vector<2x4xbf16>
    %c4_135 = arith.constant 4 : index
    %c0_136 = arith.constant 0 : index
    %331 = vector.load %arg4[%c4_135, %c0_136] : memref<32x32xbf16, #tpu.memory_space<vmem>>, vector<4x32xbf16>
    %cst_137 = arith.constant dense<0.000000e+00> : vector<2x32xf32>
    %332 = tpu.matmul %330, %331, %cst_137 {dimension_numbers = #tpu.dot_dimension_numbers<[1], [0], [0], [1], [0, 0, 1, 1], [], []>} : vector<2x4xbf16>, vector<4x32xbf16>, vector<2x32xf32> -> vector<2x32xf32>
    %333 = arith.addf %313, %332 : vector<2x32xf32>
    %334 = vector.extract_strided_slice %285 {offsets = [0, 8], sizes = [2, 4], strides = [1, 1]} : vector<2x32xbf16> to vector<2x4xbf16>
    %335 = vector.extract_strided_slice %287 {offsets = [0, 8], sizes = [2, 4], strides = [1, 1]} : vector<2x32xbf16> to vector<2x4xbf16>
    %336 = vector.extract_strided_slice %289 {offsets = [0, 8], sizes = [2, 4], strides = [1, 1]} : vector<2x32xbf16> to vector<2x4xbf16>
    %cst_138 = arith.constant dense<0.000000e+00> : vector<2x2xf32>
    %337 = tpu.matmul %334, %335, %cst_138 {dimension_numbers = #tpu.dot_dimension_numbers<[1], [1], [0], [0], [0, 0, 1, 0], [], []>} : vector<2x4xbf16>, vector<2x4xbf16>, vector<2x2xf32> -> vector<2x2xf32>
    %cst_139 = arith.constant dense<0xFF800000> : vector<2xf32>
    %338 = vector.multi_reduction <maximumf>, %337, %cst_139 [1] : vector<2x2xf32> to vector<2xf32>
    %339 = vector.shape_cast %338 : vector<2xf32> to vector<2x1xf32>
    %340 = vector.broadcast %339 : vector<2x1xf32> to vector<2x2xf32>
    %341 = arith.subf %337, %340 : vector<2x2xf32>
    %342 = math.exp %341 : vector<2x2xf32>
    %cst_140 = arith.constant dense<0.000000e+00> : vector<2xf32>
    %343 = vector.multi_reduction <add>, %342, %cst_140 [1] : vector<2x2xf32> to vector<2xf32>
    %344 = vector.shape_cast %343 : vector<2xf32> to vector<2x1xf32>
    %345 = tpu.reciprocal %344 {approx = true} : vector<2x1xf32> -> vector<2x1xf32>
    %346 = vector.broadcast %345 : vector<2x1xf32> to vector<2x2xf32>
    %347 = arith.mulf %342, %346 : vector<2x2xf32>
    %348 = arith.truncf %347 : vector<2x2xf32> to vector<2x2xbf16>
    %cst_141 = arith.constant dense<0.000000e+00> : vector<2x4xf32>
    %349 = tpu.matmul %348, %336, %cst_141 {dimension_numbers = #tpu.dot_dimension_numbers<[1], [0], [0], [1], [0, 0, 1, 1], [], []>} : vector<2x2xbf16>, vector<2x4xbf16>, vector<2x4xf32> -> vector<2x4xf32>
    %350 = arith.truncf %349 : vector<2x4xf32> to vector<2x4xbf16>
    %c8_142 = arith.constant 8 : index
    %c0_143 = arith.constant 0 : index
    %351 = vector.load %arg4[%c8_142, %c0_143] : memref<32x32xbf16, #tpu.memory_space<vmem>>, vector<4x32xbf16>
    %cst_144 = arith.constant dense<0.000000e+00> : vector<2x32xf32>
    %352 = tpu.matmul %350, %351, %cst_144 {dimension_numbers = #tpu.dot_dimension_numbers<[1], [0], [0], [1], [0, 0, 1, 1], [], []>} : vector<2x4xbf16>, vector<4x32xbf16>, vector<2x32xf32> -> vector<2x32xf32>
    %353 = arith.addf %333, %352 : vector<2x32xf32>
    %354 = vector.extract_strided_slice %285 {offsets = [0, 12], sizes = [2, 4], strides = [1, 1]} : vector<2x32xbf16> to vector<2x4xbf16>
    %355 = vector.extract_strided_slice %287 {offsets = [0, 12], sizes = [2, 4], strides = [1, 1]} : vector<2x32xbf16> to vector<2x4xbf16>
    %356 = vector.extract_strided_slice %289 {offsets = [0, 12], sizes = [2, 4], strides = [1, 1]} : vector<2x32xbf16> to vector<2x4xbf16>
    %cst_145 = arith.constant dense<0.000000e+00> : vector<2x2xf32>
    %357 = tpu.matmul %354, %355, %cst_145 {dimension_numbers = #tpu.dot_dimension_numbers<[1], [1], [0], [0], [0, 0, 1, 0], [], []>} : vector<2x4xbf16>, vector<2x4xbf16>, vector<2x2xf32> -> vector<2x2xf32>
    %cst_146 = arith.constant dense<0xFF800000> : vector<2xf32>
    %358 = vector.multi_reduction <maximumf>, %357, %cst_146 [1] : vector<2x2xf32> to vector<2xf32>
    %359 = vector.shape_cast %358 : vector<2xf32> to vector<2x1xf32>
    %360 = vector.broadcast %359 : vector<2x1xf32> to vector<2x2xf32>
    %361 = arith.subf %357, %360 : vector<2x2xf32>
    %362 = math.exp %361 : vector<2x2xf32>
    %cst_147 = arith.constant dense<0.000000e+00> : vector<2xf32>
    %363 = vector.multi_reduction <add>, %362, %cst_147 [1] : vector<2x2xf32> to vector<2xf32>
    %364 = vector.shape_cast %363 : vector<2xf32> to vector<2x1xf32>
    %365 = tpu.reciprocal %364 {approx = true} : vector<2x1xf32> -> vector<2x1xf32>
    %366 = vector.broadcast %365 : vector<2x1xf32> to vector<2x2xf32>
    %367 = arith.mulf %362, %366 : vector<2x2xf32>
    %368 = arith.truncf %367 : vector<2x2xf32> to vector<2x2xbf16>
    %cst_148 = arith.constant dense<0.000000e+00> : vector<2x4xf32>
    %369 = tpu.matmul %368, %356, %cst_148 {dimension_numbers = #tpu.dot_dimension_numbers<[1], [0], [0], [1], [0, 0, 1, 1], [], []>} : vector<2x2xbf16>, vector<2x4xbf16>, vector<2x4xf32> -> vector<2x4xf32>
    %370 = arith.truncf %369 : vector<2x4xf32> to vector<2x4xbf16>
    %c12_149 = arith.constant 12 : index
    %c0_150 = arith.constant 0 : index
    %371 = vector.load %arg4[%c12_149, %c0_150] : memref<32x32xbf16, #tpu.memory_space<vmem>>, vector<4x32xbf16>
    %cst_151 = arith.constant dense<0.000000e+00> : vector<2x32xf32>
    %372 = tpu.matmul %370, %371, %cst_151 {dimension_numbers = #tpu.dot_dimension_numbers<[1], [0], [0], [1], [0, 0, 1, 1], [], []>} : vector<2x4xbf16>, vector<4x32xbf16>, vector<2x32xf32> -> vector<2x32xf32>
    %373 = arith.addf %353, %372 : vector<2x32xf32>
    %374 = vector.extract_strided_slice %285 {offsets = [0, 16], sizes = [2, 4], strides = [1, 1]} : vector<2x32xbf16> to vector<2x4xbf16>
    %375 = vector.extract_strided_slice %287 {offsets = [0, 16], sizes = [2, 4], strides = [1, 1]} : vector<2x32xbf16> to vector<2x4xbf16>
    %376 = vector.extract_strided_slice %289 {offsets = [0, 16], sizes = [2, 4], strides = [1, 1]} : vector<2x32xbf16> to vector<2x4xbf16>
    %cst_152 = arith.constant dense<0.000000e+00> : vector<2x2xf32>
    %377 = tpu.matmul %374, %375, %cst_152 {dimension_numbers = #tpu.dot_dimension_numbers<[1], [1], [0], [0], [0, 0, 1, 0], [], []>} : vector<2x4xbf16>, vector<2x4xbf16>, vector<2x2xf32> -> vector<2x2xf32>
    %cst_153 = arith.constant dense<0xFF800000> : vector<2xf32>
    %378 = vector.multi_reduction <maximumf>, %377, %cst_153 [1] : vector<2x2xf32> to vector<2xf32>
    %379 = vector.shape_cast %378 : vector<2xf32> to vector<2x1xf32>
    %380 = vector.broadcast %379 : vector<2x1xf32> to vector<2x2xf32>
    %381 = arith.subf %377, %380 : vector<2x2xf32>
    %382 = math.exp %381 : vector<2x2xf32>
    %cst_154 = arith.constant dense<0.000000e+00> : vector<2xf32>
    %383 = vector.multi_reduction <add>, %382, %cst_154 [1] : vector<2x2xf32> to vector<2xf32>
    %384 = vector.shape_cast %383 : vector<2xf32> to vector<2x1xf32>
    %385 = tpu.reciprocal %384 {approx = true} : vector<2x1xf32> -> vector<2x1xf32>
    %386 = vector.broadcast %385 : vector<2x1xf32> to vector<2x2xf32>
    %387 = arith.mulf %382, %386 : vector<2x2xf32>
    %388 = arith.truncf %387 : vector<2x2xf32> to vector<2x2xbf16>
    %cst_155 = arith.constant dense<0.000000e+00> : vector<2x4xf32>
    %389 = tpu.matmul %388, %376, %cst_155 {dimension_numbers = #tpu.dot_dimension_numbers<[1], [0], [0], [1], [0, 0, 1, 1], [], []>} : vector<2x2xbf16>, vector<2x4xbf16>, vector<2x4xf32> -> vector<2x4xf32>
    %390 = arith.truncf %389 : vector<2x4xf32> to vector<2x4xbf16>
    %c16_156 = arith.constant 16 : index
    %c0_157 = arith.constant 0 : index
    %391 = vector.load %arg4[%c16_156, %c0_157] : memref<32x32xbf16, #tpu.memory_space<vmem>>, vector<4x32xbf16>
    %cst_158 = arith.constant dense<0.000000e+00> : vector<2x32xf32>
    %392 = tpu.matmul %390, %391, %cst_158 {dimension_numbers = #tpu.dot_dimension_numbers<[1], [0], [0], [1], [0, 0, 1, 1], [], []>} : vector<2x4xbf16>, vector<4x32xbf16>, vector<2x32xf32> -> vector<2x32xf32>
    %393 = arith.addf %373, %392 : vector<2x32xf32>
    %394 = vector.extract_strided_slice %285 {offsets = [0, 20], sizes = [2, 4], strides = [1, 1]} : vector<2x32xbf16> to vector<2x4xbf16>
    %395 = vector.extract_strided_slice %287 {offsets = [0, 20], sizes = [2, 4], strides = [1, 1]} : vector<2x32xbf16> to vector<2x4xbf16>
    %396 = vector.extract_strided_slice %289 {offsets = [0, 20], sizes = [2, 4], strides = [1, 1]} : vector<2x32xbf16> to vector<2x4xbf16>
    %cst_159 = arith.constant dense<0.000000e+00> : vector<2x2xf32>
    %397 = tpu.matmul %394, %395, %cst_159 {dimension_numbers = #tpu.dot_dimension_numbers<[1], [1], [0], [0], [0, 0, 1, 0], [], []>} : vector<2x4xbf16>, vector<2x4xbf16>, vector<2x2xf32> -> vector<2x2xf32>
    %cst_160 = arith.constant dense<0xFF800000> : vector<2xf32>
    %398 = vector.multi_reduction <maximumf>, %397, %cst_160 [1] : vector<2x2xf32> to vector<2xf32>
    %399 = vector.shape_cast %398 : vector<2xf32> to vector<2x1xf32>
    %400 = vector.broadcast %399 : vector<2x1xf32> to vector<2x2xf32>
    %401 = arith.subf %397, %400 : vector<2x2xf32>
    %402 = math.exp %401 : vector<2x2xf32>
    %cst_161 = arith.constant dense<0.000000e+00> : vector<2xf32>
    %403 = vector.multi_reduction <add>, %402, %cst_161 [1] : vector<2x2xf32> to vector<2xf32>
    %404 = vector.shape_cast %403 : vector<2xf32> to vector<2x1xf32>
    %405 = tpu.reciprocal %404 {approx = true} : vector<2x1xf32> -> vector<2x1xf32>
    %406 = vector.broadcast %405 : vector<2x1xf32> to vector<2x2xf32>
    %407 = arith.mulf %402, %406 : vector<2x2xf32>
    %408 = arith.truncf %407 : vector<2x2xf32> to vector<2x2xbf16>
    %cst_162 = arith.constant dense<0.000000e+00> : vector<2x4xf32>
    %409 = tpu.matmul %408, %396, %cst_162 {dimension_numbers = #tpu.dot_dimension_numbers<[1], [0], [0], [1], [0, 0, 1, 1], [], []>} : vector<2x2xbf16>, vector<2x4xbf16>, vector<2x4xf32> -> vector<2x4xf32>
    %410 = arith.truncf %409 : vector<2x4xf32> to vector<2x4xbf16>
    %c20_163 = arith.constant 20 : index
    %c0_164 = arith.constant 0 : index
    %411 = vector.load %arg4[%c20_163, %c0_164] : memref<32x32xbf16, #tpu.memory_space<vmem>>, vector<4x32xbf16>
    %cst_165 = arith.constant dense<0.000000e+00> : vector<2x32xf32>
    %412 = tpu.matmul %410, %411, %cst_165 {dimension_numbers = #tpu.dot_dimension_numbers<[1], [0], [0], [1], [0, 0, 1, 1], [], []>} : vector<2x4xbf16>, vector<4x32xbf16>, vector<2x32xf32> -> vector<2x32xf32>
    %413 = arith.addf %393, %412 : vector<2x32xf32>
    %414 = vector.extract_strided_slice %285 {offsets = [0, 24], sizes = [2, 4], strides = [1, 1]} : vector<2x32xbf16> to vector<2x4xbf16>
    %415 = vector.extract_strided_slice %287 {offsets = [0, 24], sizes = [2, 4], strides = [1, 1]} : vector<2x32xbf16> to vector<2x4xbf16>
    %416 = vector.extract_strided_slice %289 {offsets = [0, 24], sizes = [2, 4], strides = [1, 1]} : vector<2x32xbf16> to vector<2x4xbf16>
    %cst_166 = arith.constant dense<0.000000e+00> : vector<2x2xf32>
    %417 = tpu.matmul %414, %415, %cst_166 {dimension_numbers = #tpu.dot_dimension_numbers<[1], [1], [0], [0], [0, 0, 1, 0], [], []>} : vector<2x4xbf16>, vector<2x4xbf16>, vector<2x2xf32> -> vector<2x2xf32>
    %cst_167 = arith.constant dense<0xFF800000> : vector<2xf32>
    %418 = vector.multi_reduction <maximumf>, %417, %cst_167 [1] : vector<2x2xf32> to vector<2xf32>
    %419 = vector.shape_cast %418 : vector<2xf32> to vector<2x1xf32>
    %420 = vector.broadcast %419 : vector<2x1xf32> to vector<2x2xf32>
    %421 = arith.subf %417, %420 : vector<2x2xf32>
    %422 = math.exp %421 : vector<2x2xf32>
    %cst_168 = arith.constant dense<0.000000e+00> : vector<2xf32>
    %423 = vector.multi_reduction <add>, %422, %cst_168 [1] : vector<2x2xf32> to vector<2xf32>
    %424 = vector.shape_cast %423 : vector<2xf32> to vector<2x1xf32>
    %425 = tpu.reciprocal %424 {approx = true} : vector<2x1xf32> -> vector<2x1xf32>
    %426 = vector.broadcast %425 : vector<2x1xf32> to vector<2x2xf32>
    %427 = arith.mulf %422, %426 : vector<2x2xf32>
    %428 = arith.truncf %427 : vector<2x2xf32> to vector<2x2xbf16>
    %cst_169 = arith.constant dense<0.000000e+00> : vector<2x4xf32>
    %429 = tpu.matmul %428, %416, %cst_169 {dimension_numbers = #tpu.dot_dimension_numbers<[1], [0], [0], [1], [0, 0, 1, 1], [], []>} : vector<2x2xbf16>, vector<2x4xbf16>, vector<2x4xf32> -> vector<2x4xf32>
    %430 = arith.truncf %429 : vector<2x4xf32> to vector<2x4xbf16>
    %c24_170 = arith.constant 24 : index
    %c0_171 = arith.constant 0 : index
    %431 = vector.load %arg4[%c24_170, %c0_171] : memref<32x32xbf16, #tpu.memory_space<vmem>>, vector<4x32xbf16>
    %cst_172 = arith.constant dense<0.000000e+00> : vector<2x32xf32>
    %432 = tpu.matmul %430, %431, %cst_172 {dimension_numbers = #tpu.dot_dimension_numbers<[1], [0], [0], [1], [0, 0, 1, 1], [], []>} : vector<2x4xbf16>, vector<4x32xbf16>, vector<2x32xf32> -> vector<2x32xf32>
    %433 = arith.addf %413, %432 : vector<2x32xf32>
    %434 = vector.extract_strided_slice %285 {offsets = [0, 28], sizes = [2, 4], strides = [1, 1]} : vector<2x32xbf16> to vector<2x4xbf16>
    %435 = vector.extract_strided_slice %287 {offsets = [0, 28], sizes = [2, 4], strides = [1, 1]} : vector<2x32xbf16> to vector<2x4xbf16>
    %436 = vector.extract_strided_slice %289 {offsets = [0, 28], sizes = [2, 4], strides = [1, 1]} : vector<2x32xbf16> to vector<2x4xbf16>
    %cst_173 = arith.constant dense<0.000000e+00> : vector<2x2xf32>
    %437 = tpu.matmul %434, %435, %cst_173 {dimension_numbers = #tpu.dot_dimension_numbers<[1], [1], [0], [0], [0, 0, 1, 0], [], []>} : vector<2x4xbf16>, vector<2x4xbf16>, vector<2x2xf32> -> vector<2x2xf32>
    %cst_174 = arith.constant dense<0xFF800000> : vector<2xf32>
    %438 = vector.multi_reduction <maximumf>, %437, %cst_174 [1] : vector<2x2xf32> to vector<2xf32>
    %439 = vector.shape_cast %438 : vector<2xf32> to vector<2x1xf32>
    %440 = vector.broadcast %439 : vector<2x1xf32> to vector<2x2xf32>
    %441 = arith.subf %437, %440 : vector<2x2xf32>
    %442 = math.exp %441 : vector<2x2xf32>
    %cst_175 = arith.constant dense<0.000000e+00> : vector<2xf32>
    %443 = vector.multi_reduction <add>, %442, %cst_175 [1] : vector<2x2xf32> to vector<2xf32>
    %444 = vector.shape_cast %443 : vector<2xf32> to vector<2x1xf32>
    %445 = tpu.reciprocal %444 {approx = true} : vector<2x1xf32> -> vector<2x1xf32>
    %446 = vector.broadcast %445 : vector<2x1xf32> to vector<2x2xf32>
    %447 = arith.mulf %442, %446 : vector<2x2xf32>
    %448 = arith.truncf %447 : vector<2x2xf32> to vector<2x2xbf16>
    %cst_176 = arith.constant dense<0.000000e+00> : vector<2x4xf32>
    %449 = tpu.matmul %448, %436, %cst_176 {dimension_numbers = #tpu.dot_dimension_numbers<[1], [0], [0], [1], [0, 0, 1, 1], [], []>} : vector<2x2xbf16>, vector<2x4xbf16>, vector<2x4xf32> -> vector<2x4xf32>
    %450 = arith.truncf %449 : vector<2x4xf32> to vector<2x4xbf16>
    %c28_177 = arith.constant 28 : index
    %c0_178 = arith.constant 0 : index
    %451 = vector.load %arg4[%c28_177, %c0_178] : memref<32x32xbf16, #tpu.memory_space<vmem>>, vector<4x32xbf16>
    %cst_179 = arith.constant dense<0.000000e+00> : vector<2x32xf32>
    %452 = tpu.matmul %450, %451, %cst_179 {dimension_numbers = #tpu.dot_dimension_numbers<[1], [0], [0], [1], [0, 0, 1, 1], [], []>} : vector<2x4xbf16>, vector<4x32xbf16>, vector<2x32xf32> -> vector<2x32xf32>
    %453 = arith.addf %433, %452 : vector<2x32xf32>
    %cst_180 = arith.constant dense<0.000000e+00> : vector<2xf32>
    %454 = vector.multi_reduction <add>, %453, %cst_180 [1] : vector<2x32xf32> to vector<2xf32>
    %455 = vector.shape_cast %454 : vector<2xf32> to vector<2x1xf32>
    %cst_181 = arith.constant 3.200000e+01 : f32
    %456 = vector.broadcast %cst_181 : f32 to vector<2x1xf32>
    %457 = arith.divf %455, %456 : vector<2x1xf32>
    %458 = vector.broadcast %457 : vector<2x1xf32> to vector<2x32xf32>
    %459 = arith.subf %453, %458 : vector<2x32xf32>
    %460 = arith.mulf %459, %459 : vector<2x32xf32>
    %cst_182 = arith.constant dense<0.000000e+00> : vector<2xf32>
    %461 = vector.multi_reduction <add>, %460, %cst_182 [1] : vector<2x32xf32> to vector<2xf32>
    %462 = vector.shape_cast %461 : vector<2xf32> to vector<2x1xf32>
    %cst_183 = arith.constant 3.200000e+01 : f32
    %463 = vector.broadcast %cst_183 : f32 to vector<2x1xf32>
    %464 = arith.divf %462, %463 : vector<2x1xf32>
    %cst_184 = arith.constant 9.99999974E-6 : f32
    %465 = vector.broadcast %cst_184 : f32 to vector<2x1xf32>
    %466 = arith.addf %464, %465 : vector<2x1xf32>
    %467 = math.rsqrt %466 : vector<2x1xf32>
    %468 = vector.broadcast %467 : vector<2x1xf32> to vector<2x32xf32>
    %469 = arith.mulf %459, %468 : vector<2x32xf32>
    %c0_185 = arith.constant 0 : index
    %c0_186 = arith.constant 0 : index
    %470 = vector.load %arg6[%c0_185, %c0_186] : memref<1x32xf32, #tpu.memory_space<vmem>>, vector<1x32xf32>
    %471 = vector.broadcast %470 : vector<1x32xf32> to vector<2x32xf32>
    %472 = arith.mulf %469, %471 : vector<2x32xf32>
    %c0_187 = arith.constant 0 : index
    %c0_188 = arith.constant 0 : index
    %473 = vector.load %arg7[%c0_187, %c0_188] : memref<1x32xf32, #tpu.memory_space<vmem>>, vector<1x32xf32>
    %474 = vector.broadcast %473 : vector<1x32xf32> to vector<2x32xf32>
    %475 = arith.addf %472, %474 : vector<2x32xf32>
    %476 = arith.truncf %475 : vector<2x32xf32> to vector<2x32xbf16>
    %c0_189 = arith.constant 0 : index
    %c0_190 = arith.constant 0 : index
    %477 = vector.load %arg11[%c0_189, %c0_190] : memref<1x32xf32, #tpu.memory_space<vmem>>, vector<1x32xf32>
    %478 = vector.broadcast %477 : vector<1x32xf32> to vector<2x32xf32>
    %479 = arith.addf %475, %478 : vector<2x32xf32>
    %c0_191 = arith.constant 0 : index
    %c0_192 = arith.constant 0 : index
    %480 = vector.load %arg8[%c0_191, %c0_192] : memref<32x2048xbf16, #tpu.memory_space<vmem>>, vector<32x512xbf16>
    %cst_193 = arith.constant dense<0.000000e+00> : vector<2x512xf32>
    %481 = tpu.matmul %476, %480, %cst_193 {dimension_numbers = #tpu.dot_dimension_numbers<[1], [0], [0], [1], [0, 0, 1, 1], [], []>} : vector<2x32xbf16>, vector<32x512xbf16>, vector<2x512xf32> -> vector<2x512xf32>
    %c0_194 = arith.constant 0 : index
    %c0_195 = arith.constant 0 : index
    %482 = vector.load %arg9[%c0_194, %c0_195] : memref<1x2048xf32, #tpu.memory_space<vmem>>, vector<1x512xf32>
    %483 = vector.broadcast %482 : vector<1x512xf32> to vector<2x512xf32>
    %484 = arith.addf %481, %483 : vector<2x512xf32>
    %cst_196 = arith.constant 0.000000e+00 : f32
    %485 = vector.broadcast %cst_196 : f32 to vector<2x512xf32>
    %486 = arith.maximumf %484, %485 : vector<2x512xf32>
    %487 = arith.truncf %486 : vector<2x512xf32> to vector<2x512xbf16>
    %c0_197 = arith.constant 0 : index
    %c0_198 = arith.constant 0 : index
    %488 = vector.load %arg10[%c0_197, %c0_198] : memref<2048x32xbf16, #tpu.memory_space<vmem>>, vector<512x32xbf16>
    %cst_199 = arith.constant dense<0.000000e+00> : vector<2x32xf32>
    %489 = tpu.matmul %487, %488, %cst_199 {dimension_numbers = #tpu.dot_dimension_numbers<[1], [0], [0], [1], [0, 0, 1, 1], [], []>} : vector<2x512xbf16>, vector<512x32xbf16>, vector<2x32xf32> -> vector<2x32xf32>
    %490 = arith.addf %479, %489 : vector<2x32xf32>
    %c0_200 = arith.constant 0 : index
    %c512_201 = arith.constant 512 : index
    %491 = vector.load %arg8[%c0_200, %c512_201] : memref<32x2048xbf16, #tpu.memory_space<vmem>>, vector<32x512xbf16>
    %cst_202 = arith.constant dense<0.000000e+00> : vector<2x512xf32>
    %492 = tpu.matmul %476, %491, %cst_202 {dimension_numbers = #tpu.dot_dimension_numbers<[1], [0], [0], [1], [0, 0, 1, 1], [], []>} : vector<2x32xbf16>, vector<32x512xbf16>, vector<2x512xf32> -> vector<2x512xf32>
    %c0_203 = arith.constant 0 : index
    %c512_204 = arith.constant 512 : index
    %493 = vector.load %arg9[%c0_203, %c512_204] : memref<1x2048xf32, #tpu.memory_space<vmem>>, vector<1x512xf32>
    %494 = vector.broadcast %493 : vector<1x512xf32> to vector<2x512xf32>
    %495 = arith.addf %492, %494 : vector<2x512xf32>
    %cst_205 = arith.constant 0.000000e+00 : f32
    %496 = vector.broadcast %cst_205 : f32 to vector<2x512xf32>
    %497 = arith.maximumf %495, %496 : vector<2x512xf32>
    %498 = arith.truncf %497 : vector<2x512xf32> to vector<2x512xbf16>
    %c512_206 = arith.constant 512 : index
    %c0_207 = arith.constant 0 : index
    %499 = vector.load %arg10[%c512_206, %c0_207] : memref<2048x32xbf16, #tpu.memory_space<vmem>>, vector<512x32xbf16>
    %cst_208 = arith.constant dense<0.000000e+00> : vector<2x32xf32>
    %500 = tpu.matmul %498, %499, %cst_208 {dimension_numbers = #tpu.dot_dimension_numbers<[1], [0], [0], [1], [0, 0, 1, 1], [], []>} : vector<2x512xbf16>, vector<512x32xbf16>, vector<2x32xf32> -> vector<2x32xf32>
    %501 = arith.addf %490, %500 : vector<2x32xf32>
    %c0_209 = arith.constant 0 : index
    %c1024_210 = arith.constant 1024 : index
    %502 = vector.load %arg8[%c0_209, %c1024_210] : memref<32x2048xbf16, #tpu.memory_space<vmem>>, vector<32x512xbf16>
    %cst_211 = arith.constant dense<0.000000e+00> : vector<2x512xf32>
    %503 = tpu.matmul %476, %502, %cst_211 {dimension_numbers = #tpu.dot_dimension_numbers<[1], [0], [0], [1], [0, 0, 1, 1], [], []>} : vector<2x32xbf16>, vector<32x512xbf16>, vector<2x512xf32> -> vector<2x512xf32>
    %c0_212 = arith.constant 0 : index
    %c1024_213 = arith.constant 1024 : index
    %504 = vector.load %arg9[%c0_212, %c1024_213] : memref<1x2048xf32, #tpu.memory_space<vmem>>, vector<1x512xf32>
    %505 = vector.broadcast %504 : vector<1x512xf32> to vector<2x512xf32>
    %506 = arith.addf %503, %505 : vector<2x512xf32>
    %cst_214 = arith.constant 0.000000e+00 : f32
    %507 = vector.broadcast %cst_214 : f32 to vector<2x512xf32>
    %508 = arith.maximumf %506, %507 : vector<2x512xf32>
    %509 = arith.truncf %508 : vector<2x512xf32> to vector<2x512xbf16>
    %c1024_215 = arith.constant 1024 : index
    %c0_216 = arith.constant 0 : index
    %510 = vector.load %arg10[%c1024_215, %c0_216] : memref<2048x32xbf16, #tpu.memory_space<vmem>>, vector<512x32xbf16>
    %cst_217 = arith.constant dense<0.000000e+00> : vector<2x32xf32>
    %511 = tpu.matmul %509, %510, %cst_217 {dimension_numbers = #tpu.dot_dimension_numbers<[1], [0], [0], [1], [0, 0, 1, 1], [], []>} : vector<2x512xbf16>, vector<512x32xbf16>, vector<2x32xf32> -> vector<2x32xf32>
    %512 = arith.addf %501, %511 : vector<2x32xf32>
    %c0_218 = arith.constant 0 : index
    %c1536_219 = arith.constant 1536 : index
    %513 = vector.load %arg8[%c0_218, %c1536_219] : memref<32x2048xbf16, #tpu.memory_space<vmem>>, vector<32x512xbf16>
    %cst_220 = arith.constant dense<0.000000e+00> : vector<2x512xf32>
    %514 = tpu.matmul %476, %513, %cst_220 {dimension_numbers = #tpu.dot_dimension_numbers<[1], [0], [0], [1], [0, 0, 1, 1], [], []>} : vector<2x32xbf16>, vector<32x512xbf16>, vector<2x512xf32> -> vector<2x512xf32>
    %c0_221 = arith.constant 0 : index
    %c1536_222 = arith.constant 1536 : index
    %515 = vector.load %arg9[%c0_221, %c1536_222] : memref<1x2048xf32, #tpu.memory_space<vmem>>, vector<1x512xf32>
    %516 = vector.broadcast %515 : vector<1x512xf32> to vector<2x512xf32>
    %517 = arith.addf %514, %516 : vector<2x512xf32>
    %cst_223 = arith.constant 0.000000e+00 : f32
    %518 = vector.broadcast %cst_223 : f32 to vector<2x512xf32>
    %519 = arith.maximumf %517, %518 : vector<2x512xf32>
    %520 = arith.truncf %519 : vector<2x512xf32> to vector<2x512xbf16>
    %c1536_224 = arith.constant 1536 : index
    %c0_225 = arith.constant 0 : index
    %521 = vector.load %arg10[%c1536_224, %c0_225] : memref<2048x32xbf16, #tpu.memory_space<vmem>>, vector<512x32xbf16>
    %cst_226 = arith.constant dense<0.000000e+00> : vector<2x32xf32>
    %522 = tpu.matmul %520, %521, %cst_226 {dimension_numbers = #tpu.dot_dimension_numbers<[1], [0], [0], [1], [0, 0, 1, 1], [], []>} : vector<2x512xbf16>, vector<512x32xbf16>, vector<2x32xf32> -> vector<2x32xf32>
    %523 = arith.addf %512, %522 : vector<2x32xf32>
    %cst_227 = arith.constant dense<0.000000e+00> : vector<2xf32>
    %524 = vector.multi_reduction <add>, %523, %cst_227 [1] : vector<2x32xf32> to vector<2xf32>
    %525 = vector.shape_cast %524 : vector<2xf32> to vector<2x1xf32>
    %cst_228 = arith.constant 3.200000e+01 : f32
    %526 = vector.broadcast %cst_228 : f32 to vector<2x1xf32>
    %527 = arith.divf %525, %526 : vector<2x1xf32>
    %528 = vector.broadcast %527 : vector<2x1xf32> to vector<2x32xf32>
    %529 = arith.subf %523, %528 : vector<2x32xf32>
    %530 = arith.mulf %529, %529 : vector<2x32xf32>
    %cst_229 = arith.constant dense<0.000000e+00> : vector<2xf32>
    %531 = vector.multi_reduction <add>, %530, %cst_229 [1] : vector<2x32xf32> to vector<2xf32>
    %532 = vector.shape_cast %531 : vector<2xf32> to vector<2x1xf32>
    %cst_230 = arith.constant 3.200000e+01 : f32
    %533 = vector.broadcast %cst_230 : f32 to vector<2x1xf32>
    %534 = arith.divf %532, %533 : vector<2x1xf32>
    %cst_231 = arith.constant 9.99999974E-6 : f32
    %535 = vector.broadcast %cst_231 : f32 to vector<2x1xf32>
    %536 = arith.addf %534, %535 : vector<2x1xf32>
    %537 = math.rsqrt %536 : vector<2x1xf32>
    %538 = vector.broadcast %537 : vector<2x1xf32> to vector<2x32xf32>
    %539 = arith.mulf %529, %538 : vector<2x32xf32>
    %c0_232 = arith.constant 0 : index
    %c0_233 = arith.constant 0 : index
    %540 = vector.load %arg12[%c0_232, %c0_233] : memref<1x32xf32, #tpu.memory_space<vmem>>, vector<1x32xf32>
    %541 = vector.broadcast %540 : vector<1x32xf32> to vector<2x32xf32>
    %542 = arith.mulf %539, %541 : vector<2x32xf32>
    %c0_234 = arith.constant 0 : index
    %c0_235 = arith.constant 0 : index
    %543 = vector.load %arg13[%c0_234, %c0_235] : memref<1x32xf32, #tpu.memory_space<vmem>>, vector<1x32xf32>
    %544 = vector.broadcast %543 : vector<1x32xf32> to vector<2x32xf32>
    %545 = arith.addf %542, %544 : vector<2x32xf32>
    %546 = arith.truncf %545 : vector<2x32xf32> to vector<2x32xbf16>
    %c1_236 = arith.constant 1 : index
    %c0_237 = arith.constant 0 : index
    %c0_238 = arith.constant 0 : index
    %547 = vector.load %arg14[%c1_236, %c0_237, %c0_238] : memref<4x2x32xbf16, #tpu.memory_space<vmem>>, vector<1x2x32xbf16>
    %548 = vector.shape_cast %547 : vector<1x2x32xbf16> to vector<2x32xbf16>
    %549 = vector.shape_cast %546 : vector<2x32xbf16> to vector<1x2x32xbf16>
    tpu.vector_store %arg14[%c1_236, %c0_237, %c0_238], %549 {strides = array<i32>} : memref<4x2x32xbf16, #tpu.memory_space<vmem>>, vector<1x2x32xbf16>,
    %c2 = arith.constant 2 : index
    %c0_239 = arith.constant 0 : index
    %c0_240 = arith.constant 0 : index
    %550 = vector.load %arg1[%c2, %c0_239, %c0_240] : memref<4x2x32xbf16, #tpu.memory_space<vmem>>, vector<1x2x32xbf16>
    %551 = vector.shape_cast %550 : vector<1x2x32xbf16> to vector<2x32xbf16>
    %c0_241 = arith.constant 0 : index
    %c0_242 = arith.constant 0 : index
    %552 = vector.load %arg2[%c0_241, %c0_242] : memref<32x96xbf16, #tpu.memory_space<vmem>>, vector<32x96xbf16>
    %cst_243 = arith.constant dense<0.000000e+00> : vector<2x96xf32>
    %553 = tpu.matmul %551, %552, %cst_243 {dimension_numbers = #tpu.dot_dimension_numbers<[1], [0], [0], [1], [0, 0, 1, 1], [], []>} : vector<2x32xbf16>, vector<32x96xbf16>, vector<2x96xf32> -> vector<2x96xf32>
    %c0_244 = arith.constant 0 : index
    %c0_245 = arith.constant 0 : index
    %554 = vector.load %arg3[%c0_244, %c0_245] : memref<1x96xf32, #tpu.memory_space<vmem>>, vector<1x96xf32>
    %555 = vector.broadcast %554 : vector<1x96xf32> to vector<2x96xf32>
    %556 = arith.addf %553, %555 : vector<2x96xf32>
    %557 = vector.extract_strided_slice %556 {offsets = [0, 0], sizes = [2, 32], strides = [1, 1]} : vector<2x96xf32> to vector<2x32xf32>
    %cst_246 = arith.constant 5.000000e-01 : f32
    %558 = vector.broadcast %cst_246 : f32 to vector<2x32xf32>
    %559 = arith.mulf %557, %558 : vector<2x32xf32>
    %560 = arith.truncf %559 : vector<2x32xf32> to vector<2x32xbf16>
    %561 = vector.extract_strided_slice %556 {offsets = [0, 32], sizes = [2, 32], strides = [1, 1]} : vector<2x96xf32> to vector<2x32xf32>
    %562 = arith.truncf %561 : vector<2x32xf32> to vector<2x32xbf16>
    %563 = vector.extract_strided_slice %556 {offsets = [0, 64], sizes = [2, 32], strides = [1, 1]} : vector<2x96xf32> to vector<2x32xf32>
    %564 = arith.truncf %563 : vector<2x32xf32> to vector<2x32xbf16>
    %565 = arith.extf %551 : vector<2x32xbf16> to vector<2x32xf32>
    %c0_247 = arith.constant 0 : index
    %c0_248 = arith.constant 0 : index
    %566 = vector.load %arg5[%c0_247, %c0_248] : memref<1x32xf32, #tpu.memory_space<vmem>>, vector<1x32xf32>
    %567 = vector.broadcast %566 : vector<1x32xf32> to vector<2x32xf32>
    %568 = arith.addf %565, %567 : vector<2x32xf32>
    %569 = vector.extract_strided_slice %560 {offsets = [0, 0], sizes = [2, 4], strides = [1, 1]} : vector<2x32xbf16> to vector<2x4xbf16>
    %570 = vector.extract_strided_slice %562 {offsets = [0, 0], sizes = [2, 4], strides = [1, 1]} : vector<2x32xbf16> to vector<2x4xbf16>
    %571 = vector.extract_strided_slice %564 {offsets = [0, 0], sizes = [2, 4], strides = [1, 1]} : vector<2x32xbf16> to vector<2x4xbf16>
    %cst_249 = arith.constant dense<0.000000e+00> : vector<2x2xf32>
    %572 = tpu.matmul %569, %570, %cst_249 {dimension_numbers = #tpu.dot_dimension_numbers<[1], [1], [0], [0], [0, 0, 1, 0], [], []>} : vector<2x4xbf16>, vector<2x4xbf16>, vector<2x2xf32> -> vector<2x2xf32>
    %cst_250 = arith.constant dense<0xFF800000> : vector<2xf32>
    %573 = vector.multi_reduction <maximumf>, %572, %cst_250 [1] : vector<2x2xf32> to vector<2xf32>
    %574 = vector.shape_cast %573 : vector<2xf32> to vector<2x1xf32>
    %575 = vector.broadcast %574 : vector<2x1xf32> to vector<2x2xf32>
    %576 = arith.subf %572, %575 : vector<2x2xf32>
    %577 = math.exp %576 : vector<2x2xf32>
    %cst_251 = arith.constant dense<0.000000e+00> : vector<2xf32>
    %578 = vector.multi_reduction <add>, %577, %cst_251 [1] : vector<2x2xf32> to vector<2xf32>
    %579 = vector.shape_cast %578 : vector<2xf32> to vector<2x1xf32>
    %580 = tpu.reciprocal %579 {approx = true} : vector<2x1xf32> -> vector<2x1xf32>
    %581 = vector.broadcast %580 : vector<2x1xf32> to vector<2x2xf32>
    %582 = arith.mulf %577, %581 : vector<2x2xf32>
    %583 = arith.truncf %582 : vector<2x2xf32> to vector<2x2xbf16>
    %cst_252 = arith.constant dense<0.000000e+00> : vector<2x4xf32>
    %584 = tpu.matmul %583, %571, %cst_252 {dimension_numbers = #tpu.dot_dimension_numbers<[1], [0], [0], [1], [0, 0, 1, 1], [], []>} : vector<2x2xbf16>, vector<2x4xbf16>, vector<2x4xf32> -> vector<2x4xf32>
    %585 = arith.truncf %584 : vector<2x4xf32> to vector<2x4xbf16>
    %c0_253 = arith.constant 0 : index
    %c0_254 = arith.constant 0 : index
    %586 = vector.load %arg4[%c0_253, %c0_254] : memref<32x32xbf16, #tpu.memory_space<vmem>>, vector<4x32xbf16>
    %cst_255 = arith.constant dense<0.000000e+00> : vector<2x32xf32>
    %587 = tpu.matmul %585, %586, %cst_255 {dimension_numbers = #tpu.dot_dimension_numbers<[1], [0], [0], [1], [0, 0, 1, 1], [], []>} : vector<2x4xbf16>, vector<4x32xbf16>, vector<2x32xf32> -> vector<2x32xf32>
    %588 = arith.addf %568, %587 : vector<2x32xf32>
    %589 = vector.extract_strided_slice %560 {offsets = [0, 4], sizes = [2, 4], strides = [1, 1]} : vector<2x32xbf16> to vector<2x4xbf16>
    %590 = vector.extract_strided_slice %562 {offsets = [0, 4], sizes = [2, 4], strides = [1, 1]} : vector<2x32xbf16> to vector<2x4xbf16>
    %591 = vector.extract_strided_slice %564 {offsets = [0, 4], sizes = [2, 4], strides = [1, 1]} : vector<2x32xbf16> to vector<2x4xbf16>
    %cst_256 = arith.constant dense<0.000000e+00> : vector<2x2xf32>
    %592 = tpu.matmul %589, %590, %cst_256 {dimension_numbers = #tpu.dot_dimension_numbers<[1], [1], [0], [0], [0, 0, 1, 0], [], []>} : vector<2x4xbf16>, vector<2x4xbf16>, vector<2x2xf32> -> vector<2x2xf32>
    %cst_257 = arith.constant dense<0xFF800000> : vector<2xf32>
    %593 = vector.multi_reduction <maximumf>, %592, %cst_257 [1] : vector<2x2xf32> to vector<2xf32>
    %594 = vector.shape_cast %593 : vector<2xf32> to vector<2x1xf32>
    %595 = vector.broadcast %594 : vector<2x1xf32> to vector<2x2xf32>
    %596 = arith.subf %592, %595 : vector<2x2xf32>
    %597 = math.exp %596 : vector<2x2xf32>
    %cst_258 = arith.constant dense<0.000000e+00> : vector<2xf32>
    %598 = vector.multi_reduction <add>, %597, %cst_258 [1] : vector<2x2xf32> to vector<2xf32>
    %599 = vector.shape_cast %598 : vector<2xf32> to vector<2x1xf32>
    %600 = tpu.reciprocal %599 {approx = true} : vector<2x1xf32> -> vector<2x1xf32>
    %601 = vector.broadcast %600 : vector<2x1xf32> to vector<2x2xf32>
    %602 = arith.mulf %597, %601 : vector<2x2xf32>
    %603 = arith.truncf %602 : vector<2x2xf32> to vector<2x2xbf16>
    %cst_259 = arith.constant dense<0.000000e+00> : vector<2x4xf32>
    %604 = tpu.matmul %603, %591, %cst_259 {dimension_numbers = #tpu.dot_dimension_numbers<[1], [0], [0], [1], [0, 0, 1, 1], [], []>} : vector<2x2xbf16>, vector<2x4xbf16>, vector<2x4xf32> -> vector<2x4xf32>
    %605 = arith.truncf %604 : vector<2x4xf32> to vector<2x4xbf16>
    %c4_260 = arith.constant 4 : index
    %c0_261 = arith.constant 0 : index
    %606 = vector.load %arg4[%c4_260, %c0_261] : memref<32x32xbf16, #tpu.memory_space<vmem>>, vector<4x32xbf16>
    %cst_262 = arith.constant dense<0.000000e+00> : vector<2x32xf32>
    %607 = tpu.matmul %605, %606, %cst_262 {dimension_numbers = #tpu.dot_dimension_numbers<[1], [0], [0], [1], [0, 0, 1, 1], [], []>} : vector<2x4xbf16>, vector<4x32xbf16>, vector<2x32xf32> -> vector<2x32xf32>
    %608 = arith.addf %588, %607 : vector<2x32xf32>
    %609 = vector.extract_strided_slice %560 {offsets = [0, 8], sizes = [2, 4], strides = [1, 1]} : vector<2x32xbf16> to vector<2x4xbf16>
    %610 = vector.extract_strided_slice %562 {offsets = [0, 8], sizes = [2, 4], strides = [1, 1]} : vector<2x32xbf16> to vector<2x4xbf16>
    %611 = vector.extract_strided_slice %564 {offsets = [0, 8], sizes = [2, 4], strides = [1, 1]} : vector<2x32xbf16> to vector<2x4xbf16>
    %cst_263 = arith.constant dense<0.000000e+00> : vector<2x2xf32>
    %612 = tpu.matmul %609, %610, %cst_263 {dimension_numbers = #tpu.dot_dimension_numbers<[1], [1], [0], [0], [0, 0, 1, 0], [], []>} : vector<2x4xbf16>, vector<2x4xbf16>, vector<2x2xf32> -> vector<2x2xf32>
    %cst_264 = arith.constant dense<0xFF800000> : vector<2xf32>
    %613 = vector.multi_reduction <maximumf>, %612, %cst_264 [1] : vector<2x2xf32> to vector<2xf32>
    %614 = vector.shape_cast %613 : vector<2xf32> to vector<2x1xf32>
    %615 = vector.broadcast %614 : vector<2x1xf32> to vector<2x2xf32>
    %616 = arith.subf %612, %615 : vector<2x2xf32>
    %617 = math.exp %616 : vector<2x2xf32>
    %cst_265 = arith.constant dense<0.000000e+00> : vector<2xf32>
    %618 = vector.multi_reduction <add>, %617, %cst_265 [1] : vector<2x2xf32> to vector<2xf32>
    %619 = vector.shape_cast %618 : vector<2xf32> to vector<2x1xf32>
    %620 = tpu.reciprocal %619 {approx = true} : vector<2x1xf32> -> vector<2x1xf32>
    %621 = vector.broadcast %620 : vector<2x1xf32> to vector<2x2xf32>
    %622 = arith.mulf %617, %621 : vector<2x2xf32>
    %623 = arith.truncf %622 : vector<2x2xf32> to vector<2x2xbf16>
    %cst_266 = arith.constant dense<0.000000e+00> : vector<2x4xf32>
    %624 = tpu.matmul %623, %611, %cst_266 {dimension_numbers = #tpu.dot_dimension_numbers<[1], [0], [0], [1], [0, 0, 1, 1], [], []>} : vector<2x2xbf16>, vector<2x4xbf16>, vector<2x4xf32> -> vector<2x4xf32>
    %625 = arith.truncf %624 : vector<2x4xf32> to vector<2x4xbf16>
    %c8_267 = arith.constant 8 : index
    %c0_268 = arith.constant 0 : index
    %626 = vector.load %arg4[%c8_267, %c0_268] : memref<32x32xbf16, #tpu.memory_space<vmem>>, vector<4x32xbf16>
    %cst_269 = arith.constant dense<0.000000e+00> : vector<2x32xf32>
    %627 = tpu.matmul %625, %626, %cst_269 {dimension_numbers = #tpu.dot_dimension_numbers<[1], [0], [0], [1], [0, 0, 1, 1], [], []>} : vector<2x4xbf16>, vector<4x32xbf16>, vector<2x32xf32> -> vector<2x32xf32>
    %628 = arith.addf %608, %627 : vector<2x32xf32>
    %629 = vector.extract_strided_slice %560 {offsets = [0, 12], sizes = [2, 4], strides = [1, 1]} : vector<2x32xbf16> to vector<2x4xbf16>
    %630 = vector.extract_strided_slice %562 {offsets = [0, 12], sizes = [2, 4], strides = [1, 1]} : vector<2x32xbf16> to vector<2x4xbf16>
    %631 = vector.extract_strided_slice %564 {offsets = [0, 12], sizes = [2, 4], strides = [1, 1]} : vector<2x32xbf16> to vector<2x4xbf16>
    %cst_270 = arith.constant dense<0.000000e+00> : vector<2x2xf32>
    %632 = tpu.matmul %629, %630, %cst_270 {dimension_numbers = #tpu.dot_dimension_numbers<[1], [1], [0], [0], [0, 0, 1, 0], [], []>} : vector<2x4xbf16>, vector<2x4xbf16>, vector<2x2xf32> -> vector<2x2xf32>
    %cst_271 = arith.constant dense<0xFF800000> : vector<2xf32>
    %633 = vector.multi_reduction <maximumf>, %632, %cst_271 [1] : vector<2x2xf32> to vector<2xf32>
    %634 = vector.shape_cast %633 : vector<2xf32> to vector<2x1xf32>
    %635 = vector.broadcast %634 : vector<2x1xf32> to vector<2x2xf32>
    %636 = arith.subf %632, %635 : vector<2x2xf32>
    %637 = math.exp %636 : vector<2x2xf32>
    %cst_272 = arith.constant dense<0.000000e+00> : vector<2xf32>
    %638 = vector.multi_reduction <add>, %637, %cst_272 [1] : vector<2x2xf32> to vector<2xf32>
    %639 = vector.shape_cast %638 : vector<2xf32> to vector<2x1xf32>
    %640 = tpu.reciprocal %639 {approx = true} : vector<2x1xf32> -> vector<2x1xf32>
    %641 = vector.broadcast %640 : vector<2x1xf32> to vector<2x2xf32>
    %642 = arith.mulf %637, %641 : vector<2x2xf32>
    %643 = arith.truncf %642 : vector<2x2xf32> to vector<2x2xbf16>
    %cst_273 = arith.constant dense<0.000000e+00> : vector<2x4xf32>
    %644 = tpu.matmul %643, %631, %cst_273 {dimension_numbers = #tpu.dot_dimension_numbers<[1], [0], [0], [1], [0, 0, 1, 1], [], []>} : vector<2x2xbf16>, vector<2x4xbf16>, vector<2x4xf32> -> vector<2x4xf32>
    %645 = arith.truncf %644 : vector<2x4xf32> to vector<2x4xbf16>
    %c12_274 = arith.constant 12 : index
    %c0_275 = arith.constant 0 : index
    %646 = vector.load %arg4[%c12_274, %c0_275] : memref<32x32xbf16, #tpu.memory_space<vmem>>, vector<4x32xbf16>
    %cst_276 = arith.constant dense<0.000000e+00> : vector<2x32xf32>
    %647 = tpu.matmul %645, %646, %cst_276 {dimension_numbers = #tpu.dot_dimension_numbers<[1], [0], [0], [1], [0, 0, 1, 1], [], []>} : vector<2x4xbf16>, vector<4x32xbf16>, vector<2x32xf32> -> vector<2x32xf32>
    %648 = arith.addf %628, %647 : vector<2x32xf32>
    %649 = vector.extract_strided_slice %560 {offsets = [0, 16], sizes = [2, 4], strides = [1, 1]} : vector<2x32xbf16> to vector<2x4xbf16>
    %650 = vector.extract_strided_slice %562 {offsets = [0, 16], sizes = [2, 4], strides = [1, 1]} : vector<2x32xbf16> to vector<2x4xbf16>
    %651 = vector.extract_strided_slice %564 {offsets = [0, 16], sizes = [2, 4], strides = [1, 1]} : vector<2x32xbf16> to vector<2x4xbf16>
    %cst_277 = arith.constant dense<0.000000e+00> : vector<2x2xf32>
    %652 = tpu.matmul %649, %650, %cst_277 {dimension_numbers = #tpu.dot_dimension_numbers<[1], [1], [0], [0], [0, 0, 1, 0], [], []>} : vector<2x4xbf16>, vector<2x4xbf16>, vector<2x2xf32> -> vector<2x2xf32>
    %cst_278 = arith.constant dense<0xFF800000> : vector<2xf32>
    %653 = vector.multi_reduction <maximumf>, %652, %cst_278 [1] : vector<2x2xf32> to vector<2xf32>
    %654 = vector.shape_cast %653 : vector<2xf32> to vector<2x1xf32>
    %655 = vector.broadcast %654 : vector<2x1xf32> to vector<2x2xf32>
    %656 = arith.subf %652, %655 : vector<2x2xf32>
    %657 = math.exp %656 : vector<2x2xf32>
    %cst_279 = arith.constant dense<0.000000e+00> : vector<2xf32>
    %658 = vector.multi_reduction <add>, %657, %cst_279 [1] : vector<2x2xf32> to vector<2xf32>
    %659 = vector.shape_cast %658 : vector<2xf32> to vector<2x1xf32>
    %660 = tpu.reciprocal %659 {approx = true} : vector<2x1xf32> -> vector<2x1xf32>
    %661 = vector.broadcast %660 : vector<2x1xf32> to vector<2x2xf32>
    %662 = arith.mulf %657, %661 : vector<2x2xf32>
    %663 = arith.truncf %662 : vector<2x2xf32> to vector<2x2xbf16>
    %cst_280 = arith.constant dense<0.000000e+00> : vector<2x4xf32>
    %664 = tpu.matmul %663, %651, %cst_280 {dimension_numbers = #tpu.dot_dimension_numbers<[1], [0], [0], [1], [0, 0, 1, 1], [], []>} : vector<2x2xbf16>, vector<2x4xbf16>, vector<2x4xf32> -> vector<2x4xf32>
    %665 = arith.truncf %664 : vector<2x4xf32> to vector<2x4xbf16>
    %c16_281 = arith.constant 16 : index
    %c0_282 = arith.constant 0 : index
    %666 = vector.load %arg4[%c16_281, %c0_282] : memref<32x32xbf16, #tpu.memory_space<vmem>>, vector<4x32xbf16>
    %cst_283 = arith.constant dense<0.000000e+00> : vector<2x32xf32>
    %667 = tpu.matmul %665, %666, %cst_283 {dimension_numbers = #tpu.dot_dimension_numbers<[1], [0], [0], [1], [0, 0, 1, 1], [], []>} : vector<2x4xbf16>, vector<4x32xbf16>, vector<2x32xf32> -> vector<2x32xf32>
    %668 = arith.addf %648, %667 : vector<2x32xf32>
    %669 = vector.extract_strided_slice %560 {offsets = [0, 20], sizes = [2, 4], strides = [1, 1]} : vector<2x32xbf16> to vector<2x4xbf16>
    %670 = vector.extract_strided_slice %562 {offsets = [0, 20], sizes = [2, 4], strides = [1, 1]} : vector<2x32xbf16> to vector<2x4xbf16>
    %671 = vector.extract_strided_slice %564 {offsets = [0, 20], sizes = [2, 4], strides = [1, 1]} : vector<2x32xbf16> to vector<2x4xbf16>
    %cst_284 = arith.constant dense<0.000000e+00> : vector<2x2xf32>
    %672 = tpu.matmul %669, %670, %cst_284 {dimension_numbers = #tpu.dot_dimension_numbers<[1], [1], [0], [0], [0, 0, 1, 0], [], []>} : vector<2x4xbf16>, vector<2x4xbf16>, vector<2x2xf32> -> vector<2x2xf32>
    %cst_285 = arith.constant dense<0xFF800000> : vector<2xf32>
    %673 = vector.multi_reduction <maximumf>, %672, %cst_285 [1] : vector<2x2xf32> to vector<2xf32>
    %674 = vector.shape_cast %673 : vector<2xf32> to vector<2x1xf32>
    %675 = vector.broadcast %674 : vector<2x1xf32> to vector<2x2xf32>
    %676 = arith.subf %672, %675 : vector<2x2xf32>
    %677 = math.exp %676 : vector<2x2xf32>
    %cst_286 = arith.constant dense<0.000000e+00> : vector<2xf32>
    %678 = vector.multi_reduction <add>, %677, %cst_286 [1] : vector<2x2xf32> to vector<2xf32>
    %679 = vector.shape_cast %678 : vector<2xf32> to vector<2x1xf32>
    %680 = tpu.reciprocal %679 {approx = true} : vector<2x1xf32> -> vector<2x1xf32>
    %681 = vector.broadcast %680 : vector<2x1xf32> to vector<2x2xf32>
    %682 = arith.mulf %677, %681 : vector<2x2xf32>
    %683 = arith.truncf %682 : vector<2x2xf32> to vector<2x2xbf16>
    %cst_287 = arith.constant dense<0.000000e+00> : vector<2x4xf32>
    %684 = tpu.matmul %683, %671, %cst_287 {dimension_numbers = #tpu.dot_dimension_numbers<[1], [0], [0], [1], [0, 0, 1, 1], [], []>} : vector<2x2xbf16>, vector<2x4xbf16>, vector<2x4xf32> -> vector<2x4xf32>
    %685 = arith.truncf %684 : vector<2x4xf32> to vector<2x4xbf16>
    %c20_288 = arith.constant 20 : index
    %c0_289 = arith.constant 0 : index
    %686 = vector.load %arg4[%c20_288, %c0_289] : memref<32x32xbf16, #tpu.memory_space<vmem>>, vector<4x32xbf16>
    %cst_290 = arith.constant dense<0.000000e+00> : vector<2x32xf32>
    %687 = tpu.matmul %685, %686, %cst_290 {dimension_numbers = #tpu.dot_dimension_numbers<[1], [0], [0], [1], [0, 0, 1, 1], [], []>} : vector<2x4xbf16>, vector<4x32xbf16>, vector<2x32xf32> -> vector<2x32xf32>
    %688 = arith.addf %668, %687 : vector<2x32xf32>
    %689 = vector.extract_strided_slice %560 {offsets = [0, 24], sizes = [2, 4], strides = [1, 1]} : vector<2x32xbf16> to vector<2x4xbf16>
    %690 = vector.extract_strided_slice %562 {offsets = [0, 24], sizes = [2, 4], strides = [1, 1]} : vector<2x32xbf16> to vector<2x4xbf16>
    %691 = vector.extract_strided_slice %564 {offsets = [0, 24], sizes = [2, 4], strides = [1, 1]} : vector<2x32xbf16> to vector<2x4xbf16>
    %cst_291 = arith.constant dense<0.000000e+00> : vector<2x2xf32>
    %692 = tpu.matmul %689, %690, %cst_291 {dimension_numbers = #tpu.dot_dimension_numbers<[1], [1], [0], [0], [0, 0, 1, 0], [], []>} : vector<2x4xbf16>, vector<2x4xbf16>, vector<2x2xf32> -> vector<2x2xf32>
    %cst_292 = arith.constant dense<0xFF800000> : vector<2xf32>
    %693 = vector.multi_reduction <maximumf>, %692, %cst_292 [1] : vector<2x2xf32> to vector<2xf32>
    %694 = vector.shape_cast %693 : vector<2xf32> to vector<2x1xf32>
    %695 = vector.broadcast %694 : vector<2x1xf32> to vector<2x2xf32>
    %696 = arith.subf %692, %695 : vector<2x2xf32>
    %697 = math.exp %696 : vector<2x2xf32>
    %cst_293 = arith.constant dense<0.000000e+00> : vector<2xf32>
    %698 = vector.multi_reduction <add>, %697, %cst_293 [1] : vector<2x2xf32> to vector<2xf32>
    %699 = vector.shape_cast %698 : vector<2xf32> to vector<2x1xf32>
    %700 = tpu.reciprocal %699 {approx = true} : vector<2x1xf32> -> vector<2x1xf32>
    %701 = vector.broadcast %700 : vector<2x1xf32> to vector<2x2xf32>
    %702 = arith.mulf %697, %701 : vector<2x2xf32>
    %703 = arith.truncf %702 : vector<2x2xf32> to vector<2x2xbf16>
    %cst_294 = arith.constant dense<0.000000e+00> : vector<2x4xf32>
    %704 = tpu.matmul %703, %691, %cst_294 {dimension_numbers = #tpu.dot_dimension_numbers<[1], [0], [0], [1], [0, 0, 1, 1], [], []>} : vector<2x2xbf16>, vector<2x4xbf16>, vector<2x4xf32> -> vector<2x4xf32>
    %705 = arith.truncf %704 : vector<2x4xf32> to vector<2x4xbf16>
    %c24_295 = arith.constant 24 : index
    %c0_296 = arith.constant 0 : index
    %706 = vector.load %arg4[%c24_295, %c0_296] : memref<32x32xbf16, #tpu.memory_space<vmem>>, vector<4x32xbf16>
    %cst_297 = arith.constant dense<0.000000e+00> : vector<2x32xf32>
    %707 = tpu.matmul %705, %706, %cst_297 {dimension_numbers = #tpu.dot_dimension_numbers<[1], [0], [0], [1], [0, 0, 1, 1], [], []>} : vector<2x4xbf16>, vector<4x32xbf16>, vector<2x32xf32> -> vector<2x32xf32>
    %708 = arith.addf %688, %707 : vector<2x32xf32>
    %709 = vector.extract_strided_slice %560 {offsets = [0, 28], sizes = [2, 4], strides = [1, 1]} : vector<2x32xbf16> to vector<2x4xbf16>
    %710 = vector.extract_strided_slice %562 {offsets = [0, 28], sizes = [2, 4], strides = [1, 1]} : vector<2x32xbf16> to vector<2x4xbf16>
    %711 = vector.extract_strided_slice %564 {offsets = [0, 28], sizes = [2, 4], strides = [1, 1]} : vector<2x32xbf16> to vector<2x4xbf16>
    %cst_298 = arith.constant dense<0.000000e+00> : vector<2x2xf32>
    %712 = tpu.matmul %709, %710, %cst_298 {dimension_numbers = #tpu.dot_dimension_numbers<[1], [1], [0], [0], [0, 0, 1, 0], [], []>} : vector<2x4xbf16>, vector<2x4xbf16>, vector<2x2xf32> -> vector<2x2xf32>
    %cst_299 = arith.constant dense<0xFF800000> : vector<2xf32>
    %713 = vector.multi_reduction <maximumf>, %712, %cst_299 [1] : vector<2x2xf32> to vector<2xf32>
    %714 = vector.shape_cast %713 : vector<2xf32> to vector<2x1xf32>
    %715 = vector.broadcast %714 : vector<2x1xf32> to vector<2x2xf32>
    %716 = arith.subf %712, %715 : vector<2x2xf32>
    %717 = math.exp %716 : vector<2x2xf32>
    %cst_300 = arith.constant dense<0.000000e+00> : vector<2xf32>
    %718 = vector.multi_reduction <add>, %717, %cst_300 [1] : vector<2x2xf32> to vector<2xf32>
    %719 = vector.shape_cast %718 : vector<2xf32> to vector<2x1xf32>
    %720 = tpu.reciprocal %719 {approx = true} : vector<2x1xf32> -> vector<2x1xf32>
    %721 = vector.broadcast %720 : vector<2x1xf32> to vector<2x2xf32>
    %722 = arith.mulf %717, %721 : vector<2x2xf32>
    %723 = arith.truncf %722 : vector<2x2xf32> to vector<2x2xbf16>
    %cst_301 = arith.constant dense<0.000000e+00> : vector<2x4xf32>
    %724 = tpu.matmul %723, %711, %cst_301 {dimension_numbers = #tpu.dot_dimension_numbers<[1], [0], [0], [1], [0, 0, 1, 1], [], []>} : vector<2x2xbf16>, vector<2x4xbf16>, vector<2x4xf32> -> vector<2x4xf32>
    %725 = arith.truncf %724 : vector<2x4xf32> to vector<2x4xbf16>
    %c28_302 = arith.constant 28 : index
    %c0_303 = arith.constant 0 : index
    %726 = vector.load %arg4[%c28_302, %c0_303] : memref<32x32xbf16, #tpu.memory_space<vmem>>, vector<4x32xbf16>
    %cst_304 = arith.constant dense<0.000000e+00> : vector<2x32xf32>
    %727 = tpu.matmul %725, %726, %cst_304 {dimension_numbers = #tpu.dot_dimension_numbers<[1], [0], [0], [1], [0, 0, 1, 1], [], []>} : vector<2x4xbf16>, vector<4x32xbf16>, vector<2x32xf32> -> vector<2x32xf32>
    %728 = arith.addf %708, %727 : vector<2x32xf32>
    %cst_305 = arith.constant dense<0.000000e+00> : vector<2xf32>
    %729 = vector.multi_reduction <add>, %728, %cst_305 [1] : vector<2x32xf32> to vector<2xf32>
    %730 = vector.shape_cast %729 : vector<2xf32> to vector<2x1xf32>
    %cst_306 = arith.constant 3.200000e+01 : f32
    %731 = vector.broadcast %cst_306 : f32 to vector<2x1xf32>
    %732 = arith.divf %730, %731 : vector<2x1xf32>
    %733 = vector.broadcast %732 : vector<2x1xf32> to vector<2x32xf32>
    %734 = arith.subf %728, %733 : vector<2x32xf32>
    %735 = arith.mulf %734, %734 : vector<2x32xf32>
    %cst_307 = arith.constant dense<0.000000e+00> : vector<2xf32>
    %736 = vector.multi_reduction <add>, %735, %cst_307 [1] : vector<2x32xf32> to vector<2xf32>
    %737 = vector.shape_cast %736 : vector<2xf32> to vector<2x1xf32>
    %cst_308 = arith.constant 3.200000e+01 : f32
    %738 = vector.broadcast %cst_308 : f32 to vector<2x1xf32>
    %739 = arith.divf %737, %738 : vector<2x1xf32>
    %cst_309 = arith.constant 9.99999974E-6 : f32
    %740 = vector.broadcast %cst_309 : f32 to vector<2x1xf32>
    %741 = arith.addf %739, %740 : vector<2x1xf32>
    %742 = math.rsqrt %741 : vector<2x1xf32>
    %743 = vector.broadcast %742 : vector<2x1xf32> to vector<2x32xf32>
    %744 = arith.mulf %734, %743 : vector<2x32xf32>
    %c0_310 = arith.constant 0 : index
    %c0_311 = arith.constant 0 : index
    %745 = vector.load %arg6[%c0_310, %c0_311] : memref<1x32xf32, #tpu.memory_space<vmem>>, vector<1x32xf32>
    %746 = vector.broadcast %745 : vector<1x32xf32> to vector<2x32xf32>
    %747 = arith.mulf %744, %746 : vector<2x32xf32>
    %c0_312 = arith.constant 0 : index
    %c0_313 = arith.constant 0 : index
    %748 = vector.load %arg7[%c0_312, %c0_313] : memref<1x32xf32, #tpu.memory_space<vmem>>, vector<1x32xf32>
    %749 = vector.broadcast %748 : vector<1x32xf32> to vector<2x32xf32>
    %750 = arith.addf %747, %749 : vector<2x32xf32>
    %751 = arith.truncf %750 : vector<2x32xf32> to vector<2x32xbf16>
    %c0_314 = arith.constant 0 : index
    %c0_315 = arith.constant 0 : index
    %752 = vector.load %arg11[%c0_314, %c0_315] : memref<1x32xf32, #tpu.memory_space<vmem>>, vector<1x32xf32>
    %753 = vector.broadcast %752 : vector<1x32xf32> to vector<2x32xf32>
    %754 = arith.addf %750, %753 : vector<2x32xf32>
    %c0_316 = arith.constant 0 : index
    %c0_317 = arith.constant 0 : index
    %755 = vector.load %arg8[%c0_316, %c0_317] : memref<32x2048xbf16, #tpu.memory_space<vmem>>, vector<32x512xbf16>
    %cst_318 = arith.constant dense<0.000000e+00> : vector<2x512xf32>
    %756 = tpu.matmul %751, %755, %cst_318 {dimension_numbers = #tpu.dot_dimension_numbers<[1], [0], [0], [1], [0, 0, 1, 1], [], []>} : vector<2x32xbf16>, vector<32x512xbf16>, vector<2x512xf32> -> vector<2x512xf32>
    %c0_319 = arith.constant 0 : index
    %c0_320 = arith.constant 0 : index
    %757 = vector.load %arg9[%c0_319, %c0_320] : memref<1x2048xf32, #tpu.memory_space<vmem>>, vector<1x512xf32>
    %758 = vector.broadcast %757 : vector<1x512xf32> to vector<2x512xf32>
    %759 = arith.addf %756, %758 : vector<2x512xf32>
    %cst_321 = arith.constant 0.000000e+00 : f32
    %760 = vector.broadcast %cst_321 : f32 to vector<2x512xf32>
    %761 = arith.maximumf %759, %760 : vector<2x512xf32>
    %762 = arith.truncf %761 : vector<2x512xf32> to vector<2x512xbf16>
    %c0_322 = arith.constant 0 : index
    %c0_323 = arith.constant 0 : index
    %763 = vector.load %arg10[%c0_322, %c0_323] : memref<2048x32xbf16, #tpu.memory_space<vmem>>, vector<512x32xbf16>
    %cst_324 = arith.constant dense<0.000000e+00> : vector<2x32xf32>
    %764 = tpu.matmul %762, %763, %cst_324 {dimension_numbers = #tpu.dot_dimension_numbers<[1], [0], [0], [1], [0, 0, 1, 1], [], []>} : vector<2x512xbf16>, vector<512x32xbf16>, vector<2x32xf32> -> vector<2x32xf32>
    %765 = arith.addf %754, %764 : vector<2x32xf32>
    %c0_325 = arith.constant 0 : index
    %c512_326 = arith.constant 512 : index
    %766 = vector.load %arg8[%c0_325, %c512_326] : memref<32x2048xbf16, #tpu.memory_space<vmem>>, vector<32x512xbf16>
    %cst_327 = arith.constant dense<0.000000e+00> : vector<2x512xf32>
    %767 = tpu.matmul %751, %766, %cst_327 {dimension_numbers = #tpu.dot_dimension_numbers<[1], [0], [0], [1], [0, 0, 1, 1], [], []>} : vector<2x32xbf16>, vector<32x512xbf16>, vector<2x512xf32> -> vector<2x512xf32>
    %c0_328 = arith.constant 0 : index
    %c512_329 = arith.constant 512 : index
    %768 = vector.load %arg9[%c0_328, %c512_329] : memref<1x2048xf32, #tpu.memory_space<vmem>>, vector<1x512xf32>
    %769 = vector.broadcast %768 : vector<1x512xf32> to vector<2x512xf32>
    %770 = arith.addf %767, %769 : vector<2x512xf32>
    %cst_330 = arith.constant 0.000000e+00 : f32
    %771 = vector.broadcast %cst_330 : f32 to vector<2x512xf32>
    %772 = arith.maximumf %770, %771 : vector<2x512xf32>
    %773 = arith.truncf %772 : vector<2x512xf32> to vector<2x512xbf16>
    %c512_331 = arith.constant 512 : index
    %c0_332 = arith.constant 0 : index
    %774 = vector.load %arg10[%c512_331, %c0_332] : memref<2048x32xbf16, #tpu.memory_space<vmem>>, vector<512x32xbf16>
    %cst_333 = arith.constant dense<0.000000e+00> : vector<2x32xf32>
    %775 = tpu.matmul %773, %774, %cst_333 {dimension_numbers = #tpu.dot_dimension_numbers<[1], [0], [0], [1], [0, 0, 1, 1], [], []>} : vector<2x512xbf16>, vector<512x32xbf16>, vector<2x32xf32> -> vector<2x32xf32>
    %776 = arith.addf %765, %775 : vector<2x32xf32>
    %c0_334 = arith.constant 0 : index
    %c1024_335 = arith.constant 1024 : index
    %777 = vector.load %arg8[%c0_334, %c1024_335] : memref<32x2048xbf16, #tpu.memory_space<vmem>>, vector<32x512xbf16>
    %cst_336 = arith.constant dense<0.000000e+00> : vector<2x512xf32>
    %778 = tpu.matmul %751, %777, %cst_336 {dimension_numbers = #tpu.dot_dimension_numbers<[1], [0], [0], [1], [0, 0, 1, 1], [], []>} : vector<2x32xbf16>, vector<32x512xbf16>, vector<2x512xf32> -> vector<2x512xf32>
    %c0_337 = arith.constant 0 : index
    %c1024_338 = arith.constant 1024 : index
    %779 = vector.load %arg9[%c0_337, %c1024_338] : memref<1x2048xf32, #tpu.memory_space<vmem>>, vector<1x512xf32>
    %780 = vector.broadcast %779 : vector<1x512xf32> to vector<2x512xf32>
    %781 = arith.addf %778, %780 : vector<2x512xf32>
    %cst_339 = arith.constant 0.000000e+00 : f32
    %782 = vector.broadcast %cst_339 : f32 to vector<2x512xf32>
    %783 = arith.maximumf %781, %782 : vector<2x512xf32>
    %784 = arith.truncf %783 : vector<2x512xf32> to vector<2x512xbf16>
    %c1024_340 = arith.constant 1024 : index
    %c0_341 = arith.constant 0 : index
    %785 = vector.load %arg10[%c1024_340, %c0_341] : memref<2048x32xbf16, #tpu.memory_space<vmem>>, vector<512x32xbf16>
    %cst_342 = arith.constant dense<0.000000e+00> : vector<2x32xf32>
    %786 = tpu.matmul %784, %785, %cst_342 {dimension_numbers = #tpu.dot_dimension_numbers<[1], [0], [0], [1], [0, 0, 1, 1], [], []>} : vector<2x512xbf16>, vector<512x32xbf16>, vector<2x32xf32> -> vector<2x32xf32>
    %787 = arith.addf %776, %786 : vector<2x32xf32>
    %c0_343 = arith.constant 0 : index
    %c1536_344 = arith.constant 1536 : index
    %788 = vector.load %arg8[%c0_343, %c1536_344] : memref<32x2048xbf16, #tpu.memory_space<vmem>>, vector<32x512xbf16>
    %cst_345 = arith.constant dense<0.000000e+00> : vector<2x512xf32>
    %789 = tpu.matmul %751, %788, %cst_345 {dimension_numbers = #tpu.dot_dimension_numbers<[1], [0], [0], [1], [0, 0, 1, 1], [], []>} : vector<2x32xbf16>, vector<32x512xbf16>, vector<2x512xf32> -> vector<2x512xf32>
    %c0_346 = arith.constant 0 : index
    %c1536_347 = arith.constant 1536 : index
    %790 = vector.load %arg9[%c0_346, %c1536_347] : memref<1x2048xf32, #tpu.memory_space<vmem>>, vector<1x512xf32>
    %791 = vector.broadcast %790 : vector<1x512xf32> to vector<2x512xf32>
    %792 = arith.addf %789, %791 : vector<2x512xf32>
    %cst_348 = arith.constant 0.000000e+00 : f32
    %793 = vector.broadcast %cst_348 : f32 to vector<2x512xf32>
    %794 = arith.maximumf %792, %793 : vector<2x512xf32>
    %795 = arith.truncf %794 : vector<2x512xf32> to vector<2x512xbf16>
    %c1536_349 = arith.constant 1536 : index
    %c0_350 = arith.constant 0 : index
    %796 = vector.load %arg10[%c1536_349, %c0_350] : memref<2048x32xbf16, #tpu.memory_space<vmem>>, vector<512x32xbf16>
    %cst_351 = arith.constant dense<0.000000e+00> : vector<2x32xf32>
    %797 = tpu.matmul %795, %796, %cst_351 {dimension_numbers = #tpu.dot_dimension_numbers<[1], [0], [0], [1], [0, 0, 1, 1], [], []>} : vector<2x512xbf16>, vector<512x32xbf16>, vector<2x32xf32> -> vector<2x32xf32>
    %798 = arith.addf %787, %797 : vector<2x32xf32>
    %cst_352 = arith.constant dense<0.000000e+00> : vector<2xf32>
    %799 = vector.multi_reduction <add>, %798, %cst_352 [1] : vector<2x32xf32> to vector<2xf32>
    %800 = vector.shape_cast %799 : vector<2xf32> to vector<2x1xf32>
    %cst_353 = arith.constant 3.200000e+01 : f32
    %801 = vector.broadcast %cst_353 : f32 to vector<2x1xf32>
    %802 = arith.divf %800, %801 : vector<2x1xf32>
    %803 = vector.broadcast %802 : vector<2x1xf32> to vector<2x32xf32>
    %804 = arith.subf %798, %803 : vector<2x32xf32>
    %805 = arith.mulf %804, %804 : vector<2x32xf32>
    %cst_354 = arith.constant dense<0.000000e+00> : vector<2xf32>
    %806 = vector.multi_reduction <add>, %805, %cst_354 [1] : vector<2x32xf32> to vector<2xf32>
    %807 = vector.shape_cast %806 : vector<2xf32> to vector<2x1xf32>
    %cst_355 = arith.constant 3.200000e+01 : f32
    %808 = vector.broadcast %cst_355 : f32 to vector<2x1xf32>
    %809 = arith.divf %807, %808 : vector<2x1xf32>
    %cst_356 = arith.constant 9.99999974E-6 : f32
    %810 = vector.broadcast %cst_356 : f32 to vector<2x1xf32>
    %811 = arith.addf %809, %810 : vector<2x1xf32>
    %812 = math.rsqrt %811 : vector<2x1xf32>
    %813 = vector.broadcast %812 : vector<2x1xf32> to vector<2x32xf32>
    %814 = arith.mulf %804, %813 : vector<2x32xf32>
    %c0_357 = arith.constant 0 : index
    %c0_358 = arith.constant 0 : index
    %815 = vector.load %arg12[%c0_357, %c0_358] : memref<1x32xf32, #tpu.memory_space<vmem>>, vector<1x32xf32>
    %816 = vector.broadcast %815 : vector<1x32xf32> to vector<2x32xf32>
    %817 = arith.mulf %814, %816 : vector<2x32xf32>
    %c0_359 = arith.constant 0 : index
    %c0_360 = arith.constant 0 : index
    %818 = vector.load %arg13[%c0_359, %c0_360] : memref<1x32xf32, #tpu.memory_space<vmem>>, vector<1x32xf32>
    %819 = vector.broadcast %818 : vector<1x32xf32> to vector<2x32xf32>
    %820 = arith.addf %817, %819 : vector<2x32xf32>
    %821 = arith.truncf %820 : vector<2x32xf32> to vector<2x32xbf16>
    %c2_361 = arith.constant 2 : index
    %c0_362 = arith.constant 0 : index
    %c0_363 = arith.constant 0 : index
    %822 = vector.load %arg14[%c2_361, %c0_362, %c0_363] : memref<4x2x32xbf16, #tpu.memory_space<vmem>>, vector<1x2x32xbf16>
    %823 = vector.shape_cast %822 : vector<1x2x32xbf16> to vector<2x32xbf16>
    %824 = vector.shape_cast %821 : vector<2x32xbf16> to vector<1x2x32xbf16>
    tpu.vector_store %arg14[%c2_361, %c0_362, %c0_363], %824 {strides = array<i32>} : memref<4x2x32xbf16, #tpu.memory_space<vmem>>, vector<1x2x32xbf16>,
    %c3 = arith.constant 3 : index
    %c0_364 = arith.constant 0 : index
    %c0_365 = arith.constant 0 : index
    %825 = vector.load %arg1[%c3, %c0_364, %c0_365] : memref<4x2x32xbf16, #tpu.memory_space<vmem>>, vector<1x2x32xbf16>
    %826 = vector.shape_cast %825 : vector<1x2x32xbf16> to vector<2x32xbf16>
    %c0_366 = arith.constant 0 : index
    %c0_367 = arith.constant 0 : index
    %827 = vector.load %arg2[%c0_366, %c0_367] : memref<32x96xbf16, #tpu.memory_space<vmem>>, vector<32x96xbf16>
    %cst_368 = arith.constant dense<0.000000e+00> : vector<2x96xf32>
    %828 = tpu.matmul %826, %827, %cst_368 {dimension_numbers = #tpu.dot_dimension_numbers<[1], [0], [0], [1], [0, 0, 1, 1], [], []>} : vector<2x32xbf16>, vector<32x96xbf16>, vector<2x96xf32> -> vector<2x96xf32>
    %c0_369 = arith.constant 0 : index
    %c0_370 = arith.constant 0 : index
    %829 = vector.load %arg3[%c0_369, %c0_370] : memref<1x96xf32, #tpu.memory_space<vmem>>, vector<1x96xf32>
    %830 = vector.broadcast %829 : vector<1x96xf32> to vector<2x96xf32>
    %831 = arith.addf %828, %830 : vector<2x96xf32>
    %832 = vector.extract_strided_slice %831 {offsets = [0, 0], sizes = [2, 32], strides = [1, 1]} : vector<2x96xf32> to vector<2x32xf32>
    %cst_371 = arith.constant 5.000000e-01 : f32
    %833 = vector.broadcast %cst_371 : f32 to vector<2x32xf32>
    %834 = arith.mulf %832, %833 : vector<2x32xf32>
    %835 = arith.truncf %834 : vector<2x32xf32> to vector<2x32xbf16>
    %836 = vector.extract_strided_slice %831 {offsets = [0, 32], sizes = [2, 32], strides = [1, 1]} : vector<2x96xf32> to vector<2x32xf32>
    %837 = arith.truncf %836 : vector<2x32xf32> to vector<2x32xbf16>
    %838 = vector.extract_strided_slice %831 {offsets = [0, 64], sizes = [2, 32], strides = [1, 1]} : vector<2x96xf32> to vector<2x32xf32>
    %839 = arith.truncf %838 : vector<2x32xf32> to vector<2x32xbf16>
    %840 = arith.extf %826 : vector<2x32xbf16> to vector<2x32xf32>
    %c0_372 = arith.constant 0 : index
    %c0_373 = arith.constant 0 : index
    %841 = vector.load %arg5[%c0_372, %c0_373] : memref<1x32xf32, #tpu.memory_space<vmem>>, vector<1x32xf32>
    %842 = vector.broadcast %841 : vector<1x32xf32> to vector<2x32xf32>
    %843 = arith.addf %840, %842 : vector<2x32xf32>
    %844 = vector.extract_strided_slice %835 {offsets = [0, 0], sizes = [2, 4], strides = [1, 1]} : vector<2x32xbf16> to vector<2x4xbf16>
    %845 = vector.extract_strided_slice %837 {offsets = [0, 0], sizes = [2, 4], strides = [1, 1]} : vector<2x32xbf16> to vector<2x4xbf16>
    %846 = vector.extract_strided_slice %839 {offsets = [0, 0], sizes = [2, 4], strides = [1, 1]} : vector<2x32xbf16> to vector<2x4xbf16>
    %cst_374 = arith.constant dense<0.000000e+00> : vector<2x2xf32>
    %847 = tpu.matmul %844, %845, %cst_374 {dimension_numbers = #tpu.dot_dimension_numbers<[1], [1], [0], [0], [0, 0, 1, 0], [], []>} : vector<2x4xbf16>, vector<2x4xbf16>, vector<2x2xf32> -> vector<2x2xf32>
    %cst_375 = arith.constant dense<0xFF800000> : vector<2xf32>
    %848 = vector.multi_reduction <maximumf>, %847, %cst_375 [1] : vector<2x2xf32> to vector<2xf32>
    %849 = vector.shape_cast %848 : vector<2xf32> to vector<2x1xf32>
    %850 = vector.broadcast %849 : vector<2x1xf32> to vector<2x2xf32>
    %851 = arith.subf %847, %850 : vector<2x2xf32>
    %852 = math.exp %851 : vector<2x2xf32>
    %cst_376 = arith.constant dense<0.000000e+00> : vector<2xf32>
    %853 = vector.multi_reduction <add>, %852, %cst_376 [1] : vector<2x2xf32> to vector<2xf32>
    %854 = vector.shape_cast %853 : vector<2xf32> to vector<2x1xf32>
    %855 = tpu.reciprocal %854 {approx = true} : vector<2x1xf32> -> vector<2x1xf32>
    %856 = vector.broadcast %855 : vector<2x1xf32> to vector<2x2xf32>
    %857 = arith.mulf %852, %856 : vector<2x2xf32>
    %858 = arith.truncf %857 : vector<2x2xf32> to vector<2x2xbf16>
    %cst_377 = arith.constant dense<0.000000e+00> : vector<2x4xf32>
    %859 = tpu.matmul %858, %846, %cst_377 {dimension_numbers = #tpu.dot_dimension_numbers<[1], [0], [0], [1], [0, 0, 1, 1], [], []>} : vector<2x2xbf16>, vector<2x4xbf16>, vector<2x4xf32> -> vector<2x4xf32>
    %860 = arith.truncf %859 : vector<2x4xf32> to vector<2x4xbf16>
    %c0_378 = arith.constant 0 : index
    %c0_379 = arith.constant 0 : index
    %861 = vector.load %arg4[%c0_378, %c0_379] : memref<32x32xbf16, #tpu.memory_space<vmem>>, vector<4x32xbf16>
    %cst_380 = arith.constant dense<0.000000e+00> : vector<2x32xf32>
    %862 = tpu.matmul %860, %861, %cst_380 {dimension_numbers = #tpu.dot_dimension_numbers<[1], [0], [0], [1], [0, 0, 1, 1], [], []>} : vector<2x4xbf16>, vector<4x32xbf16>, vector<2x32xf32> -> vector<2x32xf32>
    %863 = arith.addf %843, %862 : vector<2x32xf32>
    %864 = vector.extract_strided_slice %835 {offsets = [0, 4], sizes = [2, 4], strides = [1, 1]} : vector<2x32xbf16> to vector<2x4xbf16>
    %865 = vector.extract_strided_slice %837 {offsets = [0, 4], sizes = [2, 4], strides = [1, 1]} : vector<2x32xbf16> to vector<2x4xbf16>
    %866 = vector.extract_strided_slice %839 {offsets = [0, 4], sizes = [2, 4], strides = [1, 1]} : vector<2x32xbf16> to vector<2x4xbf16>
    %cst_381 = arith.constant dense<0.000000e+00> : vector<2x2xf32>
    %867 = tpu.matmul %864, %865, %cst_381 {dimension_numbers = #tpu.dot_dimension_numbers<[1], [1], [0], [0], [0, 0, 1, 0], [], []>} : vector<2x4xbf16>, vector<2x4xbf16>, vector<2x2xf32> -> vector<2x2xf32>
    %cst_382 = arith.constant dense<0xFF800000> : vector<2xf32>
    %868 = vector.multi_reduction <maximumf>, %867, %cst_382 [1] : vector<2x2xf32> to vector<2xf32>
    %869 = vector.shape_cast %868 : vector<2xf32> to vector<2x1xf32>
    %870 = vector.broadcast %869 : vector<2x1xf32> to vector<2x2xf32>
    %871 = arith.subf %867, %870 : vector<2x2xf32>
    %872 = math.exp %871 : vector<2x2xf32>
    %cst_383 = arith.constant dense<0.000000e+00> : vector<2xf32>
    %873 = vector.multi_reduction <add>, %872, %cst_383 [1] : vector<2x2xf32> to vector<2xf32>
    %874 = vector.shape_cast %873 : vector<2xf32> to vector<2x1xf32>
    %875 = tpu.reciprocal %874 {approx = true} : vector<2x1xf32> -> vector<2x1xf32>
    %876 = vector.broadcast %875 : vector<2x1xf32> to vector<2x2xf32>
    %877 = arith.mulf %872, %876 : vector<2x2xf32>
    %878 = arith.truncf %877 : vector<2x2xf32> to vector<2x2xbf16>
    %cst_384 = arith.constant dense<0.000000e+00> : vector<2x4xf32>
    %879 = tpu.matmul %878, %866, %cst_384 {dimension_numbers = #tpu.dot_dimension_numbers<[1], [0], [0], [1], [0, 0, 1, 1], [], []>} : vector<2x2xbf16>, vector<2x4xbf16>, vector<2x4xf32> -> vector<2x4xf32>
    %880 = arith.truncf %879 : vector<2x4xf32> to vector<2x4xbf16>
    %c4_385 = arith.constant 4 : index
    %c0_386 = arith.constant 0 : index
    %881 = vector.load %arg4[%c4_385, %c0_386] : memref<32x32xbf16, #tpu.memory_space<vmem>>, vector<4x32xbf16>
    %cst_387 = arith.constant dense<0.000000e+00> : vector<2x32xf32>
    %882 = tpu.matmul %880, %881, %cst_387 {dimension_numbers = #tpu.dot_dimension_numbers<[1], [0], [0], [1], [0, 0, 1, 1], [], []>} : vector<2x4xbf16>, vector<4x32xbf16>, vector<2x32xf32> -> vector<2x32xf32>
    %883 = arith.addf %863, %882 : vector<2x32xf32>
    %884 = vector.extract_strided_slice %835 {offsets = [0, 8], sizes = [2, 4], strides = [1, 1]} : vector<2x32xbf16> to vector<2x4xbf16>
    %885 = vector.extract_strided_slice %837 {offsets = [0, 8], sizes = [2, 4], strides = [1, 1]} : vector<2x32xbf16> to vector<2x4xbf16>
    %886 = vector.extract_strided_slice %839 {offsets = [0, 8], sizes = [2, 4], strides = [1, 1]} : vector<2x32xbf16> to vector<2x4xbf16>
    %cst_388 = arith.constant dense<0.000000e+00> : vector<2x2xf32>
    %887 = tpu.matmul %884, %885, %cst_388 {dimension_numbers = #tpu.dot_dimension_numbers<[1], [1], [0], [0], [0, 0, 1, 0], [], []>} : vector<2x4xbf16>, vector<2x4xbf16>, vector<2x2xf32> -> vector<2x2xf32>
    %cst_389 = arith.constant dense<0xFF800000> : vector<2xf32>
    %888 = vector.multi_reduction <maximumf>, %887, %cst_389 [1] : vector<2x2xf32> to vector<2xf32>
    %889 = vector.shape_cast %888 : vector<2xf32> to vector<2x1xf32>
    %890 = vector.broadcast %889 : vector<2x1xf32> to vector<2x2xf32>
    %891 = arith.subf %887, %890 : vector<2x2xf32>
    %892 = math.exp %891 : vector<2x2xf32>
    %cst_390 = arith.constant dense<0.000000e+00> : vector<2xf32>
    %893 = vector.multi_reduction <add>, %892, %cst_390 [1] : vector<2x2xf32> to vector<2xf32>
    %894 = vector.shape_cast %893 : vector<2xf32> to vector<2x1xf32>
    %895 = tpu.reciprocal %894 {approx = true} : vector<2x1xf32> -> vector<2x1xf32>
    %896 = vector.broadcast %895 : vector<2x1xf32> to vector<2x2xf32>
    %897 = arith.mulf %892, %896 : vector<2x2xf32>
    %898 = arith.truncf %897 : vector<2x2xf32> to vector<2x2xbf16>
    %cst_391 = arith.constant dense<0.000000e+00> : vector<2x4xf32>
    %899 = tpu.matmul %898, %886, %cst_391 {dimension_numbers = #tpu.dot_dimension_numbers<[1], [0], [0], [1], [0, 0, 1, 1], [], []>} : vector<2x2xbf16>, vector<2x4xbf16>, vector<2x4xf32> -> vector<2x4xf32>
    %900 = arith.truncf %899 : vector<2x4xf32> to vector<2x4xbf16>
    %c8_392 = arith.constant 8 : index
    %c0_393 = arith.constant 0 : index
    %901 = vector.load %arg4[%c8_392, %c0_393] : memref<32x32xbf16, #tpu.memory_space<vmem>>, vector<4x32xbf16>
    %cst_394 = arith.constant dense<0.000000e+00> : vector<2x32xf32>
    %902 = tpu.matmul %900, %901, %cst_394 {dimension_numbers = #tpu.dot_dimension_numbers<[1], [0], [0], [1], [0, 0, 1, 1], [], []>} : vector<2x4xbf16>, vector<4x32xbf16>, vector<2x32xf32> -> vector<2x32xf32>
    %903 = arith.addf %883, %902 : vector<2x32xf32>
    %904 = vector.extract_strided_slice %835 {offsets = [0, 12], sizes = [2, 4], strides = [1, 1]} : vector<2x32xbf16> to vector<2x4xbf16>
    %905 = vector.extract_strided_slice %837 {offsets = [0, 12], sizes = [2, 4], strides = [1, 1]} : vector<2x32xbf16> to vector<2x4xbf16>
    %906 = vector.extract_strided_slice %839 {offsets = [0, 12], sizes = [2, 4], strides = [1, 1]} : vector<2x32xbf16> to vector<2x4xbf16>
    %cst_395 = arith.constant dense<0.000000e+00> : vector<2x2xf32>
    %907 = tpu.matmul %904, %905, %cst_395 {dimension_numbers = #tpu.dot_dimension_numbers<[1], [1], [0], [0], [0, 0, 1, 0], [], []>} : vector<2x4xbf16>, vector<2x4xbf16>, vector<2x2xf32> -> vector<2x2xf32>
    %cst_396 = arith.constant dense<0xFF800000> : vector<2xf32>
    %908 = vector.multi_reduction <maximumf>, %907, %cst_396 [1] : vector<2x2xf32> to vector<2xf32>
    %909 = vector.shape_cast %908 : vector<2xf32> to vector<2x1xf32>
    %910 = vector.broadcast %909 : vector<2x1xf32> to vector<2x2xf32>
    %911 = arith.subf %907, %910 : vector<2x2xf32>
    %912 = math.exp %911 : vector<2x2xf32>
    %cst_397 = arith.constant dense<0.000000e+00> : vector<2xf32>
    %913 = vector.multi_reduction <add>, %912, %cst_397 [1] : vector<2x2xf32> to vector<2xf32>
    %914 = vector.shape_cast %913 : vector<2xf32> to vector<2x1xf32>
    %915 = tpu.reciprocal %914 {approx = true} : vector<2x1xf32> -> vector<2x1xf32>
    %916 = vector.broadcast %915 : vector<2x1xf32> to vector<2x2xf32>
    %917 = arith.mulf %912, %916 : vector<2x2xf32>
    %918 = arith.truncf %917 : vector<2x2xf32> to vector<2x2xbf16>
    %cst_398 = arith.constant dense<0.000000e+00> : vector<2x4xf32>
    %919 = tpu.matmul %918, %906, %cst_398 {dimension_numbers = #tpu.dot_dimension_numbers<[1], [0], [0], [1], [0, 0, 1, 1], [], []>} : vector<2x2xbf16>, vector<2x4xbf16>, vector<2x4xf32> -> vector<2x4xf32>
    %920 = arith.truncf %919 : vector<2x4xf32> to vector<2x4xbf16>
    %c12_399 = arith.constant 12 : index
    %c0_400 = arith.constant 0 : index
    %921 = vector.load %arg4[%c12_399, %c0_400] : memref<32x32xbf16, #tpu.memory_space<vmem>>, vector<4x32xbf16>
    %cst_401 = arith.constant dense<0.000000e+00> : vector<2x32xf32>
    %922 = tpu.matmul %920, %921, %cst_401 {dimension_numbers = #tpu.dot_dimension_numbers<[1], [0], [0], [1], [0, 0, 1, 1], [], []>} : vector<2x4xbf16>, vector<4x32xbf16>, vector<2x32xf32> -> vector<2x32xf32>
    %923 = arith.addf %903, %922 : vector<2x32xf32>
    %924 = vector.extract_strided_slice %835 {offsets = [0, 16], sizes = [2, 4], strides = [1, 1]} : vector<2x32xbf16> to vector<2x4xbf16>
    %925 = vector.extract_strided_slice %837 {offsets = [0, 16], sizes = [2, 4], strides = [1, 1]} : vector<2x32xbf16> to vector<2x4xbf16>
    %926 = vector.extract_strided_slice %839 {offsets = [0, 16], sizes = [2, 4], strides = [1, 1]} : vector<2x32xbf16> to vector<2x4xbf16>
    %cst_402 = arith.constant dense<0.000000e+00> : vector<2x2xf32>
    %927 = tpu.matmul %924, %925, %cst_402 {dimension_numbers = #tpu.dot_dimension_numbers<[1], [1], [0], [0], [0, 0, 1, 0], [], []>} : vector<2x4xbf16>, vector<2x4xbf16>, vector<2x2xf32> -> vector<2x2xf32>
    %cst_403 = arith.constant dense<0xFF800000> : vector<2xf32>
    %928 = vector.multi_reduction <maximumf>, %927, %cst_403 [1] : vector<2x2xf32> to vector<2xf32>
    %929 = vector.shape_cast %928 : vector<2xf32> to vector<2x1xf32>
    %930 = vector.broadcast %929 : vector<2x1xf32> to vector<2x2xf32>
    %931 = arith.subf %927, %930 : vector<2x2xf32>
    %932 = math.exp %931 : vector<2x2xf32>
    %cst_404 = arith.constant dense<0.000000e+00> : vector<2xf32>
    %933 = vector.multi_reduction <add>, %932, %cst_404 [1] : vector<2x2xf32> to vector<2xf32>
    %934 = vector.shape_cast %933 : vector<2xf32> to vector<2x1xf32>
    %935 = tpu.reciprocal %934 {approx = true} : vector<2x1xf32> -> vector<2x1xf32>
    %936 = vector.broadcast %935 : vector<2x1xf32> to vector<2x2xf32>
    %937 = arith.mulf %932, %936 : vector<2x2xf32>
    %938 = arith.truncf %937 : vector<2x2xf32> to vector<2x2xbf16>
    %cst_405 = arith.constant dense<0.000000e+00> : vector<2x4xf32>
    %939 = tpu.matmul %938, %926, %cst_405 {dimension_numbers = #tpu.dot_dimension_numbers<[1], [0], [0], [1], [0, 0, 1, 1], [], []>} : vector<2x2xbf16>, vector<2x4xbf16>, vector<2x4xf32> -> vector<2x4xf32>
    %940 = arith.truncf %939 : vector<2x4xf32> to vector<2x4xbf16>
    %c16_406 = arith.constant 16 : index
    %c0_407 = arith.constant 0 : index
    %941 = vector.load %arg4[%c16_406, %c0_407] : memref<32x32xbf16, #tpu.memory_space<vmem>>, vector<4x32xbf16>
    %cst_408 = arith.constant dense<0.000000e+00> : vector<2x32xf32>
    %942 = tpu.matmul %940, %941, %cst_408 {dimension_numbers = #tpu.dot_dimension_numbers<[1], [0], [0], [1], [0, 0, 1, 1], [], []>} : vector<2x4xbf16>, vector<4x32xbf16>, vector<2x32xf32> -> vector<2x32xf32>
    %943 = arith.addf %923, %942 : vector<2x32xf32>
    %944 = vector.extract_strided_slice %835 {offsets = [0, 20], sizes = [2, 4], strides = [1, 1]} : vector<2x32xbf16> to vector<2x4xbf16>
    %945 = vector.extract_strided_slice %837 {offsets = [0, 20], sizes = [2, 4], strides = [1, 1]} : vector<2x32xbf16> to vector<2x4xbf16>
    %946 = vector.extract_strided_slice %839 {offsets = [0, 20], sizes = [2, 4], strides = [1, 1]} : vector<2x32xbf16> to vector<2x4xbf16>
    %cst_409 = arith.constant dense<0.000000e+00> : vector<2x2xf32>
    %947 = tpu.matmul %944, %945, %cst_409 {dimension_numbers = #tpu.dot_dimension_numbers<[1], [1], [0], [0], [0, 0, 1, 0], [], []>} : vector<2x4xbf16>, vector<2x4xbf16>, vector<2x2xf32> -> vector<2x2xf32>
    %cst_410 = arith.constant dense<0xFF800000> : vector<2xf32>
    %948 = vector.multi_reduction <maximumf>, %947, %cst_410 [1] : vector<2x2xf32> to vector<2xf32>
    %949 = vector.shape_cast %948 : vector<2xf32> to vector<2x1xf32>
    %950 = vector.broadcast %949 : vector<2x1xf32> to vector<2x2xf32>
    %951 = arith.subf %947, %950 : vector<2x2xf32>
    %952 = math.exp %951 : vector<2x2xf32>
    %cst_411 = arith.constant dense<0.000000e+00> : vector<2xf32>
    %953 = vector.multi_reduction <add>, %952, %cst_411 [1] : vector<2x2xf32> to vector<2xf32>
    %954 = vector.shape_cast %953 : vector<2xf32> to vector<2x1xf32>
    %955 = tpu.reciprocal %954 {approx = true} : vector<2x1xf32> -> vector<2x1xf32>
    %956 = vector.broadcast %955 : vector<2x1xf32> to vector<2x2xf32>
    %957 = arith.mulf %952, %956 : vector<2x2xf32>
    %958 = arith.truncf %957 : vector<2x2xf32> to vector<2x2xbf16>
    %cst_412 = arith.constant dense<0.000000e+00> : vector<2x4xf32>
    %959 = tpu.matmul %958, %946, %cst_412 {dimension_numbers = #tpu.dot_dimension_numbers<[1], [0], [0], [1], [0, 0, 1, 1], [], []>} : vector<2x2xbf16>, vector<2x4xbf16>, vector<2x4xf32> -> vector<2x4xf32>
    %960 = arith.truncf %959 : vector<2x4xf32> to vector<2x4xbf16>
    %c20_413 = arith.constant 20 : index
    %c0_414 = arith.constant 0 : index
    %961 = vector.load %arg4[%c20_413, %c0_414] : memref<32x32xbf16, #tpu.memory_space<vmem>>, vector<4x32xbf16>
    %cst_415 = arith.constant dense<0.000000e+00> : vector<2x32xf32>
    %962 = tpu.matmul %960, %961, %cst_415 {dimension_numbers = #tpu.dot_dimension_numbers<[1], [0], [0], [1], [0, 0, 1, 1], [], []>} : vector<2x4xbf16>, vector<4x32xbf16>, vector<2x32xf32> -> vector<2x32xf32>
    %963 = arith.addf %943, %962 : vector<2x32xf32>
    %964 = vector.extract_strided_slice %835 {offsets = [0, 24], sizes = [2, 4], strides = [1, 1]} : vector<2x32xbf16> to vector<2x4xbf16>
    %965 = vector.extract_strided_slice %837 {offsets = [0, 24], sizes = [2, 4], strides = [1, 1]} : vector<2x32xbf16> to vector<2x4xbf16>
    %966 = vector.extract_strided_slice %839 {offsets = [0, 24], sizes = [2, 4], strides = [1, 1]} : vector<2x32xbf16> to vector<2x4xbf16>
    %cst_416 = arith.constant dense<0.000000e+00> : vector<2x2xf32>
    %967 = tpu.matmul %964, %965, %cst_416 {dimension_numbers = #tpu.dot_dimension_numbers<[1], [1], [0], [0], [0, 0, 1, 0], [], []>} : vector<2x4xbf16>, vector<2x4xbf16>, vector<2x2xf32> -> vector<2x2xf32>
    %cst_417 = arith.constant dense<0xFF800000> : vector<2xf32>
    %968 = vector.multi_reduction <maximumf>, %967, %cst_417 [1] : vector<2x2xf32> to vector<2xf32>
    %969 = vector.shape_cast %968 : vector<2xf32> to vector<2x1xf32>
    %970 = vector.broadcast %969 : vector<2x1xf32> to vector<2x2xf32>
    %971 = arith.subf %967, %970 : vector<2x2xf32>
    %972 = math.exp %971 : vector<2x2xf32>
    %cst_418 = arith.constant dense<0.000000e+00> : vector<2xf32>
    %973 = vector.multi_reduction <add>, %972, %cst_418 [1] : vector<2x2xf32> to vector<2xf32>
    %974 = vector.shape_cast %973 : vector<2xf32> to vector<2x1xf32>
    %975 = tpu.reciprocal %974 {approx = true} : vector<2x1xf32> -> vector<2x1xf32>
    %976 = vector.broadcast %975 : vector<2x1xf32> to vector<2x2xf32>
    %977 = arith.mulf %972, %976 : vector<2x2xf32>
    %978 = arith.truncf %977 : vector<2x2xf32> to vector<2x2xbf16>
    %cst_419 = arith.constant dense<0.000000e+00> : vector<2x4xf32>
    %979 = tpu.matmul %978, %966, %cst_419 {dimension_numbers = #tpu.dot_dimension_numbers<[1], [0], [0], [1], [0, 0, 1, 1], [], []>} : vector<2x2xbf16>, vector<2x4xbf16>, vector<2x4xf32> -> vector<2x4xf32>
    %980 = arith.truncf %979 : vector<2x4xf32> to vector<2x4xbf16>
    %c24_420 = arith.constant 24 : index
    %c0_421 = arith.constant 0 : index
    %981 = vector.load %arg4[%c24_420, %c0_421] : memref<32x32xbf16, #tpu.memory_space<vmem>>, vector<4x32xbf16>
    %cst_422 = arith.constant dense<0.000000e+00> : vector<2x32xf32>
    %982 = tpu.matmul %980, %981, %cst_422 {dimension_numbers = #tpu.dot_dimension_numbers<[1], [0], [0], [1], [0, 0, 1, 1], [], []>} : vector<2x4xbf16>, vector<4x32xbf16>, vector<2x32xf32> -> vector<2x32xf32>
    %983 = arith.addf %963, %982 : vector<2x32xf32>
    %984 = vector.extract_strided_slice %835 {offsets = [0, 28], sizes = [2, 4], strides = [1, 1]} : vector<2x32xbf16> to vector<2x4xbf16>
    %985 = vector.extract_strided_slice %837 {offsets = [0, 28], sizes = [2, 4], strides = [1, 1]} : vector<2x32xbf16> to vector<2x4xbf16>
    %986 = vector.extract_strided_slice %839 {offsets = [0, 28], sizes = [2, 4], strides = [1, 1]} : vector<2x32xbf16> to vector<2x4xbf16>
    %cst_423 = arith.constant dense<0.000000e+00> : vector<2x2xf32>
    %987 = tpu.matmul %984, %985, %cst_423 {dimension_numbers = #tpu.dot_dimension_numbers<[1], [1], [0], [0], [0, 0, 1, 0], [], []>} : vector<2x4xbf16>, vector<2x4xbf16>, vector<2x2xf32> -> vector<2x2xf32>
    %cst_424 = arith.constant dense<0xFF800000> : vector<2xf32>
    %988 = vector.multi_reduction <maximumf>, %987, %cst_424 [1] : vector<2x2xf32> to vector<2xf32>
    %989 = vector.shape_cast %988 : vector<2xf32> to vector<2x1xf32>
    %990 = vector.broadcast %989 : vector<2x1xf32> to vector<2x2xf32>
    %991 = arith.subf %987, %990 : vector<2x2xf32>
    %992 = math.exp %991 : vector<2x2xf32>
    %cst_425 = arith.constant dense<0.000000e+00> : vector<2xf32>
    %993 = vector.multi_reduction <add>, %992, %cst_425 [1] : vector<2x2xf32> to vector<2xf32>
    %994 = vector.shape_cast %993 : vector<2xf32> to vector<2x1xf32>
    %995 = tpu.reciprocal %994 {approx = true} : vector<2x1xf32> -> vector<2x1xf32>
    %996 = vector.broadcast %995 : vector<2x1xf32> to vector<2x2xf32>
    %997 = arith.mulf %992, %996 : vector<2x2xf32>
    %998 = arith.truncf %997 : vector<2x2xf32> to vector<2x2xbf16>
    %cst_426 = arith.constant dense<0.000000e+00> : vector<2x4xf32>
    %999 = tpu.matmul %998, %986, %cst_426 {dimension_numbers = #tpu.dot_dimension_numbers<[1], [0], [0], [1], [0, 0, 1, 1], [], []>} : vector<2x2xbf16>, vector<2x4xbf16>, vector<2x4xf32> -> vector<2x4xf32>
    %1000 = arith.truncf %999 : vector<2x4xf32> to vector<2x4xbf16>
    %c28_427 = arith.constant 28 : index
    %c0_428 = arith.constant 0 : index
    %1001 = vector.load %arg4[%c28_427, %c0_428] : memref<32x32xbf16, #tpu.memory_space<vmem>>, vector<4x32xbf16>
    %cst_429 = arith.constant dense<0.000000e+00> : vector<2x32xf32>
    %1002 = tpu.matmul %1000, %1001, %cst_429 {dimension_numbers = #tpu.dot_dimension_numbers<[1], [0], [0], [1], [0, 0, 1, 1], [], []>} : vector<2x4xbf16>, vector<4x32xbf16>, vector<2x32xf32> -> vector<2x32xf32>
    %1003 = arith.addf %983, %1002 : vector<2x32xf32>
    %cst_430 = arith.constant dense<0.000000e+00> : vector<2xf32>
    %1004 = vector.multi_reduction <add>, %1003, %cst_430 [1] : vector<2x32xf32> to vector<2xf32>
    %1005 = vector.shape_cast %1004 : vector<2xf32> to vector<2x1xf32>
    %cst_431 = arith.constant 3.200000e+01 : f32
    %1006 = vector.broadcast %cst_431 : f32 to vector<2x1xf32>
    %1007 = arith.divf %1005, %1006 : vector<2x1xf32>
    %1008 = vector.broadcast %1007 : vector<2x1xf32> to vector<2x32xf32>
    %1009 = arith.subf %1003, %1008 : vector<2x32xf32>
    %1010 = arith.mulf %1009, %1009 : vector<2x32xf32>
    %cst_432 = arith.constant dense<0.000000e+00> : vector<2xf32>
    %1011 = vector.multi_reduction <add>, %1010, %cst_432 [1] : vector<2x32xf32> to vector<2xf32>
    %1012 = vector.shape_cast %1011 : vector<2xf32> to vector<2x1xf32>
    %cst_433 = arith.constant 3.200000e+01 : f32
    %1013 = vector.broadcast %cst_433 : f32 to vector<2x1xf32>
    %1014 = arith.divf %1012, %1013 : vector<2x1xf32>
    %cst_434 = arith.constant 9.99999974E-6 : f32
    %1015 = vector.broadcast %cst_434 : f32 to vector<2x1xf32>
    %1016 = arith.addf %1014, %1015 : vector<2x1xf32>
    %1017 = math.rsqrt %1016 : vector<2x1xf32>
    %1018 = vector.broadcast %1017 : vector<2x1xf32> to vector<2x32xf32>
    %1019 = arith.mulf %1009, %1018 : vector<2x32xf32>
    %c0_435 = arith.constant 0 : index
    %c0_436 = arith.constant 0 : index
    %1020 = vector.load %arg6[%c0_435, %c0_436] : memref<1x32xf32, #tpu.memory_space<vmem>>, vector<1x32xf32>
    %1021 = vector.broadcast %1020 : vector<1x32xf32> to vector<2x32xf32>
    %1022 = arith.mulf %1019, %1021 : vector<2x32xf32>
    %c0_437 = arith.constant 0 : index
    %c0_438 = arith.constant 0 : index
    %1023 = vector.load %arg7[%c0_437, %c0_438] : memref<1x32xf32, #tpu.memory_space<vmem>>, vector<1x32xf32>
    %1024 = vector.broadcast %1023 : vector<1x32xf32> to vector<2x32xf32>
    %1025 = arith.addf %1022, %1024 : vector<2x32xf32>
    %1026 = arith.truncf %1025 : vector<2x32xf32> to vector<2x32xbf16>
    %c0_439 = arith.constant 0 : index
    %c0_440 = arith.constant 0 : index
    %1027 = vector.load %arg11[%c0_439, %c0_440] : memref<1x32xf32, #tpu.memory_space<vmem>>, vector<1x32xf32>
    %1028 = vector.broadcast %1027 : vector<1x32xf32> to vector<2x32xf32>
    %1029 = arith.addf %1025, %1028 : vector<2x32xf32>
    %c0_441 = arith.constant 0 : index
    %c0_442 = arith.constant 0 : index
    %1030 = vector.load %arg8[%c0_441, %c0_442] : memref<32x2048xbf16, #tpu.memory_space<vmem>>, vector<32x512xbf16>
    %cst_443 = arith.constant dense<0.000000e+00> : vector<2x512xf32>
    %1031 = tpu.matmul %1026, %1030, %cst_443 {dimension_numbers = #tpu.dot_dimension_numbers<[1], [0], [0], [1], [0, 0, 1, 1], [], []>} : vector<2x32xbf16>, vector<32x512xbf16>, vector<2x512xf32> -> vector<2x512xf32>
    %c0_444 = arith.constant 0 : index
    %c0_445 = arith.constant 0 : index
    %1032 = vector.load %arg9[%c0_444, %c0_445] : memref<1x2048xf32, #tpu.memory_space<vmem>>, vector<1x512xf32>
    %1033 = vector.broadcast %1032 : vector<1x512xf32> to vector<2x512xf32>
    %1034 = arith.addf %1031, %1033 : vector<2x512xf32>
    %cst_446 = arith.constant 0.000000e+00 : f32
    %1035 = vector.broadcast %cst_446 : f32 to vector<2x512xf32>
    %1036 = arith.maximumf %1034, %1035 : vector<2x512xf32>
    %1037 = arith.truncf %1036 : vector<2x512xf32> to vector<2x512xbf16>
    %c0_447 = arith.constant 0 : index
    %c0_448 = arith.constant 0 : index
    %1038 = vector.load %arg10[%c0_447, %c0_448] : memref<2048x32xbf16, #tpu.memory_space<vmem>>, vector<512x32xbf16>
    %cst_449 = arith.constant dense<0.000000e+00> : vector<2x32xf32>
    %1039 = tpu.matmul %1037, %1038, %cst_449 {dimension_numbers = #tpu.dot_dimension_numbers<[1], [0], [0], [1], [0, 0, 1, 1], [], []>} : vector<2x512xbf16>, vector<512x32xbf16>, vector<2x32xf32> -> vector<2x32xf32>
    %1040 = arith.addf %1029, %1039 : vector<2x32xf32>
    %c0_450 = arith.constant 0 : index
    %c512_451 = arith.constant 512 : index
    %1041 = vector.load %arg8[%c0_450, %c512_451] : memref<32x2048xbf16, #tpu.memory_space<vmem>>, vector<32x512xbf16>
    %cst_452 = arith.constant dense<0.000000e+00> : vector<2x512xf32>
    %1042 = tpu.matmul %1026, %1041, %cst_452 {dimension_numbers = #tpu.dot_dimension_numbers<[1], [0], [0], [1], [0, 0, 1, 1], [], []>} : vector<2x32xbf16>, vector<32x512xbf16>, vector<2x512xf32> -> vector<2x512xf32>
    %c0_453 = arith.constant 0 : index
    %c512_454 = arith.constant 512 : index
    %1043 = vector.load %arg9[%c0_453, %c512_454] : memref<1x2048xf32, #tpu.memory_space<vmem>>, vector<1x512xf32>
    %1044 = vector.broadcast %1043 : vector<1x512xf32> to vector<2x512xf32>
    %1045 = arith.addf %1042, %1044 : vector<2x512xf32>
    %cst_455 = arith.constant 0.000000e+00 : f32
    %1046 = vector.broadcast %cst_455 : f32 to vector<2x512xf32>
    %1047 = arith.maximumf %1045, %1046 : vector<2x512xf32>
    %1048 = arith.truncf %1047 : vector<2x512xf32> to vector<2x512xbf16>
    %c512_456 = arith.constant 512 : index
    %c0_457 = arith.constant 0 : index
    %1049 = vector.load %arg10[%c512_456, %c0_457] : memref<2048x32xbf16, #tpu.memory_space<vmem>>, vector<512x32xbf16>
    %cst_458 = arith.constant dense<0.000000e+00> : vector<2x32xf32>
    %1050 = tpu.matmul %1048, %1049, %cst_458 {dimension_numbers = #tpu.dot_dimension_numbers<[1], [0], [0], [1], [0, 0, 1, 1], [], []>} : vector<2x512xbf16>, vector<512x32xbf16>, vector<2x32xf32> -> vector<2x32xf32>
    %1051 = arith.addf %1040, %1050 : vector<2x32xf32>
    %c0_459 = arith.constant 0 : index
    %c1024_460 = arith.constant 1024 : index
    %1052 = vector.load %arg8[%c0_459, %c1024_460] : memref<32x2048xbf16, #tpu.memory_space<vmem>>, vector<32x512xbf16>
    %cst_461 = arith.constant dense<0.000000e+00> : vector<2x512xf32>
    %1053 = tpu.matmul %1026, %1052, %cst_461 {dimension_numbers = #tpu.dot_dimension_numbers<[1], [0], [0], [1], [0, 0, 1, 1], [], []>} : vector<2x32xbf16>, vector<32x512xbf16>, vector<2x512xf32> -> vector<2x512xf32>
    %c0_462 = arith.constant 0 : index
    %c1024_463 = arith.constant 1024 : index
    %1054 = vector.load %arg9[%c0_462, %c1024_463] : memref<1x2048xf32, #tpu.memory_space<vmem>>, vector<1x512xf32>
    %1055 = vector.broadcast %1054 : vector<1x512xf32> to vector<2x512xf32>
    %1056 = arith.addf %1053, %1055 : vector<2x512xf32>
    %cst_464 = arith.constant 0.000000e+00 : f32
    %1057 = vector.broadcast %cst_464 : f32 to vector<2x512xf32>
    %1058 = arith.maximumf %1056, %1057 : vector<2x512xf32>
    %1059 = arith.truncf %1058 : vector<2x512xf32> to vector<2x512xbf16>
    %c1024_465 = arith.constant 1024 : index
    %c0_466 = arith.constant 0 : index
    %1060 = vector.load %arg10[%c1024_465, %c0_466] : memref<2048x32xbf16, #tpu.memory_space<vmem>>, vector<512x32xbf16>
    %cst_467 = arith.constant dense<0.000000e+00> : vector<2x32xf32>
    %1061 = tpu.matmul %1059, %1060, %cst_467 {dimension_numbers = #tpu.dot_dimension_numbers<[1], [0], [0], [1], [0, 0, 1, 1], [], []>} : vector<2x512xbf16>, vector<512x32xbf16>, vector<2x32xf32> -> vector<2x32xf32>
    %1062 = arith.addf %1051, %1061 : vector<2x32xf32>
    %c0_468 = arith.constant 0 : index
    %c1536_469 = arith.constant 1536 : index
    %1063 = vector.load %arg8[%c0_468, %c1536_469] : memref<32x2048xbf16, #tpu.memory_space<vmem>>, vector<32x512xbf16>
    %cst_470 = arith.constant dense<0.000000e+00> : vector<2x512xf32>
    %1064 = tpu.matmul %1026, %1063, %cst_470 {dimension_numbers = #tpu.dot_dimension_numbers<[1], [0], [0], [1], [0, 0, 1, 1], [], []>} : vector<2x32xbf16>, vector<32x512xbf16>, vector<2x512xf32> -> vector<2x512xf32>
    %c0_471 = arith.constant 0 : index
    %c1536_472 = arith.constant 1536 : index
    %1065 = vector.load %arg9[%c0_471, %c1536_472] : memref<1x2048xf32, #tpu.memory_space<vmem>>, vector<1x512xf32>
    %1066 = vector.broadcast %1065 : vector<1x512xf32> to vector<2x512xf32>
    %1067 = arith.addf %1064, %1066 : vector<2x512xf32>
    %cst_473 = arith.constant 0.000000e+00 : f32
    %1068 = vector.broadcast %cst_473 : f32 to vector<2x512xf32>
    %1069 = arith.maximumf %1067, %1068 : vector<2x512xf32>
    %1070 = arith.truncf %1069 : vector<2x512xf32> to vector<2x512xbf16>
    %c1536_474 = arith.constant 1536 : index
    %c0_475 = arith.constant 0 : index
    %1071 = vector.load %arg10[%c1536_474, %c0_475] : memref<2048x32xbf16, #tpu.memory_space<vmem>>, vector<512x32xbf16>
    %cst_476 = arith.constant dense<0.000000e+00> : vector<2x32xf32>
    %1072 = tpu.matmul %1070, %1071, %cst_476 {dimension_numbers = #tpu.dot_dimension_numbers<[1], [0], [0], [1], [0, 0, 1, 1], [], []>} : vector<2x512xbf16>, vector<512x32xbf16>, vector<2x32xf32> -> vector<2x32xf32>
    %1073 = arith.addf %1062, %1072 : vector<2x32xf32>
    %cst_477 = arith.constant dense<0.000000e+00> : vector<2xf32>
    %1074 = vector.multi_reduction <add>, %1073, %cst_477 [1] : vector<2x32xf32> to vector<2xf32>
    %1075 = vector.shape_cast %1074 : vector<2xf32> to vector<2x1xf32>
    %cst_478 = arith.constant 3.200000e+01 : f32
    %1076 = vector.broadcast %cst_478 : f32 to vector<2x1xf32>
    %1077 = arith.divf %1075, %1076 : vector<2x1xf32>
    %1078 = vector.broadcast %1077 : vector<2x1xf32> to vector<2x32xf32>
    %1079 = arith.subf %1073, %1078 : vector<2x32xf32>
    %1080 = arith.mulf %1079, %1079 : vector<2x32xf32>
    %cst_479 = arith.constant dense<0.000000e+00> : vector<2xf32>
    %1081 = vector.multi_reduction <add>, %1080, %cst_479 [1] : vector<2x32xf32> to vector<2xf32>
    %1082 = vector.shape_cast %1081 : vector<2xf32> to vector<2x1xf32>
    %cst_480 = arith.constant 3.200000e+01 : f32
    %1083 = vector.broadcast %cst_480 : f32 to vector<2x1xf32>
    %1084 = arith.divf %1082, %1083 : vector<2x1xf32>
    %cst_481 = arith.constant 9.99999974E-6 : f32
    %1085 = vector.broadcast %cst_481 : f32 to vector<2x1xf32>
    %1086 = arith.addf %1084, %1085 : vector<2x1xf32>
    %1087 = math.rsqrt %1086 : vector<2x1xf32>
    %1088 = vector.broadcast %1087 : vector<2x1xf32> to vector<2x32xf32>
    %1089 = arith.mulf %1079, %1088 : vector<2x32xf32>
    %c0_482 = arith.constant 0 : index
    %c0_483 = arith.constant 0 : index
    %1090 = vector.load %arg12[%c0_482, %c0_483] : memref<1x32xf32, #tpu.memory_space<vmem>>, vector<1x32xf32>
    %1091 = vector.broadcast %1090 : vector<1x32xf32> to vector<2x32xf32>
    %1092 = arith.mulf %1089, %1091 : vector<2x32xf32>
    %c0_484 = arith.constant 0 : index
    %c0_485 = arith.constant 0 : index
    %1093 = vector.load %arg13[%c0_484, %c0_485] : memref<1x32xf32, #tpu.memory_space<vmem>>, vector<1x32xf32>
    %1094 = vector.broadcast %1093 : vector<1x32xf32> to vector<2x32xf32>
    %1095 = arith.addf %1092, %1094 : vector<2x32xf32>
    %1096 = arith.truncf %1095 : vector<2x32xf32> to vector<2x32xbf16>
    %c3_486 = arith.constant 3 : index
    %c0_487 = arith.constant 0 : index
    %c0_488 = arith.constant 0 : index
    %1097 = vector.load %arg14[%c3_486, %c0_487, %c0_488] : memref<4x2x32xbf16, #tpu.memory_space<vmem>>, vector<1x2x32xbf16>
    %1098 = vector.shape_cast %1097 : vector<1x2x32xbf16> to vector<2x32xbf16>
    %1099 = vector.shape_cast %1096 : vector<2x32xbf16> to vector<1x2x32xbf16>
    tpu.vector_store %arg14[%c3_486, %c0_487, %c0_488], %1099 {strides = array<i32>} : memref<4x2x32xbf16, #tpu.memory_space<vmem>>, vector<1x2x32xbf16>,
    return
  }
  func.func @transform_0(%arg0: i32) -> (i32, i32, i32) {
    %c0_i32 = arith.constant 0 : i32
    %c0_i32_0 = arith.constant 0 : i32
    %c0_i32_1 = arith.constant 0 : i32
    return %arg0, %c0_i32, %c0_i32_0 : i32, i32, i32
  }
  func.func @transform_1(%arg0: i32) -> (i32, i32) {
    %c0_i32 = arith.constant 0 : i32
    %c0_i32_0 = arith.constant 0 : i32
    %c0_i32_1 = arith.constant 0 : i32
    return %c0_i32, %c0_i32_0 : i32, i32
  }
  func.func @transform_2(%arg0: i32) -> (i32, i32) {
    %c0_i32 = arith.constant 0 : i32
    %c0_i32_0 = arith.constant 0 : i32
    %c0_i32_1 = arith.constant 0 : i32
    return %c0_i32, %c0_i32_0 : i32, i32
  }
  func.func @transform_3(%arg0: i32) -> (i32, i32) {
    %c0_i32 = arith.constant 0 : i32
    %c0_i32_0 = arith.constant 0 : i32
    %c0_i32_1 = arith.constant 0 : i32
    return %c0_i32, %c0_i32_0 : i32, i32
  }
  func.func @transform_4(%arg0: i32) -> (i32, i32) {
    %c0_i32 = arith.constant 0 : i32
    %c0_i32_0 = arith.constant 0 : i32
    %c0_i32_1 = arith.constant 0 : i32
    return %c0_i32, %c0_i32_0 : i32, i32
  }
  func.func @transform_5(%arg0: i32) -> (i32, i32) {
    %c0_i32 = arith.constant 0 : i32
    %c0_i32_0 = arith.constant 0 : i32
    %c0_i32_1 = arith.constant 0 : i32
    return %c0_i32, %c0_i32_0 : i32, i32
  }
  func.func @transform_6(%arg0: i32) -> (i32, i32) {
    %c0_i32 = arith.constant 0 : i32
    %c0_i32_0 = arith.constant 0 : i32
    %c0_i32_1 = arith.constant 0 : i32
    return %c0_i32, %c0_i32_0 : i32, i32
  }
  func.func @transform_7(%arg0: i32) -> (i32, i32) {
    %c0_i32 = arith.constant 0 : i32
    %c0_i32_0 = arith.constant 0 : i32
    %c0_i32_1 = arith.constant 0 : i32
    return %c0_i32, %c0_i32_0 : i32, i32
  }
  func.func @transform_8(%arg0: i32) -> (i32, i32) {
    %c0_i32 = arith.constant 0 : i32
    %c0_i32_0 = arith.constant 0 : i32
    %c0_i32_1 = arith.constant 0 : i32
    return %c0_i32, %c0_i32_0 : i32, i32
  }
  func.func @transform_9(%arg0: i32) -> (i32, i32) {
    %c0_i32 = arith.constant 0 : i32
    %c0_i32_0 = arith.constant 0 : i32
    %c0_i32_1 = arith.constant 0 : i32
    return %c0_i32, %c0_i32_0 : i32, i32
  }
  func.func @transform_10(%arg0: i32) -> (i32, i32) {
    %c0_i32 = arith.constant 0 : i32
    %c0_i32_0 = arith.constant 0 : i32
    %c0_i32_1 = arith.constant 0 : i32
    return %c0_i32, %c0_i32_0 : i32, i32
  }
  func.func @transform_11(%arg0: i32) -> (i32, i32) {
    %c0_i32 = arith.constant 0 : i32
    %c0_i32_0 = arith.constant 0 : i32
    %c0_i32_1 = arith.constant 0 : i32
    return %c0_i32, %c0_i32_0 : i32, i32
  }
  func.func @transform_12(%arg0: i32) -> (i32, i32) {
    %c0_i32 = arith.constant 0 : i32
    %c0_i32_0 = arith.constant 0 : i32
    %c0_i32_1 = arith.constant 0 : i32
    return %c0_i32, %c0_i32_0 : i32, i32
  }
  func.func @transform_13(%arg0: i32) -> (i32, i32, i32) {
    %c0_i32 = arith.constant 0 : i32
    %c0_i32_0 = arith.constant 0 : i32
    %c0_i32_1 = arith.constant 0 : i32
    return %arg0, %c0_i32, %c0_i32_0 : i32, i32, i32
  }
}

</mosaic_0001>

<bundles_post_ra>
// kernel: _lambda_.7
= control target key start
LH: loop header
LB: loop body
LE: loop exit
PB: predicated region body
PF: predicated region fallthrough
CT: control target
= control target key end

     0   :  { %vm36_vm0 = vcmask 261120   ;;  %v112_v0 = vmov 0.0   ;;  %vm113_vm1 = vmmov 0   ;;  %v114_v2 = vmov 0   ;;  %s153_s0 = inlined_call_operand.vmem [shape: bf16[32,32], index: 0, kind: input, shape index: {}]   ;;  %s154_s2 = inlined_call_operand.vmem [shape: f32[4,1], index: 2, kind: input, shape index: {}]   ;;  %s155_s1 = inlined_call_operand.vmem [shape: bf16[4,32], index: 1, kind: input, shape index: {}]   ;;  %s156_s3 = inlined_call_operand.vmem [shape: f32[4,32], index: 3, kind: output, shape index: {}]  }
   0x1   :  { %98 = vmatprep.subr.bf16.mxu0 %v112_v0  ;;  %v110_v1 = vld [vmem:[%s153_s0] sm:$0xff]   ;;  %102 = vmatprep.mubr.msk.bf16.mxu0 %vm113_vm1, %v112_v0  ;;  %v111_v5 = vld [vmem:[%s153_s0 + $0x8] sm:$0xff]   ;;  %vm86_vm2 = vcmask 257024  }
   0x2   :  { %109 = vset.pattern.permute.xlu0 %v114_v2  ;;  %v41_v3 = vsel %vm36_vm0, %v110_v1, 0  ;;  %v20_v4 = vld [vmem:[%s154_s2] sm:$0xf]  ;;  %v44_v6 = vsel %vm36_vm0, %v111_v5, 0 }
   0x3   :  { %99 = vmatpush3.bf16.xpose.msra.mxu0 %v41_v3  ;;  %23 = vperm.xlu0 %109, %v20_v4   ;;  %v15_v7 = vld [vmem:[%s155_s1] sm:$0x3] }
   0x4   :  { %100 = vmatprep.subr.bf16.mxu0 %v112_v0 }
   0xb   :  { %101 = vmatpush3.bf16.xpose.msra.mxu0 %v44_v6 }
  0x12   :  { %103 = vmatmul.mubr.msk.bf16.vlgmr.msra.gmra.mrb[0].mxu0 %vm36_vm0, %v15_v7 }
  0x82   :  { %v24_v8 = vpop.permute.xlu0 %23 }
  0xe5   :  { %v80_v9 = vpop.f32.mrb[0].mxu0 }
  0xe6   :  { %v81_v10 = vadd.f32 %v80_v9, %v24_v8  ;;  %v104_v11 = vpop.f32.mrb[1].mxu0 }
  0xe7   :  { %v83_v12 = vpop.f32.mrb[2].mxu0 }
  0xe8   :  { %87 = vst.msk [vmem:[%s156_s3] sm:$0xf] %vm86_vm2, %v81_v10  ;;  %v105_v13 = vpop.f32.mrb[3].mxu0 }

// kernel: _lambda_.4
= control target key start
LH: loop header
LB: loop body
LE: loop exit
PB: predicated region body
PF: predicated region fallthrough
CT: control target
= control target key end

     0   :  { %12 = vsyncpa [#allocation3], 0  ;;  %s1372_s0 = inlined_call_operand.vmem [shape: bf16[2,16,4], index: 0, kind: input, shape index: {}]   ;;  %s1373_s1 = inlined_call_operand.vmem [shape: bf16[2,1,32], index: 1, kind: input, shape index: {}]   ;;  %s1374_s2 = inlined_call_operand.vmem [shape: bf16[2,8,32], index: 2, kind: input, shape index: {}]   ;;  %s1375_s3 = inlined_call_operand.hbm [shape: bf16[4,32], index: 3, kind: input, shape index: {}]   ;;  %s1376_s4 = inlined_call_operand.hbm [shape: f32[1,32], index: 4, kind: input, shape index: {}]   ;;  %s1377_s5 = inlined_call_operand.hbm [shape: bf16[32,32], index: 5, kind: input, shape index: {}]   ;;  %s1378_s6 = inlined_call_operand.hbm [shape: f32[1,32], index: 6, kind: input, shape index: {}]   ;;  %s1379_s7 = inlined_call_operand.vmem [shape: bf16[2,16,32], index: 7, kind: output, shape index: {}]  }
   0x1   :  { %13 = vsyncpa [#allocation5], 0 }
   0x2   :  { %14 = vsyncpa [#allocation8], 0  ;;  %s1178_s24 = smov 0   ;;  %s1180_s25 = smov 0  }
   0x3   :  { %s1182_s26 = smov 0  }
   0x4 LB: > { %s1130_s27 = smov [#allocation4]   ;;  %s828_s29 = sadd.s32 4294967295, %s1128_s26   ;;  %s1128_s26 = sphi %s1182_s26, %s20_s26   ;;  %s1124_s25 = sphi %s1180_s25, %s1392_s25   ;;  %s1120_s24 = sphi %s1178_s24, %s1391_s24  }
   0x5   : > { %s253_s28 = sshll.u32 %s1130_s27, 4  ;;  %p830_p0 = scmp.ge.s32.totalorder %s1128_s26, 1  ;;  %s254_s28 = int_to_ptr.vmem [resolvable:$true] %s253_s28 }
   0x6   : > { %p229_p1 = scmp.lt.s32.totalorder %s1128_s26, 3  ;;  %p1196_p2 = scmp.eq.s32.totalorder %s828_s29, 0 }
   0x7   : > { %s32_s9 = sadd.s32 1, %s1124_s25  ;;  %s1131_s12 = smov [#allocation2]  }
   0x8   : > { %s1383_s30 = scalar_select %p1196_p2, 1, 0 }
   0x9   : > { %p1200_p3 = pnand %p830_p0, %p229_p1  ;;  %p1213_p6 = scmp.ge.s32.totalorder %s32_s9, 2 }
   0xa   : > { %s242_s13 = sshll.u32 %s1131_s12, 4  ;;  %s982_s16 = scalar_lea.hbm %s1376_s4, 16  ;;  %s1217_s13 = int_to_ptr.vmem [resolvable:$true] %s242_s13 }
   0xb   : > { %s1384_s8 = scalar_select %p1200_p3, 1, 0 }
   0xc   : > { %p914_p4 = pneg %p1200_p3  ;;  %p983_p7 = scmp.ne.s32.totalorder %s1376_s4, %s982_s16 }
   0xd   : > { %s1386_s11 = scalar_select %p1213_p6, 1, 0 }
   0xe   : > { %p1209_p5 = pnand %p1196_p2, %p914_p4  ;;  %p989_p11 = scmp.lt.u32.totalorder %s982_s16, %s1376_s4 }
  0x10   : > { %p1227_p8 = pneg %p1209_p5 }
  0x12   : > { %p985_p9 = pnand %p1227_p8, %p983_p7 }
  0x14   : > { %p986_p10 = pneg %p985_p9 }
  0x16   : > { %p991_p12 = pnand %p989_p11, %p986_p10 }
  0x18   : > { %994 = shalt.err (!%p991_p12)
}
  0x19   : > { %s995_s22 = scalar_lea.vmem %s254_s28, 16  ;;  %s1002_s23 = scalar_lea.vmem %s254_s28, 32 }
  0x1a   : > { %p996_p13 = scmp.ne.s32.totalorder %s254_s28, %s995_s22  ;;  %p1003_p4 = scmp.lt.s32.totalorder %s254_s28, %s254_s28 }
  0x1b   : > { %p1004_p2 = scmp.lt.s32.totalorder %s1002_s23, %s995_s22 }
  0x1c   : > { %p998_p0 = pnand %p996_p13, %p1227_p8 }
  0x1d   : > { %p1005_p3 = por %p1004_p2, %p1003_p4 }
  0x1e   : > { %p999_p1 = pneg %p998_p0 }
  0x20   : > { %p1006_p6 = pnand %p1005_p3, %p999_p1 }
  0x22   : > { %1009 = shalt.err (!%p1006_p6)
}
  0x23   : > { %920 = dma.hbm_to_vmem [thread:$0]  (!%p1209_p5), %s1376_s4, 16, %s254_s28, [#allocation5]  }
  0x24   : > { %p1388_p7 = scmp.ne.s32.totalorder %s1386_s11, 0  ;;  %s1010_s15 = scalar_lea.hbm %s1375_s3, 32 }
  0x25   : > { %p1011_p2 = scmp.ne.s32.totalorder %s1375_s3, %s1010_s15  ;;  %p1017_p9 = scmp.lt.u32.totalorder %s1010_s15, %s1375_s3 }
  0x26   : > { %s1394_s9 = smov (%p1388_p7, %s32_s9), 0 }
  0x27   : > { %p1013_p3 = pnand %p1011_p2, %p1227_p8 }
  0x29   : > { %p1014_p6 = pneg %p1013_p3 }
  0x2b   : > { %p1019_p10 = pnand %p1017_p9, %p1014_p6 }
  0x2d   : > { %1022 = shalt.err (!%p1019_p10)
}
  0x2e   : > { %s1023_s28 = scalar_lea.vmem %s1217_s13, 32  ;;  %p1031_p0 = scmp.lt.s32.totalorder %s1217_s13, %s1217_s13 }
  0x2f   : > { %p1024_p11 = scmp.ne.s32.totalorder %s1217_s13, %s1023_s28  ;;  %p1032_p1 = scmp.lt.s32.totalorder %s1023_s28, %s1023_s28 }
  0x31   : > { %p1026_p12 = pnand %p1024_p11, %p1227_p8  ;;  %p1033_p4 = por %p1032_p1, %p1031_p0 }
  0x33   : > { %p1027_p13 = pneg %p1026_p12 }
  0x35   : > { %p1034_p7 = pnand %p1033_p4, %p1027_p13 }
  0x37   : > { %1037 = shalt.err (!%p1034_p7)
}
  0x38   : > { %917 = dma.hbm_to_vmem [thread:$0]  (!%p1209_p5), %s1375_s3, 32, %s1217_s13, [#allocation3]  }
  0x39   : > { %s1132_s22 = smov [#allocation6]   ;;  %s1038_s12 = scalar_lea.hbm %s1377_s5, 256 }
  0x3a   : > { %s263_s23 = sshll.u32 %s1132_s22, 4  ;;  %p1039_p2 = scmp.ne.s32.totalorder %s1377_s5, %s1038_s12  ;;  %s264_s23 = int_to_ptr.vmem [resolvable:$true] %s263_s23 }
  0x3b   : > { %p1045_p9 = scmp.lt.u32.totalorder %s1038_s12, %s1377_s5 }
  0x3c   : > { %p1041_p3 = pnand %p1039_p2, %p1227_p8 }
  0x3e   : > { %p1042_p6 = pneg %p1041_p3 }
  0x40   : > { %p1047_p10 = pnand %p1045_p9, %p1042_p6 }
  0x42   : > { %1050 = shalt.err (!%p1047_p10)
}
  0x43   : > { %s1051_s13 = scalar_lea.vmem %s264_s23, 256  ;;  %p1059_p0 = scmp.lt.s32.totalorder %s264_s23, %s264_s23 }
  0x44   : > { %p1052_p11 = scmp.ne.s32.totalorder %s264_s23, %s1051_s13  ;;  %p1060_p1 = scmp.lt.s32.totalorder %s1051_s13, %s1051_s13 }
  0x46   : > { %p1054_p12 = pnand %p1052_p11, %p1227_p8  ;;  %p1061_p4 = por %p1060_p1, %p1059_p0 }
  0x48   : > { %p1055_p13 = pneg %p1054_p12 }
  0x4a   : > { %p1062_p7 = pnand %p1061_p4, %p1055_p13 }
  0x4c   : > { %1065 = shalt.err (!%p1062_p7)
}
  0x4d   : > { %s1133_s18 = smov 64   ;;  %s1134_s20 = smov 4  }
  0x4e   : > { %923 = dma.hbm_to_vmem [thread:$0]  (!%p1209_p5), %s1377_s5, 256, %s264_s23, [#allocation5], %s1133_s18, %s1133_s18, %s1134_s20  }
  0x4f   : > { %s1135_s21 = smov [#allocation7]   ;;  %s1066_s12 = scalar_lea.hbm %s1378_s6, 16 }
  0x50   : > { %s277_s22 = sshll.u32 %s1135_s21, 4  ;;  %p1067_p2 = scmp.ne.s32.totalorder %s1378_s6, %s1066_s12  ;;  %s278_s22 = int_to_ptr.vmem [resolvable:$true] %s277_s22 }
  0x51   : > { %p1073_p9 = scmp.lt.u32.totalorder %s1066_s12, %s1378_s6 }
  0x52   : > { %p1069_p3 = pnand %p1067_p2, %p1227_p8 }
  0x54   : > { %p1070_p6 = pneg %p1069_p3 }
  0x56   : > { %p1075_p10 = pnand %p1073_p9, %p1070_p6 }
  0x58   : > { %1078 = shalt.err (!%p1075_p10)
}
  0x59   : > { %s1079_s23 = scalar_lea.vmem %s278_s22, 16  ;;  %s1086_s13 = scalar_lea.vmem %s278_s22, 32 }
  0x5a   : > { %p1080_p11 = scmp.ne.s32.totalorder %s278_s22, %s1079_s23  ;;  %p1087_p0 = scmp.lt.s32.totalorder %s278_s22, %s278_s22 }
  0x5b   : > { %p1088_p1 = scmp.lt.s32.totalorder %s1086_s13, %s1079_s23 }
  0x5c   : > { %p1082_p12 = pnand %p1080_p11, %p1227_p8 }
  0x5d   : > { %p1089_p4 = por %p1088_p1, %p1087_p0 }
  0x5e   : > { %p1083_p13 = pneg %p1082_p12 }
  0x60   : > { %p1090_p7 = pnand %p1089_p4, %p1083_p13 }
  0x62   : > { %1093 = shalt.err (!%p1090_p7)
}
  0x63   : > { %926 = dma.hbm_to_vmem [thread:$0]  (!%p1209_p5), %s1378_s6, 16, %s278_s22, [#allocation8]  }
  0x64   : > { %p1389_p2 = scmp.ne.s32.totalorder %s1384_s8, 0 }
  0x65   : > { %p1390_p3 = scmp.ne.s32.totalorder (!%p1389_p2), %s1383_s30, 0 }
  0x66   : > { %316 = sbr.rel (%p1389_p2) target bundleno = 1318 (0x526), region = 48 }
  0x6d   : > { %1107 = dma.done.wait (%p1390_p3), [#allocation3], 32  }
  0x6e   : > { %1109 = vsyncadd (%p1390_p3), [#allocation3], 4294967264 }
  0x6f   : > { %1111 = dma.done.wait (%p1390_p3), [#allocation5], 272  }
  0x70   : > { %1113 = vsyncadd (%p1390_p3), [#allocation5], 4294967024 }
  0x71   : > { %1115 = dma.done.wait (%p1390_p3), [#allocation8], 16  }
  0x72   : > { %1117 = vsyncadd (%p1390_p3), [#allocation8], 4294967280  ;;  %p376_p5 = scmp.lt.s32.totalorder %s1120_s24, 1  ;;  %v1136_v0 = vmov 0.0   ;;  %vm1137_vm0 = vmmov 0   ;;  %vm422_vm1 = vcmask 1041408   ;;  %v660_v50 = vlaneseq }
  0x73   : > { %872 = vmatprep.subr.bf16.mxu0 %v1136_v0  ;;  %874 = vmatprep.mubr.msk.bf16.mxu0 %vm1137_vm0, %v1136_v0  ;;  %v405_v1 = vld [vmem:[#allocation2] sm:$0x3]  ;;  %vm418_vm2 = vcmask 31744   ;;  %v968_v4 = vld [vmem:[#allocation6] sm:$0xff]   ;;  %v969_v5 = vld [vmem:[#allocation6 + $0x8] sm:$0xff]   ;;  %vm491_vm3 = vcmask 261120  }
  0x74   : > { %s1396_s24 = smov (!%p376_p5, %s1120_s24), 1  ;;  %878 = vmatprep.subr.bf16.mxu1 %v1136_v0  ;;  %882 = vmatprep.mubr.msk.bf16.mxu1 %vm1137_vm0, %v1136_v0  ;;  %v424_v2 = vsel %vm422_vm1, %v405_v1, 0  ;;  %v846_v6 = vld [vmem:[#allocation4] ss:$0 sm:$0xff]  ;;  %v849_v16 = vld [vmem:[#allocation7] ss:$0 sm:$0xff] }
  0x75   : > { %s859_s8 = sshll.u32 %s1396_s24, 3  ;;  %873 = vmatpush3.bf16.msra.mxu0 %v424_v2  ;;  %879 = vmatpush3.bf16.msra.mxu1 %v968_v4  ;;  %s843_s28 = sshll.u32 %s1396_s24, 2  ;;  %vm587_vm4 = vcmask 64512   ;;  %vm614_vm5 = vcmask 1043456   ;;  %v661_v51 = vshrl.u32 %v660_v50, 7  ;;  %vm676_vm6 = vcmask 257024  }
  0x76   : > { %s383_s19 = scalar_lea.vmem %s1372_s0, %s859_s8  ;;  %886 = vmatprep.subr.bf16.mxu0 %v1136_v0  ;;  %880 = vmatprep.subr.bf16.mxu1 %v1136_v0  ;;  %s391_s22 = scalar_lea.vmem %s1374_s2, %s843_s28 }
  0x77   : > { %v967_v3 = vld [vmem:[%s383_s19] sm:$0xff]   ;;  %s387_s12 = scalar_lea.vmem %s1373_s1, %s1396_s24  ;;  %v662_v54 = vsub.s32 0, %v661_v51  ;;  %s400_s16 = scalar_lea.vmem %s1379_s7, %s859_s8 }
  0x78   : > { %875 = vmatmul.mubr.msk.bf16.vlgmr.msra.gmra.mrb[0].mxu0 %vm418_vm2, %v967_v3  ;;  %v539_v14 = vld [vmem:[%s391_s22] sm:$0xf] }
  0x79   : > { %888 = vmatprep.mubr.msk.bf16.mxu0 %vm1137_vm0, %v1136_v0  ;;  %881 = vmatpush3.bf16.msra.mxu1 %v969_v5  ;;  %v544_v15 = vsel %vm491_vm3, %v539_v14, 0  ;;  %v615_v42 = vsel %vm614_vm5, %v539_v14, 0  ;;  %v658_v52 = vld [vmem:[%s387_s12] sm:$0x1] }
  0x7a   : > { %892 = vmatprep.subr.bf16.mxu1 %v1136_v0  ;;  %v659_v53 = vunpack.c.l.bf16 %v658_v52 }
  0x7c   : > { %v663_v55 = vrot.slane %v659_v53, %v662_v54 }
  0x7e   : > { %887 = vmatpush3.bf16.xpose.msra.mxu0 %v544_v15 }
 0x14b   : > { %v460_v7 = vpop.f32.mrb[0].mxu0 }
 0x14c   : > { %v876_v8 = vpop.f32.mrb[1].mxu0  ;;  %v1333_v10 = vadd.f32 %v846_v6, %v460_v7 }
 0x14d   : > { %v463_v9 = vpop.f32.mrb[2].mxu0 }
 0x14e   : > { %v1335_v11 = vadd.f32 %v846_v6, %v463_v9  ;;  %v877_v12 = vpop.f32.mrb[3].mxu0  ;;  %v664_v56 = vadd.f32 %v663_v55, %v1333_v10 }
 0x150   : > { %v467_v13 = vpack.c.bf16 %v1335_v11, %v1333_v10  ;;  %v665_v60 = vadd.f32 %v663_v55, %v1335_v11 }
 0x152   : > { %883 = vmatmul.mubr.msk.bf16.vlgmr.msra.gmra.mrb[0].mxu1 %vm491_vm3, %v467_v13 }
 0x153   : > { %894 = vmatprep.mubr.msk.bf16.mxu1 %vm1137_vm0, %v1136_v0  ;;  %893 = vmatpush3.bf16.msra.mxu1 %v615_v42 }
 0x225   : > { %v529_v17 = vpop.f32.mrb[0].mxu1 }
 0x226   : > { %v530_v18 = vadd.f32 %v849_v16, %v529_v17  ;;  %v884_v19 = vpop.f32.mrb[1].mxu1 }
 0x227   : > { %v532_v20 = vpop.f32.mrb[2].mxu1 }
 0x228   : > { %v533_v21 = vadd.f32 %v849_v16, %v532_v20  ;;  %v885_v22 = vpop.f32.mrb[3].mxu1  ;;  %970 = vtanh.f32 %v530_v18 }
 0x22a   : > { %972 = vtanh.f32 %v533_v21 }
 0x232   : > { %v971_v23 = vpop.eup %970 }
 0x234   : > { %v973_v24 = vpop.eup %972 }
 0x235   : > { %v538_v25 = vpack.c.bf16 %v973_v24, %v971_v23 }
 0x237   : > { %889 = vmatmul.mubr.msk.bf16.vlgmr.msra.gmra.mrb[4].mxu0 %vm491_vm3, %v538_v25 }
 0x30a   : > { %v580_v26 = vpop.f32.mrb[4].mxu0 }
 0x30b   : > { %v890_v27 = vpop.f32.mrb[5].mxu0  ;;  %v588_v28 = vsel %vm587_vm4, %v580_v26, -inf }
 0x30c   : > { %589 = vmax.xlane.f32.xlu0 %v588_v28  ;;  %v583_v29 = vpop.f32.mrb[6].mxu0 }
 0x30d   : > { %v891_v30 = vpop.f32.mrb[7].mxu0  ;;  %v591_v31 = vsel %vm587_vm4, %v583_v29, -inf }
 0x310   : > { %592 = vmax.xlane.f32.xlu0 %v591_v31 }
 0x399   : > { %v590_v32 = vpop.xlane.xlu0 %589 }
 0x39a   : > { %v594_v33 = vsub.f32 %v580_v26, %v590_v32 }
 0x39c   : > { %v596_v34 = vmul.f32 1.442695, %v594_v33 }
 0x39d   : > { %v593_v35 = vpop.xlane.xlu0 %592 }
 0x39e   : > { %974 = vpow2.f32 %v596_v34  ;;  %v595_v36 = vsub.f32 %v583_v29, %v593_v35 }
 0x3a0   : > { %v598_v37 = vmul.f32 1.442695, %v595_v36 }
 0x3a2   : > { %976 = vpow2.f32 %v598_v37 }
 0x3a8   : > { %v975_v38 = vpop.eup %974 }
 0x3a9   : > { %v600_v39 = vsel %vm587_vm4, %v975_v38, 0.0 }
 0x3aa   : > { %601 = vadd.xlane.f32.xlu1 %v600_v39 }
 0x3ac   : > { %v977_v40 = vpop.eup %976 }
 0x3ad   : > { %v603_v41 = vsel %vm587_vm4, %v977_v40, 0.0 }
 0x3ae   : > { %604 = vadd.xlane.f32.xlu1 %v603_v41 }
 0x437   : > { %v602_v43 = vpop.xlane.xlu1 %601 }
 0x438   : > { %978 = vrcp.f32 %v602_v43 }
 0x43b   : > { %v605_v44 = vpop.xlane.xlu1 %604 }
 0x43c   : > { %980 = vrcp.f32 %v605_v44 }
 0x442   : > { %v979_v45 = vpop.eup %978 }
 0x443   : > { %v608_v47 = vmul.f32 %v979_v45, %v975_v38 }
 0x446   : > { %v981_v46 = vpop.eup %980 }
 0x447   : > { %v609_v48 = vmul.f32 %v981_v46, %v977_v40 }
 0x449   : > { %v610_v49 = vpack.c.bf16 %v609_v48, %v608_v47 }
 0x44b   : > { %895 = vmatmul.mubr.msk.bf16.vlgmr.msra.gmra.mrb[4].mxu1 %vm587_vm4, %v610_v49 }
 0x51e   : > { %v651_v57 = vpop.f32.mrb[4].mxu1 }
 0x51f   : > { %v666_v58 = vadd.f32 %v664_v56, %v651_v57  ;;  %v896_v59 = vpop.f32.mrb[5].mxu1 }
 0x520   : > { %v654_v61 = vpop.f32.mrb[6].mxu1 }
 0x521   : > { %v861_v62 = vpack.c.bf16 %v666_v58, %v666_v58  ;;  %v667_v63 = vadd.f32 %v665_v60, %v654_v61  ;;  %v897_v0 = vpop.f32.mrb[7].mxu1 }
 0x523   : > { %677 = vst.msk [vmem:[%s400_s16] sm:$0xf] %vm676_vm6, %v861_v62  ;;  %v862_v1 = vpack.c.bf16 %v667_v63, %v667_v63 }
 0x525   : > { %678 = vst.msk [vmem:[%s400_s16 + $0x4] sm:$0xf] %vm676_vm6, %v862_v1 }
 0x526 PF: > { %s20_s26 = sadd.s32 1, %s1128_s26   ;;  %s1391_s24 = smov %s1124_s25 }
 0x527   : > { %p17_p8 = scmp.ge.s32.totalorder %s20_s26, 4   ;;  %s1392_s25 = smov %s1394_s9 }
 0x529   :  { %19 = sbr.rel (!%p17_p8) target bundleno = 4 (0x4), region = 101 }
 0x530   :  { %709 = vsyncpa [#allocation3], 1 }
 0x531   :  { %711 = vsyncpa [#allocation3 + $0x1], 1 }
 0x532   :  { %712 = vsyncpa [#allocation5], 1 }
 0x533   :  { %713 = vsyncpa [#allocation8], 1 }

// kernel: _lambda_.5
= control target key start
LH: loop header
LB: loop body
LE: loop exit
PB: predicated region body
PF: predicated region fallthrough
CT: control target
= control target key end

     0   :  { %s17500_s25 = smov 0   ;;  %s20830_s0 = inlined_call_operand.vmem [shape: bf16[16,2,32], index: 0, kind: input, shape index: {}]   ;;  %s20831_s1 = inlined_call_operand.vmem [shape: bf16[32,96], index: 1, kind: input, shape index: {}]   ;;  %s20832_s2 = inlined_call_operand.vmem [shape: f32[1,96], index: 2, kind: input, shape index: {}]   ;;  %s20833_s3 = inlined_call_operand.vmem [shape: bf16[32,32], index: 3, kind: input, shape index: {}]   ;;  %s20834_s4 = inlined_call_operand.vmem [shape: f32[1,32], index: 4, kind: input, shape index: {}]   ;;  %s20835_s5 = inlined_call_operand.vmem [shape: f32[1,32], index: 5, kind: input, shape index: {}, may-alias: {5,11}]   ;;  %s20836_s6 = inlined_call_operand.vmem [shape: f32[1,32], index: 6, kind: input, shape index: {}, may-alias: {6,12}]   ;;  %s20837_s7 = inlined_call_operand.vmem [shape: bf16[32,2048], index: 7, kind: input, shape index: {}]   ;;  %s20838_s8 = inlined_call_operand.vmem [shape: f32[1,2048], index: 8, kind: input, shape index: {}]   ;;  %s20839_s9 = inlined_call_operand.vmem [shape: bf16[2048,32], index: 9, kind: input, shape index: {}]   ;;  %s20840_s10 = inlined_call_operand.vmem [shape: f32[1,32], index: 10, kind: input, shape index: {}]   ;;  %s20841_s11 = inlined_call_operand.vmem [shape: f32[1,32], index: 11, kind: input, shape index: {}, may-alias: {5,11}]   ;;  %s20842_s12 = inlined_call_operand.vmem [shape: f32[1,32], index: 12, kind: input, shape index: {}, may-alias: {6,12}]   ;;  %s20843_s13 = inlined_call_operand.vmem [shape: bf16[16,2,32], index: 13, kind: output, shape index: {}]  }
   0x1   :  { %20899 = sst [smem:[#allocation4_spill]] %s20830_s0 }
   0x2   :  { %20900 = sst [smem:[#allocation5_spill]] %s20834_s4 }
   0x3   :  { %20901 = sst [smem:[#allocation6_spill]] %s20841_s11 }
   0x4   :  { %20902 = sst [smem:[#allocation7_spill]] %s20842_s12 }
   0x5   :  { %20903 = sst [smem:[#allocation8_spill]] %s20843_s13 }
   0x6 LB: > { %20904 = sst [smem:[#allocation2_spill]] %s17402_s25  ;;  %s14210_s26 = sadd.s32 4294967295, %s17402_s25   ;;  %s17402_s25 = sphi %s17500_s25, %s23_s25  }
   0x7   : > { %p14214_p0 = scmp.ge.s32.totalorder %s17402_s25, 1  ;;  %p387_p1 = scmp.lt.s32.totalorder %s17402_s25, 5 }
   0x9   : > { %p388_p2 = pnand %p14214_p0, %p387_p1 }
   0xb   : > { %391 = sbr.rel (%p388_p2) target bundleno = 19322 (0x4b7a), region = 72 }
  0x12   : > { %v16715_v0 = vld [vmem:[%s20831_s1] sm:$0xff]   ;;  %v17404_v1 = vmov 0.0   ;;  %v16716_v2 = vld [vmem:[%s20831_s1 + $0x8] sm:$0xff]   ;;  %vm17405_vm0 = vmmov 0   ;;  %s14215_s14 = sshll.u32 %s14210_s26, 2  ;;  %vm464_vm1 = vcmask 261120  }
  0x13   : > { %15957 = vmatprep.subr.bf16.mxu0 %v17404_v1  ;;  %15965 = vmatprep.subr.bf16.mxu1 %v17404_v1  ;;  %p430_p3 = scmp.lt.s32.totalorder %s14215_s14, 15  ;;  %s20906_s0 = sld [smem:[#allocation4_spill]]  ;;  %v14217_v4 = vld [vmem:[%s20832_s2] ss:$0 sm:$0xff]  ;;  %vm589_vm2 = vcmask 1040384   ;;  %vm523_vm3 = vcmask 31744  }
  0x14   : > { %15958 = vmatpush3.bf16.msra.mxu0 %v16715_v0  ;;  %15961 = vmatprep.mubr.msk.bf16.mxu0 %vm17405_vm0, %v17404_v1  ;;  %s20886_s20 = smov 64   ;;  %s20888_s21 = smov 96   ;;  %vm570_vm4 = vcmask 9216   ;;  %vm585_vm5 = vcmask 15360   ;;  %v634_v37 = vld [vmem:[%s20833_s3] sm:$0x3] }
  0x15   : > { %15959 = vmatprep.subr.bf16.mxu0 %v17404_v1  ;;  %15967 = vmatprep.mubr.msk.bf16.mxu1 %vm17405_vm0, %v17404_v1  ;;  %s20959_s14 = smov (!%p430_p3, %s14215_s14), 15  ;;  %s20884_s22 = smov 92   ;;  %vm638_vm6 = vcmask 1041408   ;;  %vm1813_vm7 = vcmask 254976   ;;  %vm3874_vm8 = vcmask 253952  }
  0x16   : > { %20905 = sst [smem:[#allocation3_spill]] %s20959_s14  ;;  %s20882_s23 = smov 124   ;;  %v640_v38 = vsel %vm638_vm6, %v634_v37, 0 }
  0x17   : > { %s20880_s24 = smov 88   ;;  %s20878_s26 = smov 120  }
  0x18   : > { %15960 = vmatpush3.bf16.msra.mxu0 %v16716_v2  ;;  %s20876_s29 = smov 56   ;;  %s20874_s30 = smov 84  }
  0x19   : > { %s17527_s17 = scalar_lea.vmem %s20906_s0, %s20959_s14  ;;  %15971 = vmatprep.subr.bf16.mxu0 %v17404_v1  ;;  %s20872_s15 = smov 116  }
  0x1a   : > { %v440_v3 = vld [vmem:[%s17527_s17] sm:$0x1]  ;;  %s20870_s16 = smov 80   ;;  %s20844_s18 = smov 112  }
  0x1b   : > { %15962 = vmatmul.mubr.msk.bf16.vlgmr.msra.gmra.mrb[0].mxu0 %vm464_vm1, %v440_v3  ;;  %s20856_s19 = smov 48   ;;  %s20854_s27 = smov 76  }
  0x1c   : > { %15973 = vmatprep.mubr.msk.bf16.mxu0 %vm17405_vm0, %v17404_v1  ;;  %s20848_s28 = smov 108   ;;  %s20907_s4 = sld [smem:[#allocation5_spill]] }
  0x1d   : > { %s20921_s0 = smov 52   ;;  %s20922_s13 = smov 68  }
  0x1e   : > { %s20923_s25 = smov 100   ;;  %s20925_s12 = smov 40  }
  0x1f   : > { %s20927_s14 = smov 96   ;;  %s20928_s11 = smov 64  }
  0xee   : > { %v502_v5 = vpop.f32.mrb[0].mxu0 }
  0xef   : > { %v503_v6 = vadd.f32 %v14217_v4, %v502_v5  ;;  %v15963_v7 = vpop.f32.mrb[1].mxu0 }
  0xf0   : > { %v505_v8 = vpop.f32.mrb[2].mxu0 }
  0xf1   : > { %v17537_v9 = vpack.c.bf16 %v503_v6, %v503_v6  ;;  %v15964_v10 = vpop.f32.mrb[3].mxu0  ;;  %v508_v11 = vmul.f32 0.5, %v503_v6 }
  0xf3   : > { %583 = vrot.lane.b32.xlu1 %v17537_v9, %s20886_s20  ;;  %521 = vrot.lane.b32.xlu0 %v17537_v9, %s20888_s21  ;;  %v17549_v16 = vpack.c.bf16 %v508_v11, %v508_v11 }
  0xf7   : > { %686 = vrot.lane.b32.xlu1 %v17537_v9, %s20884_s22 }
 0x165   : > { %v584_v12 = vpop.permute.xlu1 %583  ;;  %v522_v13 = vpop.permute.xlu0 %521 }
 0x166   : > { %v591_v14 = vsel %vm589_vm2, %v584_v12, 0  ;;  %v528_v15 = vsel %vm523_vm3, %v522_v13, 0 }
 0x167   : > { %15966 = vmatpush3.bf16.xpose.msra.mxu1 %v528_v15  ;;  %15972 = vmatpush3.bf16.msra.mxu0 %v591_v14 }
 0x168   : > { %15983 = vmatprep.subr.bf16.mxu0 %v17404_v1  ;;  %15977 = vmatprep.subr.bf16.mxu1 %v17404_v1 }
 0x169   : > { %v687_v27 = vpop.permute.xlu1 %686 }
 0x16a   : > { %v692_v33 = vsel %vm523_vm3, %v687_v27, 0 }
 0x16e   : > { %15968 = vmatmul.mubr.msk.bf16.vlgmr.msra.gmra.mrb[0].mxu1 %vm523_vm3, %v17549_v16 }
 0x16f   : > { %15979 = vmatprep.mubr.msk.bf16.mxu1 %vm17405_vm0, %v17404_v1  ;;  %15978 = vmatpush3.bf16.msra.mxu1 %v640_v38 }
 0x170   : > { %15989 = vmatprep.subr.bf16.mxu1 %v17404_v1 }
 0x241   : > { %v564_v17 = vpop.f32.mrb[0].mxu1 }
 0x242   : > { %v15969_v18 = vpop.f32.mrb[1].mxu1  ;;  %v571_v19 = vsel %vm570_vm4, %v564_v17, -inf }
 0x243   : > { %572 = vmax.xlane.f32.xlu0 %v571_v19  ;;  %v567_v20 = vpop.f32.mrb[2].mxu1 }
 0x244   : > { %v15970_v21 = vpop.f32.mrb[3].mxu1 }
 0x2d0   : > { %v573_v22 = vpop.xlane.xlu0 %572 }
 0x2d1   : > { %v574_v23 = vsub.f32 %v564_v17, %v573_v22 }
 0x2d3   : > { %v575_v24 = vmul.f32 1.442695, %v574_v23 }
 0x2d5   : > { %17251 = vpow2.f32 %v575_v24 }
 0x2df   : > { %v17252_v25 = vpop.eup %17251 }
 0x2e0   : > { %v577_v26 = vsel %vm570_vm4, %v17252_v25, 0.0 }
 0x2e1   : > { %578 = vadd.xlane.f32.xlu1 %v577_v26 }
 0x2f2   : > { %684 = vrot.lane.b32.xlu1 %v17549_v16, %s20882_s23 }
 0x2f6   : > { %849 = vrot.lane.b32.xlu1 %v17537_v9, %s20880_s24  ;;  %s20911_s24 = smov 84  }
 0x2fa   : > { %847 = vrot.lane.b32.xlu1 %v17549_v16, %s20878_s26  ;;  %s20912_s26 = smov 116  }
 0x36e   : > { %v579_v28 = vpop.xlane.xlu1 %578 }
 0x36f   : > { %17253 = vrcp.f32 %v579_v28 }
 0x372   : > { %v685_v32 = vpop.permute.xlu1 %684 }
 0x376   : > { %v850_v34 = vpop.permute.xlu1 %849 }
 0x377   : > { %v855_v35 = vsel %vm523_vm3, %v850_v34, 0 }
 0x379   : > { %v17254_v29 = vpop.eup %17253 }
 0x37a   : > { %v581_v30 = vmul.f32 %v17254_v29, %v17252_v25  ;;  %v848_v36 = vpop.permute.xlu1 %847 }
 0x37c   : > { %v582_v31 = vpack.c.bf16 %v581_v30, %v581_v30 }
 0x37e   : > { %15974 = vmatmul.mubr.msk.bf16.vlgmr.msra.gmra.mrb[4].mxu0 %vm585_vm5, %v582_v31 }
 0x37f   : > { %15984 = vmatpush3.bf16.xpose.msra.mxu0 %v692_v33  ;;  %15985 = vmatprep.mubr.msk.bf16.mxu0 %vm17405_vm0, %v17404_v1 }
 0x380   : > { %16001 = vmatprep.subr.bf16.mxu0 %v17404_v1 }
 0x386   : > { %15986 = vmatmul.mubr.msk.bf16.vlgmr.msra.gmra.mrb[8].mxu0 %vm523_vm3, %v685_v32 }
 0x387   : > { %16002 = vmatpush3.bf16.xpose.msra.mxu0 %v855_v35  ;;  %16003 = vmatprep.mubr.msk.bf16.mxu0 %vm17405_vm0, %v17404_v1 }
 0x388   : > { %16007 = vmatprep.subr.bf16.mxu0 %v17404_v1 }
 0x38e   : > { %16004 = vmatmul.mubr.msk.bf16.vlgmr.msra.gmra.mrb[12].mxu0 %vm523_vm3, %v848_v36 }
 0x38f   : > { %16009 = vmatprep.mubr.msk.bf16.mxu0 %vm17405_vm0, %v17404_v1 }
 0x451   : > { %v627_v39 = vpop.f32.mrb[4].mxu0 }
 0x452   : > { %v633_v40 = vpack.c.bf16 %v627_v39, %v627_v39  ;;  %v15975_v41 = vpop.f32.mrb[5].mxu0 }
 0x453   : > { %v630_v42 = vpop.f32.mrb[6].mxu0 }
 0x454   : > { %v15976_v43 = vpop.f32.mrb[7].mxu0  ;;  %15980 = vmatmul.mubr.msk.bf16.vlgmr.msra.gmra.mrb[4].mxu1 %vm523_vm3, %v633_v40 }
 0x455   : > { %15991 = vmatprep.mubr.msk.bf16.mxu1 %vm17405_vm0, %v17404_v1 }
 0x459   : > { %v17584_v44 = vpop.f32.mrb[8].mxu0 }
 0x45a   : > { %v15987_v45 = vpop.f32.mrb[9].mxu0  ;;  %v734_v22 = vsel %vm570_vm4, %v17584_v44, -inf }
 0x45b   : > { %v731_v46 = vpop.f32.mrb[10].mxu0 }
 0x45c   : > { %v15988_v47 = vpop.f32.mrb[11].mxu0 }
 0x461   : > { %v891_v48 = vpop.f32.mrb[12].mxu0 }
 0x462   : > { %v16005_v49 = vpop.f32.mrb[13].mxu0  ;;  %v897_v50 = vsel %vm570_vm4, %v891_v48, -inf }
 0x463   : > { %898 = vmax.xlane.f32.xlu0 %v897_v50  ;;  %v894_v51 = vpop.f32.mrb[14].mxu0 }
 0x464   : > { %v16006_v52 = vpop.f32.mrb[15].mxu0 }
 0x465   : > { %v16717_v52 = vld [vmem:[%s20833_s3] ss:$0 sps:$4 sm:$0xcc]  }
 0x479   : > { %909 = vrot.lane.b32.xlu0 %v17537_v9, %s20876_s29  ;;  %s20916_s29 = smov 76  }
 0x47d   : > { %1008 = vrot.lane.b32.xlu0 %v17537_v9, %s20874_s30  ;;  %s20917_s30 = smov 108  }
 0x481   : > { %1006 = vrot.lane.b32.xlu0 %v17549_v16, %s20872_s15  ;;  %s20910_s15 = smov 56  }
 0x485   : > { %1171 = vrot.lane.b32.xlu0 %v17537_v9, %s20870_s16  ;;  %s20913_s16 = smov 80  }
 0x489   : > { %1169 = vrot.lane.b32.xlu0 %v17549_v16, %s20844_s18  ;;  %s20846_s18 = smov 72  }
 0x4f0   : > { %v899_v53 = vpop.xlane.xlu0 %898 }
 0x4f1   : > { %v900_v54 = vsub.f32 %v891_v48, %v899_v53  ;;  %v799_v53 = vrot.slane %v16717_v52, 2 }
 0x4f3   : > { %v901_v55 = vmul.f32 1.442695, %v900_v54  ;;  %v804_v54 = vsel %vm638_vm6, %v799_v53, 0 }
 0x4f4   : > { %v910_v56 = vpop.permute.xlu0 %909 }
 0x4f5   : > { %17255 = vpow2.f32 %v901_v55  ;;  %v915_v57 = vsel %vm589_vm2, %v910_v56, 0 }
 0x4f6   : > { %16008 = vmatpush3.bf16.msra.mxu0 %v915_v57 }
 0x4f7   : > { %16019 = vmatprep.subr.bf16.mxu0 %v17404_v1 }
 0x4f8   : > { %v1009_v61 = vpop.permute.xlu0 %1008 }
 0x4f9   : > { %v1014_v3 = vsel %vm523_vm3, %v1009_v61, 0 }
 0x4fc   : > { %v1007_v2 = vpop.permute.xlu0 %1006 }
 0x4ff   : > { %v17256_v58 = vpop.eup %17255 }
 0x500   : > { %v903_v59 = vsel %vm570_vm4, %v17256_v58, 0.0  ;;  %v1172_v4 = vpop.permute.xlu0 %1171 }
 0x501   : > { %904 = vadd.xlane.f32.xlu1 %v903_v59  ;;  %v1177_v5 = vsel %vm523_vm3, %v1172_v4, 0 }
 0x504   : > { %v1170_v6 = vpop.permute.xlu0 %1169 }
 0x58e   : > { %v905_v60 = vpop.xlane.xlu1 %904 }
 0x58f   : > { %17257 = vrcp.f32 %v905_v60  ;;  %v958_v60 = vld [vmem:[%s20833_s3 + $0x4] sm:$0x3] }
 0x599   : > { %v17258_v62 = vpop.eup %17257 }
 0x59a   : > { %v907_v63 = vmul.f32 %v17258_v62, %v17256_v58 }
 0x59c   : > { %v908_v0 = vpack.c.bf16 %v907_v63, %v907_v63 }
 0x59e   : > { %16010 = vmatmul.mubr.msk.bf16.vlgmr.msra.gmra.mrb[16].mxu0 %vm585_vm5, %v908_v0 }
 0x59f   : > { %16020 = vmatpush3.bf16.xpose.msra.mxu0 %v1014_v3  ;;  %16021 = vmatprep.mubr.msk.bf16.mxu0 %vm17405_vm0, %v17404_v1  ;;  %v963_v3 = vsel %vm638_vm6, %v958_v60, 0 }
 0x5a0   : > { %16037 = vmatprep.subr.bf16.mxu0 %v17404_v1 }
 0x5a6   : > { %16022 = vmatmul.mubr.msk.bf16.vlgmr.msra.gmra.mrb[20].mxu0 %vm523_vm3, %v1007_v2 }
 0x5a7   : > { %16038 = vmatpush3.bf16.xpose.msra.mxu0 %v1177_v5  ;;  %16039 = vmatprep.mubr.msk.bf16.mxu0 %vm17405_vm0, %v17404_v1 }
 0x5a8   : > { %16043 = vmatprep.subr.bf16.mxu0 %v17404_v1 }
 0x5ae   : > { %16040 = vmatmul.mubr.msk.bf16.vlgmr.msra.gmra.mrb[24].mxu0 %vm523_vm3, %v1170_v6 }
 0x5af   : > { %16045 = vmatprep.mubr.msk.bf16.mxu0 %vm17405_vm0, %v17404_v1 }
 0x671   : > { %v17613_v7 = vpop.f32.mrb[16].mxu0 }
 0x672   : > { %v16011_v8 = vpop.f32.mrb[17].mxu0 }
 0x673   : > { %v954_v10 = vpop.f32.mrb[18].mxu0 }
 0x674   : > { %v16012_v11 = vpop.f32.mrb[19].mxu0 }
 0x679   : > { %v17615_v12 = vpop.f32.mrb[20].mxu0 }
 0x67a   : > { %v16023_v13 = vpop.f32.mrb[21].mxu0  ;;  %v1056_v35 = vsel %vm570_vm4, %v17615_v12, -inf }
 0x67b   : > { %v1053_v14 = vpop.f32.mrb[22].mxu0  ;;  %v957_v13 = vpack.c.bf16 %v17613_v7, %v17613_v7 }
 0x67c   : > { %v16024_v15 = vpop.f32.mrb[23].mxu0 }
 0x681   : > { %v1213_v17 = vpop.f32.mrb[24].mxu0 }
 0x682   : > { %v16041_v18 = vpop.f32.mrb[25].mxu0  ;;  %v1219_v19 = vsel %vm570_vm4, %v1213_v17, -inf }
 0x683   : > { %1220 = vmax.xlane.f32.xlu1 %v1219_v19  ;;  %v1216_v20 = vpop.f32.mrb[26].mxu0 }
 0x684   : > { %v16042_v21 = vpop.f32.mrb[27].mxu0 }
 0x687   : > { %735 = vmax.xlane.f32.xlu1 %v734_v22 }
 0x698   : > { %1231 = vrot.lane.b32.xlu1 %v17537_v9, %s20856_s19  ;;  %s20862_s19 = smov 68  }
 0x69c   : > { %1330 = vrot.lane.b32.xlu1 %v17537_v9, %s20854_s27  ;;  %s20860_s27 = smov 100  }
 0x6a0   : > { %1328 = vrot.lane.b32.xlu1 %v17549_v16, %s20848_s28  ;;  %s20850_s28 = smov 60  }
 0x6a4   : > { %1493 = vrot.lane.b32.xlu1 %v17537_v9, %s20846_s18  ;;  %s20852_s18 = smov 104  }
 0x710   : > { %v1221_v23 = vpop.xlane.xlu1 %1220 }
 0x711   : > { %v1222_v24 = vsub.f32 %v1213_v17, %v1221_v23 }
 0x713   : > { %v1223_v25 = vmul.f32 1.442695, %v1222_v24 }
 0x714   : > { %v736_v26 = vpop.xlane.xlu1 %735 }
 0x715   : > { %17259 = vpow2.f32 %v1223_v25  ;;  %v737_v27 = vsub.f32 %v17584_v44, %v736_v26 }
 0x717   : > { %v738_v28 = vmul.f32 1.442695, %v737_v27 }
 0x718   : > { %v1232_v29 = vpop.permute.xlu1 %1231 }
 0x719   : > { %17261 = vpow2.f32 %v738_v28  ;;  %v1237_v30 = vsel %vm589_vm2, %v1232_v29, 0 }
 0x71a   : > { %16044 = vmatpush3.bf16.msra.mxu0 %v1237_v30 }
 0x71b   : > { %16055 = vmatprep.subr.bf16.mxu0 %v17404_v1 }
 0x71c   : > { %v1331_v36 = vpop.permute.xlu1 %1330 }
 0x71d   : > { %v1336_v48 = vsel %vm523_vm3, %v1331_v36, 0 }
 0x71f   : > { %v17260_v31 = vpop.eup %17259 }
 0x720   : > { %v1225_v32 = vsel %vm570_vm4, %v17260_v31, 0.0  ;;  %v1329_v37 = vpop.permute.xlu1 %1328 }
 0x721   : > { %1226 = vadd.xlane.f32.xlu0 %v1225_v32 }
 0x723   : > { %v17262_v33 = vpop.eup %17261 }
 0x724   : > { %v740_v34 = vsel %vm570_vm4, %v17262_v33, 0.0  ;;  %v1494_v38 = vpop.permute.xlu1 %1493 }
 0x725   : > { %741 = vadd.xlane.f32.xlu1 %v740_v34  ;;  %v1499_v51 = vsel %vm523_vm3, %v1494_v38, 0  ;;  %v16718_v38 = vld [vmem:[%s20833_s3 + $0x4] ss:$0 sps:$4 sm:$0xcc]  }
 0x737   : > { %1491 = vrot.lane.b32.xlu0 %v17549_v16, %s20852_s18  ;;  %s20868_s18 = smov 52  }
 0x73b   : > { %746 = vrot.lane.b32.xlu0 %v17537_v9, %s20850_s28  ;;  %s20858_s28 = smov 44  }
 0x75a   : > { %1057 = vmax.xlane.f32.xlu0 %v1056_v35 }
 0x7ae   : > { %v1227_v39 = vpop.xlane.xlu0 %1226 }
 0x7af   : > { %17263 = vrcp.f32 %v1227_v39  ;;  %v1121_v39 = vrot.slane %v16718_v38, 2  ;;  %v17395_v38 = vld [vmem:[%s17527_s17] sm:$0x1] }
 0x7b2   : > { %v1492_v40 = vpop.permute.xlu0 %1491  ;;  %v742_v41 = vpop.xlane.xlu1 %741 }
 0x7b3   : > { %17265 = vrcp.f32 %v742_v41 }
 0x7b6   : > { %v747_v42 = vpop.permute.xlu0 %746 }
 0x7b7   : > { %v752_v43 = vsel %vm589_vm2, %v747_v42, 0 }
 0x7b8   : > { %15990 = vmatpush3.bf16.msra.mxu1 %v752_v43 }
 0x7b9   : > { %v17264_v44 = vpop.eup %17263  ;;  %15995 = vmatprep.subr.bf16.mxu1 %v17404_v1 }
 0x7ba   : > { %v1229_v45 = vmul.f32 %v17264_v44, %v17260_v31 }
 0x7bc   : > { %v1230_v46 = vpack.c.bf16 %v1229_v45, %v1229_v45 }
 0x7bd   : > { %v17266_v47 = vpop.eup %17265 }
 0x7be   : > { %16046 = vmatmul.mubr.msk.bf16.vlgmr.msra.gmra.mrb[28].mxu0 %vm585_vm5, %v1230_v46  ;;  %v744_v49 = vmul.f32 %v17266_v47, %v17262_v33 }
 0x7bf   : > { %16056 = vmatpush3.bf16.xpose.msra.mxu0 %v1336_v48  ;;  %16057 = vmatprep.mubr.msk.bf16.mxu0 %vm17405_vm0, %v17404_v1  ;;  %v1280_v48 = vld [vmem:[%s20833_s3 + $0x8] sm:$0x3] }
 0x7c0   : > { %v745_v50 = vpack.c.bf16 %v744_v49, %v744_v49  ;;  %16073 = vmatprep.subr.bf16.mxu0 %v17404_v1  ;;  %v1285_v53 = vsel %vm638_vm6, %v1280_v48, 0 }
 0x7c2   : > { %15992 = vmatmul.mubr.msk.bf16.vlgmr.msra.gmra.mrb[8].mxu1 %vm585_vm5, %v745_v50 }
 0x7c3   : > { %15997 = vmatprep.mubr.msk.bf16.mxu1 %vm17405_vm0, %v17404_v1  ;;  %15996 = vmatpush3.bf16.msra.mxu1 %v804_v54 }
 0x7c4   : > { %16013 = vmatprep.subr.bf16.mxu1 %v17404_v1 }
 0x7c6   : > { %16058 = vmatmul.mubr.msk.bf16.vlgmr.msra.gmra.mrb[32].mxu0 %vm523_vm3, %v1329_v37 }
 0x7c7   : > { %16074 = vmatpush3.bf16.xpose.msra.mxu0 %v1499_v51  ;;  %16075 = vmatprep.mubr.msk.bf16.mxu0 %vm17405_vm0, %v17404_v1 }
 0x7c8   : > { %16079 = vmatprep.subr.bf16.mxu0 %v17404_v1 }
 0x7ce   : > { %16076 = vmatmul.mubr.msk.bf16.vlgmr.msra.gmra.mrb[36].mxu0 %vm523_vm3, %v1492_v40  ;;  %v1126_v40 = vsel %vm638_vm6, %v1121_v39, 0  ;;  %v511_v39 = vunpack.c.l.bf16 %v17395_v38  ;;  %v16742_v38 = vld [vmem:[%s20839_s9 + $0xe0] sm:$0xff]  }
 0x7cf   : > { %16081 = vmatprep.mubr.msk.bf16.mxu0 %vm17405_vm0, %v17404_v1 }
 0x7e7   : > { %v1058_v55 = vpop.xlane.xlu0 %1057 }
 0x7e8   : > { %v1059_v56 = vsub.f32 %v17615_v12, %v1058_v55 }
 0x7ea   : > { %v1060_v62 = vmul.f32 1.442695, %v1059_v56 }
 0x7ec   : > { %17267 = vpow2.f32 %v1060_v62 }
 0x7f6   : > { %v17268_v17 = vpop.eup %17267 }
 0x7f7   : > { %v1062_v20 = vsel %vm570_vm4, %v17268_v17, 0.0 }
 0x891   : > { %v17663_v57 = vpop.f32.mrb[28].mxu0 }
 0x892   : > { %v16047_v58 = vpop.f32.mrb[29].mxu0 }
 0x893   : > { %v1276_v59 = vpop.f32.mrb[30].mxu0  ;;  %v1279_v58 = vpack.c.bf16 %v17663_v57, %v17663_v57  ;;  %v16719_v57 = vld [vmem:[%s20833_s3 + $0x8] ss:$0 sps:$4 sm:$0xcc]  }
 0x894   : > { %v16048_v61 = vpop.f32.mrb[31].mxu0 }
 0x895   : > { %v788_v63 = vpop.f32.mrb[8].mxu1 }
 0x896   : > { %v794_v0 = vpack.c.bf16 %v788_v63, %v788_v63  ;;  %v15993_v2 = vpop.f32.mrb[9].mxu1  ;;  %v1443_v63 = vrot.slane %v16719_v57, 2  ;;  %v1854_v57 = vld [vmem:[%s20837_s7 + $0x8] sm:$0xff] }
 0x897   : > { %v791_v4 = vpop.f32.mrb[10].mxu1 }
 0x898   : > { %v15994_v5 = vpop.f32.mrb[11].mxu1  ;;  %15998 = vmatmul.mubr.msk.bf16.vlgmr.msra.gmra.mrb[4].mxu1 %vm523_vm3, %v794_v0  ;;  %v1448_v0 = vsel %vm638_vm6, %v1443_v63, 0  ;;  %v1856_v63 = vld [vmem:[%s20837_s7 + $0x48] sm:$0xff] }
 0x899   : > { %v1372_v6 = vpop.f32.mrb[32].mxu0  ;;  %16014 = vmatpush3.bf16.msra.mxu1 %v963_v3  ;;  %16015 = vmatprep.mubr.msk.bf16.mxu1 %vm17405_vm0, %v17404_v1 }
 0x89a   : > { %v16059_v8 = vpop.f32.mrb[33].mxu0  ;;  %16025 = vmatprep.subr.bf16.mxu1 %v17404_v1  ;;  %v1378_v7 = vsel %vm570_vm4, %v1372_v6, -inf }
 0x89b   : > { %v1375_v10 = vpop.f32.mrb[34].mxu0 }
 0x89c   : > { %v16060_v11 = vpop.f32.mrb[35].mxu0 }
 0x8a1   : > { %v1535_v12 = vpop.f32.mrb[36].mxu0 }
 0x8a2   : > { %v16077_v14 = vpop.f32.mrb[37].mxu0  ;;  %v1541_v15 = vsel %vm570_vm4, %v1535_v12, -inf }
 0x8a3   : > { %1542 = vmax.xlane.f32.xlu1 %v1541_v15  ;;  %v1538_v18 = vpop.f32.mrb[38].mxu0 }
 0x8a4   : > { %16016 = vmatmul.mubr.msk.bf16.vlgmr.msra.gmra.mrb[4].mxu1 %vm523_vm3, %v957_v13  ;;  %v16078_v19 = vpop.f32.mrb[39].mxu0  ;;  %v1602_v13 = vld [vmem:[%s20833_s3 + $0xc] sm:$0x3] }
 0x8a5   : > { %16027 = vmatprep.mubr.msk.bf16.mxu1 %vm17405_vm0, %v17404_v1  ;;  %v1607_v18 = vsel %vm638_vm6, %v1602_v13, 0  ;;  %v16733_v13 = vld [vmem:[%s20839_s9 + $0x60] sm:$0xff]  }
 0x8a7   : > { %1063 = vadd.xlane.f32.xlu1 %v1062_v20 }
 0x8b8   : > { %1068 = vrot.lane.b32.xlu1 %v17537_v9, %s20868_s18  ;;  %s20914_s18 = smov 112  }
 0x8bc   : > { %1652 = vrot.lane.b32.xlu1 %v17537_v9, %s20862_s19  ;;  %s20909_s19 = smov 120  }
 0x8c0   : > { %1650 = vrot.lane.b32.xlu1 %v17549_v16, %s20860_s27  ;;  %s20908_s27 = smov 88  }
 0x8e4   : > { %1379 = vmax.xlane.f32.xlu1 %v1378_v7 }
 0x8f5   : > { %1390 = vrot.lane.b32.xlu1 %v17537_v9, %s20858_s28  ;;  %s20864_s28 = smov 40  }
 0x930   : > { %v1543_v21 = vpop.xlane.xlu1 %1542 }
 0x931   : > { %v1544_v22 = vsub.f32 %v1535_v12, %v1543_v21 }
 0x933   : > { %v1545_v23 = vmul.f32 1.442695, %v1544_v22 }
 0x934   : > { %v1064_v24 = vpop.xlane.xlu1 %1063 }
 0x935   : > { %17269 = vpow2.f32 %v1545_v23 }
 0x936   : > { %17271 = vrcp.f32 %v1064_v24 }
 0x938   : > { %v1069_v25 = vpop.permute.xlu1 %1068 }
 0x939   : > { %v1074_v26 = vsel %vm589_vm2, %v1069_v25, 0 }
 0x93a   : > { %16026 = vmatpush3.bf16.msra.mxu1 %v1074_v26 }
 0x93b   : > { %16031 = vmatprep.subr.bf16.mxu1 %v17404_v1 }
 0x93c   : > { %v1653_v31 = vpop.permute.xlu1 %1652 }
 0x93d   : > { %v1658_v47 = vsel %vm523_vm3, %v1653_v31, 0 }
 0x93f   : > { %v17270_v16 = vpop.eup %17269 }
 0x940   : > { %v17272_v27 = vpop.eup %17271  ;;  %v1547_v28 = vsel %vm570_vm4, %v17270_v16, 0.0  ;;  %v1651_v32 = vpop.permute.xlu1 %1650 }
 0x941   : > { %1548 = vadd.xlane.f32.xlu0 %v1547_v28  ;;  %v1066_v29 = vmul.f32 %v17272_v27, %v17268_v17  ;;  %v16720_v28 = vld [vmem:[%s20833_s3 + $0xc] ss:$0 sps:$4 sm:$0xcc]  }
 0x943   : > { %v1067_v30 = vpack.c.bf16 %v1066_v29, %v1066_v29  ;;  %v1765_v29 = vrot.slane %v16720_v28, 2 }
 0x945   : > { %16028 = vmatmul.mubr.msk.bf16.vlgmr.msra.gmra.mrb[12].mxu1 %vm585_vm5, %v1067_v30 }
 0x946   : > { %16033 = vmatprep.mubr.msk.bf16.mxu1 %vm17405_vm0, %v17404_v1  ;;  %16032 = vmatpush3.bf16.msra.mxu1 %v1126_v40  ;;  %v14221_v40 = vld [vmem:[%s20907_s4] ss:$0 sm:$0xff] }
 0x947   : > { %16049 = vmatprep.subr.bf16.mxu1 %v17404_v1 }
 0x957   : > { %1553 = vrot.lane.b32.xlu0 %v17537_v9, %s20864_s28  ;;  %s20866_s28 = smov 36  }
 0x971   : > { %v1380_v33 = vpop.xlane.xlu1 %1379 }
 0x972   : > { %v1381_v34 = vsub.f32 %v1372_v6, %v1380_v33  ;;  %v1770_v33 = vsel %vm638_vm6, %v1765_v29, 0 }
 0x974   : > { %v1382_v35 = vmul.f32 1.442695, %v1381_v34 }
 0x975   : > { %v1391_v56 = vpop.permute.xlu1 %1390 }
 0x976   : > { %17273 = vpow2.f32 %v1382_v35  ;;  %v1396_v60 = vsel %vm589_vm2, %v1391_v56, 0 }
 0x980   : > { %v17274_v36 = vpop.eup %17273 }
 0x981   : > { %v1384_v37 = vsel %vm570_vm4, %v17274_v36, 0.0 }
 0x982   : > { %1385 = vadd.xlane.f32.xlu0 %v1384_v37 }
 0x9ce   : > { %v1549_v41 = vpop.xlane.xlu0 %1548 }
 0x9cf   : > { %17275 = vrcp.f32 %v1549_v41  ;;  %v519_v41 = vadd.f32 %v14221_v40, %v511_v39  ;;  %v16743_v39 = vld [vmem:[%s20839_s9 + $0x30] sm:$0xff]   ;;  %v16744_v40 = vld [vmem:[%s20839_s9 + $0xa0] sm:$0xff]  }
 0x9d2   : > { %v1554_v42 = vpop.permute.xlu0 %1553 }
 0x9d3   : > { %v1559_v43 = vsel %vm589_vm2, %v1554_v42, 0 }
 0x9d4   : > { %16080 = vmatpush3.bf16.msra.mxu0 %v1559_v43 }
 0x9d5   : > { %16091 = vmatprep.subr.bf16.mxu0 %v17404_v1 }
 0x9d9   : > { %v17276_v44 = vpop.eup %17275 }
 0x9da   : > { %v1551_v45 = vmul.f32 %v17276_v44, %v17270_v16 }
 0x9dc   : > { %v1552_v46 = vpack.c.bf16 %v1551_v45, %v1551_v45 }
 0x9de   : > { %16082 = vmatmul.mubr.msk.bf16.vlgmr.msra.gmra.mrb[40].mxu0 %vm585_vm5, %v1552_v46 }
 0x9df   : > { %16092 = vmatpush3.bf16.xpose.msra.mxu0 %v1658_v47  ;;  %16093 = vmatprep.mubr.msk.bf16.mxu0 %vm17405_vm0, %v17404_v1 }
 0x9e6   : > { %16094 = vmatmul.mubr.msk.bf16.vlgmr.msra.gmra.mrb[44].mxu0 %vm523_vm3, %v1651_v32 }
 0xa0f   : > { %v1386_v50 = vpop.xlane.xlu0 %1385 }
 0xa10   : > { %17277 = vrcp.f32 %v1386_v50 }
 0xa18   : > { %v1110_v49 = vpop.f32.mrb[12].mxu1 }
 0xa19   : > { %v1116_v51 = vpack.c.bf16 %v1110_v49, %v1110_v49  ;;  %v16029_v52 = vpop.f32.mrb[13].mxu1 }
 0xa1a   : > { %v1113_v54 = vpop.f32.mrb[14].mxu1  ;;  %v17278_v59 = vpop.eup %17277 }
 0xa1b   : > { %v16030_v55 = vpop.f32.mrb[15].mxu1  ;;  %16034 = vmatmul.mubr.msk.bf16.vlgmr.msra.gmra.mrb[4].mxu1 %vm523_vm3, %v1116_v51  ;;  %v1388_v61 = vmul.f32 %v17278_v59, %v17274_v36  ;;  %v1855_v54 = vld [vmem:[%s20837_s7 + $0x40] sm:$0xff] }
 0xa1c   : > { %16050 = vmatpush3.bf16.msra.mxu1 %v1285_v53  ;;  %16051 = vmatprep.mubr.msk.bf16.mxu1 %vm17405_vm0, %v17404_v1  ;;  %v1853_v53 = vld [vmem:[%s20837_s7] sm:$0xff] }
 0xa1d   : > { %16061 = vmatprep.subr.bf16.mxu1 %v17404_v1  ;;  %v1389_v62 = vpack.c.bf16 %v1388_v61, %v1388_v61  ;;  %v14254_v55 = vcombine.high %v1853_v53, %v1855_v54  ;;  %v14253_v56 = vcombine.low %v1853_v53, %v1855_v54  ;;  %v1859_v59 = vld [vmem:[%s20837_s7 + $0xc0] sm:$0xff]  ;;  %v2354_v53 = vld [vmem:[%s20837_s7 + $0x18] sm:$0xff] }
 0xa1e   : > { %v2356_v54 = vld [vmem:[%s20837_s7 + $0x58] sm:$0xff] }
 0xa1f   : > { %1926 = vmatprep.subr.bf16.mxu0 %v14254_v55  ;;  %v14297_v55 = vcombine.low %v2354_v53, %v2356_v54 }
 0xa20   : > { %1927 = vmatpush1.bf16.msra.mxu0 %v14253_v56  ;;  %v14298_v56 = vcombine.high %v2354_v53, %v2356_v54  ;;  %v16770_v53 = vld [vmem:[%s20839_s9 + $0x1d8] sm:$0xff]   ;;  %v16771_v54 = vld [vmem:[%s20839_s9 + $0x128] sm:$0xff]  }
 0xa27   : > { %16052 = vmatmul.mubr.msk.bf16.vlgmr.msra.gmra.mrb[4].mxu1 %vm523_vm3, %v1279_v58  ;;  %v1857_v58 = vld [vmem:[%s20837_s7 + $0x80] sm:$0xff] }
 0xa28   : > { %16062 = vmatpush3.bf16.msra.mxu1 %v1396_v60  ;;  %16063 = vmatprep.mubr.msk.bf16.mxu1 %vm17405_vm0, %v17404_v1  ;;  %v14258_v60 = vcombine.high %v1857_v58, %v1859_v59  ;;  %v14257_v61 = vcombine.low %v1857_v58, %v1859_v59  ;;  %v1863_v58 = vlaneseq }
 0xa29   : > { %16067 = vmatprep.subr.bf16.mxu1 %v17404_v1 }
 0xa2a   : > { %1928 = vmatprep.subr.bf16.mxu0 %v14258_v60  ;;  %v1864_v59 = vshrl.u32 %v1863_v58, 7  ;;  %v16774_v58 = vld [vmem:[%s20839_s9 + $0x1e0] sm:$0xff]  }
 0xa2b   : > { %1929 = vmatpush1.bf16.msra.mxu0 %v14257_v61  ;;  %v1861_v61 = vld [vmem:[%s20838_s8] sm:$0xf] }
 0xa2c   : > { %v17914_v60 = vsub.s32 0, %v1864_v59 }
 0xa2f   : > { %16064 = vmatmul.mubr.msk.bf16.vlgmr.msra.gmra.mrb[16].mxu1 %vm585_vm5, %v1389_v62  ;;  %v17429_v62 = vmov 0  }
 0xa30   : > { %16069 = vmatprep.mubr.msk.bf16.mxu1 %vm17405_vm0, %v17404_v1  ;;  %16068 = vmatpush3.bf16.msra.mxu1 %v1448_v0  ;;  %v14255_v0 = vcombine.low %v1854_v57, %v1856_v63 }
 0xa31   : > { %16085 = vmatprep.subr.bf16.mxu1 %v17404_v1  ;;  %1958 = vmatprep.mubr.bf16.mxu0 %v17429_v62 }
 0xab1   : > { %v1595_v2 = vpop.f32.mrb[40].mxu0 }
 0xab2   : > { %v16083_v3 = vpop.f32.mrb[41].mxu0  ;;  %v1601_v7 = vpack.c.bf16 %v1595_v2, %v1595_v2  ;;  %v14256_v2 = vcombine.high %v1854_v57, %v1856_v63  ;;  %v17919_v57 = vsub.s32 1, %v1864_v59  ;;  %v1866_v63 = vrot.slane %v1861_v61, %v17914_v60 }
 0xab3   : > { %v1598_v4 = vpop.f32.mrb[42].mxu0  ;;  %v16721_v3 = vld [vmem:[%s20839_s9 + $0x40] sm:$0xff]  }
 0xab4   : > { %v16084_v5 = vpop.f32.mrb[43].mxu0  ;;  %1967 = vmatprep.subr.bf16.mxu0 %v14256_v2  ;;  %v16722_v4 = vld [vmem:[%s20839_s9] sm:$0xff]  }
 0xab5   : > { %v16723_v5 = vld [vmem:[%s20839_s9 + $0x48] sm:$0xff]  }
 0xab9   : > { %v1694_v6 = vpop.f32.mrb[44].mxu0 }
 0xaba   : > { %v16095_v8 = vpop.f32.mrb[45].mxu0  ;;  %v1700_v10 = vsel %vm570_vm4, %v1694_v6, -inf }
 0xabb   : > { %1701 = vmax.xlane.f32.xlu0 %v1700_v10  ;;  %v1697_v11 = vpop.f32.mrb[46].mxu0  ;;  %v16725_v8 = vld [vmem:[%s20839_s9 + $0x50] sm:$0xff]  }
 0xabc   : > { %v16096_v12 = vpop.f32.mrb[47].mxu0  ;;  %v16727_v10 = vld [vmem:[%s20839_s9 + $0x10] sm:$0xff]   ;;  %v16729_v11 = vld [vmem:[%s20839_s9 + $0x58] sm:$0xff]  }
 0xabd   : > { %v16731_v12 = vld [vmem:[%s20839_s9 + $0x18] sm:$0xff]  }
 0xb02   : > { %v1432_v14 = vpop.f32.mrb[16].mxu1 }
 0xb03   : > { %v1438_v15 = vpack.c.bf16 %v1432_v14, %v1432_v14  ;;  %v16065_v17 = vpop.f32.mrb[17].mxu1  ;;  %v16735_v14 = vld [vmem:[%s20839_s9 + $0x20] sm:$0xff]  }
 0xb04   : > { %v1435_v19 = vpop.f32.mrb[18].mxu1  ;;  %v16739_v17 = vld [vmem:[%s20839_s9 + $0x28] sm:$0xff]  }
 0xb05   : > { %v16066_v20 = vpop.f32.mrb[19].mxu1  ;;  %16070 = vmatmul.mubr.msk.bf16.vlgmr.msra.gmra.mrb[4].mxu1 %vm523_vm3, %v1438_v15  ;;  %v16737_v15 = vld [vmem:[%s20839_s9 + $0x68] sm:$0xff]  }
 0xb06   : > { %16086 = vmatpush3.bf16.msra.mxu1 %v1607_v18  ;;  %16087 = vmatprep.mubr.msk.bf16.mxu1 %vm17405_vm0, %v17404_v1 }
 0xb07   : > { %16097 = vmatprep.subr.bf16.mxu1 %v17404_v1 }
 0xb11   : > { %16088 = vmatmul.mubr.msk.bf16.vlgmr.msra.gmra.mrb[4].mxu1 %vm523_vm3, %v1601_v7 }
 0xb12   : > { %16099 = vmatprep.mubr.msk.bf16.mxu1 %vm17405_vm0, %v17404_v1 }
 0xb48   : > { %v1702_v21 = vpop.xlane.xlu0 %1701 }
 0xb49   : > { %v1703_v22 = vsub.f32 %v1694_v6, %v1702_v21  ;;  %v16724_v6 = vld [vmem:[%s20839_s9 + $0x8] sm:$0xff]   ;;  %v14250_v21 = vld [vmem:[%s20835_s5] ss:$0 sm:$0xff] }
 0xb4b   : > { %v1704_v23 = vmul.f32 1.442695, %v1703_v22 }
 0xb4d   : > { %17279 = vpow2.f32 %v1704_v23  ;;  %v14251_v23 = vld [vmem:[%s20836_s6] ss:$0 sm:$0xff] }
 0xb57   : > { %v17280_v24 = vpop.eup %17279 }
 0xb58   : > { %v1706_v25 = vsel %vm570_vm4, %v17280_v24, 0.0 }
 0xb59   : > { %1707 = vadd.xlane.f32.xlu0 %v1706_v25  ;;  %v1858_v25 = vld [vmem:[%s20837_s7 + $0x88] sm:$0xff] }
 0xb6f   : > { %1712 = vrot.lane.b32.xlu0 %v17537_v9, %s20866_s28  ;;  %s20915_s28 = smov 48  }
 0xbe6   : > { %v1708_v26 = vpop.xlane.xlu0 %1707 }
 0xbe7   : > { %17281 = vrcp.f32 %v1708_v26  ;;  %v1860_v26 = vld [vmem:[%s20837_s7 + $0xc8] sm:$0xff] }
 0xbe8   : > { %v14260_v28 = vcombine.high %v1858_v25, %v1860_v26  ;;  %v14259_v29 = vcombine.low %v1858_v25, %v1860_v26 }
 0xbea   : > { %v1713_v16 = vpop.permute.xlu0 %1712 }
 0xbeb   : > { %v1718_v27 = vsel %vm589_vm2, %v1713_v16, 0 }
 0xbec   : > { %16098 = vmatpush3.bf16.msra.mxu1 %v1718_v27 }
 0xbed   : > { %16103 = vmatprep.subr.bf16.mxu1 %v17404_v1 }
 0xbf1   : > { %v17282_v30 = vpop.eup %17281 }
 0xbf2   : > { %v1710_v31 = vmul.f32 %v17282_v30, %v17280_v24  ;;  %v16726_v30 = vld [vmem:[%s20839_s9 + $0xc0] sm:$0xff]  }
 0xbf4   : > { %v1711_v32 = vpack.c.bf16 %v1710_v31, %v1710_v31  ;;  %v16728_v31 = vld [vmem:[%s20839_s9 + $0x80] sm:$0xff]  }
 0xbf6   : > { %16100 = vmatmul.mubr.msk.bf16.vlgmr.msra.gmra.mrb[20].mxu1 %vm585_vm5, %v1711_v32  ;;  %v16730_v32 = vld [vmem:[%s20839_s9 + $0xc8] sm:$0xff]  }
 0xbf7   : > { %16104 = vmatpush3.bf16.msra.mxu1 %v1770_v33  ;;  %16105 = vmatprep.mubr.msk.bf16.mxu1 %vm17405_vm0, %v17404_v1  ;;  %v16732_v33 = vld [vmem:[%s20839_s9 + $0x88] sm:$0xff]  }
 0xbf8   : > { %15100 = vmatprep.subr.bf16.mxu1 %v16721_v3 }
 0xcc9   : > { %v1754_v9 = vpop.f32.mrb[20].mxu1 }
 0xcca   : > { %v1760_v34 = vpack.c.bf16 %v1754_v9, %v1754_v9  ;;  %v16101_v35 = vpop.f32.mrb[21].mxu1  ;;  %v16734_v9 = vld [vmem:[%s20839_s9 + $0xd0] sm:$0xff]  }
 0xccb   : > { %v1757_v36 = vpop.f32.mrb[22].mxu1  ;;  %v16738_v35 = vld [vmem:[%s20839_s9 + $0xd8] sm:$0xff]  }
 0xccc   : > { %v16102_v37 = vpop.f32.mrb[23].mxu1  ;;  %16106 = vmatmul.mubr.msk.bf16.vlgmr.msra.gmra.mrb[4].mxu1 %vm523_vm3, %v1760_v34  ;;  %v16736_v34 = vld [vmem:[%s20839_s9 + $0x90] sm:$0xff]   ;;  %v16740_v36 = vld [vmem:[%s20839_s9 + $0x98] sm:$0xff]  }
 0xccd   : > { %15101 = vmatpush3.bf16.msra.mxu1 %v16722_v4  ;;  %v16741_v37 = vld [vmem:[%s20839_s9 + $0x70] sm:$0xff]  }
 0xcce   : > { %15102 = vmatprep.subr.bf16.mxu1 %v16723_v5  ;;  %v17923_v5 = vsub.s32 2, %v1864_v59 }
 0xcd1   : > { %15103 = vmatpush3.bf16.msra.mxu1 %v16724_v6 }
 0xcd2   : > { %15104 = vmatprep.subr.bf16.mxu1 %v16725_v8 }
 0xcd5   : > { %15105 = vmatpush3.bf16.msra.mxu1 %v16727_v10  ;;  %v17925_v10 = vsub.s32 3, %v1864_v59  ;;  %v16775_v59 = vld [vmem:[%s20839_s9 + $0x130] sm:$0xff]  }
 0xcd6   : > { %15106 = vmatprep.subr.bf16.mxu1 %v16729_v11 }
 0xcd9   : > { %15107 = vmatpush3.bf16.msra.mxu1 %v16731_v12 }
 0xcda   : > { %15108 = vmatprep.subr.bf16.mxu1 %v16733_v13 }
 0xcdd   : > { %15109 = vmatpush3.bf16.msra.mxu1 %v16735_v14  ;;  %v2357_v14 = vld [vmem:[%s20837_s7 + $0x90] sm:$0xff] }
 0xcde   : > { %15110 = vmatprep.subr.bf16.mxu1 %v16737_v15  ;;  %v2359_v15 = vld [vmem:[%s20837_s7 + $0xd0] sm:$0xff] }
 0xcdf   : > { %v14299_v26 = vcombine.low %v2357_v14, %v2359_v15 }
 0xce1   : > { %15111 = vmatpush3.bf16.msra.mxu1 %v16739_v17  ;;  %v1874_v17 = vrot.slane %v1861_v61, %v17923_v5 }
 0xce2   : > { %15112 = vmatprep.subr.bf16.mxu1 %v16741_v37  ;;  %v16755_v37 = vld [vmem:[%s20839_s9 + $0x148] sm:$0xff]  }
 0xce5   : > { %15113 = vmatpush3.bf16.msra.mxu1 %v16743_v39  ;;  %v16756_v39 = vld [vmem:[%s20839_s9 + $0x108] sm:$0xff]  }
 0xd9f   : > { %v1806_v42 = vpop.f32.mrb[4].mxu1 }
 0xda0   : > { %v16565_v43 = vadd.f32 %v1806_v42, %v519_v41  ;;  %v16107_v44 = vpop.f32.mrb[5].mxu1  ;;  %v16745_v41 = vld [vmem:[%s20839_s9 + $0x78] sm:$0xff]   ;;  %v16746_v42 = vld [vmem:[%s20839_s9 + $0xe8] sm:$0xff]  }
 0xda1   : > { %v1809_v45 = vpop.f32.mrb[6].mxu1  ;;  %v16748_v44 = vld [vmem:[%s20839_s9 + $0xa8] sm:$0xff]   ;;  %15114 = vmatprep.subr.bf16.mxu1 %v16745_v41  ;;  %v16757_v41 = vld [vmem:[%s20839_s9 + $0x150] sm:$0xff]  }
 0xda2   : > { %v16108_v46 = vpop.f32.mrb[7].mxu1  ;;  %v1814_v47 = vsel %vm1813_vm7, %v16565_v43, 0.0  ;;  %v2353_v45 = vld [vmem:[%s20837_s7 + $0x10] sm:$0xff] }
 0xda3   : > { %1815 = vadd.xlane.f32.xlu1 %v1814_v47  ;;  %v2355_v46 = vld [vmem:[%s20837_s7 + $0x50] sm:$0xff] }
 0xda4   : > { %v16749_v47 = vld [vmem:[%s20839_s9 + $0xf0] sm:$0xff]  }
 0xe30   : > { %v1816_v48 = vpop.xlane.xlu1 %1815 }
 0xe31   : > { %v1818_v49 = vmul.f32 0.03125, %v1816_v48  ;;  %v14296_v48 = vcombine.high %v2353_v45, %v2355_v46 }
 0xe33   : > { %v1819_v50 = vsub.f32 %v16565_v43, %v1818_v49  ;;  %v16747_v43 = vld [vmem:[%s20839_s9 + $0x38] sm:$0xff]   ;;  %v14295_v49 = vcombine.low %v2353_v45, %v2355_v46  ;;  %v16764_v46 = vld [vmem:[%s20839_s9 + $0x188] sm:$0xff]  }
 0xe34   : > { %15115 = vmatpush3.bf16.msra.mxu1 %v16747_v43  ;;  %v16759_v43 = vld [vmem:[%s20839_s9 + $0x110] sm:$0xff]   ;;  %v16761_v45 = vld [vmem:[%s20839_s9 + $0x158] sm:$0xff]  }
 0xe35   : > { %v1820_v51 = vmul.f32 %v1819_v50, %v1819_v50  ;;  %2423 = vmatprep.subr.bf16.mxu1 %v14296_v48  ;;  %v16765_v48 = vld [vmem:[%s20839_s9 + $0x160] sm:$0xff]  }
 0xe37   : > { %v1821_v52 = vsel %vm1813_vm7, %v1820_v51, 0.0  ;;  %v16751_v51 = vld [vmem:[%s20839_s9 + $0xf8] sm:$0xff]  }
 0xe38   : > { %1822 = vadd.xlane.f32.xlu0 %v1821_v52  ;;  %v16752_v52 = vld [vmem:[%s20839_s9 + $0xb8] sm:$0xff]  }
 0xec5   : > { %v1823_v18 = vpop.xlane.xlu0 %1822 }
 0xec6   : > { %v1824_v19 = vmul.f32 0.03125, %v1823_v18 }
 0xec8   : > { %v1825_v20 = vadd.f32 1e-05, %v1824_v19  ;;  %v1878_v19 = vrot.slane %v1861_v61, %v17925_v10 }
 0xeca   : > { %17283 = vrsqrt.f32 %v1825_v20 }
 0xed4   : > { %v17284_v7 = vpop.eup %17283 }
 0xed5   : > { %v1827_v22 = vmul.f32 %v17284_v7, %v1819_v50  ;;  %v16750_v50 = vld [vmem:[%s20839_s9 + $0xb0] sm:$0xff]   ;;  %v14300_v7 = vcombine.high %v2357_v14, %v2359_v15  ;;  %v16783_v14 = vld [vmem:[%s20839_s9 + $0x1f8] sm:$0xff]  }
 0xed6   : > { %v16784_v15 = vld [vmem:[%s20839_s9 + $0x1b8] sm:$0xff]  }
 0xed7   : > { %v1835_v24 = vmul.f32 %v14250_v21, %v1827_v22 }
 0xed9   : > { %v17831_v16 = vadd.f32 %v14251_v23, %v1835_v24 }
 0xedb   : > { %v17835_v27 = vpack.c.bf16 %v17831_v16, %v17831_v16 }
 0xedd   : > { %14261 = vmatmul.mubr.msk.bf16.vlgmr.msra.gmra.mrb[48].mxu0 %vm464_vm1, %v17835_v27 }
 0xede   : > { %1968 = vmatpush1.bf16.msra.mxu0 %v14255_v0  ;;  %1999 = vmatprep.mubr.bf16.mxu0 %v17429_v62  ;;  %v1870_v0 = vrot.slane %v1861_v61, %v17919_v57  ;;  %v16776_v61 = vld [vmem:[%s20839_s9 + $0x1a0] sm:$0xff]  }
 0xedf   : > { %1969 = vmatprep.subr.bf16.mxu0 %v14260_v28 }
 0xee2   : > { %1970 = vmatpush1.bf16.msra.mxu0 %v14259_v29 }
 0xee3   : > { %15122 = vmatprep.subr.bf16.mxu0 %v16726_v30  ;;  %v16753_v30 = vld [vmem:[%s20839_s9 + $0x140] sm:$0xff]  }
 0xee5   : > { %14262 = vmatmul.mubr.msk.bf16.vlgmr.msra.gmra.mrb[52].mxu0 %vm464_vm1, %v17835_v27 }
 0xee6   : > { %15123 = vmatpush3.bf16.msra.mxu0 %v16728_v31 }
 0xee7   : > { %15124 = vmatprep.subr.bf16.mxu0 %v16730_v32  ;;  %v2358_v32 = vld [vmem:[%s20837_s7 + $0x98] sm:$0xff] }
 0xeea   : > { %15125 = vmatpush3.bf16.msra.mxu0 %v16732_v33  ;;  %v2360_v33 = vld [vmem:[%s20837_s7 + $0xd8] sm:$0xff] }
 0xeeb   : > { %15126 = vmatprep.subr.bf16.mxu0 %v16734_v9 }
 0xeee   : > { %15127 = vmatpush3.bf16.msra.mxu0 %v16736_v34 }
 0xeef   : > { %15128 = vmatprep.subr.bf16.mxu0 %v16738_v35  ;;  %v14302_v35 = vcombine.high %v2358_v32, %v2360_v33 }
 0xef2   : > { %15129 = vmatpush3.bf16.msra.mxu0 %v16740_v36  ;;  %v16754_v36 = vld [vmem:[%s20839_s9 + $0x100] sm:$0xff]  }
 0xef3   : > { %15130 = vmatprep.subr.bf16.mxu0 %v16742_v38  ;;  %v14301_v38 = vcombine.low %v2358_v32, %v2360_v33  ;;  %v14252_v32 = vld [vmem:[%s20840_s10] ss:$0 sm:$0xff] }
 0xef6   : > { %15131 = vmatpush3.bf16.msra.mxu0 %v16744_v40  ;;  %v16758_v40 = vld [vmem:[%s20839_s9 + $0x1c0] sm:$0xff]  }
 0xef7   : > { %15132 = vmatprep.subr.bf16.mxu0 %v16746_v42  ;;  %v16760_v42 = vld [vmem:[%s20839_s9 + $0x180] sm:$0xff]  }
 0xefa   : > { %15133 = vmatpush3.bf16.msra.mxu0 %v16748_v44  ;;  %v16762_v44 = vld [vmem:[%s20839_s9 + $0x1c8] sm:$0xff]  }
 0xefb   : > { %15134 = vmatprep.subr.bf16.mxu0 %v16749_v47  ;;  %v16763_v47 = vld [vmem:[%s20839_s9 + $0x118] sm:$0xff]  }
 0xefe   : > { %15135 = vmatpush3.bf16.msra.mxu0 %v16750_v50  ;;  %v16767_v50 = vld [vmem:[%s20839_s9 + $0x120] sm:$0xff]  }
 0xeff   : > { %15136 = vmatprep.subr.bf16.mxu0 %v16751_v51  ;;  %v16768_v51 = vld [vmem:[%s20839_s9 + $0x190] sm:$0xff]  }
 0xf02   : > { %15137 = vmatpush3.bf16.msra.mxu0 %v16752_v52  ;;  %v16769_v52 = vld [vmem:[%s20839_s9 + $0x168] sm:$0xff]  }
 0xf03   : > { %2464 = vmatprep.subr.bf16.mxu0 %v14298_v56  ;;  %v16773_v56 = vld [vmem:[%s20839_s9 + $0x170] sm:$0xff]  }
 0xfb0   : > { %v1960_v2 = vpop.f32.mrb[48].mxu0 }
 0xfb1   : > { %v1961_v3 = vadd.f32 %v1960_v2, %v1866_v63  ;;  %v1962_v4 = vpop.f32.mrb[49].mxu0  ;;  %v16777_v63 = vld [vmem:[%s20839_s9 + $0x178] sm:$0xff]  }
 0xfb2   : > { %v1963_v6 = vadd.f32 %v1962_v4, %v1870_v0  ;;  %v1964_v8 = vpop.f32.mrb[50].mxu0  ;;  %v16778_v0 = vld [vmem:[%s20839_s9 + $0x1e8] sm:$0xff]   ;;  %v16779_v2 = vld [vmem:[%s20839_s9 + $0x138] sm:$0xff]   ;;  %v2850_v4 = vld [vmem:[%s20837_s7 + $0x20] sm:$0xff] }
 0xfb3   : > { %v2008_v11 = vmax.f32 %v1961_v3, 0.0  ;;  %v1965_v12 = vpop.f32.mrb[51].mxu0  ;;  %v16780_v3 = vld [vmem:[%s20839_s9 + $0x1a8] sm:$0xff]   ;;  %v16781_v8 = vld [vmem:[%s20839_s9 + $0x1f0] sm:$0xff]  }
 0xfb4   : > { %v2009_v13 = vmax.f32 %v1963_v6, 0.0  ;;  %v2852_v6 = vld [vmem:[%s20837_s7 + $0x60] sm:$0xff] }
 0xfb5   : > { %v2012_v20 = vpack.c.bf16 %v2008_v11, %v2008_v11  ;;  %v14338_v11 = vcombine.high %v2850_v4, %v2852_v6  ;;  %v14337_v12 = vcombine.low %v2850_v4, %v2852_v6 }
 0xfb6   : > { %v2013_v18 = vpack.c.bf16 %v2009_v13, %v2009_v13  ;;  %v16782_v13 = vld [vmem:[%s20839_s9 + $0x1b0] sm:$0xff]  }
 0xfb8   : > { %v2001_v21 = vpop.f32.mrb[52].mxu0  ;;  %2304 = vmatprep.mubr.bf16.mxu1 %v2013_v18  ;;  %v18057_v18 = vld [vmem:[%s20837_s7 + $0x68] sm:$0xff] }
 0xfb9   : > { %v2002_v22 = vadd.f32 %v2001_v21, %v1874_v17  ;;  %v2003_v23 = vpop.f32.mrb[53].mxu0  ;;  %2305 = vmatmul.mubr.bf16.vlgmr.msra.gmra.mrb[24].mxu1 %v2012_v20  ;;  %v18052_v17 = vld [vmem:[%s20837_s7 + $0x28] sm:$0xff] }
 0xfba   : > { %v2004_v24 = vadd.f32 %v2003_v23, %v1878_v19  ;;  %v2005_v25 = vpop.f32.mrb[54].mxu0  ;;  %2424 = vmatpush1.bf16.msra.mxu1 %v14295_v49  ;;  %2455 = vmatprep.mubr.bf16.mxu1 %v17429_v62  ;;  %v16766_v49 = vld [vmem:[%s20839_s9 + $0x1d0] sm:$0xff]   ;;  %v14339_v19 = vcombine.low %v18052_v17, %v18057_v18  ;;  %v14340_v20 = vcombine.high %v18052_v17, %v18057_v18  ;;  %v16792_v17 = vld [vmem:[%s20839_s9 + $0x280] sm:$0xff]  }
 0xfbb   : > { %v2010_v28 = vmax.f32 %v2002_v22, 0.0  ;;  %v2006_v29 = vpop.f32.mrb[55].mxu0  ;;  %2425 = vmatprep.subr.bf16.mxu1 %v14300_v7  ;;  %v16791_v18 = vld [vmem:[%s20839_s9 + $0x210] sm:$0xff]  }
 0xfbc   : > { %v2011_v31 = vmax.f32 %v2004_v24, 0.0  ;;  %v2361_v24 = vld [vmem:[%s20838_s8 + $0x4] sm:$0xf] }
 0xfbd   : > { %v2014_v34 = vpack.c.bf16 %v2010_v28, %v2010_v28  ;;  %v2370_v28 = vrot.slane %v2361_v24, %v17919_v57 }
 0xfbe   : > { %v2015_v9 = vpack.c.bf16 %v2011_v31, %v2011_v31  ;;  %2426 = vmatpush1.bf16.msra.mxu1 %v14299_v26  ;;  %v2366_v26 = vrot.slane %v2361_v24, %v17914_v60 }
 0xfbf   : > { %15144 = vmatprep.subr.bf16.mxu1 %v16753_v30 }
 0xfc0   : > { %2344 = vmatprep.mubr.bf16.mxu0 %v2015_v9 }
 0xfc1   : > { %2345 = vmatmul.mubr.bf16.vlgmr.msra.gmra.mrb[56].mxu0 %v2014_v34  ;;  %14303 = vmatmul.mubr.msk.bf16.vlgmr.msra.gmra.mrb[28].mxu1 %vm464_vm1, %v17835_v27 }
 0xfc2   : > { %2465 = vmatpush1.bf16.msra.mxu0 %v14297_v55  ;;  %2496 = vmatprep.mubr.bf16.mxu0 %v17429_v62  ;;  %v16772_v55 = vld [vmem:[%s20839_s9 + $0x198] sm:$0xff]  }
 0xfc3   : > { %2466 = vmatprep.subr.bf16.mxu0 %v14302_v35  ;;  %15145 = vmatpush3.bf16.msra.mxu1 %v16754_v36 }
 0xfc4   : > { %15146 = vmatprep.subr.bf16.mxu1 %v16755_v37 }
 0xfc6   : > { %2467 = vmatpush1.bf16.msra.mxu0 %v14301_v38 }
 0xfc7   : > { %15147 = vmatpush3.bf16.msra.mxu1 %v16756_v39  ;;  %15166 = vmatprep.subr.bf16.mxu0 %v16758_v40 }
 0xfc8   : > { %15148 = vmatprep.subr.bf16.mxu1 %v16757_v41  ;;  %v1852_v41 = vadd.f32 %v14252_v32, %v17831_v16  ;;  %v16806_v32 = vld [vmem:[%s20839_s9 + $0x2e0] sm:$0xff]  }
 0xfc9   : > { %14304 = vmatmul.mubr.msk.bf16.vlgmr.msra.gmra.mrb[60].mxu0 %vm464_vm1, %v17835_v27 }
 0xfca   : > { %15167 = vmatpush3.bf16.msra.mxu0 %v16760_v42 }
 0xfcb   : > { %15149 = vmatpush3.bf16.msra.mxu1 %v16759_v43  ;;  %15168 = vmatprep.subr.bf16.mxu0 %v16762_v44  ;;  %v2854_v44 = vld [vmem:[%s20837_s7 + $0xa0] sm:$0xff] }
 0xfcc   : > { %15150 = vmatprep.subr.bf16.mxu1 %v16761_v45  ;;  %v2856_v45 = vld [vmem:[%s20837_s7 + $0xe0] sm:$0xff] }
 0xfce   : > { %15169 = vmatpush3.bf16.msra.mxu0 %v16764_v46  ;;  %v2374_v46 = vrot.slane %v2361_v24, %v17923_v5 }
 0xfcf   : > { %15151 = vmatpush3.bf16.msra.mxu1 %v16763_v47  ;;  %15170 = vmatprep.subr.bf16.mxu0 %v16766_v49  ;;  %v2378_v49 = vrot.slane %v2361_v24, %v17925_v10  ;;  %v16799_v24 = vld [vmem:[%s20839_s9 + $0x220] sm:$0xff]  }
 0xfd0   : > { %15152 = vmatprep.subr.bf16.mxu1 %v16765_v48 }
 0xfd2   : > { %15171 = vmatpush3.bf16.msra.mxu0 %v16768_v51  ;;  %v14342_v51 = vcombine.high %v2854_v44, %v2856_v45 }
 0xfd3   : > { %15153 = vmatpush3.bf16.msra.mxu1 %v16767_v50  ;;  %15172 = vmatprep.subr.bf16.mxu0 %v16770_v53 }
 0xfd4   : > { %15154 = vmatprep.subr.bf16.mxu1 %v16769_v52 }
 0xfd6   : > { %15173 = vmatpush3.bf16.msra.mxu0 %v16772_v55 }
 0xfd7   : > { %15155 = vmatpush3.bf16.msra.mxu1 %v16771_v54  ;;  %15174 = vmatprep.subr.bf16.mxu0 %v16774_v58 }
 0xfd8   : > { %15156 = vmatprep.subr.bf16.mxu1 %v16773_v56  ;;  %v14341_v56 = vcombine.low %v2854_v44, %v2856_v45  ;;  %v16815_v44 = vld [vmem:[%s20839_s9 + $0x2f8] sm:$0xff]  }
 0xfd9   : > { %v16816_v45 = vld [vmem:[%s20839_s9 + $0x2b8] sm:$0xff]  }
 0xfda   : > { %15175 = vmatpush3.bf16.msra.mxu0 %v16776_v61  ;;  %v16785_v61 = vld [vmem:[%s20839_s9 + $0x240] sm:$0xff]  }
 0xfdb   : > { %15157 = vmatpush3.bf16.msra.mxu1 %v16775_v59  ;;  %15176 = vmatprep.subr.bf16.mxu0 %v16778_v0  ;;  %v2855_v0 = vld [vmem:[%s20837_s7 + $0xa8] sm:$0xff] }
 0xfdc   : > { %15158 = vmatprep.subr.bf16.mxu1 %v16777_v63 }
 0xfde   : > { %15177 = vmatpush3.bf16.msra.mxu0 %v16780_v3 }
 0xfdf   : > { %15159 = vmatpush3.bf16.msra.mxu1 %v16779_v2  ;;  %15178 = vmatprep.subr.bf16.mxu0 %v16781_v8  ;;  %v2857_v2 = vld [vmem:[%s20837_s7 + $0xe8] sm:$0xff]  ;;  %v16786_v8 = vld [vmem:[%s20839_s9 + $0x200] sm:$0xff]  }
 0xfe0   : > { %2920 = vmatprep.subr.bf16.mxu1 %v14338_v11  ;;  %v14344_v6 = vcombine.high %v2855_v0, %v2857_v2  ;;  %v16787_v11 = vld [vmem:[%s20839_s9 + $0x248] sm:$0xff]  }
 0xfe2   : > { %15179 = vmatpush3.bf16.msra.mxu0 %v16782_v13  ;;  %v16788_v13 = vld [vmem:[%s20839_s9 + $0x208] sm:$0xff]  }
 0xfe3   : > { %15180 = vmatprep.subr.bf16.mxu0 %v16783_v14  ;;  %v16790_v14 = vld [vmem:[%s20839_s9 + $0x2c0] sm:$0xff]  }
 0xfe6   : > { %15181 = vmatpush3.bf16.msra.mxu0 %v16784_v15  ;;  %v16789_v15 = vld [vmem:[%s20839_s9 + $0x250] sm:$0xff]  }
 0xfe7   : > { %2961 = vmatprep.subr.bf16.mxu0 %v14340_v20  ;;  %v16793_v20 = vld [vmem:[%s20839_s9 + $0x258] sm:$0xff]  }
0x108c   : > { %v15116_v7 = vpop.f32.mrb[24].mxu1 }
0x108d   : > { %v15117_v21 = vpop.f32.mrb[25].mxu1 }
0x108e   : > { %v15118_v22 = vadd.f32 %v15117_v21, %v15116_v7  ;;  %v15119_v23 = vpop.f32.mrb[26].mxu1  ;;  %v16796_v7 = vld [vmem:[%s20839_s9 + $0x288] sm:$0xff]   ;;  %v16795_v21 = vld [vmem:[%s20839_s9 + $0x218] sm:$0xff]  }
0x108f   : > { %v15120_v25 = vpop.f32.mrb[27].mxu1  ;;  %v16798_v23 = vld [vmem:[%s20839_s9 + $0x2d0] sm:$0xff]  }
0x1090   : > { %v16800_v25 = vld [vmem:[%s20839_s9 + $0x290] sm:$0xff]  }
0x1094   : > { %v15138_v29 = vpop.f32.mrb[56].mxu0  ;;  %v2457_v30 = vpop.f32.mrb[28].mxu1 }
0x1095   : > { %v2458_v31 = vadd.f32 %v2457_v30, %v2366_v26  ;;  %v15139_v33 = vpop.f32.mrb[57].mxu0  ;;  %v2459_v9 = vpop.f32.mrb[29].mxu1  ;;  %v16801_v26 = vld [vmem:[%s20839_s9 + $0x268] sm:$0xff]   ;;  %v16804_v30 = vld [vmem:[%s20839_s9 + $0x298] sm:$0xff]  }
0x1096   : > { %v15140_v34 = vadd.f32 %v15139_v33, %v15138_v29  ;;  %v2460_v35 = vadd.f32 %v2459_v9, %v2370_v28  ;;  %v15141_v36 = vpop.f32.mrb[58].mxu0  ;;  %v2461_v37 = vpop.f32.mrb[30].mxu1  ;;  %v16802_v28 = vld [vmem:[%s20839_s9 + $0x2d8] sm:$0xff]   ;;  %v16803_v29 = vld [vmem:[%s20839_s9 + $0x228] sm:$0xff]   ;;  %v16807_v33 = vld [vmem:[%s20839_s9 + $0x230] sm:$0xff]  }
0x1097   : > { %v2505_v38 = vmax.f32 %v2458_v31, 0.0  ;;  %v15142_v39 = vpop.f32.mrb[59].mxu0  ;;  %v2462_v40 = vpop.f32.mrb[31].mxu1  ;;  %v16805_v31 = vld [vmem:[%s20839_s9 + $0x270] sm:$0xff]   ;;  %v16808_v9 = vld [vmem:[%s20839_s9 + $0x2a0] sm:$0xff]   ;;  %v16811_v36 = vld [vmem:[%s20839_s9 + $0x238] sm:$0xff]  }
0x1098   : > { %v2347_v42 = vadd.f32 %v15140_v34, %v15118_v22  ;;  %v2506_v43 = vmax.f32 %v2460_v35, 0.0  ;;  %v16797_v22 = vld [vmem:[%s20839_s9 + $0x260] sm:$0xff]   ;;  %v16809_v34 = vld [vmem:[%s20839_s9 + $0x278] sm:$0xff]   ;;  %v16810_v35 = vld [vmem:[%s20839_s9 + $0x2e8] sm:$0xff]  }
0x1099   : > { %v2509_v50 = vpack.c.bf16 %v2505_v38, %v2505_v38  ;;  %v16812_v37 = vld [vmem:[%s20839_s9 + $0x2a8] sm:$0xff]   ;;  %v3347_v38 = vld [vmem:[%s20837_s7 + $0x30] sm:$0xff] }
0x109a   : > { %v18079_v47 = vadd.f32 %v2347_v42, %v1852_v41  ;;  %v2510_v48 = vpack.c.bf16 %v2506_v43, %v2506_v43  ;;  %v3349_v39 = vld [vmem:[%s20837_s7 + $0x70] sm:$0xff] }
0x109b   : > { %v16813_v40 = vld [vmem:[%s20839_s9 + $0x2f0] sm:$0xff]   ;;  %v14380_v41 = vcombine.high %v3347_v38, %v3349_v39  ;;  %v14379_v42 = vcombine.low %v3347_v38, %v3349_v39  ;;  %v16818_v38 = vld [vmem:[%s20839_s9 + $0x300] sm:$0xff]   ;;  %v16819_v39 = vld [vmem:[%s20839_s9 + $0x348] sm:$0xff]  }
0x109c   : > { %v2498_v16 = vpop.f32.mrb[60].mxu0  ;;  %2801 = vmatprep.mubr.bf16.mxu1 %v2510_v48  ;;  %v16814_v43 = vld [vmem:[%s20839_s9 + $0x2b0] sm:$0xff]   ;;  %v3350_v48 = vld [vmem:[%s20837_s7 + $0x78] sm:$0xff] }
0x109d   : > { %v2499_v52 = vadd.f32 %v2498_v16, %v2374_v46  ;;  %v2500_v53 = vpop.f32.mrb[61].mxu0  ;;  %2802 = vmatmul.mubr.bf16.vlgmr.msra.gmra.mrb[32].mxu1 %v2509_v50  ;;  %v3348_v46 = vld [vmem:[%s20837_s7 + $0x38] sm:$0xff] }
0x109e   : > { %v2501_v54 = vadd.f32 %v2500_v53, %v2378_v49  ;;  %v2502_v55 = vpop.f32.mrb[62].mxu0  ;;  %2921 = vmatpush1.bf16.msra.mxu1 %v14337_v12  ;;  %2952 = vmatprep.mubr.bf16.mxu1 %v17429_v62  ;;  %v14343_v12 = vcombine.low %v2855_v0, %v2857_v2  ;;  %v14381_v49 = vcombine.low %v3348_v46, %v3350_v48 }
0x109f   : > { %v2507_v58 = vmax.f32 %v2499_v52, 0.0  ;;  %v2503_v59 = vpop.f32.mrb[63].mxu0  ;;  %2922 = vmatprep.subr.bf16.mxu1 %v14342_v51  ;;  %v14382_v50 = vcombine.high %v3348_v46, %v3350_v48  ;;  %v16826_v46 = vld [vmem:[%s20839_s9 + $0x3c8] sm:$0xff]   ;;  %v16825_v48 = vld [vmem:[%s20839_s9 + $0x358] sm:$0xff]  }
0x10a0   : > { %v2508_v63 = vmax.f32 %v2501_v54, 0.0  ;;  %v2858_v54 = vld [vmem:[%s20838_s8 + $0x8] sm:$0xf] }
0x10a1   : > { %v2511_v4 = vpack.c.bf16 %v2507_v58, %v2507_v58  ;;  %v2867_v58 = vrot.slane %v2858_v54, %v17919_v57 }
0x10a2   : > { %v2512_v3 = vpack.c.bf16 %v2508_v63, %v2508_v63  ;;  %2923 = vmatpush1.bf16.msra.mxu1 %v14341_v56  ;;  %v2863_v56 = vrot.slane %v2858_v54, %v17914_v60 }
0x10a3   : > { %15188 = vmatprep.subr.bf16.mxu1 %v16785_v61 }
0x10a4   : > { %2841 = vmatprep.mubr.bf16.mxu0 %v2512_v3 }
0x10a5   : > { %2842 = vmatmul.mubr.bf16.vlgmr.msra.gmra.mrb[64].mxu0 %v2511_v4  ;;  %14345 = vmatmul.mubr.msk.bf16.vlgmr.msra.gmra.mrb[36].mxu1 %vm464_vm1, %v17835_v27 }
0x10a6   : > { %2962 = vmatpush1.bf16.msra.mxu0 %v14339_v19  ;;  %2993 = vmatprep.mubr.bf16.mxu0 %v17429_v62  ;;  %v16794_v19 = vld [vmem:[%s20839_s9 + $0x2c8] sm:$0xff]  }
0x10a7   : > { %2963 = vmatprep.subr.bf16.mxu0 %v14344_v6  ;;  %15189 = vmatpush3.bf16.msra.mxu1 %v16786_v8 }
0x10a8   : > { %15190 = vmatprep.subr.bf16.mxu1 %v16787_v11 }
0x10aa   : > { %2964 = vmatpush1.bf16.msra.mxu0 %v14343_v12 }
0x10ab   : > { %15191 = vmatpush3.bf16.msra.mxu1 %v16788_v13  ;;  %15210 = vmatprep.subr.bf16.mxu0 %v16790_v14 }
0x10ac   : > { %15192 = vmatprep.subr.bf16.mxu1 %v16789_v15 }
0x10ad   : > { %14346 = vmatmul.mubr.msk.bf16.vlgmr.msra.gmra.mrb[68].mxu0 %vm464_vm1, %v17835_v27 }
0x10ae   : > { %15211 = vmatpush3.bf16.msra.mxu0 %v16792_v17  ;;  %v3351_v17 = vld [vmem:[%s20837_s7 + $0xb0] sm:$0xff] }
0x10af   : > { %15193 = vmatpush3.bf16.msra.mxu1 %v16791_v18  ;;  %15212 = vmatprep.subr.bf16.mxu0 %v16794_v19  ;;  %v3353_v18 = vld [vmem:[%s20837_s7 + $0xf0] sm:$0xff]  ;;  %v2871_v19 = vrot.slane %v2858_v54, %v17923_v5 }
0x10b0   : > { %15194 = vmatprep.subr.bf16.mxu1 %v16793_v20 }
0x10b2   : > { %15213 = vmatpush3.bf16.msra.mxu0 %v16796_v7 }
0x10b3   : > { %15195 = vmatpush3.bf16.msra.mxu1 %v16795_v21  ;;  %15214 = vmatprep.subr.bf16.mxu0 %v16798_v23  ;;  %v2875_v21 = vrot.slane %v2858_v54, %v17925_v10  ;;  %v14384_v23 = vcombine.high %v3351_v17, %v3353_v18  ;;  %v16834_v54 = vld [vmem:[%s20839_s9 + $0x3d8] sm:$0xff]  }
0x10b4   : > { %15196 = vmatprep.subr.bf16.mxu1 %v16797_v22 }
0x10b6   : > { %15215 = vmatpush3.bf16.msra.mxu0 %v16800_v25 }
0x10b7   : > { %15197 = vmatpush3.bf16.msra.mxu1 %v16799_v24  ;;  %15216 = vmatprep.subr.bf16.mxu0 %v16802_v28 }
0x10b8   : > { %15198 = vmatprep.subr.bf16.mxu1 %v16801_v26 }
0x10ba   : > { %15217 = vmatpush3.bf16.msra.mxu0 %v16804_v30  ;;  %v14383_v30 = vcombine.low %v3351_v17, %v3353_v18  ;;  %v3355_v18 = vld [vmem:[%s20838_s8 + $0xc] sm:$0xf] }
0x10bb   : > { %15199 = vmatpush3.bf16.msra.mxu1 %v16803_v29  ;;  %15218 = vmatprep.subr.bf16.mxu0 %v16806_v32 }
0x10bc   : > { %15200 = vmatprep.subr.bf16.mxu1 %v16805_v31 }
0x10be   : > { %15219 = vmatpush3.bf16.msra.mxu0 %v16808_v9  ;;  %v3352_v9 = vld [vmem:[%s20837_s7 + $0xb8] sm:$0xff] }
0x10bf   : > { %15201 = vmatpush3.bf16.msra.mxu1 %v16807_v33  ;;  %15220 = vmatprep.subr.bf16.mxu0 %v16810_v35 }
0x10c0   : > { %15202 = vmatprep.subr.bf16.mxu1 %v16809_v34  ;;  %v3354_v34 = vld [vmem:[%s20837_s7 + $0xf8] sm:$0xff] }
0x10c2   : > { %15221 = vmatpush3.bf16.msra.mxu0 %v16812_v37  ;;  %v14386_v37 = vcombine.high %v3352_v9, %v3354_v34 }
0x10c3   : > { %15203 = vmatpush3.bf16.msra.mxu1 %v16811_v36  ;;  %15222 = vmatprep.subr.bf16.mxu0 %v16813_v40  ;;  %v14385_v40 = vcombine.low %v3352_v9, %v3354_v34 }
0x10c4   : > { %3417 = vmatprep.subr.bf16.mxu1 %v14380_v41  ;;  %v16820_v41 = vld [vmem:[%s20839_s9 + $0x308] sm:$0xff]  }
0x10c6   : > { %15223 = vmatpush3.bf16.msra.mxu0 %v16814_v43  ;;  %v16821_v43 = vld [vmem:[%s20839_s9 + $0x350] sm:$0xff]  }
0x10c7   : > { %15224 = vmatprep.subr.bf16.mxu0 %v16815_v44  ;;  %v16824_v44 = vld [vmem:[%s20839_s9 + $0x380] sm:$0xff]  }
0x10ca   : > { %15225 = vmatpush3.bf16.msra.mxu0 %v16816_v45  ;;  %v16823_v45 = vld [vmem:[%s20839_s9 + $0x310] sm:$0xff]  }
0x10cb   : > { %3458 = vmatprep.subr.bf16.mxu0 %v14382_v50  ;;  %v16827_v50 = vld [vmem:[%s20839_s9 + $0x318] sm:$0xff]  }
0x1170   : > { %v15160_v51 = vpop.f32.mrb[32].mxu1 }
0x1171   : > { %v15161_v16 = vpop.f32.mrb[33].mxu1 }
0x1172   : > { %v15162_v52 = vadd.f32 %v15161_v16, %v15160_v51  ;;  %v15163_v53 = vpop.f32.mrb[34].mxu1  ;;  %v16829_v51 = vld [vmem:[%s20839_s9 + $0x360] sm:$0xff]  }
0x1173   : > { %v15164_v55 = vpop.f32.mrb[35].mxu1  ;;  %v16831_v16 = vld [vmem:[%s20839_s9 + $0x320] sm:$0xff]   ;;  %v16833_v53 = vld [vmem:[%s20839_s9 + $0x368] sm:$0xff]  }
0x1174   : > { %v16835_v55 = vld [vmem:[%s20839_s9 + $0x328] sm:$0xff]  }
0x1178   : > { %v15182_v59 = vpop.f32.mrb[64].mxu0  ;;  %v2954_v61 = vpop.f32.mrb[36].mxu1 }
0x1179   : > { %v2955_v63 = vadd.f32 %v2954_v61, %v2863_v56  ;;  %v15183_v0 = vpop.f32.mrb[65].mxu0  ;;  %v2956_v2 = vpop.f32.mrb[37].mxu1  ;;  %v16836_v56 = vld [vmem:[%s20839_s9 + $0x398] sm:$0xff]   ;;  %v16839_v61 = vld [vmem:[%s20839_s9 + $0x330] sm:$0xff]  }
0x117a   : > { %v15184_v3 = vadd.f32 %v15183_v0, %v15182_v59  ;;  %v2957_v4 = vadd.f32 %v2956_v2, %v2867_v58  ;;  %v15185_v6 = vpop.f32.mrb[66].mxu0  ;;  %v2958_v8 = vpop.f32.mrb[38].mxu1  ;;  %v16837_v58 = vld [vmem:[%s20839_s9 + $0x370] sm:$0xff]   ;;  %v16838_v59 = vld [vmem:[%s20839_s9 + $0x3e0] sm:$0xff]   ;;  %v16841_v0 = vld [vmem:[%s20839_s9 + $0x378] sm:$0xff]  }
0x117b   : > { %v3002_v11 = vmax.f32 %v2955_v63, 0.0  ;;  %v15186_v12 = vpop.f32.mrb[67].mxu0  ;;  %v2959_v13 = vpop.f32.mrb[39].mxu1  ;;  %v16840_v63 = vld [vmem:[%s20839_s9 + $0x3a0] sm:$0xff]   ;;  %v16842_v2 = vld [vmem:[%s20839_s9 + $0x3e8] sm:$0xff]   ;;  %v16845_v6 = vld [vmem:[%s20839_s9 + $0x3f0] sm:$0xff]  }
0x117c   : > { %v2844_v14 = vadd.f32 %v15184_v3, %v15162_v52  ;;  %v3003_v15 = vmax.f32 %v2957_v4, 0.0  ;;  %v16832_v52 = vld [vmem:[%s20839_s9 + $0x390] sm:$0xff]   ;;  %v16843_v3 = vld [vmem:[%s20839_s9 + $0x338] sm:$0xff]   ;;  %v16844_v4 = vld [vmem:[%s20839_s9 + $0x3a8] sm:$0xff]  }
0x117d   : > { %v3006_v22 = vpack.c.bf16 %v3002_v11, %v3002_v11  ;;  %v16846_v8 = vld [vmem:[%s20839_s9 + $0x3b0] sm:$0xff]   ;;  %v16848_v11 = vld [vmem:[%s20839_s9 + $0x3f8] sm:$0xff]  }
0x117e   : > { %v18215_v20 = vadd.f32 %v2844_v14, %v18079_v47  ;;  %v3007_v7 = vpack.c.bf16 %v3003_v15, %v3003_v15  ;;  %v16817_v47 = vld [vmem:[%s20839_s9 + $0x340] sm:$0xff]   ;;  %v16849_v12 = vld [vmem:[%s20839_s9 + $0x3b8] sm:$0xff]  }
0x1180   : > { %v2995_v24 = vpop.f32.mrb[68].mxu0  ;;  %3298 = vmatprep.mubr.bf16.mxu1 %v3007_v7  ;;  %v3360_v7 = vrot.slane %v3355_v18, %v17914_v60 }
0x1181   : > { %v2996_v25 = vadd.f32 %v2995_v24, %v2871_v19  ;;  %v2997_v26 = vpop.f32.mrb[69].mxu0  ;;  %3299 = vmatmul.mubr.bf16.vlgmr.msra.gmra.mrb[40].mxu1 %v3006_v22 }
0x1182   : > { %v2998_v28 = vadd.f32 %v2997_v26, %v2875_v21  ;;  %v2999_v29 = vpop.f32.mrb[70].mxu0  ;;  %3418 = vmatpush1.bf16.msra.mxu1 %v14379_v42  ;;  %3449 = vmatprep.mubr.bf16.mxu1 %v17429_v62  ;;  %v16822_v42 = vld [vmem:[%s20839_s9 + $0x3c0] sm:$0xff]   ;;  %v3364_v21 = vrot.slane %v3355_v18, %v17919_v57 }
0x1183   : > { %v3004_v31 = vmax.f32 %v2996_v25, 0.0  ;;  %v3000_v32 = vpop.f32.mrb[71].mxu0  ;;  %3419 = vmatprep.subr.bf16.mxu1 %v14384_v23 }
0x1184   : > { %v3005_v33 = vmax.f32 %v2998_v28, 0.0 }
0x1185   : > { %v3008_v36 = vpack.c.bf16 %v3004_v31, %v3004_v31 }
0x1186   : > { %v3009_v35 = vpack.c.bf16 %v3005_v33, %v3005_v33  ;;  %3420 = vmatpush1.bf16.msra.mxu1 %v14383_v30 }
0x1187   : > { %15232 = vmatprep.subr.bf16.mxu1 %v16817_v47 }
0x1188   : > { %3338 = vmatprep.mubr.bf16.mxu0 %v3009_v35  ;;  %v3368_v35 = vrot.slane %v3355_v18, %v17923_v5 }
0x1189   : > { %3339 = vmatmul.mubr.bf16.vlgmr.msra.gmra.mrb[72].mxu0 %v3008_v36  ;;  %14387 = vmatmul.mubr.msk.bf16.vlgmr.msra.gmra.mrb[44].mxu1 %vm464_vm1, %v17835_v27 }
0x118a   : > { %3459 = vmatpush1.bf16.msra.mxu0 %v14381_v49  ;;  %3490 = vmatprep.mubr.bf16.mxu0 %v17429_v62  ;;  %v16828_v49 = vld [vmem:[%s20839_s9 + $0x388] sm:$0xff]  }
0x118b   : > { %3460 = vmatprep.subr.bf16.mxu0 %v14386_v37  ;;  %15233 = vmatpush3.bf16.msra.mxu1 %v16818_v38  ;;  %v3372_v38 = vrot.slane %v3355_v18, %v17925_v10 }
0x118c   : > { %15234 = vmatprep.subr.bf16.mxu1 %v16819_v39  ;;  %v16847_v39 = vld [vmem:[%s20831_s1] sm:$0xff]  }
0x118e   : > { %3461 = vmatpush1.bf16.msra.mxu0 %v14385_v40 }
0x118f   : > { %15235 = vmatpush3.bf16.msra.mxu1 %v16820_v41  ;;  %15254 = vmatprep.subr.bf16.mxu0 %v16822_v42 }
0x1190   : > { %15236 = vmatprep.subr.bf16.mxu1 %v16821_v43 }
0x1191   : > { %14388 = vmatmul.mubr.msk.bf16.vlgmr.msra.gmra.mrb[76].mxu0 %vm464_vm1, %v17835_v27  ;;  %v16830_v27 = vld [vmem:[%s20839_s9 + $0x3d0] sm:$0xff]  }
0x1192   : > { %15255 = vmatpush3.bf16.msra.mxu0 %v16824_v44 }
0x1193   : > { %15237 = vmatpush3.bf16.msra.mxu1 %v16823_v45  ;;  %15256 = vmatprep.subr.bf16.mxu0 %v16826_v46 }
0x1194   : > { %15238 = vmatprep.subr.bf16.mxu1 %v16825_v48 }
0x1196   : > { %15257 = vmatpush3.bf16.msra.mxu0 %v16828_v49 }
0x1197   : > { %15239 = vmatpush3.bf16.msra.mxu1 %v16827_v50  ;;  %15258 = vmatprep.subr.bf16.mxu0 %v16830_v27 }
0x1198   : > { %15240 = vmatprep.subr.bf16.mxu1 %v16829_v51  ;;  %v18346_v51 = vld [vmem:[%s17527_s17 + $0x1] sm:$0x1] }
0x119a   : > { %15259 = vmatpush3.bf16.msra.mxu0 %v16832_v52 }
0x119b   : > { %15241 = vmatpush3.bf16.msra.mxu1 %v16831_v16  ;;  %15260 = vmatprep.subr.bf16.mxu0 %v16834_v54 }
0x119c   : > { %15242 = vmatprep.subr.bf16.mxu1 %v16833_v53 }
0x119e   : > { %15261 = vmatpush3.bf16.msra.mxu0 %v16836_v56  ;;  %v14424_v56 = vld [vmem:[%s20832_s2] ss:$0 sm:$0xff] }
0x119f   : > { %15243 = vmatpush3.bf16.msra.mxu1 %v16835_v55  ;;  %15262 = vmatprep.subr.bf16.mxu0 %v16838_v59 }
0x11a0   : > { %15244 = vmatprep.subr.bf16.mxu1 %v16837_v58 }
0x11a2   : > { %15263 = vmatpush3.bf16.msra.mxu0 %v16840_v63 }
0x11a3   : > { %15245 = vmatpush3.bf16.msra.mxu1 %v16839_v61  ;;  %15264 = vmatprep.subr.bf16.mxu0 %v16842_v2 }
0x11a4   : > { %15246 = vmatprep.subr.bf16.mxu1 %v16841_v0 }
0x11a6   : > { %15265 = vmatpush3.bf16.msra.mxu0 %v16844_v4 }
0x11a7   : > { %15247 = vmatpush3.bf16.msra.mxu1 %v16843_v3  ;;  %15266 = vmatprep.subr.bf16.mxu0 %v16845_v6 }
0x11a8   : > { %16109 = vmatprep.subr.bf16.mxu1 %v17404_v1 }
0x11aa   : > { %15267 = vmatpush3.bf16.msra.mxu0 %v16846_v8 }
0x11ab   : > { %15268 = vmatprep.subr.bf16.mxu0 %v16848_v11 }
0x11ae   : > { %15269 = vmatpush3.bf16.msra.mxu0 %v16849_v12 }
0x11af   : > { %16117 = vmatprep.subr.bf16.mxu0 %v17404_v1 }
0x1254   : > { %v15204_v13 = vpop.f32.mrb[40].mxu1 }
0x1255   : > { %v15205_v14 = vpop.f32.mrb[41].mxu1 }
0x1256   : > { %v15206_v15 = vadd.f32 %v15205_v14, %v15204_v13  ;;  %v15207_v17 = vpop.f32.mrb[42].mxu1 }
0x1257   : > { %v15208_v19 = vpop.f32.mrb[43].mxu1 }
0x125c   : > { %v15226_v22 = vpop.f32.mrb[72].mxu0  ;;  %v3451_v23 = vpop.f32.mrb[44].mxu1 }
0x125d   : > { %v3452_v24 = vadd.f32 %v3451_v23, %v3360_v7  ;;  %v15227_v25 = vpop.f32.mrb[73].mxu0  ;;  %v3453_v26 = vpop.f32.mrb[45].mxu1 }
0x125e   : > { %v15228_v28 = vadd.f32 %v15227_v25, %v15226_v22  ;;  %v3454_v29 = vadd.f32 %v3453_v26, %v3364_v21  ;;  %v15229_v30 = vpop.f32.mrb[74].mxu0  ;;  %v3455_v31 = vpop.f32.mrb[46].mxu1 }
0x125f   : > { %v3499_v32 = vmax.f32 %v3452_v24, 0.0  ;;  %v15230_v47 = vpop.f32.mrb[75].mxu0  ;;  %v3456_v33 = vpop.f32.mrb[47].mxu1 }
0x1260   : > { %v3341_v9 = vadd.f32 %v15228_v28, %v15206_v15  ;;  %v3500_v34 = vmax.f32 %v3454_v29, 0.0 }
0x1261   : > { %v3503_v40 = vpack.c.bf16 %v3499_v32, %v3499_v32 }
0x1262   : > { %v3346_v36 = vadd.f32 %v3341_v9, %v18215_v20  ;;  %v3504_v37 = vpack.c.bf16 %v3500_v34, %v3500_v34  ;;  %v16850_v20 = vld [vmem:[%s20831_s1 + $0x8] sm:$0xff]  }
0x1264   : > { %v3492_v41 = vpop.f32.mrb[76].mxu0  ;;  %3795 = vmatprep.mubr.bf16.mxu1 %v3504_v37 }
0x1265   : > { %v3493_v42 = vadd.f32 %v3492_v41, %v3368_v35  ;;  %v3494_v43 = vpop.f32.mrb[77].mxu0  ;;  %3796 = vmatmul.mubr.bf16.vlgmr.msra.gmra.mrb[48].mxu1 %v3503_v40  ;;  %v4066_v40 = vld [vmem:[%s20833_s3] sm:$0x3] }
0x1266   : > { %v3495_v44 = vadd.f32 %v3494_v43, %v3372_v38  ;;  %v3496_v45 = vpop.f32.mrb[78].mxu0  ;;  %16110 = vmatpush3.bf16.msra.mxu1 %v16847_v39  ;;  %16113 = vmatprep.mubr.msk.bf16.mxu1 %vm17405_vm0, %v17404_v1  ;;  %v4071_v41 = vsel %vm638_vm6, %v4066_v40, 0 }
0x1267   : > { %v3501_v46 = vmax.f32 %v3493_v42, 0.0  ;;  %v3497_v48 = vpop.f32.mrb[79].mxu0  ;;  %16111 = vmatprep.subr.bf16.mxu1 %v17404_v1 }
0x1268   : > { %v3502_v49 = vmax.f32 %v3495_v44, 0.0 }
0x1269   : > { %v3505_v27 = vpack.c.bf16 %v3501_v46, %v3501_v46 }
0x126a   : > { %v3506_v50 = vpack.c.bf16 %v3502_v49, %v3502_v49  ;;  %16112 = vmatpush3.bf16.msra.mxu1 %v16850_v20 }
0x126b   : > { %16123 = vmatprep.subr.bf16.mxu1 %v17404_v1 }
0x126c   : > { %3835 = vmatprep.mubr.bf16.mxu0 %v3506_v50 }
0x126d   : > { %3836 = vmatmul.mubr.bf16.vlgmr.msra.gmra.mrb[80].mxu0 %v3505_v27  ;;  %16114 = vmatmul.mubr.msk.bf16.vlgmr.msra.gmra.mrb[52].mxu1 %vm464_vm1, %v18346_v51 }
0x126e   : > { %16119 = vmatprep.mubr.msk.bf16.mxu0 %vm17405_vm0, %v17404_v1  ;;  %16125 = vmatprep.mubr.msk.bf16.mxu1 %vm17405_vm0, %v17404_v1 }
0x1338   : > { %v15248_v16 = vpop.f32.mrb[48].mxu1 }
0x1339   : > { %v15249_v52 = vpop.f32.mrb[49].mxu1 }
0x133a   : > { %v15250_v53 = vadd.f32 %v15249_v52, %v15248_v16  ;;  %v15251_v54 = vpop.f32.mrb[50].mxu1 }
0x133b   : > { %v15252_v55 = vpop.f32.mrb[51].mxu1 }
0x1340   : > { %v15270_v58 = vpop.f32.mrb[80].mxu0  ;;  %v3938_v59 = vpop.f32.mrb[52].mxu1 }
0x1341   : > { %v3939_v61 = vadd.f32 %v14424_v56, %v3938_v59  ;;  %v15271_v63 = vpop.f32.mrb[81].mxu0  ;;  %v16115_v0 = vpop.f32.mrb[53].mxu1 }
0x1342   : > { %v15272_v2 = vadd.f32 %v15271_v63, %v15270_v58  ;;  %v15273_v3 = vpop.f32.mrb[82].mxu0  ;;  %v3941_v4 = vpop.f32.mrb[54].mxu1 }
0x1343   : > { %v18358_v6 = vpack.c.bf16 %v3939_v61, %v3939_v61  ;;  %v15274_v8 = vpop.f32.mrb[83].mxu0  ;;  %v16116_v11 = vpop.f32.mrb[55].mxu1  ;;  %v3944_v17 = vmul.f32 0.5, %v3939_v61 }
0x1344   : > { %v3838_v12 = vadd.f32 %v15272_v2, %v15250_v53 }
0x1345   : > { %3957 = vrot.lane.b32.xlu1 %v18358_v6, %s20888_s21  ;;  %v18366_v18 = vpack.c.bf16 %v3944_v17, %v3944_v17  ;;  %s20924_s21 = smov 44  }
0x1346   : > { %v18362_v13 = vadd.f32 %v3838_v12, %v3346_v36 }
0x13b7   : > { %v3958_v14 = vpop.permute.xlu1 %3957 }
0x13b8   : > { %v3963_v15 = vsel %vm523_vm3, %v3958_v14, 0 }
0x13b9   : > { %16118 = vmatpush3.bf16.xpose.msra.mxu0 %v3963_v15 }
0x13ba   : > { %16129 = vmatprep.subr.bf16.mxu0 %v17404_v1 }
0x13c0   : > { %16120 = vmatmul.mubr.msk.bf16.vlgmr.msra.gmra.mrb[84].mxu0 %vm523_vm3, %v18366_v18 }
0x13c1   : > { %16131 = vmatprep.mubr.msk.bf16.mxu0 %vm17405_vm0, %v17404_v1  ;;  %16130 = vmatpush3.bf16.msra.mxu0 %v4071_v41 }
0x13c2   : > { %16141 = vmatprep.subr.bf16.mxu0 %v17404_v1 }
0x1493   : > { %v3999_v19 = vpop.f32.mrb[84].mxu0 }
0x1494   : > { %v16121_v7 = vpop.f32.mrb[85].mxu0  ;;  %v4005_v21 = vsel %vm570_vm4, %v3999_v19, -inf }
0x1495   : > { %4006 = vmax.xlane.f32.xlu0 %v4005_v21  ;;  %v4002_v22 = vpop.f32.mrb[86].mxu0 }
0x1496   : > { %v16122_v23 = vpop.f32.mrb[87].mxu0 }
0x14ab   : > { %4017 = vrot.lane.b32.xlu0 %v18358_v6, %s20886_s20  ;;  %s20920_s20 = smov 60  }
0x14af   : > { %4117 = vrot.lane.b32.xlu0 %v18358_v6, %s20884_s22  ;;  %s20919_s22 = smov 104  }
0x14b3   : > { %4115 = vrot.lane.b32.xlu0 %v18366_v18, %s20882_s23  ;;  %s20918_s23 = smov 72  }
0x14b7   : > { %4280 = vrot.lane.b32.xlu0 %v18358_v6, %s20908_s27 }
0x14bb   : > { %4278 = vrot.lane.b32.xlu0 %v18366_v18, %s20909_s19 }
0x1522   : > { %v4007_v24 = vpop.xlane.xlu0 %4006 }
0x1523   : > { %v4008_v25 = vsub.f32 %v3999_v19, %v4007_v24 }
0x1525   : > { %v4009_v26 = vmul.f32 1.442695, %v4008_v25 }
0x1526   : > { %v4018_v28 = vpop.permute.xlu0 %4017 }
0x1527   : > { %17285 = vpow2.f32 %v4009_v26  ;;  %v4023_v29 = vsel %vm589_vm2, %v4018_v28, 0 }
0x1528   : > { %16124 = vmatpush3.bf16.msra.mxu1 %v4023_v29 }
0x1529   : > { %16135 = vmatprep.subr.bf16.mxu1 %v17404_v1 }
0x152a   : > { %v4118_v47 = vpop.permute.xlu0 %4117 }
0x152b   : > { %v4123_v36 = vsel %vm523_vm3, %v4118_v47, 0 }
0x152e   : > { %v4116_v35 = vpop.permute.xlu0 %4115 }
0x1531   : > { %v17286_v30 = vpop.eup %17285 }
0x1532   : > { %v4011_v31 = vsel %vm570_vm4, %v17286_v30, 0.0  ;;  %v4281_v37 = vpop.permute.xlu0 %4280 }
0x1533   : > { %4012 = vadd.xlane.f32.xlu1 %v4011_v31  ;;  %v4286_v38 = vsel %vm523_vm3, %v4281_v37, 0 }
0x1536   : > { %v4279_v39 = vpop.permute.xlu0 %4278 }
0x15c0   : > { %v4013_v32 = vpop.xlane.xlu1 %4012 }
0x15c1   : > { %17287 = vrcp.f32 %v4013_v32 }
0x15cb   : > { %v17288_v33 = vpop.eup %17287 }
0x15cc   : > { %v4015_v9 = vmul.f32 %v17288_v33, %v17286_v30 }
0x15ce   : > { %v4016_v34 = vpack.c.bf16 %v4015_v9, %v4015_v9 }
0x15d0   : > { %16126 = vmatmul.mubr.msk.bf16.vlgmr.msra.gmra.mrb[56].mxu1 %vm585_vm5, %v4016_v34 }
0x15d1   : > { %16136 = vmatpush3.bf16.xpose.msra.mxu1 %v4123_v36  ;;  %16137 = vmatprep.mubr.msk.bf16.mxu1 %vm17405_vm0, %v17404_v1 }
0x15d2   : > { %16153 = vmatprep.subr.bf16.mxu1 %v17404_v1 }
0x15d8   : > { %16138 = vmatmul.mubr.msk.bf16.vlgmr.msra.gmra.mrb[60].mxu1 %vm523_vm3, %v4116_v35 }
0x15d9   : > { %16154 = vmatpush3.bf16.xpose.msra.mxu1 %v4286_v38  ;;  %16155 = vmatprep.mubr.msk.bf16.mxu1 %vm17405_vm0, %v17404_v1 }
0x15da   : > { %16159 = vmatprep.subr.bf16.mxu1 %v17404_v1 }
0x15e0   : > { %16156 = vmatmul.mubr.msk.bf16.vlgmr.msra.gmra.mrb[64].mxu1 %vm523_vm3, %v4279_v39 }
0x15e1   : > { %16161 = vmatprep.mubr.msk.bf16.mxu1 %vm17405_vm0, %v17404_v1 }
0x16a3   : > { %v4059_v42 = vpop.f32.mrb[56].mxu1 }
0x16a4   : > { %v4065_v43 = vpack.c.bf16 %v4059_v42, %v4059_v42  ;;  %v16127_v44 = vpop.f32.mrb[57].mxu1 }
0x16a5   : > { %v4062_v45 = vpop.f32.mrb[58].mxu1 }
0x16a6   : > { %v16128_v20 = vpop.f32.mrb[59].mxu1  ;;  %16132 = vmatmul.mubr.msk.bf16.vlgmr.msra.gmra.mrb[88].mxu0 %vm523_vm3, %v4065_v43 }
0x16a7   : > { %16143 = vmatprep.mubr.msk.bf16.mxu0 %vm17405_vm0, %v17404_v1 }
0x16ab   : > { %v18407_v46 = vpop.f32.mrb[60].mxu1 }
0x16ac   : > { %v16139_v48 = vpop.f32.mrb[61].mxu1  ;;  %v4165_v33 = vsel %vm570_vm4, %v18407_v46, -inf }
0x16ad   : > { %v4162_v49 = vpop.f32.mrb[62].mxu1 }
0x16ae   : > { %v16140_v50 = vpop.f32.mrb[63].mxu1 }
0x16b3   : > { %v4322_v27 = vpop.f32.mrb[64].mxu1 }
0x16b4   : > { %v16157_v16 = vpop.f32.mrb[65].mxu1  ;;  %v4328_v52 = vsel %vm570_vm4, %v4322_v27, -inf }
0x16b5   : > { %4329 = vmax.xlane.f32.xlu1 %v4328_v52  ;;  %v4325_v53 = vpop.f32.mrb[66].mxu1 }
0x16b6   : > { %v16158_v54 = vpop.f32.mrb[67].mxu1 }
0x16c6   : > { %4340 = vrot.lane.b32.xlu1 %v18358_v6, %s20910_s15 }
0x16ca   : > { %4439 = vrot.lane.b32.xlu1 %v18358_v6, %s20911_s24 }
0x16ce   : > { %4437 = vrot.lane.b32.xlu1 %v18366_v18, %s20912_s26 }
0x16d2   : > { %4602 = vrot.lane.b32.xlu1 %v18358_v6, %s20913_s16 }
0x16d6   : > { %4600 = vrot.lane.b32.xlu1 %v18366_v18, %s20914_s18 }
0x1742   : > { %v4330_v55 = vpop.xlane.xlu1 %4329 }
0x1743   : > { %v4331_v56 = vsub.f32 %v4322_v27, %v4330_v55 }
0x1745   : > { %v4332_v58 = vmul.f32 1.442695, %v4331_v56 }
0x1746   : > { %v4341_v59 = vpop.permute.xlu1 %4340 }
0x1747   : > { %17289 = vpow2.f32 %v4332_v58  ;;  %v4346_v61 = vsel %vm589_vm2, %v4341_v59, 0 }
0x1748   : > { %16160 = vmatpush3.bf16.msra.mxu1 %v4346_v61 }
0x1749   : > { %16171 = vmatprep.subr.bf16.mxu1 %v17404_v1 }
0x174a   : > { %v4440_v3 = vpop.permute.xlu1 %4439 }
0x174b   : > { %v4445_v14 = vsel %vm523_vm3, %v4440_v3, 0 }
0x174e   : > { %v4438_v12 = vpop.permute.xlu1 %4437 }
0x1751   : > { %v17290_v63 = vpop.eup %17289 }
0x1752   : > { %v4334_v0 = vsel %vm570_vm4, %v17290_v63, 0.0  ;;  %v4603_v15 = vpop.permute.xlu1 %4602 }
0x1753   : > { %4335 = vadd.xlane.f32.xlu0 %v4334_v0  ;;  %v4608_v17 = vsel %vm523_vm3, %v4603_v15, 0  ;;  %v16851_v0 = vld [vmem:[%s20833_s3] ss:$0 sps:$4 sm:$0xcc]   ;;  %v4389_v15 = vld [vmem:[%s20833_s3 + $0x4] sm:$0x3] }
0x1756   : > { %v4601_v19 = vpop.permute.xlu1 %4600 }
0x17e0   : > { %v4336_v2 = vpop.xlane.xlu0 %4335 }
0x17e1   : > { %17291 = vrcp.f32 %v4336_v2  ;;  %v4230_v2 = vrot.slane %v16851_v0, 2 }
0x17e3   : > { %v4235_v3 = vsel %vm638_vm6, %v4230_v2, 0 }
0x17eb   : > { %v17292_v4 = vpop.eup %17291 }
0x17ec   : > { %v4338_v8 = vmul.f32 %v17292_v4, %v17290_v63 }
0x17ee   : > { %v4339_v11 = vpack.c.bf16 %v4338_v8, %v4338_v8 }
0x17f0   : > { %16162 = vmatmul.mubr.msk.bf16.vlgmr.msra.gmra.mrb[68].mxu1 %vm585_vm5, %v4339_v11 }
0x17f1   : > { %16172 = vmatpush3.bf16.xpose.msra.mxu1 %v4445_v14  ;;  %16173 = vmatprep.mubr.msk.bf16.mxu1 %vm17405_vm0, %v17404_v1 }
0x17f2   : > { %16189 = vmatprep.subr.bf16.mxu1 %v17404_v1 }
0x17f8   : > { %16174 = vmatmul.mubr.msk.bf16.vlgmr.msra.gmra.mrb[72].mxu1 %vm523_vm3, %v4438_v12 }
0x17f9   : > { %16190 = vmatpush3.bf16.xpose.msra.mxu1 %v4608_v17  ;;  %16191 = vmatprep.mubr.msk.bf16.mxu1 %vm17405_vm0, %v17404_v1 }
0x17fa   : > { %16195 = vmatprep.subr.bf16.mxu1 %v17404_v1 }
0x1800   : > { %16192 = vmatmul.mubr.msk.bf16.vlgmr.msra.gmra.mrb[76].mxu1 %vm523_vm3, %v4601_v19 }
0x1801   : > { %16197 = vmatprep.mubr.msk.bf16.mxu1 %vm17405_vm0, %v17404_v1 }
0x18c3   : > { %v18436_v7 = vpop.f32.mrb[68].mxu1 }
0x18c4   : > { %v16163_v21 = vpop.f32.mrb[69].mxu1 }
0x18c5   : > { %v4385_v22 = vpop.f32.mrb[70].mxu1 }
0x18c6   : > { %v16164_v23 = vpop.f32.mrb[71].mxu1 }
0x18cb   : > { %v18438_v24 = vpop.f32.mrb[72].mxu1 }
0x18cc   : > { %v16175_v25 = vpop.f32.mrb[73].mxu1  ;;  %v4487_v45 = vsel %vm570_vm4, %v18438_v24, -inf }
0x18cd   : > { %v4484_v26 = vpop.f32.mrb[74].mxu1  ;;  %v4394_v25 = vsel %vm638_vm6, %v4389_v15, 0 }
0x18ce   : > { %v16176_v28 = vpop.f32.mrb[75].mxu1 }
0x18d3   : > { %v4644_v29 = vpop.f32.mrb[76].mxu1 }
0x18d4   : > { %v16193_v30 = vpop.f32.mrb[77].mxu1  ;;  %v4650_v31 = vsel %vm570_vm4, %v4644_v29, -inf }
0x18d5   : > { %4651 = vmax.xlane.f32.xlu0 %v4650_v31  ;;  %v4647_v32 = vpop.f32.mrb[78].mxu1 }
0x18d6   : > { %v16194_v47 = vpop.f32.mrb[79].mxu1 }
0x18d7   : > { %v4388_v47 = vpack.c.bf16 %v18436_v7, %v18436_v7 }
0x18d9   : > { %4166 = vmax.xlane.f32.xlu0 %v4165_v33 }
0x18ef   : > { %4662 = vrot.lane.b32.xlu0 %v18358_v6, %s20915_s28 }
0x18f3   : > { %4761 = vrot.lane.b32.xlu0 %v18358_v6, %s20916_s29 }
0x18f7   : > { %4759 = vrot.lane.b32.xlu0 %v18366_v18, %s20917_s30 }
0x18fb   : > { %4924 = vrot.lane.b32.xlu0 %v18358_v6, %s20918_s23 }
0x1962   : > { %v4652_v9 = vpop.xlane.xlu0 %4651 }
0x1963   : > { %v4653_v34 = vsub.f32 %v4644_v29, %v4652_v9 }
0x1965   : > { %v4654_v35 = vmul.f32 1.442695, %v4653_v34 }
0x1966   : > { %v4167_v36 = vpop.xlane.xlu0 %4166 }
0x1967   : > { %17293 = vpow2.f32 %v4654_v35  ;;  %v4168_v37 = vsub.f32 %v18407_v46, %v4167_v36 }
0x1969   : > { %v4169_v38 = vmul.f32 1.442695, %v4168_v37 }
0x196a   : > { %v4663_v39 = vpop.permute.xlu0 %4662 }
0x196b   : > { %17295 = vpow2.f32 %v4169_v38  ;;  %v4668_v40 = vsel %vm589_vm2, %v4663_v39, 0 }
0x196c   : > { %16196 = vmatpush3.bf16.msra.mxu1 %v4668_v40 }
0x196d   : > { %16207 = vmatprep.subr.bf16.mxu1 %v17404_v1 }
0x196e   : > { %v4762_v20 = vpop.permute.xlu0 %4761 }
0x196f   : > { %v4767_v58 = vsel %vm523_vm3, %v4762_v20, 0 }
0x1971   : > { %v17294_v41 = vpop.eup %17293 }
0x1972   : > { %v4656_v42 = vsel %vm570_vm4, %v17294_v41, 0.0  ;;  %v4760_v46 = vpop.permute.xlu0 %4759 }
0x1973   : > { %4657 = vadd.xlane.f32.xlu1 %v4656_v42 }
0x1975   : > { %v17296_v43 = vpop.eup %17295 }
0x1976   : > { %v4171_v44 = vsel %vm570_vm4, %v17296_v43, 0.0  ;;  %v4925_v48 = vpop.permute.xlu0 %4924 }
0x1977   : > { %4172 = vadd.xlane.f32.xlu0 %v4171_v44  ;;  %v4930_v63 = vsel %vm523_vm3, %v4925_v48, 0 }
0x1984   : > { %4922 = vrot.lane.b32.xlu1 %v18366_v18, %s20919_s22  ;;  %s20931_s22 = smov 104  }
0x1988   : > { %4177 = vrot.lane.b32.xlu1 %v18358_v6, %s20920_s20  ;;  %s20936_s20 = smov 44  }
0x19ac   : > { %4488 = vmax.xlane.f32.xlu1 %v4487_v45 }
0x1a00   : > { %v4658_v49 = vpop.xlane.xlu1 %4657 }
0x1a01   : > { %17297 = vrcp.f32 %v4658_v49 }
0x1a04   : > { %v4923_v50 = vpop.permute.xlu1 %4922  ;;  %v4173_v27 = vpop.xlane.xlu0 %4172 }
0x1a05   : > { %17299 = vrcp.f32 %v4173_v27 }
0x1a08   : > { %v4178_v16 = vpop.permute.xlu1 %4177 }
0x1a09   : > { %v4183_v52 = vsel %vm589_vm2, %v4178_v16, 0 }
0x1a0a   : > { %16142 = vmatpush3.bf16.msra.mxu0 %v4183_v52 }
0x1a0b   : > { %v17298_v53 = vpop.eup %17297  ;;  %16147 = vmatprep.subr.bf16.mxu0 %v17404_v1 }
0x1a0c   : > { %v4660_v54 = vmul.f32 %v17298_v53, %v17294_v41 }
0x1a0e   : > { %v4661_v55 = vpack.c.bf16 %v4660_v54, %v4660_v54  ;;  %v16852_v54 = vld [vmem:[%s20833_s3 + $0x4] ss:$0 sps:$4 sm:$0xcc]  }
0x1a0f   : > { %v17300_v56 = vpop.eup %17299 }
0x1a10   : > { %16198 = vmatmul.mubr.msk.bf16.vlgmr.msra.gmra.mrb[80].mxu1 %vm585_vm5, %v4661_v55  ;;  %v4175_v59 = vmul.f32 %v17300_v56, %v17296_v43  ;;  %v4552_v55 = vrot.slane %v16852_v54, 2 }
0x1a11   : > { %16208 = vmatpush3.bf16.xpose.msra.mxu1 %v4767_v58  ;;  %16209 = vmatprep.mubr.msk.bf16.mxu1 %vm17405_vm0, %v17404_v1 }
0x1a12   : > { %v4176_v61 = vpack.c.bf16 %v4175_v59, %v4175_v59  ;;  %16225 = vmatprep.subr.bf16.mxu1 %v17404_v1  ;;  %v4557_v56 = vsel %vm638_vm6, %v4552_v55, 0 }
0x1a14   : > { %16144 = vmatmul.mubr.msk.bf16.vlgmr.msra.gmra.mrb[92].mxu0 %vm585_vm5, %v4176_v61 }
0x1a15   : > { %16149 = vmatprep.mubr.msk.bf16.mxu0 %vm17405_vm0, %v17404_v1  ;;  %16148 = vmatpush3.bf16.msra.mxu0 %v4235_v3 }
0x1a16   : > { %16165 = vmatprep.subr.bf16.mxu0 %v17404_v1 }
0x1a18   : > { %16210 = vmatmul.mubr.msk.bf16.vlgmr.msra.gmra.mrb[84].mxu1 %vm523_vm3, %v4760_v46 }
0x1a19   : > { %16226 = vmatpush3.bf16.xpose.msra.mxu1 %v4930_v63  ;;  %16227 = vmatprep.mubr.msk.bf16.mxu1 %vm17405_vm0, %v17404_v1 }
0x1a1a   : > { %16231 = vmatprep.subr.bf16.mxu1 %v17404_v1 }
0x1a20   : > { %16228 = vmatmul.mubr.msk.bf16.vlgmr.msra.gmra.mrb[88].mxu1 %vm523_vm3, %v4923_v50 }
0x1a21   : > { %16233 = vmatprep.mubr.msk.bf16.mxu1 %vm17405_vm0, %v17404_v1 }
0x1a39   : > { %v4489_v4 = vpop.xlane.xlu1 %4488 }
0x1a3a   : > { %v4490_v8 = vsub.f32 %v18438_v24, %v4489_v4  ;;  %v4711_v4 = vld [vmem:[%s20833_s3 + $0x8] sm:$0x3] }
0x1a3c   : > { %v4491_v19 = vmul.f32 1.442695, %v4490_v8 }
0x1a3e   : > { %17301 = vpow2.f32 %v4491_v19 }
0x1a48   : > { %v17302_v34 = vpop.eup %17301 }
0x1a49   : > { %v4493_v37 = vsel %vm570_vm4, %v17302_v34, 0.0 }
0x1ae3   : > { %v18486_v11 = vpop.f32.mrb[80].mxu1 }
0x1ae4   : > { %v16199_v12 = vpop.f32.mrb[81].mxu1 }
0x1ae5   : > { %v4707_v14 = vpop.f32.mrb[82].mxu1 }
0x1ae6   : > { %v16200_v17 = vpop.f32.mrb[83].mxu1 }
0x1ae7   : > { %v4219_v21 = vpop.f32.mrb[92].mxu0  ;;  %v4716_v17 = vsel %vm638_vm6, %v4711_v4, 0 }
0x1ae8   : > { %v4225_v22 = vpack.c.bf16 %v4219_v21, %v4219_v21  ;;  %v16145_v23 = vpop.f32.mrb[93].mxu0 }
0x1ae9   : > { %v4222_v26 = vpop.f32.mrb[94].mxu0  ;;  %v4710_v23 = vpack.c.bf16 %v18486_v11, %v18486_v11  ;;  %v16853_v11 = vld [vmem:[%s20833_s3 + $0x8] ss:$0 sps:$4 sm:$0xcc]  }
0x1aea   : > { %v16146_v28 = vpop.f32.mrb[95].mxu0  ;;  %16150 = vmatmul.mubr.msk.bf16.vlgmr.msra.gmra.mrb[88].mxu0 %vm523_vm3, %v4225_v22 }
0x1aeb   : > { %v4803_v24 = vpop.f32.mrb[84].mxu1  ;;  %16166 = vmatpush3.bf16.msra.mxu0 %v4394_v25  ;;  %16167 = vmatprep.mubr.msk.bf16.mxu0 %vm17405_vm0, %v17404_v1 }
0x1aec   : > { %v16211_v29 = vpop.f32.mrb[85].mxu1  ;;  %16177 = vmatprep.subr.bf16.mxu0 %v17404_v1  ;;  %v4809_v7 = vsel %vm570_vm4, %v4803_v24, -inf }
0x1aed   : > { %v4806_v30 = vpop.f32.mrb[86].mxu1  ;;  %v4874_v29 = vrot.slane %v16853_v11, 2  ;;  %v5286_v11 = vld [vmem:[%s20837_s7 + $0x80] sm:$0xff] }
0x1aee   : > { %v16212_v31 = vpop.f32.mrb[87].mxu1 }
0x1aef   : > { %v4879_v30 = vsel %vm638_vm6, %v4874_v29, 0  ;;  %v5288_v29 = vld [vmem:[%s20837_s7 + $0xc0] sm:$0xff] }
0x1af3   : > { %v4966_v32 = vpop.f32.mrb[88].mxu1 }
0x1af4   : > { %v16229_v33 = vpop.f32.mrb[89].mxu1  ;;  %v4972_v9 = vsel %vm570_vm4, %v4966_v32, -inf }
0x1af5   : > { %4973 = vmax.xlane.f32.xlu0 %v4972_v9  ;;  %v4969_v35 = vpop.f32.mrb[90].mxu1 }
0x1af6   : > { %16168 = vmatmul.mubr.msk.bf16.vlgmr.msra.gmra.mrb[88].mxu0 %vm523_vm3, %v4388_v47  ;;  %v16230_v36 = vpop.f32.mrb[91].mxu1 }
0x1af7   : > { %16179 = vmatprep.mubr.msk.bf16.mxu0 %vm17405_vm0, %v17404_v1 }
0x1af9   : > { %4494 = vadd.xlane.f32.xlu0 %v4493_v37 }
0x1b0f   : > { %4499 = vrot.lane.b32.xlu0 %v18358_v6, %s20921_s0  ;;  %s20935_s0 = smov 100  }
0x1b13   : > { %5083 = vrot.lane.b32.xlu0 %v18358_v6, %s20922_s13  ;;  %s20932_s13 = smov 60  }
0x1b17   : > { %5081 = vrot.lane.b32.xlu0 %v18366_v18, %s20923_s25  ;;  %s20930_s25 = smov 124  }
0x1b36   : > { %4810 = vmax.xlane.f32.xlu0 %v4809_v7  ;;  %v5033_v7 = vld [vmem:[%s20833_s3 + $0xc] sm:$0x3] }
0x1b4c   : > { %4821 = vrot.lane.b32.xlu0 %v18358_v6, %s20924_s21  ;;  %s20933_s21 = smov 52  }
0x1b82   : > { %v4974_v38 = vpop.xlane.xlu0 %4973 }
0x1b83   : > { %v4975_v39 = vsub.f32 %v4966_v32, %v4974_v38 }
0x1b85   : > { %v4976_v40 = vmul.f32 1.442695, %v4975_v39 }
0x1b86   : > { %v4495_v41 = vpop.xlane.xlu0 %4494 }
0x1b87   : > { %17303 = vpow2.f32 %v4976_v40 }
0x1b88   : > { %17305 = vrcp.f32 %v4495_v41  ;;  %v5038_v41 = vsel %vm638_vm6, %v5033_v7, 0  ;;  %v16859_v7 = vld [vmem:[%s20839_s9 + $0x50] sm:$0xff]  }
0x1b8a   : > { %v4500_v42 = vpop.permute.xlu0 %4499 }
0x1b8b   : > { %v4505_v43 = vsel %vm589_vm2, %v4500_v42, 0 }
0x1b8c   : > { %16178 = vmatpush3.bf16.msra.mxu0 %v4505_v43 }
0x1b8d   : > { %16183 = vmatprep.subr.bf16.mxu0 %v17404_v1 }
0x1b8e   : > { %v5084_v48 = vpop.permute.xlu0 %5083 }
0x1b8f   : > { %v5089_v3 = vsel %vm523_vm3, %v5084_v48, 0 }
0x1b91   : > { %v17304_v44 = vpop.eup %17303 }
0x1b92   : > { %v17306_v18 = vpop.eup %17305  ;;  %v4978_v45 = vsel %vm570_vm4, %v17304_v44, 0.0  ;;  %v5082_v49 = vpop.permute.xlu0 %5081 }
0x1b93   : > { %4979 = vadd.xlane.f32.xlu1 %v4978_v45  ;;  %v4497_v20 = vmul.f32 %v17306_v18, %v17302_v34 }
0x1b95   : > { %v4498_v46 = vpack.c.bf16 %v4497_v20, %v4497_v20 }
0x1b97   : > { %16180 = vmatmul.mubr.msk.bf16.vlgmr.msra.gmra.mrb[96].mxu0 %vm585_vm5, %v4498_v46 }
0x1b98   : > { %16185 = vmatprep.mubr.msk.bf16.mxu0 %vm17405_vm0, %v17404_v1  ;;  %16184 = vmatpush3.bf16.msra.mxu0 %v4557_v56 }
0x1b99   : > { %16201 = vmatprep.subr.bf16.mxu0 %v17404_v1 }
0x1ba4   : > { %4984 = vrot.lane.b32.xlu1 %v18358_v6, %s20925_s12  ;;  %s20926_s12 = smov 36  }
0x1bc3   : > { %v4811_v50 = vpop.xlane.xlu0 %4810 }
0x1bc4   : > { %v4812_v27 = vsub.f32 %v4803_v24, %v4811_v50 }
0x1bc6   : > { %v4813_v16 = vmul.f32 1.442695, %v4812_v27 }
0x1bc7   : > { %v4822_v22 = vpop.permute.xlu0 %4821 }
0x1bc8   : > { %17307 = vpow2.f32 %v4813_v16  ;;  %v4827_v26 = vsel %vm589_vm2, %v4822_v22, 0  ;;  %v16854_v16 = vld [vmem:[%s20833_s3 + $0xc] ss:$0 sps:$4 sm:$0xcc]  }
0x1bd2   : > { %v17308_v52 = vpop.eup %17307 }
0x1bd3   : > { %v4815_v53 = vsel %vm570_vm4, %v17308_v52, 0.0 }
0x1bd4   : > { %4816 = vadd.xlane.f32.xlu1 %v4815_v53 }
0x1c20   : > { %v4980_v58 = vpop.xlane.xlu1 %4979 }
0x1c21   : > { %17309 = vrcp.f32 %v4980_v58 }
0x1c24   : > { %v4985_v59 = vpop.permute.xlu1 %4984 }
0x1c25   : > { %v4990_v61 = vsel %vm589_vm2, %v4985_v59, 0 }
0x1c26   : > { %16232 = vmatpush3.bf16.msra.mxu1 %v4990_v61 }
0x1c27   : > { %16243 = vmatprep.subr.bf16.mxu1 %v17404_v1 }
0x1c2b   : > { %v17310_v63 = vpop.eup %17309 }
0x1c2c   : > { %v4982_v0 = vmul.f32 %v17310_v63, %v17304_v44 }
0x1c2e   : > { %v4983_v2 = vpack.c.bf16 %v4982_v0, %v4982_v0  ;;  %v3947_v0 = vunpack.c.l.bf16 %v18346_v51  ;;  %v5282_v51 = vld [vmem:[%s20837_s7] sm:$0xff] }
0x1c30   : > { %16234 = vmatmul.mubr.msk.bf16.vlgmr.msra.gmra.mrb[92].mxu1 %vm585_vm5, %v4983_v2  ;;  %v14428_v2 = vld [vmem:[%s20907_s4] ss:$0 sm:$0xff]  ;;  %s20929_s4 = smov 92  }
0x1c31   : > { %16244 = vmatpush3.bf16.xpose.msra.mxu1 %v5089_v3  ;;  %16245 = vmatprep.mubr.msk.bf16.mxu1 %vm17405_vm0, %v17404_v1  ;;  %v3955_v3 = vadd.f32 %v14428_v2, %v3947_v0  ;;  %v16870_v0 = vld [vmem:[%s20839_s9 + $0x90] sm:$0xff]   ;;  %v16872_v2 = vld [vmem:[%s20839_s9 + $0xd8] sm:$0xff]  }
0x1c38   : > { %16246 = vmatmul.mubr.msk.bf16.vlgmr.msra.gmra.mrb[96].mxu1 %vm523_vm3, %v5082_v49 }
0x1c39   : > { %5387 = vmatprep.mubr.bf16.mxu1 %v17429_v62 }
0x1c61   : > { %v4817_v12 = vpop.xlane.xlu1 %4816 }
0x1c62   : > { %17311 = vrcp.f32 %v4817_v12 }
0x1c6a   : > { %v4541_v8 = vpop.f32.mrb[96].mxu0 }
0x1c6b   : > { %v4547_v14 = vpack.c.bf16 %v4541_v8, %v4541_v8  ;;  %v16181_v15 = vpop.f32.mrb[97].mxu0 }
0x1c6c   : > { %v4544_v19 = vpop.f32.mrb[98].mxu0  ;;  %v17312_v25 = vpop.eup %17311 }
0x1c6d   : > { %v16182_v21 = vpop.f32.mrb[99].mxu0  ;;  %16186 = vmatmul.mubr.msk.bf16.vlgmr.msra.gmra.mrb[88].mxu0 %vm523_vm3, %v4547_v14  ;;  %v4819_v28 = vmul.f32 %v17312_v25, %v17308_v52  ;;  %v5196_v52 = vrot.slane %v16854_v16, 2  ;;  %v5287_v16 = vld [vmem:[%s20837_s7 + $0x88] sm:$0xff] }
0x1c6e   : > { %16202 = vmatpush3.bf16.msra.mxu0 %v4716_v17  ;;  %16203 = vmatprep.mubr.msk.bf16.mxu0 %vm17405_vm0, %v17404_v1 }
0x1c6f   : > { %16213 = vmatprep.subr.bf16.mxu0 %v17404_v1  ;;  %v4820_v24 = vpack.c.bf16 %v4819_v28, %v4819_v28  ;;  %v5201_v56 = vsel %vm638_vm6, %v5196_v52, 0  ;;  %v5289_v52 = vld [vmem:[%s20837_s7 + $0xc8] sm:$0xff] }
0x1c79   : > { %16204 = vmatmul.mubr.msk.bf16.vlgmr.msra.gmra.mrb[88].mxu0 %vm523_vm3, %v4710_v23 }
0x1c7a   : > { %16214 = vmatpush3.bf16.msra.mxu0 %v4827_v26  ;;  %16215 = vmatprep.mubr.msk.bf16.mxu0 %vm17405_vm0, %v17404_v1  ;;  %v5284_v26 = vld [vmem:[%s20837_s7 + $0x40] sm:$0xff] }
0x1c7b   : > { %16219 = vmatprep.subr.bf16.mxu0 %v17404_v1  ;;  %v14461_v28 = vcombine.high %v5282_v51, %v5284_v26 }
0x1c7d   : > { %5355 = vmatprep.subr.bf16.mxu1 %v14461_v28  ;;  %v16884_v28 = vld [vmem:[%s20839_s9 + $0xb0] sm:$0xff]  }
0x1c81   : > { %16216 = vmatmul.mubr.msk.bf16.vlgmr.msra.gmra.mrb[100].mxu0 %vm585_vm5, %v4820_v24  ;;  %v14460_v24 = vcombine.low %v5282_v51, %v5284_v26 }
0x1c82   : > { %16221 = vmatprep.mubr.msk.bf16.mxu0 %vm17405_vm0, %v17404_v1  ;;  %16220 = vmatpush3.bf16.msra.mxu0 %v4879_v30  ;;  %v14465_v30 = vcombine.high %v5286_v11, %v5288_v29 }
0x1c83   : > { %16237 = vmatprep.subr.bf16.mxu0 %v17404_v1  ;;  %5356 = vmatpush1.bf16.msra.mxu1 %v14460_v24  ;;  %v16885_v24 = vld [vmem:[%s20839_s9 + $0xf8] sm:$0xff]  }
0x1c84   : > { %5357 = vmatprep.subr.bf16.mxu1 %v14465_v30  ;;  %v5785_v30 = vld [vmem:[%s20837_s7 + $0x58] sm:$0xff] }
0x1d03   : > { %v5026_v31 = vpop.f32.mrb[92].mxu1 }
0x1d04   : > { %v16235_v32 = vpop.f32.mrb[93].mxu1  ;;  %v5032_v44 = vpack.c.bf16 %v5026_v31, %v5026_v31  ;;  %v14464_v31 = vcombine.low %v5286_v11, %v5288_v29  ;;  %v16886_v11 = vld [vmem:[%s20839_s9 + $0xb8] sm:$0xff]  }
0x1d05   : > { %v5029_v47 = vpop.f32.mrb[94].mxu1  ;;  %v5283_v32 = vld [vmem:[%s20837_s7 + $0x8] sm:$0xff]  ;;  %v5783_v29 = vld [vmem:[%s20837_s7 + $0x18] sm:$0xff] }
0x1d06   : > { %v16236_v33 = vpop.f32.mrb[95].mxu1  ;;  %5358 = vmatpush1.bf16.msra.mxu1 %v14464_v31  ;;  %v5285_v47 = vld [vmem:[%s20837_s7 + $0x48] sm:$0xff]  ;;  %v14504_v31 = vcombine.low %v5783_v29, %v5785_v30 }
0x1d07   : > { %v14462_v33 = vcombine.low %v5283_v32, %v5285_v47 }
0x1d0b   : > { %v5125_v9 = vpop.f32.mrb[96].mxu1 }
0x1d0c   : > { %v16247_v34 = vpop.f32.mrb[97].mxu1  ;;  %v5131_v35 = vsel %vm570_vm4, %v5125_v9, -inf }
0x1d0d   : > { %5132 = vmax.xlane.f32.xlu1 %v5131_v35  ;;  %v5128_v36 = vpop.f32.mrb[98].mxu1  ;;  %v16855_v34 = vld [vmem:[%s20839_s9 + $0x40] sm:$0xff]  }
0x1d0e   : > { %v16248_v37 = vpop.f32.mrb[99].mxu1  ;;  %v16856_v35 = vld [vmem:[%s20839_s9] sm:$0xff]   ;;  %v16857_v36 = vld [vmem:[%s20839_s9 + $0x48] sm:$0xff]  }
0x1d0f   : > { %v16858_v37 = vld [vmem:[%s20839_s9 + $0x8] sm:$0xff]  }
0x1d54   : > { %v4863_v38 = vpop.f32.mrb[100].mxu0 }
0x1d55   : > { %v4869_v39 = vpack.c.bf16 %v4863_v38, %v4863_v38  ;;  %v16217_v40 = vpop.f32.mrb[101].mxu0  ;;  %v16861_v38 = vld [vmem:[%s20839_s9 + $0x10] sm:$0xff]  }
0x1d56   : > { %v4866_v42 = vpop.f32.mrb[102].mxu0  ;;  %v16865_v40 = vld [vmem:[%s20839_s9 + $0x18] sm:$0xff]  }
0x1d57   : > { %v16218_v43 = vpop.f32.mrb[103].mxu0  ;;  %16222 = vmatmul.mubr.msk.bf16.vlgmr.msra.gmra.mrb[88].mxu0 %vm523_vm3, %v4869_v39  ;;  %v16863_v39 = vld [vmem:[%s20839_s9 + $0x58] sm:$0xff]   ;;  %v16869_v42 = vld [vmem:[%s20839_s9 + $0x20] sm:$0xff]  }
0x1d58   : > { %16238 = vmatpush3.bf16.msra.mxu0 %v5038_v41  ;;  %16239 = vmatprep.mubr.msk.bf16.mxu0 %vm17405_vm0, %v17404_v1  ;;  %v16867_v41 = vld [vmem:[%s20839_s9 + $0x60] sm:$0xff]   ;;  %v16871_v43 = vld [vmem:[%s20839_s9 + $0x68] sm:$0xff]  }
0x1d59   : > { %16249 = vmatprep.subr.bf16.mxu0 %v17404_v1 }
0x1d63   : > { %16240 = vmatmul.mubr.msk.bf16.vlgmr.msra.gmra.mrb[88].mxu0 %vm523_vm3, %v5032_v44  ;;  %v16873_v44 = vld [vmem:[%s20839_s9 + $0x28] sm:$0xff]  }
0x1d64   : > { %16251 = vmatprep.mubr.msk.bf16.mxu0 %vm17405_vm0, %v17404_v1 }
0x1d9a   : > { %v5133_v18 = vpop.xlane.xlu1 %5132 }
0x1d9b   : > { %v5134_v45 = vsub.f32 %v5125_v9, %v5133_v18  ;;  %v14463_v9 = vcombine.high %v5283_v32, %v5285_v47  ;;  %v14505_v32 = vcombine.high %v5783_v29, %v5785_v30  ;;  %v5290_v47 = vld [vmem:[%s20838_s8] sm:$0xf]  ;;  %v16905_v29 = vld [vmem:[%s20839_s9 + $0x128] sm:$0xff]   ;;  %v16906_v30 = vld [vmem:[%s20839_s9 + $0x198] sm:$0xff]  }
0x1d9d   : > { %v5135_v20 = vmul.f32 1.442695, %v5134_v45  ;;  %5396 = vmatprep.subr.bf16.mxu1 %v14463_v9  ;;  %v5299_v9 = vrot.slane %v5290_v47, %v17919_v57 }
0x1d9f   : > { %17313 = vpow2.f32 %v5135_v20 }
0x1da9   : > { %v17314_v46 = vpop.eup %17313 }
0x1daa   : > { %v5137_v48 = vsel %vm570_vm4, %v17314_v46, 0.0 }
0x1dab   : > { %5138 = vadd.xlane.f32.xlu1 %v5137_v48  ;;  %v14457_v48 = vld [vmem:[%s20835_s5] ss:$0 sm:$0xff] }
0x1dbc   : > { %5143 = vrot.lane.b32.xlu1 %v18358_v6, %s20926_s12  ;;  %s20934_s12 = smov 68  }
0x1e38   : > { %v5139_v49 = vpop.xlane.xlu1 %5138 }
0x1e39   : > { %17315 = vrcp.f32 %v5139_v49 }
0x1e3c   : > { %v5144_v50 = vpop.permute.xlu1 %5143 }
0x1e3d   : > { %v5149_v27 = vsel %vm589_vm2, %v5144_v50, 0  ;;  %v14458_v50 = vld [vmem:[%s20836_s6] ss:$0 sm:$0xff] }
0x1e3e   : > { %16250 = vmatpush3.bf16.msra.mxu0 %v5149_v27 }
0x1e3f   : > { %16255 = vmatprep.subr.bf16.mxu0 %v17404_v1 }
0x1e43   : > { %v17316_v53 = vpop.eup %17315 }
0x1e44   : > { %v5141_v54 = vmul.f32 %v17316_v53, %v17314_v46 }
0x1e46   : > { %v5142_v55 = vpack.c.bf16 %v5141_v54, %v5141_v54 }
0x1e48   : > { %16252 = vmatmul.mubr.msk.bf16.vlgmr.msra.gmra.mrb[104].mxu0 %vm585_vm5, %v5142_v55  ;;  %v14467_v55 = vcombine.high %v5287_v16, %v5289_v52 }
0x1e49   : > { %16256 = vmatpush3.bf16.msra.mxu0 %v5201_v56  ;;  %16257 = vmatprep.mubr.msk.bf16.mxu0 %vm17405_vm0, %v17404_v1  ;;  %v14466_v56 = vcombine.low %v5287_v16, %v5289_v52 }
0x1e4a   : > { %15327 = vmatprep.subr.bf16.mxu0 %v16855_v34 }
0x1f1b   : > { %v5185_v6 = vpop.f32.mrb[104].mxu0 }
0x1f1c   : > { %v5191_v58 = vpack.c.bf16 %v5185_v6, %v5185_v6  ;;  %v16253_v59 = vpop.f32.mrb[105].mxu0  ;;  %v16860_v6 = vld [vmem:[%s20839_s9 + $0xc0] sm:$0xff]  }
0x1f1d   : > { %v5188_v61 = vpop.f32.mrb[106].mxu0  ;;  %v16864_v59 = vld [vmem:[%s20839_s9 + $0xc8] sm:$0xff]  }
0x1f1e   : > { %v16254_v63 = vpop.f32.mrb[107].mxu0  ;;  %16258 = vmatmul.mubr.msk.bf16.vlgmr.msra.gmra.mrb[88].mxu0 %vm523_vm3, %v5191_v58  ;;  %v16862_v58 = vld [vmem:[%s20839_s9 + $0x80] sm:$0xff]   ;;  %v16866_v61 = vld [vmem:[%s20839_s9 + $0x88] sm:$0xff]  }
0x1f1f   : > { %15328 = vmatpush3.bf16.msra.mxu0 %v16856_v35  ;;  %v16868_v63 = vld [vmem:[%s20839_s9 + $0xd0] sm:$0xff]  }
0x1f20   : > { %15329 = vmatprep.subr.bf16.mxu0 %v16857_v36 }
0x1f23   : > { %15330 = vmatpush3.bf16.msra.mxu0 %v16858_v37 }
0x1f24   : > { %15331 = vmatprep.subr.bf16.mxu0 %v16859_v7 }
0x1f27   : > { %15332 = vmatpush3.bf16.msra.mxu0 %v16861_v38 }
0x1f28   : > { %15333 = vmatprep.subr.bf16.mxu0 %v16863_v39 }
0x1f2b   : > { %15334 = vmatpush3.bf16.msra.mxu0 %v16865_v40 }
0x1f2c   : > { %15335 = vmatprep.subr.bf16.mxu0 %v16867_v41  ;;  %v5786_v41 = vld [vmem:[%s20837_s7 + $0x90] sm:$0xff] }
0x1f2f   : > { %15336 = vmatpush3.bf16.msra.mxu0 %v16869_v42  ;;  %v5788_v42 = vld [vmem:[%s20837_s7 + $0xd0] sm:$0xff] }
0x1f30   : > { %15337 = vmatprep.subr.bf16.mxu0 %v16871_v43  ;;  %v5303_v43 = vrot.slane %v5290_v47, %v17923_v5  ;;  %v14506_v16 = vcombine.low %v5786_v41, %v5788_v42 }
0x1f33   : > { %15338 = vmatpush3.bf16.msra.mxu0 %v16873_v44 }
0x1ff1   : > { %v5237_v4 = vpop.f32.mrb[88].mxu0 }
0x1ff2   : > { %v16566_v8 = vadd.f32 %v5237_v4, %v3955_v3  ;;  %v16259_v12 = vpop.f32.mrb[89].mxu0  ;;  %v16874_v3 = vld [vmem:[%s20839_s9 + $0x98] sm:$0xff]   ;;  %v16875_v4 = vld [vmem:[%s20839_s9 + $0x70] sm:$0xff]  }
0x1ff3   : > { %v5240_v14 = vpop.f32.mrb[90].mxu0  ;;  %v16877_v12 = vld [vmem:[%s20839_s9 + $0x30] sm:$0xff]   ;;  %15339 = vmatprep.subr.bf16.mxu0 %v16875_v4 }
0x1ff4   : > { %v16260_v15 = vpop.f32.mrb[91].mxu0  ;;  %v5244_v17 = vsel %vm1813_vm7, %v16566_v8, 0.0  ;;  %v16878_v14 = vld [vmem:[%s20839_s9 + $0xa0] sm:$0xff]   ;;  %15340 = vmatpush3.bf16.msra.mxu0 %v16877_v12 }
0x1ff5   : > { %5245 = vadd.xlane.f32.xlu0 %v5244_v17  ;;  %v16879_v15 = vld [vmem:[%s20839_s9 + $0x78] sm:$0xff]   ;;  %v16880_v17 = vld [vmem:[%s20839_s9 + $0xe8] sm:$0xff]   ;;  %v16892_v12 = vld [vmem:[%s20839_s9 + $0x1c0] sm:$0xff]  }
0x1ff6   : > { %15341 = vmatprep.subr.bf16.mxu0 %v16879_v15  ;;  %v16894_v15 = vld [vmem:[%s20839_s9 + $0x180] sm:$0xff]  }
0x2082   : > { %v5246_v19 = vpop.xlane.xlu0 %5245 }
0x2083   : > { %v5247_v21 = vmul.f32 0.03125, %v5246_v19  ;;  %v16881_v19 = vld [vmem:[%s20839_s9 + $0x38] sm:$0xff]  }
0x2084   : > { %15342 = vmatpush3.bf16.msra.mxu0 %v16881_v19  ;;  %v16896_v19 = vld [vmem:[%s20839_s9 + $0x1c8] sm:$0xff]  }
0x2085   : > { %v5248_v22 = vsub.f32 %v16566_v8, %v5247_v21  ;;  %v16876_v8 = vld [vmem:[%s20839_s9 + $0xe0] sm:$0xff]   ;;  %v16882_v21 = vld [vmem:[%s20839_s9 + $0xa8] sm:$0xff]  }
0x2087   : > { %v5249_v23 = vmul.f32 %v5248_v22, %v5248_v22 }
0x2089   : > { %v5250_v25 = vsel %vm1813_vm7, %v5249_v23, 0.0  ;;  %v5784_v23 = vld [vmem:[%s20837_s7 + $0x50] sm:$0xff] }
0x208a   : > { %5251 = vadd.xlane.f32.xlu1 %v5250_v25  ;;  %v16883_v25 = vld [vmem:[%s20839_s9 + $0xf0] sm:$0xff]  }
0x2117   : > { %v5252_v18 = vpop.xlane.xlu1 %5251 }
0x2118   : > { %v5253_v45 = vmul.f32 0.03125, %v5252_v18  ;;  %v5307_v18 = vrot.slane %v5290_v47, %v17925_v10 }
0x211a   : > { %v5254_v20 = vadd.f32 1e-05, %v5253_v45 }
0x211c   : > { %17317 = vrsqrt.f32 %v5254_v20  ;;  %v14507_v20 = vcombine.high %v5786_v41, %v5788_v42  ;;  %v16916_v41 = vld [vmem:[%s20839_s9 + $0x1b0] sm:$0xff]   ;;  %v16917_v42 = vld [vmem:[%s20839_s9 + $0x1f8] sm:$0xff]  }
0x2126   : > { %v17318_v46 = vpop.eup %17317 }
0x2127   : > { %v5256_v49 = vmul.f32 %v17318_v46, %v5248_v22  ;;  %v5782_v22 = vld [vmem:[%s20837_s7 + $0x10] sm:$0xff] }
0x2128   : > { %v14503_v51 = vcombine.high %v5782_v22, %v5784_v23  ;;  %v14502_v26 = vcombine.low %v5782_v22, %v5784_v23  ;;  %v16898_v22 = vld [vmem:[%s20839_s9 + $0x188] sm:$0xff]   ;;  %v16897_v23 = vld [vmem:[%s20839_s9 + $0x118] sm:$0xff]  }
0x2129   : > { %v5264_v27 = vmul.f32 %v14457_v48, %v5256_v49 }
0x212a   : > { %5852 = vmatprep.subr.bf16.mxu0 %v14503_v51  ;;  %v16900_v51 = vld [vmem:[%s20839_s9 + $0x1d0] sm:$0xff]  }
0x212b   : > { %v18654_v53 = vadd.f32 %v14458_v50, %v5264_v27 }
0x212d   : > { %v18658_v54 = vpack.c.bf16 %v18654_v53, %v18654_v53 }
0x212f   : > { %14468 = vmatmul.mubr.msk.bf16.vlgmr.msra.gmra.mrb[100].mxu1 %vm464_vm1, %v18658_v54 }
0x2130   : > { %5397 = vmatpush1.bf16.msra.mxu1 %v14462_v33  ;;  %5428 = vmatprep.mubr.bf16.mxu1 %v17429_v62  ;;  %v5295_v33 = vrot.slane %v5290_v47, %v17914_v60  ;;  %v16909_v47 = vld [vmem:[%s20839_s9 + $0x130] sm:$0xff]  }
0x2131   : > { %5398 = vmatprep.subr.bf16.mxu1 %v14467_v55 }
0x2134   : > { %5399 = vmatpush1.bf16.msra.mxu1 %v14466_v56  ;;  %v16887_v56 = vld [vmem:[%s20839_s9 + $0x140] sm:$0xff]  }
0x2135   : > { %15349 = vmatprep.subr.bf16.mxu1 %v16860_v6 }
0x2137   : > { %14469 = vmatmul.mubr.msk.bf16.vlgmr.msra.gmra.mrb[104].mxu1 %vm464_vm1, %v18658_v54 }
0x2138   : > { %15350 = vmatpush3.bf16.msra.mxu1 %v16862_v58  ;;  %v5787_v58 = vld [vmem:[%s20837_s7 + $0x98] sm:$0xff] }
0x2139   : > { %15351 = vmatprep.subr.bf16.mxu1 %v16864_v59  ;;  %v5789_v59 = vld [vmem:[%s20837_s7 + $0xd8] sm:$0xff] }
0x213a   : > { %v14508_v4 = vcombine.low %v5787_v58, %v5789_v59 }
0x213c   : > { %15352 = vmatpush3.bf16.msra.mxu1 %v16866_v61 }
0x213d   : > { %15353 = vmatprep.subr.bf16.mxu1 %v16868_v63 }
0x2140   : > { %15354 = vmatpush3.bf16.msra.mxu1 %v16870_v0  ;;  %v14509_v0 = vcombine.high %v5787_v58, %v5789_v59  ;;  %v14459_v59 = vld [vmem:[%s20840_s10] ss:$0 sm:$0xff] }
0x2141   : > { %15355 = vmatprep.subr.bf16.mxu1 %v16872_v2  ;;  %v16888_v2 = vld [vmem:[%s20839_s9 + $0x100] sm:$0xff]  }
0x2144   : > { %15356 = vmatpush3.bf16.msra.mxu1 %v16874_v3  ;;  %v16889_v3 = vld [vmem:[%s20839_s9 + $0x148] sm:$0xff]  }
0x2145   : > { %15357 = vmatprep.subr.bf16.mxu1 %v16876_v8  ;;  %v16890_v8 = vld [vmem:[%s20839_s9 + $0x108] sm:$0xff]  }
0x2148   : > { %15358 = vmatpush3.bf16.msra.mxu1 %v16878_v14  ;;  %v16891_v14 = vld [vmem:[%s20839_s9 + $0x150] sm:$0xff]  }
0x2149   : > { %15359 = vmatprep.subr.bf16.mxu1 %v16880_v17  ;;  %v16893_v17 = vld [vmem:[%s20839_s9 + $0x110] sm:$0xff]  }
0x214c   : > { %15360 = vmatpush3.bf16.msra.mxu1 %v16882_v21  ;;  %v16895_v21 = vld [vmem:[%s20839_s9 + $0x158] sm:$0xff]  }
0x214d   : > { %15361 = vmatprep.subr.bf16.mxu1 %v16883_v25  ;;  %v16899_v25 = vld [vmem:[%s20839_s9 + $0x160] sm:$0xff]  }
0x2150   : > { %15362 = vmatpush3.bf16.msra.mxu1 %v16884_v28  ;;  %v16902_v28 = vld [vmem:[%s20839_s9 + $0x190] sm:$0xff]  }
0x2151   : > { %15363 = vmatprep.subr.bf16.mxu1 %v16885_v24  ;;  %v16903_v24 = vld [vmem:[%s20839_s9 + $0x168] sm:$0xff]  }
0x2154   : > { %15364 = vmatpush3.bf16.msra.mxu1 %v16886_v11  ;;  %v16904_v11 = vld [vmem:[%s20839_s9 + $0x1d8] sm:$0xff]  }
0x2155   : > { %5893 = vmatprep.subr.bf16.mxu1 %v14505_v32  ;;  %v16908_v32 = vld [vmem:[%s20839_s9 + $0x1e0] sm:$0xff]  }
0x2202   : > { %v5389_v34 = vpop.f32.mrb[100].mxu1 }
0x2203   : > { %v5390_v35 = vadd.f32 %v5389_v34, %v5295_v33  ;;  %v5391_v36 = vpop.f32.mrb[101].mxu1  ;;  %v16910_v33 = vld [vmem:[%s20839_s9 + $0x1a0] sm:$0xff]   ;;  %v16912_v34 = vld [vmem:[%s20839_s9 + $0x1e8] sm:$0xff]  }
0x2204   : > { %v5392_v37 = vadd.f32 %v5391_v36, %v5299_v9  ;;  %v5393_v7 = vpop.f32.mrb[102].mxu1  ;;  %v16911_v9 = vld [vmem:[%s20839_s9 + $0x178] sm:$0xff]   ;;  %v16914_v36 = vld [vmem:[%s20839_s9 + $0x1a8] sm:$0xff]  }
0x2205   : > { %v5437_v38 = vmax.f32 %v5390_v35, 0.0  ;;  %v5394_v39 = vpop.f32.mrb[103].mxu1  ;;  %v16913_v35 = vld [vmem:[%s20839_s9 + $0x138] sm:$0xff]   ;;  %v6281_v7 = vld [vmem:[%s20837_s7 + $0x60] sm:$0xff] }
0x2206   : > { %v5438_v40 = vmax.f32 %v5392_v37, 0.0  ;;  %v6279_v37 = vld [vmem:[%s20837_s7 + $0x20] sm:$0xff] }
0x2207   : > { %v5441_v45 = vpack.c.bf16 %v5437_v38, %v5437_v38  ;;  %v16915_v38 = vld [vmem:[%s20839_s9 + $0x1f0] sm:$0xff]   ;;  %v14545_v39 = vcombine.high %v6279_v37, %v6281_v7 }
0x2208   : > { %v5442_v44 = vpack.c.bf16 %v5438_v40, %v5438_v40  ;;  %v14544_v40 = vcombine.low %v6279_v37, %v6281_v7 }
0x220a   : > { %v5430_v46 = vpop.f32.mrb[104].mxu1  ;;  %5733 = vmatprep.mubr.bf16.mxu0 %v5442_v44  ;;  %v18867_v44 = vld [vmem:[%s20837_s7 + $0x28] sm:$0xff] }
0x220b   : > { %v5431_v48 = vadd.f32 %v5430_v46, %v5303_v43  ;;  %v5432_v49 = vpop.f32.mrb[105].mxu1  ;;  %5734 = vmatmul.mubr.bf16.vlgmr.msra.gmra.mrb[108].mxu0 %v5441_v45  ;;  %v16918_v43 = vld [vmem:[%s20839_s9 + $0x1b8] sm:$0xff]  }
0x220c   : > { %v5433_v50 = vadd.f32 %v5432_v49, %v5307_v18  ;;  %v5434_v27 = vpop.f32.mrb[106].mxu1  ;;  %5853 = vmatpush1.bf16.msra.mxu0 %v14502_v26  ;;  %5884 = vmatprep.mubr.bf16.mxu0 %v17429_v62  ;;  %v16901_v26 = vld [vmem:[%s20839_s9 + $0x120] sm:$0xff]   ;;  %v18872_v18 = vld [vmem:[%s20837_s7 + $0x68] sm:$0xff] }
0x220d   : > { %v5439_v52 = vmax.f32 %v5431_v48, 0.0  ;;  %v5435_v55 = vpop.f32.mrb[107].mxu1  ;;  %5854 = vmatprep.subr.bf16.mxu0 %v14507_v20  ;;  %v14546_v45 = vcombine.low %v18867_v44, %v18872_v18  ;;  %v14547_v20 = vcombine.high %v18867_v44, %v18872_v18  ;;  %v5790_v27 = vld [vmem:[%s20838_s8 + $0x4] sm:$0xf]  ;;  %v16923_v44 = vld [vmem:[%s20839_s9 + $0x250] sm:$0xff]  }
0x220e   : > { %v5440_v6 = vmax.f32 %v5433_v50, 0.0  ;;  %v5799_v55 = vrot.slane %v5790_v27, %v17919_v57  ;;  %v16926_v18 = vld [vmem:[%s20839_s9 + $0x280] sm:$0xff]  }
0x220f   : > { %v5443_v63 = vpack.c.bf16 %v5439_v52, %v5439_v52  ;;  %v5795_v52 = vrot.slane %v5790_v27, %v17914_v60 }
0x2210   : > { %v5444_v61 = vpack.c.bf16 %v5440_v6, %v5440_v6  ;;  %5855 = vmatpush1.bf16.msra.mxu0 %v14506_v16 }
0x2211   : > { %15371 = vmatprep.subr.bf16.mxu0 %v16887_v56 }
0x2212   : > { %5773 = vmatprep.mubr.bf16.mxu1 %v5444_v61 }
0x2213   : > { %5774 = vmatmul.mubr.bf16.vlgmr.msra.gmra.mrb[108].mxu1 %v5443_v63  ;;  %14510 = vmatmul.mubr.msk.bf16.vlgmr.msra.gmra.mrb[112].mxu0 %vm464_vm1, %v18658_v54 }
0x2214   : > { %5894 = vmatpush1.bf16.msra.mxu1 %v14504_v31  ;;  %5925 = vmatprep.mubr.bf16.mxu1 %v17429_v62  ;;  %v16907_v31 = vld [vmem:[%s20839_s9 + $0x170] sm:$0xff]  }
0x2215   : > { %5895 = vmatprep.subr.bf16.mxu1 %v14509_v0  ;;  %15372 = vmatpush3.bf16.msra.mxu0 %v16888_v2 }
0x2216   : > { %15373 = vmatprep.subr.bf16.mxu0 %v16889_v3 }
0x2218   : > { %5896 = vmatpush1.bf16.msra.mxu1 %v14508_v4 }
0x2219   : > { %15374 = vmatpush3.bf16.msra.mxu0 %v16890_v8  ;;  %15393 = vmatprep.subr.bf16.mxu1 %v16892_v12 }
0x221a   : > { %15375 = vmatprep.subr.bf16.mxu0 %v16891_v14 }
0x221b   : > { %14511 = vmatmul.mubr.msk.bf16.vlgmr.msra.gmra.mrb[112].mxu1 %vm464_vm1, %v18658_v54 }
0x221c   : > { %15394 = vmatpush3.bf16.msra.mxu1 %v16894_v15  ;;  %v5281_v15 = vadd.f32 %v14459_v59, %v18654_v53  ;;  %v16939_v59 = vld [vmem:[%s20839_s9 + $0x270] sm:$0xff]  }
0x221d   : > { %15376 = vmatpush3.bf16.msra.mxu0 %v16893_v17  ;;  %15395 = vmatprep.subr.bf16.mxu1 %v16896_v19 }
0x221e   : > { %15377 = vmatprep.subr.bf16.mxu0 %v16895_v21  ;;  %v6283_v21 = vld [vmem:[%s20837_s7 + $0xa0] sm:$0xff] }
0x2220   : > { %15396 = vmatpush3.bf16.msra.mxu1 %v16898_v22  ;;  %v6285_v22 = vld [vmem:[%s20837_s7 + $0xe0] sm:$0xff] }
0x2221   : > { %15378 = vmatpush3.bf16.msra.mxu0 %v16897_v23  ;;  %15397 = vmatprep.subr.bf16.mxu1 %v16900_v51  ;;  %v5803_v23 = vrot.slane %v5790_v27, %v17923_v5 }
0x2222   : > { %15379 = vmatprep.subr.bf16.mxu0 %v16899_v25 }
0x2224   : > { %15398 = vmatpush3.bf16.msra.mxu1 %v16902_v28 }
0x2225   : > { %15380 = vmatpush3.bf16.msra.mxu0 %v16901_v26  ;;  %15399 = vmatprep.subr.bf16.mxu1 %v16904_v11  ;;  %v5807_v26 = vrot.slane %v5790_v27, %v17925_v10  ;;  %v16932_v27 = vld [vmem:[%s20839_s9 + $0x2d0] sm:$0xff]  }
0x2226   : > { %15381 = vmatprep.subr.bf16.mxu0 %v16903_v24  ;;  %v14549_v24 = vcombine.high %v6283_v21, %v6285_v22 }
0x2228   : > { %15400 = vmatpush3.bf16.msra.mxu1 %v16906_v30 }
0x2229   : > { %15382 = vmatpush3.bf16.msra.mxu0 %v16905_v29  ;;  %15401 = vmatprep.subr.bf16.mxu1 %v16908_v32  ;;  %v14548_v32 = vcombine.low %v6283_v21, %v6285_v22  ;;  %v16948_v21 = vld [vmem:[%s20839_s9 + $0x2b0] sm:$0xff]   ;;  %v16949_v22 = vld [vmem:[%s20839_s9 + $0x2f8] sm:$0xff]  }
0x222a   : > { %15383 = vmatprep.subr.bf16.mxu0 %v16907_v31 }
0x222c   : > { %15402 = vmatpush3.bf16.msra.mxu1 %v16910_v33 }
0x222d   : > { %15384 = vmatpush3.bf16.msra.mxu0 %v16909_v47  ;;  %15403 = vmatprep.subr.bf16.mxu1 %v16912_v34 }
0x222e   : > { %15385 = vmatprep.subr.bf16.mxu0 %v16911_v9  ;;  %v16919_v9 = vld [vmem:[%s20839_s9 + $0x240] sm:$0xff]  }
0x2230   : > { %15404 = vmatpush3.bf16.msra.mxu1 %v16914_v36  ;;  %v6286_v36 = vld [vmem:[%s20837_s7 + $0xe8] sm:$0xff] }
0x2231   : > { %15386 = vmatpush3.bf16.msra.mxu0 %v16913_v35  ;;  %15405 = vmatprep.subr.bf16.mxu1 %v16915_v38  ;;  %v6284_v35 = vld [vmem:[%s20837_s7 + $0xa8] sm:$0xff] }
0x2232   : > { %6349 = vmatprep.subr.bf16.mxu0 %v14545_v39  ;;  %v14551_v38 = vcombine.high %v6284_v35, %v6286_v36  ;;  %v16920_v39 = vld [vmem:[%s20839_s9 + $0x200] sm:$0xff]  }
0x2234   : > { %15406 = vmatpush3.bf16.msra.mxu1 %v16916_v41  ;;  %v14550_v41 = vcombine.low %v6284_v35, %v6286_v36 }
0x2235   : > { %15407 = vmatprep.subr.bf16.mxu1 %v16917_v42  ;;  %v16922_v42 = vld [vmem:[%s20839_s9 + $0x208] sm:$0xff]  }
0x2238   : > { %15408 = vmatpush3.bf16.msra.mxu1 %v16918_v43  ;;  %v16924_v43 = vld [vmem:[%s20839_s9 + $0x2c0] sm:$0xff]  }
0x2239   : > { %6390 = vmatprep.subr.bf16.mxu1 %v14547_v20  ;;  %v16928_v20 = vld [vmem:[%s20839_s9 + $0x2c8] sm:$0xff]  }
0x22de   : > { %v15343_v46 = vpop.f32.mrb[108].mxu0 }
0x22df   : > { %v15344_v48 = vpop.f32.mrb[109].mxu0 }
0x22e0   : > { %v15345_v49 = vadd.f32 %v15344_v48, %v15343_v46  ;;  %v15346_v50 = vpop.f32.mrb[110].mxu0  ;;  %v16927_v46 = vld [vmem:[%s20839_s9 + $0x258] sm:$0xff]   ;;  %v16930_v48 = vld [vmem:[%s20839_s9 + $0x288] sm:$0xff]  }
0x22e1   : > { %v15347_v16 = vpop.f32.mrb[111].mxu0  ;;  %v16931_v50 = vld [vmem:[%s20839_s9 + $0x260] sm:$0xff]  }
0x22e2   : > { %v16933_v16 = vld [vmem:[%s20839_s9 + $0x220] sm:$0xff]  }
0x22e6   : > { %v15365_v56 = vpop.f32.mrb[108].mxu1  ;;  %v5886_v6 = vpop.f32.mrb[112].mxu0 }
0x22e7   : > { %v5887_v58 = vadd.f32 %v5886_v6, %v5795_v52  ;;  %v15366_v61 = vpop.f32.mrb[109].mxu1  ;;  %v5888_v63 = vpop.f32.mrb[113].mxu0  ;;  %v16934_v52 = vld [vmem:[%s20839_s9 + $0x290] sm:$0xff]   ;;  %v16937_v6 = vld [vmem:[%s20839_s9 + $0x228] sm:$0xff]  }
0x22e8   : > { %v15367_v0 = vadd.f32 %v15366_v61, %v15365_v56  ;;  %v5889_v2 = vadd.f32 %v5888_v63, %v5799_v55  ;;  %v15368_v3 = vpop.f32.mrb[110].mxu1  ;;  %v5890_v4 = vpop.f32.mrb[114].mxu0  ;;  %v16935_v55 = vld [vmem:[%s20839_s9 + $0x268] sm:$0xff]   ;;  %v16936_v56 = vld [vmem:[%s20839_s9 + $0x2d8] sm:$0xff]   ;;  %v16940_v61 = vld [vmem:[%s20839_s9 + $0x2e0] sm:$0xff]  }
0x22e9   : > { %v5934_v8 = vmax.f32 %v5887_v58, 0.0  ;;  %v15369_v12 = vpop.f32.mrb[111].mxu1  ;;  %v5891_v14 = vpop.f32.mrb[115].mxu0  ;;  %v16938_v58 = vld [vmem:[%s20839_s9 + $0x298] sm:$0xff]   ;;  %v16941_v63 = vld [vmem:[%s20839_s9 + $0x230] sm:$0xff]   ;;  %v16944_v3 = vld [vmem:[%s20839_s9 + $0x2e8] sm:$0xff]  }
0x22ea   : > { %v5776_v17 = vadd.f32 %v15367_v0, %v15345_v49  ;;  %v5935_v19 = vmax.f32 %v5889_v2, 0.0  ;;  %v16929_v49 = vld [vmem:[%s20839_s9 + $0x218] sm:$0xff]   ;;  %v16942_v0 = vld [vmem:[%s20839_s9 + $0x2a0] sm:$0xff]   ;;  %v6776_v12 = vld [vmem:[%s20837_s7 + $0x30] sm:$0xff] }
0x22eb   : > { %v5938_v28 = vpack.c.bf16 %v5934_v8, %v5934_v8  ;;  %v16943_v2 = vld [vmem:[%s20839_s9 + $0x278] sm:$0xff]   ;;  %v16946_v8 = vld [vmem:[%s20839_s9 + $0x2a8] sm:$0xff]   ;;  %v6778_v14 = vld [vmem:[%s20837_s7 + $0x70] sm:$0xff] }
0x22ec   : > { %v18894_v25 = vadd.f32 %v5776_v17, %v5281_v15  ;;  %v5939_v51 = vpack.c.bf16 %v5935_v19, %v5935_v19  ;;  %v16945_v4 = vld [vmem:[%s20839_s9 + $0x238] sm:$0xff]   ;;  %v16947_v15 = vld [vmem:[%s20839_s9 + $0x2f0] sm:$0xff]   ;;  %v14587_v17 = vcombine.high %v6776_v12, %v6778_v14  ;;  %v14586_v19 = vcombine.low %v6776_v12, %v6778_v14  ;;  %v16952_v14 = vld [vmem:[%s20839_s9 + $0x300] sm:$0xff]  }
0x22ee   : > { %v5927_v53 = vpop.f32.mrb[112].mxu1  ;;  %6230 = vmatprep.mubr.bf16.mxu0 %v5939_v51  ;;  %v6777_v51 = vld [vmem:[%s20837_s7 + $0x38] sm:$0xff] }
0x22ef   : > { %v5928_v11 = vadd.f32 %v5927_v53, %v5803_v23  ;;  %v5929_v29 = vpop.f32.mrb[113].mxu1  ;;  %6231 = vmatmul.mubr.bf16.vlgmr.msra.gmra.mrb[116].mxu0 %v5938_v28  ;;  %v16950_v23 = vld [vmem:[%s20839_s9 + $0x2b8] sm:$0xff]  }
0x22f0   : > { %v5930_v30 = vadd.f32 %v5929_v29, %v5807_v26  ;;  %v5931_v31 = vpop.f32.mrb[114].mxu1  ;;  %6350 = vmatpush1.bf16.msra.mxu0 %v14544_v40  ;;  %6381 = vmatprep.mubr.bf16.mxu0 %v17429_v62  ;;  %v16921_v40 = vld [vmem:[%s20839_s9 + $0x248] sm:$0xff]   ;;  %v6779_v26 = vld [vmem:[%s20837_s7 + $0x78] sm:$0xff] }
0x22f1   : > { %v5936_v47 = vmax.f32 %v5928_v11, 0.0  ;;  %v5932_v33 = vpop.f32.mrb[115].mxu1  ;;  %6351 = vmatprep.subr.bf16.mxu0 %v14549_v24  ;;  %v14588_v28 = vcombine.low %v6777_v51, %v6779_v26  ;;  %v14589_v24 = vcombine.high %v6777_v51, %v6779_v26  ;;  %v6287_v31 = vld [vmem:[%s20838_s8 + $0x8] sm:$0xf]  ;;  %v16957_v51 = vld [vmem:[%s20839_s9 + $0x310] sm:$0xff]  }
0x22f2   : > { %v5937_v34 = vmax.f32 %v5930_v30, 0.0  ;;  %v6296_v33 = vrot.slane %v6287_v31, %v17919_v57  ;;  %v16960_v26 = vld [vmem:[%s20839_s9 + $0x3c8] sm:$0xff]  }
0x22f3   : > { %v5940_v7 = vpack.c.bf16 %v5936_v47, %v5936_v47  ;;  %v6292_v47 = vrot.slane %v6287_v31, %v17914_v60 }
0x22f4   : > { %v5941_v37 = vpack.c.bf16 %v5937_v34, %v5937_v34  ;;  %6352 = vmatpush1.bf16.msra.mxu0 %v14548_v32 }
0x22f5   : > { %15415 = vmatprep.subr.bf16.mxu0 %v16919_v9 }
0x22f6   : > { %6270 = vmatprep.mubr.bf16.mxu1 %v5941_v37 }
0x22f7   : > { %6271 = vmatmul.mubr.bf16.vlgmr.msra.gmra.mrb[116].mxu1 %v5940_v7  ;;  %14552 = vmatmul.mubr.msk.bf16.vlgmr.msra.gmra.mrb[120].mxu0 %vm464_vm1, %v18658_v54 }
0x22f8   : > { %6391 = vmatpush1.bf16.msra.mxu1 %v14546_v45  ;;  %6422 = vmatprep.mubr.bf16.mxu1 %v17429_v62  ;;  %v16925_v45 = vld [vmem:[%s20839_s9 + $0x210] sm:$0xff]  }
0x22f9   : > { %6392 = vmatprep.subr.bf16.mxu1 %v14551_v38  ;;  %15416 = vmatpush3.bf16.msra.mxu0 %v16920_v39 }
0x22fa   : > { %15417 = vmatprep.subr.bf16.mxu0 %v16921_v40 }
0x22fc   : > { %6393 = vmatpush1.bf16.msra.mxu1 %v14550_v41 }
0x22fd   : > { %15418 = vmatpush3.bf16.msra.mxu0 %v16922_v42  ;;  %15437 = vmatprep.subr.bf16.mxu1 %v16924_v43 }
0x22fe   : > { %15419 = vmatprep.subr.bf16.mxu0 %v16923_v44 }
0x22ff   : > { %14553 = vmatmul.mubr.msk.bf16.vlgmr.msra.gmra.mrb[120].mxu1 %vm464_vm1, %v18658_v54 }
0x2300   : > { %15438 = vmatpush3.bf16.msra.mxu1 %v16926_v18 }
0x2301   : > { %15420 = vmatpush3.bf16.msra.mxu0 %v16925_v45  ;;  %15439 = vmatprep.subr.bf16.mxu1 %v16928_v20  ;;  %v6780_v45 = vld [vmem:[%s20837_s7 + $0xb0] sm:$0xff] }
0x2302   : > { %15421 = vmatprep.subr.bf16.mxu0 %v16927_v46  ;;  %v6782_v20 = vld [vmem:[%s20837_s7 + $0xf0] sm:$0xff]  ;;  %v6300_v46 = vrot.slane %v6287_v31, %v17923_v5 }
0x2304   : > { %15440 = vmatpush3.bf16.msra.mxu1 %v16930_v48 }
0x2305   : > { %15422 = vmatpush3.bf16.msra.mxu0 %v16929_v49  ;;  %15441 = vmatprep.subr.bf16.mxu1 %v16932_v27 }
0x2306   : > { %15423 = vmatprep.subr.bf16.mxu0 %v16931_v50  ;;  %v6304_v50 = vrot.slane %v6287_v31, %v17925_v10  ;;  %v16967_v31 = vld [vmem:[%s20839_s9 + $0x368] sm:$0xff]  }
0x2308   : > { %15442 = vmatpush3.bf16.msra.mxu1 %v16934_v52 }
0x2309   : > { %15424 = vmatpush3.bf16.msra.mxu0 %v16933_v16  ;;  %15443 = vmatprep.subr.bf16.mxu1 %v16936_v56  ;;  %v14591_v16 = vcombine.high %v6780_v45, %v6782_v20 }
0x230a   : > { %15425 = vmatprep.subr.bf16.mxu0 %v16935_v55 }
0x230c   : > { %15444 = vmatpush3.bf16.msra.mxu1 %v16938_v58 }
0x230d   : > { %15426 = vmatpush3.bf16.msra.mxu0 %v16937_v6  ;;  %15445 = vmatprep.subr.bf16.mxu1 %v16940_v61 }
0x230e   : > { %15427 = vmatprep.subr.bf16.mxu0 %v16939_v59  ;;  %v14590_v59 = vcombine.low %v6780_v45, %v6782_v20 }
0x2310   : > { %15446 = vmatpush3.bf16.msra.mxu1 %v16942_v0 }
0x2311   : > { %15428 = vmatpush3.bf16.msra.mxu0 %v16941_v63  ;;  %15447 = vmatprep.subr.bf16.mxu1 %v16944_v3  ;;  %v6783_v3 = vld [vmem:[%s20837_s7 + $0xf8] sm:$0xff] }
0x2312   : > { %15429 = vmatprep.subr.bf16.mxu0 %v16943_v2  ;;  %v6781_v2 = vld [vmem:[%s20837_s7 + $0xb8] sm:$0xff] }
0x2313   : > { %v14593_v12 = vcombine.high %v6781_v2, %v6783_v3 }
0x2314   : > { %15448 = vmatpush3.bf16.msra.mxu1 %v16946_v8 }
0x2315   : > { %15430 = vmatpush3.bf16.msra.mxu0 %v16945_v4  ;;  %15449 = vmatprep.subr.bf16.mxu1 %v16947_v15  ;;  %v16953_v15 = vld [vmem:[%s20839_s9 + $0x348] sm:$0xff]  }
0x2316   : > { %6846 = vmatprep.subr.bf16.mxu0 %v14587_v17  ;;  %v14592_v17 = vcombine.low %v6781_v2, %v6783_v3 }
0x2318   : > { %15450 = vmatpush3.bf16.msra.mxu1 %v16948_v21  ;;  %v16956_v21 = vld [vmem:[%s20839_s9 + $0x3c0] sm:$0xff]  }
0x2319   : > { %15451 = vmatprep.subr.bf16.mxu1 %v16949_v22  ;;  %v16955_v22 = vld [vmem:[%s20839_s9 + $0x350] sm:$0xff]  }
0x231c   : > { %15452 = vmatpush3.bf16.msra.mxu1 %v16950_v23  ;;  %v16958_v23 = vld [vmem:[%s20839_s9 + $0x380] sm:$0xff]  }
0x231d   : > { %6887 = vmatprep.subr.bf16.mxu1 %v14589_v24  ;;  %v16962_v24 = vld [vmem:[%s20839_s9 + $0x388] sm:$0xff]  }
0x23c2   : > { %v15387_v53 = vpop.f32.mrb[116].mxu0 }
0x23c3   : > { %v15388_v11 = vpop.f32.mrb[117].mxu0 }
0x23c4   : > { %v15389_v29 = vadd.f32 %v15388_v11, %v15387_v53  ;;  %v15390_v30 = vpop.f32.mrb[118].mxu0  ;;  %v16961_v53 = vld [vmem:[%s20839_s9 + $0x318] sm:$0xff]   ;;  %v16963_v11 = vld [vmem:[%s20839_s9 + $0x360] sm:$0xff]  }
0x23c5   : > { %v15391_v32 = vpop.f32.mrb[119].mxu0  ;;  %v16966_v30 = vld [vmem:[%s20839_s9 + $0x390] sm:$0xff]  }
0x23c6   : > { %v16968_v32 = vld [vmem:[%s20839_s9 + $0x3d8] sm:$0xff]  }
0x23ca   : > { %v15409_v9 = vpop.f32.mrb[116].mxu1  ;;  %v6383_v34 = vpop.f32.mrb[120].mxu0 }
0x23cb   : > { %v6384_v35 = vadd.f32 %v6383_v34, %v6292_v47  ;;  %v15410_v36 = vpop.f32.mrb[117].mxu1  ;;  %v6385_v37 = vpop.f32.mrb[121].mxu0  ;;  %v16969_v47 = vld [vmem:[%s20839_s9 + $0x328] sm:$0xff]   ;;  %v16972_v34 = vld [vmem:[%s20839_s9 + $0x3e0] sm:$0xff]  }
0x23cc   : > { %v15411_v7 = vadd.f32 %v15410_v36, %v15409_v9  ;;  %v6386_v38 = vadd.f32 %v6385_v37, %v6296_v33  ;;  %v15412_v39 = vpop.f32.mrb[118].mxu1  ;;  %v6387_v40 = vpop.f32.mrb[122].mxu0  ;;  %v16970_v33 = vld [vmem:[%s20839_s9 + $0x398] sm:$0xff]   ;;  %v16971_v9 = vld [vmem:[%s20839_s9 + $0x370] sm:$0xff]   ;;  %v16974_v36 = vld [vmem:[%s20839_s9 + $0x3a0] sm:$0xff]  }
0x23cd   : > { %v6431_v41 = vmax.f32 %v6384_v35, 0.0  ;;  %v15413_v42 = vpop.f32.mrb[119].mxu1  ;;  %v6388_v43 = vpop.f32.mrb[123].mxu0  ;;  %v16973_v35 = vld [vmem:[%s20839_s9 + $0x330] sm:$0xff]   ;;  %v16975_v37 = vld [vmem:[%s20839_s9 + $0x378] sm:$0xff]   ;;  %v16978_v39 = vld [vmem:[%s20839_s9 + $0x3a8] sm:$0xff]  }
0x23ce   : > { %v6273_v44 = vadd.f32 %v15411_v7, %v15389_v29  ;;  %v6432_v18 = vmax.f32 %v6386_v38, 0.0  ;;  %v16965_v29 = vld [vmem:[%s20839_s9 + $0x320] sm:$0xff]   ;;  %v16976_v7 = vld [vmem:[%s20839_s9 + $0x3e8] sm:$0xff]   ;;  %v16977_v38 = vld [vmem:[%s20839_s9 + $0x338] sm:$0xff]  }
0x23cf   : > { %v6435_v27 = vpack.c.bf16 %v6431_v41, %v6431_v41  ;;  %v16979_v40 = vld [vmem:[%s20839_s9 + $0x3f0] sm:$0xff]   ;;  %v16982_v42 = vld [vmem:[%s20839_s9 + $0x3f8] sm:$0xff]  }
0x23d0   : > { %v19030_v48 = vadd.f32 %v6273_v44, %v18894_v25  ;;  %v6436_v49 = vpack.c.bf16 %v6432_v18, %v6432_v18  ;;  %v16951_v25 = vld [vmem:[%s20839_s9 + $0x340] sm:$0xff]   ;;  %v16980_v41 = vld [vmem:[%s20839_s9 + $0x3b0] sm:$0xff]   ;;  %v16983_v43 = vld [vmem:[%s20839_s9 + $0x3b8] sm:$0xff]  }
0x23d2   : > { %v6424_v52 = vpop.f32.mrb[120].mxu1  ;;  %6727 = vmatprep.mubr.bf16.mxu0 %v6436_v49 }
0x23d3   : > { %v6425_v55 = vadd.f32 %v6424_v52, %v6300_v46  ;;  %v6426_v56 = vpop.f32.mrb[121].mxu1  ;;  %6728 = vmatmul.mubr.bf16.vlgmr.msra.gmra.mrb[124].mxu0 %v6435_v27  ;;  %v6784_v46 = vld [vmem:[%s20838_s8 + $0xc] sm:$0xf] }
0x23d4   : > { %v6427_v6 = vadd.f32 %v6426_v56, %v6304_v50  ;;  %v6428_v58 = vpop.f32.mrb[122].mxu1  ;;  %6847 = vmatpush1.bf16.msra.mxu0 %v14586_v19  ;;  %6878 = vmatprep.mubr.bf16.mxu0 %v17429_v62  ;;  %v16954_v19 = vld [vmem:[%s20839_s9 + $0x308] sm:$0xff]   ;;  %v6789_v50 = vrot.slane %v6784_v46, %v17914_v60  ;;  %v6793_v27 = vrot.slane %v6784_v46, %v17919_v57 }
0x23d5   : > { %v6433_v61 = vmax.f32 %v6425_v55, 0.0  ;;  %v6429_v63 = vpop.f32.mrb[123].mxu1  ;;  %6848 = vmatprep.subr.bf16.mxu0 %v14591_v16 }
0x23d6   : > { %v6434_v0 = vmax.f32 %v6427_v6, 0.0 }
0x23d7   : > { %v6437_v8 = vpack.c.bf16 %v6433_v61, %v6433_v61 }
0x23d8   : > { %v6438_v4 = vpack.c.bf16 %v6434_v0, %v6434_v0  ;;  %6849 = vmatpush1.bf16.msra.mxu0 %v14590_v59 }
0x23d9   : > { %15459 = vmatprep.subr.bf16.mxu0 %v16951_v25 }
0x23da   : > { %6767 = vmatprep.mubr.bf16.mxu1 %v6438_v4 }
0x23db   : > { %6768 = vmatmul.mubr.bf16.vlgmr.msra.gmra.mrb[124].mxu1 %v6437_v8  ;;  %14594 = vmatmul.mubr.msk.bf16.vlgmr.msra.gmra.mrb[128].mxu0 %vm464_vm1, %v18658_v54  ;;  %v6797_v8 = vrot.slane %v6784_v46, %v17923_v5 }
0x23dc   : > { %6888 = vmatpush1.bf16.msra.mxu1 %v14588_v28  ;;  %6919 = vmatprep.mubr.bf16.mxu1 %v17429_v62  ;;  %v16959_v28 = vld [vmem:[%s20839_s9 + $0x358] sm:$0xff]  }
0x23dd   : > { %6889 = vmatprep.subr.bf16.mxu1 %v14593_v12  ;;  %15460 = vmatpush3.bf16.msra.mxu0 %v16952_v14 }
0x23de   : > { %15461 = vmatprep.subr.bf16.mxu0 %v16953_v15  ;;  %v6801_v15 = vrot.slane %v6784_v46, %v17925_v10 }
0x23e0   : > { %6890 = vmatpush1.bf16.msra.mxu1 %v14592_v17  ;;  %v16981_v17 = vld [vmem:[%s20831_s1] sm:$0xff]  }
0x23e1   : > { %15462 = vmatpush3.bf16.msra.mxu0 %v16954_v19  ;;  %15481 = vmatprep.subr.bf16.mxu1 %v16956_v21 }
0x23e2   : > { %15463 = vmatprep.subr.bf16.mxu0 %v16955_v22 }
0x23e3   : > { %14595 = vmatmul.mubr.msk.bf16.vlgmr.msra.gmra.mrb[128].mxu1 %vm464_vm1, %v18658_v54  ;;  %v16964_v54 = vld [vmem:[%s20839_s9 + $0x3d0] sm:$0xff]  }
0x23e4   : > { %15482 = vmatpush3.bf16.msra.mxu1 %v16958_v23 }
0x23e5   : > { %15464 = vmatpush3.bf16.msra.mxu0 %v16957_v51  ;;  %15483 = vmatprep.subr.bf16.mxu1 %v16960_v26 }
0x23e6   : > { %15465 = vmatprep.subr.bf16.mxu0 %v16959_v28 }
0x23e8   : > { %15484 = vmatpush3.bf16.msra.mxu1 %v16962_v24 }
0x23e9   : > { %15466 = vmatpush3.bf16.msra.mxu0 %v16961_v53  ;;  %15485 = vmatprep.subr.bf16.mxu1 %v16964_v54  ;;  %v19161_v54 = vld [vmem:[%s17527_s17 + $0x2] sm:$0x1] }
0x23ea   : > { %15467 = vmatprep.subr.bf16.mxu0 %v16963_v11 }
0x23ec   : > { %15486 = vmatpush3.bf16.msra.mxu1 %v16966_v30 }
0x23ed   : > { %15468 = vmatpush3.bf16.msra.mxu0 %v16965_v29  ;;  %15487 = vmatprep.subr.bf16.mxu1 %v16968_v32 }
0x23ee   : > { %15469 = vmatprep.subr.bf16.mxu0 %v16967_v31 }
0x23f0   : > { %15488 = vmatpush3.bf16.msra.mxu1 %v16970_v33 }
0x23f1   : > { %15470 = vmatpush3.bf16.msra.mxu0 %v16969_v47  ;;  %15489 = vmatprep.subr.bf16.mxu1 %v16972_v34 }
0x23f2   : > { %15471 = vmatprep.subr.bf16.mxu0 %v16971_v9  ;;  %v14632_v9 = vld [vmem:[%s20832_s2] ss:$0 sm:$0xff] }
0x23f4   : > { %15490 = vmatpush3.bf16.msra.mxu1 %v16974_v36 }
0x23f5   : > { %15472 = vmatpush3.bf16.msra.mxu0 %v16973_v35  ;;  %15491 = vmatprep.subr.bf16.mxu1 %v16976_v7 }
0x23f6   : > { %15473 = vmatprep.subr.bf16.mxu0 %v16975_v37 }
0x23f8   : > { %15492 = vmatpush3.bf16.msra.mxu1 %v16978_v39 }
0x23f9   : > { %15474 = vmatpush3.bf16.msra.mxu0 %v16977_v38  ;;  %15493 = vmatprep.subr.bf16.mxu1 %v16979_v40 }
0x23fa   : > { %16261 = vmatprep.subr.bf16.mxu0 %v17404_v1 }
0x23fc   : > { %15494 = vmatpush3.bf16.msra.mxu1 %v16980_v41 }
0x23fd   : > { %15495 = vmatprep.subr.bf16.mxu1 %v16982_v42 }
0x2400   : > { %15496 = vmatpush3.bf16.msra.mxu1 %v16983_v43 }
0x2401   : > { %16269 = vmatprep.subr.bf16.mxu1 %v17404_v1 }
0x24a6   : > { %v15431_v44 = vpop.f32.mrb[124].mxu0 }
0x24a7   : > { %v15432_v18 = vpop.f32.mrb[125].mxu0 }
0x24a8   : > { %v15433_v45 = vadd.f32 %v15432_v18, %v15431_v44  ;;  %v15434_v20 = vpop.f32.mrb[126].mxu0 }
0x24a9   : > { %v15435_v49 = vpop.f32.mrb[127].mxu0 }
0x24ae   : > { %v15453_v16 = vpop.f32.mrb[124].mxu1  ;;  %v6880_v52 = vpop.f32.mrb[128].mxu0 }
0x24af   : > { %v6881_v55 = vadd.f32 %v6880_v52, %v6789_v50  ;;  %v15454_v56 = vpop.f32.mrb[125].mxu1  ;;  %v6882_v6 = vpop.f32.mrb[129].mxu0 }
0x24b0   : > { %v15455_v58 = vadd.f32 %v15454_v56, %v15453_v16  ;;  %v6883_v59 = vadd.f32 %v6882_v6, %v6793_v27  ;;  %v15456_v61 = vpop.f32.mrb[126].mxu1  ;;  %v6884_v63 = vpop.f32.mrb[130].mxu0 }
0x24b1   : > { %v6928_v25 = vmax.f32 %v6881_v55, 0.0  ;;  %v15457_v0 = vpop.f32.mrb[127].mxu1  ;;  %v6885_v2 = vpop.f32.mrb[131].mxu0 }
0x24b2   : > { %v6770_v3 = vadd.f32 %v15455_v58, %v15433_v45  ;;  %v6929_v4 = vmax.f32 %v6883_v59, 0.0 }
0x24b3   : > { %v6932_v19 = vpack.c.bf16 %v6928_v25, %v6928_v25 }
0x24b4   : > { %v6775_v12 = vadd.f32 %v6770_v3, %v19030_v48  ;;  %v6933_v14 = vpack.c.bf16 %v6929_v4, %v6929_v4  ;;  %v16984_v48 = vld [vmem:[%s20831_s1 + $0x8] sm:$0xff]  }
0x24b6   : > { %v6921_v21 = vpop.f32.mrb[128].mxu1  ;;  %7224 = vmatprep.mubr.bf16.mxu0 %v6933_v14 }
0x24b7   : > { %v6922_v22 = vadd.f32 %v6921_v21, %v6797_v8  ;;  %v6923_v23 = vpop.f32.mrb[129].mxu1  ;;  %7225 = vmatmul.mubr.bf16.vlgmr.msra.gmra.mrb[132].mxu0 %v6932_v19  ;;  %v7495_v21 = vld [vmem:[%s20833_s3] sm:$0x3] }
0x24b8   : > { %v6924_v51 = vadd.f32 %v6923_v23, %v6801_v15  ;;  %v6925_v26 = vpop.f32.mrb[130].mxu1  ;;  %16262 = vmatpush3.bf16.msra.mxu0 %v16981_v17  ;;  %16265 = vmatprep.mubr.msk.bf16.mxu0 %vm17405_vm0, %v17404_v1 }
0x24b9   : > { %v6930_v28 = vmax.f32 %v6922_v22, 0.0  ;;  %v6926_v24 = vpop.f32.mrb[131].mxu1  ;;  %16263 = vmatprep.subr.bf16.mxu0 %v17404_v1  ;;  %v7500_v22 = vsel %vm638_vm6, %v7495_v21, 0 }
0x24ba   : > { %v6931_v53 = vmax.f32 %v6924_v51, 0.0 }
0x24bb   : > { %v6934_v29 = vpack.c.bf16 %v6930_v28, %v6930_v28 }
0x24bc   : > { %v6935_v11 = vpack.c.bf16 %v6931_v53, %v6931_v53  ;;  %16264 = vmatpush3.bf16.msra.mxu0 %v16984_v48 }
0x24bd   : > { %16275 = vmatprep.subr.bf16.mxu0 %v17404_v1 }
0x24be   : > { %7264 = vmatprep.mubr.bf16.mxu1 %v6935_v11 }
0x24bf   : > { %7265 = vmatmul.mubr.bf16.vlgmr.msra.gmra.mrb[132].mxu1 %v6934_v29  ;;  %16266 = vmatmul.mubr.msk.bf16.vlgmr.msra.gmra.mrb[136].mxu0 %vm464_vm1, %v19161_v54 }
0x24c0   : > { %16271 = vmatprep.mubr.msk.bf16.mxu1 %vm17405_vm0, %v17404_v1  ;;  %16277 = vmatprep.mubr.msk.bf16.mxu0 %vm17405_vm0, %v17404_v1 }
0x258a   : > { %v15475_v30 = vpop.f32.mrb[132].mxu0 }
0x258b   : > { %v15476_v31 = vpop.f32.mrb[133].mxu0 }
0x258c   : > { %v15477_v32 = vadd.f32 %v15476_v31, %v15475_v30  ;;  %v15478_v47 = vpop.f32.mrb[134].mxu0 }
0x258d   : > { %v15479_v33 = vpop.f32.mrb[135].mxu0 }
0x2592   : > { %v15497_v34 = vpop.f32.mrb[132].mxu1  ;;  %v7367_v35 = vpop.f32.mrb[136].mxu0 }
0x2593   : > { %v7368_v36 = vadd.f32 %v14632_v9, %v7367_v35  ;;  %v15498_v37 = vpop.f32.mrb[133].mxu1  ;;  %v16267_v7 = vpop.f32.mrb[137].mxu0 }
0x2594   : > { %v15499_v38 = vadd.f32 %v15498_v37, %v15497_v34  ;;  %v15500_v39 = vpop.f32.mrb[134].mxu1  ;;  %v7370_v40 = vpop.f32.mrb[138].mxu0 }
0x2595   : > { %v19173_v41 = vpack.c.bf16 %v7368_v36, %v7368_v36  ;;  %v15501_v42 = vpop.f32.mrb[135].mxu1  ;;  %v16268_v43 = vpop.f32.mrb[139].mxu0  ;;  %v7373_v46 = vmul.f32 0.5, %v7368_v36 }
0x2596   : > { %v7267_v44 = vadd.f32 %v15499_v38, %v15477_v32 }
0x2597   : > { %7386 = vrot.lane.b32.xlu0 %v19173_v41, %s20927_s14  ;;  %v19181_v49 = vpack.c.bf16 %v7373_v46, %v7373_v46 }
0x2598   : > { %v19177_v18 = vadd.f32 %v7267_v44, %v6775_v12 }
0x2609   : > { %v7387_v45 = vpop.permute.xlu0 %7386 }
0x260a   : > { %v7392_v20 = vsel %vm523_vm3, %v7387_v45, 0 }
0x260b   : > { %16270 = vmatpush3.bf16.xpose.msra.mxu1 %v7392_v20 }
0x260c   : > { %16281 = vmatprep.subr.bf16.mxu1 %v17404_v1 }
0x2612   : > { %16272 = vmatmul.mubr.msk.bf16.vlgmr.msra.gmra.mrb[136].mxu1 %vm523_vm3, %v19181_v49 }
0x2613   : > { %16283 = vmatprep.mubr.msk.bf16.mxu1 %vm17405_vm0, %v17404_v1  ;;  %16282 = vmatpush3.bf16.msra.mxu1 %v7500_v22 }
0x2614   : > { %16293 = vmatprep.subr.bf16.mxu1 %v17404_v1 }
0x26e5   : > { %v7428_v50 = vpop.f32.mrb[136].mxu1 }
0x26e6   : > { %v16273_v27 = vpop.f32.mrb[137].mxu1  ;;  %v7434_v16 = vsel %vm570_vm4, %v7428_v50, -inf }
0x26e7   : > { %7435 = vmax.xlane.f32.xlu1 %v7434_v16  ;;  %v7431_v52 = vpop.f32.mrb[138].mxu1 }
0x26e8   : > { %v16274_v55 = vpop.f32.mrb[139].mxu1 }
0x26f8   : > { %7446 = vrot.lane.b32.xlu1 %v19173_v41, %s20928_s11 }
0x26fc   : > { %7546 = vrot.lane.b32.xlu1 %v19173_v41, %s20929_s4 }
0x2700   : > { %7544 = vrot.lane.b32.xlu1 %v19181_v49, %s20930_s25 }
0x2704   : > { %7709 = vrot.lane.b32.xlu1 %v19173_v41, %s20908_s27 }
0x2708   : > { %7707 = vrot.lane.b32.xlu1 %v19181_v49, %s20909_s19 }
0x2774   : > { %v7436_v56 = vpop.xlane.xlu1 %7435 }
0x2775   : > { %v7437_v6 = vsub.f32 %v7428_v50, %v7436_v56 }
0x2777   : > { %v7438_v58 = vmul.f32 1.442695, %v7437_v6 }
0x2778   : > { %v7447_v59 = vpop.permute.xlu1 %7446 }
0x2779   : > { %17319 = vpow2.f32 %v7438_v58  ;;  %v7452_v61 = vsel %vm589_vm2, %v7447_v59, 0 }
0x277a   : > { %16276 = vmatpush3.bf16.msra.mxu0 %v7452_v61 }
0x277b   : > { %16287 = vmatprep.subr.bf16.mxu0 %v17404_v1 }
0x277c   : > { %v7547_v2 = vpop.permute.xlu1 %7546 }
0x277d   : > { %v7552_v14 = vsel %vm523_vm3, %v7547_v2, 0 }
0x2780   : > { %v7545_v12 = vpop.permute.xlu1 %7544 }
0x2783   : > { %v17320_v63 = vpop.eup %17319 }
0x2784   : > { %v7440_v25 = vsel %vm570_vm4, %v17320_v63, 0.0  ;;  %v7710_v15 = vpop.permute.xlu1 %7709 }
0x2785   : > { %7441 = vadd.xlane.f32.xlu0 %v7440_v25  ;;  %v7715_v17 = vsel %vm523_vm3, %v7710_v15, 0 }
0x2788   : > { %v7708_v19 = vpop.permute.xlu1 %7707 }
0x2812   : > { %v7442_v0 = vpop.xlane.xlu0 %7441 }
0x2813   : > { %17321 = vrcp.f32 %v7442_v0 }
0x281d   : > { %v17322_v3 = vpop.eup %17321 }
0x281e   : > { %v7444_v4 = vmul.f32 %v17322_v3, %v17320_v63 }
0x2820   : > { %v7445_v8 = vpack.c.bf16 %v7444_v4, %v7444_v4 }
0x2822   : > { %16278 = vmatmul.mubr.msk.bf16.vlgmr.msra.gmra.mrb[140].mxu0 %vm585_vm5, %v7445_v8 }
0x2823   : > { %16288 = vmatpush3.bf16.xpose.msra.mxu0 %v7552_v14  ;;  %16289 = vmatprep.mubr.msk.bf16.mxu0 %vm17405_vm0, %v17404_v1 }
0x2824   : > { %16305 = vmatprep.subr.bf16.mxu0 %v17404_v1 }
0x282a   : > { %16290 = vmatmul.mubr.msk.bf16.vlgmr.msra.gmra.mrb[144].mxu0 %vm523_vm3, %v7545_v12 }
0x282b   : > { %16306 = vmatpush3.bf16.xpose.msra.mxu0 %v7715_v17  ;;  %16307 = vmatprep.mubr.msk.bf16.mxu0 %vm17405_vm0, %v17404_v1 }
0x282c   : > { %16311 = vmatprep.subr.bf16.mxu0 %v17404_v1 }
0x2832   : > { %16308 = vmatmul.mubr.msk.bf16.vlgmr.msra.gmra.mrb[148].mxu0 %vm523_vm3, %v7708_v19 }
0x2833   : > { %16313 = vmatprep.mubr.msk.bf16.mxu0 %vm17405_vm0, %v17404_v1 }
0x28f5   : > { %v7488_v23 = vpop.f32.mrb[140].mxu0 }
0x28f6   : > { %v7494_v51 = vpack.c.bf16 %v7488_v23, %v7488_v23  ;;  %v16279_v26 = vpop.f32.mrb[141].mxu0 }
0x28f7   : > { %v7491_v48 = vpop.f32.mrb[142].mxu0 }
0x28f8   : > { %v16280_v28 = vpop.f32.mrb[143].mxu0  ;;  %16284 = vmatmul.mubr.msk.bf16.vlgmr.msra.gmra.mrb[140].mxu1 %vm523_vm3, %v7494_v51 }
0x28f9   : > { %16295 = vmatprep.mubr.msk.bf16.mxu1 %vm17405_vm0, %v17404_v1 }
0x28fd   : > { %v19222_v24 = vpop.f32.mrb[144].mxu0 }
0x28fe   : > { %v16291_v53 = vpop.f32.mrb[145].mxu0  ;;  %v7594_v4 = vsel %vm570_vm4, %v19222_v24, -inf }
0x28ff   : > { %v7591_v11 = vpop.f32.mrb[146].mxu0 }
0x2900   : > { %v16292_v29 = vpop.f32.mrb[147].mxu0 }
0x2905   : > { %v7751_v30 = vpop.f32.mrb[148].mxu0 }
0x2906   : > { %v16309_v31 = vpop.f32.mrb[149].mxu0  ;;  %v7757_v32 = vsel %vm570_vm4, %v7751_v30, -inf }
0x2907   : > { %7758 = vmax.xlane.f32.xlu0 %v7757_v32  ;;  %v7754_v47 = vpop.f32.mrb[150].mxu0 }
0x2908   : > { %v16310_v33 = vpop.f32.mrb[151].mxu0 }
0x291d   : > { %7769 = vrot.lane.b32.xlu0 %v19173_v41, %s20910_s15 }
0x2921   : > { %7868 = vrot.lane.b32.xlu0 %v19173_v41, %s20911_s24 }
0x2925   : > { %7866 = vrot.lane.b32.xlu0 %v19181_v49, %s20912_s26 }
0x2929   : > { %8031 = vrot.lane.b32.xlu0 %v19173_v41, %s20913_s16 }
0x292d   : > { %8029 = vrot.lane.b32.xlu0 %v19181_v49, %s20914_s18 }
0x2994   : > { %v7759_v9 = vpop.xlane.xlu0 %7758 }
0x2995   : > { %v7760_v34 = vsub.f32 %v7751_v30, %v7759_v9 }
0x2997   : > { %v7761_v35 = vmul.f32 1.442695, %v7760_v34 }
0x2998   : > { %v7770_v36 = vpop.permute.xlu0 %7769 }
0x2999   : > { %17323 = vpow2.f32 %v7761_v35  ;;  %v7775_v37 = vsel %vm589_vm2, %v7770_v36, 0 }
0x299a   : > { %16312 = vmatpush3.bf16.msra.mxu0 %v7775_v37 }
0x299b   : > { %16323 = vmatprep.subr.bf16.mxu0 %v17404_v1 }
0x299c   : > { %v7869_v40 = vpop.permute.xlu0 %7868 }
0x299d   : > { %v7874_v20 = vsel %vm523_vm3, %v7869_v40, 0 }
0x29a0   : > { %v7867_v45 = vpop.permute.xlu0 %7866 }
0x29a3   : > { %v17324_v7 = vpop.eup %17323 }
0x29a4   : > { %v7763_v38 = vsel %vm570_vm4, %v17324_v7, 0.0  ;;  %v8032_v46 = vpop.permute.xlu0 %8031 }
0x29a5   : > { %7764 = vadd.xlane.f32.xlu1 %v7763_v38  ;;  %v8037_v50 = vsel %vm523_vm3, %v8032_v46, 0 }
0x29a8   : > { %v8030_v27 = vpop.permute.xlu0 %8029 }
0x2a32   : > { %v7765_v39 = vpop.xlane.xlu1 %7764 }
0x2a33   : > { %17325 = vrcp.f32 %v7765_v39  ;;  %v16985_v39 = vld [vmem:[%s20833_s3] ss:$0 sps:$4 sm:$0xcc]  }
0x2a34   : > { %v7659_v40 = vrot.slane %v16985_v39, 2 }
0x2a3d   : > { %v17326_v42 = vpop.eup %17325 }
0x2a3e   : > { %v7767_v43 = vmul.f32 %v17326_v42, %v17324_v7  ;;  %v7664_v42 = vsel %vm638_vm6, %v7659_v40, 0 }
0x2a40   : > { %v7768_v44 = vpack.c.bf16 %v7767_v43, %v7767_v43 }
0x2a42   : > { %16314 = vmatmul.mubr.msk.bf16.vlgmr.msra.gmra.mrb[152].mxu0 %vm585_vm5, %v7768_v44 }
0x2a43   : > { %16324 = vmatpush3.bf16.xpose.msra.mxu0 %v7874_v20  ;;  %16325 = vmatprep.mubr.msk.bf16.mxu0 %vm17405_vm0, %v17404_v1 }
0x2a44   : > { %16341 = vmatprep.subr.bf16.mxu0 %v17404_v1 }
0x2a4a   : > { %16326 = vmatmul.mubr.msk.bf16.vlgmr.msra.gmra.mrb[156].mxu0 %vm523_vm3, %v7867_v45 }
0x2a4b   : > { %16342 = vmatpush3.bf16.xpose.msra.mxu0 %v8037_v50  ;;  %16343 = vmatprep.mubr.msk.bf16.mxu0 %vm17405_vm0, %v17404_v1  ;;  %v7818_v50 = vld [vmem:[%s20833_s3 + $0x4] sm:$0x3] }
0x2a4c   : > { %16347 = vmatprep.subr.bf16.mxu0 %v17404_v1 }
0x2a52   : > { %16344 = vmatmul.mubr.msk.bf16.vlgmr.msra.gmra.mrb[160].mxu0 %vm523_vm3, %v8030_v27 }
0x2a53   : > { %16349 = vmatprep.mubr.msk.bf16.mxu0 %vm17405_vm0, %v17404_v1 }
0x2b15   : > { %v19251_v16 = vpop.f32.mrb[152].mxu0 }
0x2b16   : > { %v16315_v52 = vpop.f32.mrb[153].mxu0 }
0x2b17   : > { %v7814_v55 = vpop.f32.mrb[154].mxu0 }
0x2b18   : > { %v16316_v56 = vpop.f32.mrb[155].mxu0 }
0x2b1d   : > { %v19253_v6 = vpop.f32.mrb[156].mxu0 }
0x2b1e   : > { %v16327_v58 = vpop.f32.mrb[157].mxu0  ;;  %v7916_v28 = vsel %vm570_vm4, %v19253_v6, -inf }
0x2b1f   : > { %v7913_v59 = vpop.f32.mrb[158].mxu0 }
0x2b20   : > { %v16328_v61 = vpop.f32.mrb[159].mxu0  ;;  %v7823_v59 = vsel %vm638_vm6, %v7818_v50, 0 }
0x2b25   : > { %v8073_v63 = vpop.f32.mrb[160].mxu0 }
0x2b26   : > { %v16345_v25 = vpop.f32.mrb[161].mxu0  ;;  %v8079_v0 = vsel %vm570_vm4, %v8073_v63, -inf }
0x2b27   : > { %8080 = vmax.xlane.f32.xlu1 %v8079_v0  ;;  %v8076_v2 = vpop.f32.mrb[162].mxu0 }
0x2b28   : > { %v16346_v3 = vpop.f32.mrb[163].mxu0 }
0x2b2b   : > { %7595 = vmax.xlane.f32.xlu1 %v7594_v4  ;;  %v7817_v4 = vpack.c.bf16 %v19251_v16, %v19251_v16 }
0x2b3c   : > { %8091 = vrot.lane.b32.xlu1 %v19173_v41, %s20915_s28 }
0x2b40   : > { %8190 = vrot.lane.b32.xlu1 %v19173_v41, %s20916_s29 }
0x2b44   : > { %8188 = vrot.lane.b32.xlu1 %v19181_v49, %s20917_s30 }
0x2b48   : > { %8353 = vrot.lane.b32.xlu1 %v19173_v41, %s20918_s23  ;;  %s20950_s23 = smov 40  }
0x2bb4   : > { %v8081_v8 = vpop.xlane.xlu1 %8080 }
0x2bb5   : > { %v8082_v12 = vsub.f32 %v8073_v63, %v8081_v8 }
0x2bb7   : > { %v8083_v14 = vmul.f32 1.442695, %v8082_v12 }
0x2bb8   : > { %v7596_v15 = vpop.xlane.xlu1 %7595 }
0x2bb9   : > { %17327 = vpow2.f32 %v8083_v14  ;;  %v7597_v17 = vsub.f32 %v19222_v24, %v7596_v15 }
0x2bbb   : > { %v7598_v19 = vmul.f32 1.442695, %v7597_v17 }
0x2bbc   : > { %v8092_v21 = vpop.permute.xlu1 %8091 }
0x2bbd   : > { %17329 = vpow2.f32 %v7598_v19  ;;  %v8097_v22 = vsel %vm589_vm2, %v8092_v21, 0 }
0x2bbe   : > { %16348 = vmatpush3.bf16.msra.mxu0 %v8097_v22 }
0x2bbf   : > { %16359 = vmatprep.subr.bf16.mxu0 %v17404_v1 }
0x2bc0   : > { %v8191_v24 = vpop.permute.xlu1 %8190 }
0x2bc1   : > { %v8196_v36 = vsel %vm523_vm3, %v8191_v24, 0 }
0x2bc3   : > { %v17328_v23 = vpop.eup %17327 }
0x2bc4   : > { %v8085_v51 = vsel %vm570_vm4, %v17328_v23, 0.0  ;;  %v8189_v53 = vpop.permute.xlu1 %8188 }
0x2bc5   : > { %8086 = vadd.xlane.f32.xlu0 %v8085_v51 }
0x2bc7   : > { %v17330_v26 = vpop.eup %17329 }
0x2bc8   : > { %v7600_v48 = vsel %vm570_vm4, %v17330_v26, 0.0  ;;  %v8354_v11 = vpop.permute.xlu1 %8353 }
0x2bc9   : > { %7601 = vadd.xlane.f32.xlu1 %v7600_v48  ;;  %v8359_v38 = vsel %vm523_vm3, %v8354_v11, 0 }
0x2bdb   : > { %8351 = vrot.lane.b32.xlu0 %v19181_v49, %s20931_s22  ;;  %s20948_s22 = smov 100  }
0x2bdf   : > { %7606 = vrot.lane.b32.xlu0 %v19173_v41, %s20932_s13 }
0x2bfe   : > { %7917 = vmax.xlane.f32.xlu0 %v7916_v28 }
0x2c52   : > { %v8087_v29 = vpop.xlane.xlu0 %8086 }
0x2c53   : > { %17331 = vrcp.f32 %v8087_v29 }
0x2c56   : > { %v8352_v30 = vpop.permute.xlu0 %8351  ;;  %v7602_v31 = vpop.xlane.xlu1 %7601 }
0x2c57   : > { %17333 = vrcp.f32 %v7602_v31 }
0x2c5a   : > { %v7607_v32 = vpop.permute.xlu0 %7606 }
0x2c5b   : > { %v7612_v47 = vsel %vm589_vm2, %v7607_v32, 0 }
0x2c5c   : > { %16294 = vmatpush3.bf16.msra.mxu1 %v7612_v47 }
0x2c5d   : > { %v17332_v33 = vpop.eup %17331  ;;  %16299 = vmatprep.subr.bf16.mxu1 %v17404_v1 }
0x2c5e   : > { %v8089_v9 = vmul.f32 %v17332_v33, %v17328_v23 }
0x2c60   : > { %v8090_v34 = vpack.c.bf16 %v8089_v9, %v8089_v9 }
0x2c61   : > { %v17334_v35 = vpop.eup %17333 }
0x2c62   : > { %v7604_v37 = vmul.f32 %v17334_v35, %v17330_v26  ;;  %16350 = vmatmul.mubr.msk.bf16.vlgmr.msra.gmra.mrb[164].mxu0 %vm585_vm5, %v8090_v34  ;;  %v16986_v34 = vld [vmem:[%s20833_s3 + $0x4] ss:$0 sps:$4 sm:$0xcc]  }
0x2c63   : > { %16360 = vmatpush3.bf16.xpose.msra.mxu0 %v8196_v36  ;;  %16361 = vmatprep.mubr.msk.bf16.mxu0 %vm17405_vm0, %v17404_v1  ;;  %v7981_v35 = vrot.slane %v16986_v34, 2 }
0x2c64   : > { %v7605_v7 = vpack.c.bf16 %v7604_v37, %v7604_v37  ;;  %16377 = vmatprep.subr.bf16.mxu0 %v17404_v1 }
0x2c65   : > { %v7986_v36 = vsel %vm638_vm6, %v7981_v35, 0 }
0x2c66   : > { %16296 = vmatmul.mubr.msk.bf16.vlgmr.msra.gmra.mrb[144].mxu1 %vm585_vm5, %v7605_v7 }
0x2c67   : > { %16301 = vmatprep.mubr.msk.bf16.mxu1 %vm17405_vm0, %v17404_v1  ;;  %16300 = vmatpush3.bf16.msra.mxu1 %v7664_v42 }
0x2c68   : > { %16317 = vmatprep.subr.bf16.mxu1 %v17404_v1 }
0x2c6a   : > { %16362 = vmatmul.mubr.msk.bf16.vlgmr.msra.gmra.mrb[168].mxu0 %vm523_vm3, %v8189_v53 }
0x2c6b   : > { %16378 = vmatpush3.bf16.xpose.msra.mxu0 %v8359_v38  ;;  %16379 = vmatprep.mubr.msk.bf16.mxu0 %vm17405_vm0, %v17404_v1 }
0x2c6c   : > { %16383 = vmatprep.subr.bf16.mxu0 %v17404_v1 }
0x2c72   : > { %16380 = vmatmul.mubr.msk.bf16.vlgmr.msra.gmra.mrb[172].mxu0 %vm523_vm3, %v8352_v30 }
0x2c73   : > { %16385 = vmatprep.mubr.msk.bf16.mxu0 %vm17405_vm0, %v17404_v1 }
0x2c8b   : > { %v7918_v43 = vpop.xlane.xlu0 %7917 }
0x2c8c   : > { %v7919_v44 = vsub.f32 %v19253_v6, %v7918_v43 }
0x2c8e   : > { %v7920_v52 = vmul.f32 1.442695, %v7919_v44  ;;  %v8140_v44 = vld [vmem:[%s20833_s3 + $0x8] sm:$0x3] }
0x2c90   : > { %17335 = vpow2.f32 %v7920_v52  ;;  %v8145_v52 = vsel %vm638_vm6, %v8140_v44, 0 }
0x2c9a   : > { %v17336_v14 = vpop.eup %17335 }
0x2c9b   : > { %v7922_v19 = vsel %vm570_vm4, %v17336_v14, 0.0 }
0x2d35   : > { %v19301_v45 = vpop.f32.mrb[164].mxu0 }
0x2d36   : > { %v16351_v20 = vpop.f32.mrb[165].mxu0 }
0x2d37   : > { %v8136_v46 = vpop.f32.mrb[166].mxu0 }
0x2d38   : > { %v16352_v27 = vpop.f32.mrb[167].mxu0 }
0x2d39   : > { %v7648_v55 = vpop.f32.mrb[144].mxu1 }
0x2d3a   : > { %v7654_v56 = vpack.c.bf16 %v7648_v55, %v7648_v55  ;;  %v16297_v58 = vpop.f32.mrb[145].mxu1 }
0x2d3b   : > { %v7651_v61 = vpop.f32.mrb[146].mxu1 }
0x2d3c   : > { %v16298_v63 = vpop.f32.mrb[147].mxu1  ;;  %16302 = vmatmul.mubr.msk.bf16.vlgmr.msra.gmra.mrb[140].mxu1 %vm523_vm3, %v7654_v56 }
0x2d3d   : > { %v8232_v6 = vpop.f32.mrb[168].mxu0  ;;  %16318 = vmatpush3.bf16.msra.mxu1 %v7823_v59  ;;  %16319 = vmatprep.mubr.msk.bf16.mxu1 %vm17405_vm0, %v17404_v1  ;;  %v8139_v59 = vpack.c.bf16 %v19301_v45, %v19301_v45  ;;  %v16987_v45 = vld [vmem:[%s20833_s3 + $0x8] ss:$0 sps:$4 sm:$0xcc]  }
0x2d3e   : > { %v16363_v25 = vpop.f32.mrb[169].mxu0  ;;  %16329 = vmatprep.subr.bf16.mxu1 %v17404_v1  ;;  %v8238_v16 = vsel %vm570_vm4, %v8232_v6, -inf }
0x2d3f   : > { %v8235_v0 = vpop.f32.mrb[170].mxu0 }
0x2d40   : > { %v16364_v2 = vpop.f32.mrb[171].mxu0  ;;  %v8303_v0 = vrot.slane %v16987_v45, 2 }
0x2d42   : > { %v8308_v2 = vsel %vm638_vm6, %v8303_v0, 0  ;;  %v8715_v0 = vld [vmem:[%s20837_s7 + $0x80] sm:$0xff] }
0x2d45   : > { %v8395_v3 = vpop.f32.mrb[172].mxu0 }
0x2d46   : > { %v16381_v8 = vpop.f32.mrb[173].mxu0  ;;  %v8401_v12 = vsel %vm570_vm4, %v8395_v3, -inf }
0x2d47   : > { %8402 = vmax.xlane.f32.xlu1 %v8401_v12  ;;  %v8398_v15 = vpop.f32.mrb[174].mxu0 }
0x2d48   : > { %16320 = vmatmul.mubr.msk.bf16.vlgmr.msra.gmra.mrb[140].mxu1 %vm523_vm3, %v7817_v4  ;;  %v16382_v17 = vpop.f32.mrb[175].mxu0 }
0x2d49   : > { %16331 = vmatprep.mubr.msk.bf16.mxu1 %vm17405_vm0, %v17404_v1 }
0x2d4b   : > { %7923 = vadd.xlane.f32.xlu1 %v7922_v19 }
0x2d5c   : > { %7928 = vrot.lane.b32.xlu1 %v19173_v41, %s20933_s21 }
0x2d60   : > { %8512 = vrot.lane.b32.xlu1 %v19173_v41, %s20934_s12  ;;  %s20947_s12 = smov 68  }
0x2d64   : > { %8510 = vrot.lane.b32.xlu1 %v19181_v49, %s20935_s0  ;;  %s20946_s0 = smov 52  }
0x2d88   : > { %8239 = vmax.xlane.f32.xlu1 %v8238_v16 }
0x2d99   : > { %8250 = vrot.lane.b32.xlu1 %v19173_v41, %s20936_s20  ;;  %s20937_s20 = smov 40  }
0x2dd4   : > { %v8403_v21 = vpop.xlane.xlu1 %8402 }
0x2dd5   : > { %v8404_v22 = vsub.f32 %v8395_v3, %v8403_v21  ;;  %v8462_v21 = vld [vmem:[%s20833_s3 + $0xc] sm:$0x3] }
0x2dd7   : > { %v8405_v23 = vmul.f32 1.442695, %v8404_v22 }
0x2dd8   : > { %v7924_v51 = vpop.xlane.xlu1 %7923 }
0x2dd9   : > { %17337 = vpow2.f32 %v8405_v23 }
0x2dda   : > { %17339 = vrcp.f32 %v7924_v51 }
0x2ddc   : > { %v7929_v26 = vpop.permute.xlu1 %7928 }
0x2ddd   : > { %v7934_v48 = vsel %vm589_vm2, %v7929_v26, 0  ;;  %v8467_v26 = vsel %vm638_vm6, %v8462_v21, 0  ;;  %v16992_v21 = vld [vmem:[%s20839_s9 + $0x8] sm:$0xff]  }
0x2dde   : > { %16330 = vmatpush3.bf16.msra.mxu1 %v7934_v48 }
0x2ddf   : > { %16335 = vmatprep.subr.bf16.mxu1 %v17404_v1 }
0x2de0   : > { %v8513_v29 = vpop.permute.xlu1 %8512 }
0x2de1   : > { %v8518_v43 = vsel %vm523_vm3, %v8513_v29, 0 }
0x2de3   : > { %v17338_v28 = vpop.eup %17337 }
0x2de4   : > { %v17340_v49 = vpop.eup %17339  ;;  %v8407_v24 = vsel %vm570_vm4, %v17338_v28, 0.0  ;;  %v8511_v30 = vpop.permute.xlu1 %8510 }
0x2de5   : > { %v7926_v53 = vmul.f32 %v17340_v49, %v17336_v14  ;;  %8408 = vadd.xlane.f32.xlu0 %v8407_v24 }
0x2de7   : > { %v7927_v11 = vpack.c.bf16 %v7926_v53, %v7926_v53 }
0x2de9   : > { %16332 = vmatmul.mubr.msk.bf16.vlgmr.msra.gmra.mrb[148].mxu1 %vm585_vm5, %v7927_v11 }
0x2dea   : > { %16337 = vmatprep.mubr.msk.bf16.mxu1 %vm17405_vm0, %v17404_v1  ;;  %16336 = vmatpush3.bf16.msra.mxu1 %v7986_v36 }
0x2deb   : > { %16353 = vmatprep.subr.bf16.mxu1 %v17404_v1 }
0x2dfb   : > { %8413 = vrot.lane.b32.xlu0 %v19173_v41, %s20937_s20  ;;  %s20938_s20 = smov 36  }
0x2e15   : > { %v8240_v31 = vpop.xlane.xlu1 %8239 }
0x2e16   : > { %v8241_v32 = vsub.f32 %v8232_v6, %v8240_v31 }
0x2e18   : > { %v8242_v47 = vmul.f32 1.442695, %v8241_v32 }
0x2e19   : > { %v8251_v58 = vpop.permute.xlu1 %8250 }
0x2e1a   : > { %17341 = vpow2.f32 %v8242_v47  ;;  %v8256_v63 = vsel %vm589_vm2, %v8251_v58, 0 }
0x2e24   : > { %v17342_v33 = vpop.eup %17341 }
0x2e25   : > { %v8244_v9 = vsel %vm570_vm4, %v17342_v33, 0.0 }
0x2e26   : > { %8245 = vadd.xlane.f32.xlu0 %v8244_v9 }
0x2e72   : > { %v8409_v37 = vpop.xlane.xlu0 %8408 }
0x2e73   : > { %17343 = vrcp.f32 %v8409_v37 }
0x2e76   : > { %v8414_v7 = vpop.permute.xlu0 %8413 }
0x2e77   : > { %v8419_v38 = vsel %vm589_vm2, %v8414_v7, 0 }
0x2e78   : > { %16384 = vmatpush3.bf16.msra.mxu0 %v8419_v38 }
0x2e79   : > { %16395 = vmatprep.subr.bf16.mxu0 %v17404_v1 }
0x2e7d   : > { %v17344_v39 = vpop.eup %17343 }
0x2e7e   : > { %v8411_v40 = vmul.f32 %v17344_v39, %v17338_v28 }
0x2e80   : > { %v8412_v42 = vpack.c.bf16 %v8411_v40, %v8411_v40 }
0x2e82   : > { %16386 = vmatmul.mubr.msk.bf16.vlgmr.msra.gmra.mrb[176].mxu0 %vm585_vm5, %v8412_v42  ;;  %v7376_v42 = vunpack.c.l.bf16 %v19161_v54  ;;  %v8711_v54 = vld [vmem:[%s20837_s7] sm:$0xff] }
0x2e83   : > { %16396 = vmatpush3.bf16.xpose.msra.mxu0 %v8518_v43  ;;  %16397 = vmatprep.mubr.msk.bf16.mxu0 %vm17405_vm0, %v17404_v1 }
0x2e8a   : > { %16398 = vmatmul.mubr.msk.bf16.vlgmr.msra.gmra.mrb[180].mxu0 %vm523_vm3, %v8511_v30 }
0x2e8b   : > { %8816 = vmatprep.mubr.bf16.mxu0 %v17429_v62 }
0x2eb3   : > { %v8246_v46 = vpop.xlane.xlu0 %8245 }
0x2eb4   : > { %17345 = vrcp.f32 %v8246_v46 }
0x2ebc   : > { %v7970_v20 = vpop.f32.mrb[148].mxu1 }
0x2ebd   : > { %v7976_v50 = vpack.c.bf16 %v7970_v20, %v7970_v20  ;;  %v16333_v27 = vpop.f32.mrb[149].mxu1 }
0x2ebe   : > { %v7973_v55 = vpop.f32.mrb[150].mxu1  ;;  %v17346_v61 = vpop.eup %17345 }
0x2ebf   : > { %v16334_v56 = vpop.f32.mrb[151].mxu1  ;;  %16338 = vmatmul.mubr.msk.bf16.vlgmr.msra.gmra.mrb[140].mxu1 %vm523_vm3, %v7976_v50  ;;  %v8248_v6 = vmul.f32 %v17346_v61, %v17342_v33  ;;  %v16988_v33 = vld [vmem:[%s20833_s3 + $0xc] ss:$0 sps:$4 sm:$0xcc]  }
0x2ec0   : > { %16354 = vmatpush3.bf16.msra.mxu1 %v8145_v52  ;;  %16355 = vmatprep.mubr.msk.bf16.mxu1 %vm17405_vm0, %v17404_v1  ;;  %v8625_v9 = vrot.slane %v16988_v33, 2 }
0x2ec1   : > { %16365 = vmatprep.subr.bf16.mxu1 %v17404_v1  ;;  %v8249_v25 = vpack.c.bf16 %v8248_v6, %v8248_v6  ;;  %v8713_v6 = vld [vmem:[%s20837_s7 + $0x40] sm:$0xff] }
0x2ec2   : > { %v8630_v37 = vsel %vm638_vm6, %v8625_v9, 0  ;;  %v14668_v45 = vcombine.low %v8711_v54, %v8713_v6  ;;  %v8716_v9 = vld [vmem:[%s20837_s7 + $0x88] sm:$0xff] }
0x2ecb   : > { %16356 = vmatmul.mubr.msk.bf16.vlgmr.msra.gmra.mrb[140].mxu1 %vm523_vm3, %v8139_v59 }
0x2ecc   : > { %16366 = vmatpush3.bf16.msra.mxu1 %v8256_v63  ;;  %16367 = vmatprep.mubr.msk.bf16.mxu1 %vm17405_vm0, %v17404_v1 }
0x2ecd   : > { %16371 = vmatprep.subr.bf16.mxu1 %v17404_v1 }
0x2ed3   : > { %16368 = vmatmul.mubr.msk.bf16.vlgmr.msra.gmra.mrb[152].mxu1 %vm585_vm5, %v8249_v25  ;;  %v14669_v25 = vcombine.high %v8711_v54, %v8713_v6  ;;  %v17017_v54 = vld [vmem:[%s20839_s9 + $0xf0] sm:$0xff]  }
0x2ed4   : > { %16373 = vmatprep.mubr.msk.bf16.mxu1 %vm17405_vm0, %v17404_v1  ;;  %16372 = vmatpush3.bf16.msra.mxu1 %v8308_v2  ;;  %v8717_v2 = vld [vmem:[%s20837_s7 + $0xc0] sm:$0xff] }
0x2ed5   : > { %16389 = vmatprep.subr.bf16.mxu1 %v17404_v1  ;;  %8784 = vmatprep.subr.bf16.mxu0 %v14669_v25 }
0x2ed6   : > { %8785 = vmatpush1.bf16.msra.mxu0 %v14668_v45  ;;  %v17018_v45 = vld [vmem:[%s20839_s9 + $0xb0] sm:$0xff]  }
0x2f55   : > { %v8455_v3 = vpop.f32.mrb[176].mxu0 }
0x2f56   : > { %v16387_v4 = vpop.f32.mrb[177].mxu0  ;;  %v8461_v49 = vpack.c.bf16 %v8455_v3, %v8455_v3  ;;  %v14673_v3 = vcombine.high %v8715_v0, %v8717_v2 }
0x2f57   : > { %v8458_v8 = vpop.f32.mrb[178].mxu0  ;;  %v14672_v4 = vcombine.low %v8715_v0, %v8717_v2  ;;  %v17019_v0 = vld [vmem:[%s20839_s9 + $0xf8] sm:$0xff]  }
0x2f58   : > { %v16388_v12 = vpop.f32.mrb[179].mxu0  ;;  %8786 = vmatprep.subr.bf16.mxu0 %v14673_v3  ;;  %v8712_v8 = vld [vmem:[%s20837_s7 + $0x8] sm:$0xff]  ;;  %v17020_v2 = vld [vmem:[%s20839_s9 + $0xb8] sm:$0xff]  }
0x2f59   : > { %8787 = vmatpush1.bf16.msra.mxu0 %v14672_v4  ;;  %v8714_v12 = vld [vmem:[%s20837_s7 + $0x48] sm:$0xff]  ;;  %v9212_v3 = vld [vmem:[%s20837_s7 + $0x18] sm:$0xff] }
0x2f5a   : > { %v9214_v4 = vld [vmem:[%s20837_s7 + $0x58] sm:$0xff] }
0x2f5d   : > { %v8554_v14 = vpop.f32.mrb[180].mxu0 }
0x2f5e   : > { %v16399_v15 = vpop.f32.mrb[181].mxu0  ;;  %v8560_v17 = vsel %vm570_vm4, %v8554_v14, -inf }
0x2f5f   : > { %8561 = vmax.xlane.f32.xlu0 %v8560_v17  ;;  %v8557_v19 = vpop.f32.mrb[182].mxu0  ;;  %v14671_v15 = vcombine.high %v8712_v8, %v8714_v12  ;;  %v16989_v17 = vld [vmem:[%s20839_s9 + $0x40] sm:$0xff]  }
0x2f60   : > { %v16400_v16 = vpop.f32.mrb[183].mxu0  ;;  %v16990_v19 = vld [vmem:[%s20839_s9] sm:$0xff]  }
0x2f61   : > { %8825 = vmatprep.subr.bf16.mxu0 %v14671_v15  ;;  %v16991_v16 = vld [vmem:[%s20839_s9 + $0x48] sm:$0xff]  }
0x2fa6   : > { %v8292_v22 = vpop.f32.mrb[152].mxu1 }
0x2fa7   : > { %v8298_v23 = vpack.c.bf16 %v8292_v22, %v8292_v22  ;;  %v16369_v51 = vpop.f32.mrb[153].mxu1  ;;  %v16993_v22 = vld [vmem:[%s20839_s9 + $0x50] sm:$0xff]  }
0x2fa8   : > { %v8295_v48 = vpop.f32.mrb[154].mxu1  ;;  %v16997_v51 = vld [vmem:[%s20839_s9 + $0x58] sm:$0xff]  }
0x2fa9   : > { %v16370_v28 = vpop.f32.mrb[155].mxu1  ;;  %16374 = vmatmul.mubr.msk.bf16.vlgmr.msra.gmra.mrb[140].mxu1 %vm523_vm3, %v8298_v23  ;;  %v16995_v23 = vld [vmem:[%s20839_s9 + $0x10] sm:$0xff]   ;;  %v17001_v48 = vld [vmem:[%s20839_s9 + $0x60] sm:$0xff]  }
0x2faa   : > { %16390 = vmatpush3.bf16.msra.mxu1 %v8467_v26  ;;  %16391 = vmatprep.mubr.msk.bf16.mxu1 %vm17405_vm0, %v17404_v1  ;;  %v16999_v26 = vld [vmem:[%s20839_s9 + $0x18] sm:$0xff]   ;;  %v17003_v28 = vld [vmem:[%s20839_s9 + $0x20] sm:$0xff]  }
0x2fab   : > { %16401 = vmatprep.subr.bf16.mxu1 %v17404_v1 }
0x2fb5   : > { %16392 = vmatmul.mubr.msk.bf16.vlgmr.msra.gmra.mrb[140].mxu1 %vm523_vm3, %v8461_v49  ;;  %v17005_v49 = vld [vmem:[%s20839_s9 + $0x68] sm:$0xff]  }
0x2fb6   : > { %16403 = vmatprep.mubr.msk.bf16.mxu1 %vm17405_vm0, %v17404_v1 }
0x2fec   : > { %v8562_v24 = vpop.xlane.xlu0 %8561 }
0x2fed   : > { %v8563_v53 = vsub.f32 %v8554_v14, %v8562_v24  ;;  %v14670_v14 = vcombine.low %v8712_v8, %v8714_v12  ;;  %v17007_v24 = vld [vmem:[%s20839_s9 + $0x28] sm:$0xff]   ;;  %v14712_v8 = vcombine.low %v9212_v3, %v9214_v4  ;;  %v14713_v12 = vcombine.high %v9212_v3, %v9214_v4  ;;  %v17038_v3 = vld [vmem:[%s20839_s9 + $0x1d8] sm:$0xff]  }
0x2fee   : > { %v17039_v4 = vld [vmem:[%s20839_s9 + $0x128] sm:$0xff]  }
0x2fef   : > { %v8564_v11 = vmul.f32 1.442695, %v8563_v53 }
0x2ff1   : > { %17347 = vpow2.f32 %v8564_v11 }
0x2ffb   : > { %v17348_v29 = vpop.eup %17347 }
0x2ffc   : > { %v8566_v30 = vsel %vm570_vm4, %v17348_v29, 0.0 }
0x2ffd   : > { %8567 = vadd.xlane.f32.xlu0 %v8566_v30 }
0x3013   : > { %8572 = vrot.lane.b32.xlu0 %v19173_v41, %s20938_s20  ;;  %s20939_s20 = sld [smem:[#allocation5_spill]] }
0x3019   : > { %v14636_v43 = vld [vmem:[%s20939_s20] ss:$0 sm:$0xff]  ;;  %s20949_s20 = smov 44  }
0x301a   : > { %v7384_v44 = vadd.f32 %v14636_v43, %v7376_v42  ;;  %v17002_v42 = vld [vmem:[%s20839_s9 + $0xd0] sm:$0xff]  }
0x301b   : > { %v17004_v43 = vld [vmem:[%s20839_s9 + $0x90] sm:$0xff]  }
0x308a   : > { %v8568_v31 = vpop.xlane.xlu0 %8567 }
0x308b   : > { %17349 = vrcp.f32 %v8568_v31  ;;  %v14665_v31 = vld [vmem:[%s20835_s5] ss:$0 sm:$0xff] }
0x308e   : > { %v8573_v32 = vpop.permute.xlu0 %8572 }
0x308f   : > { %v8578_v47 = vsel %vm589_vm2, %v8573_v32, 0 }
0x3090   : > { %16402 = vmatpush3.bf16.msra.mxu1 %v8578_v47  ;;  %v14666_v47 = vld [vmem:[%s20836_s6] ss:$0 sm:$0xff] }
0x3091   : > { %16407 = vmatprep.subr.bf16.mxu1 %v17404_v1 }
0x3095   : > { %v17350_v34 = vpop.eup %17349 }
0x3096   : > { %v8570_v35 = vmul.f32 %v17350_v34, %v17348_v29  ;;  %v8718_v34 = vld [vmem:[%s20837_s7 + $0xc8] sm:$0xff] }
0x3098   : > { %v8571_v36 = vpack.c.bf16 %v8570_v35, %v8570_v35 }
0x309a   : > { %16404 = vmatmul.mubr.msk.bf16.vlgmr.msra.gmra.mrb[156].mxu1 %vm585_vm5, %v8571_v36 }
0x309b   : > { %16408 = vmatpush3.bf16.msra.mxu1 %v8630_v37  ;;  %16409 = vmatprep.mubr.msk.bf16.mxu1 %vm17405_vm0, %v17404_v1  ;;  %v14675_v37 = vcombine.high %v8716_v9, %v8718_v34 }
0x309c   : > { %15554 = vmatprep.subr.bf16.mxu1 %v16989_v17 }
0x316d   : > { %v8614_v41 = vpop.f32.mrb[156].mxu1 }
0x316e   : > { %v8620_v7 = vpack.c.bf16 %v8614_v41, %v8614_v41  ;;  %v16405_v38 = vpop.f32.mrb[157].mxu1  ;;  %v14674_v41 = vcombine.low %v8716_v9, %v8718_v34 }
0x316f   : > { %v8617_v39 = vpop.f32.mrb[158].mxu1  ;;  %v16996_v38 = vld [vmem:[%s20839_s9 + $0x80] sm:$0xff]  }
0x3170   : > { %v16406_v40 = vpop.f32.mrb[159].mxu1  ;;  %16410 = vmatmul.mubr.msk.bf16.vlgmr.msra.gmra.mrb[140].mxu1 %vm523_vm3, %v8620_v7  ;;  %v16994_v7 = vld [vmem:[%s20839_s9 + $0xc0] sm:$0xff]   ;;  %v16998_v39 = vld [vmem:[%s20839_s9 + $0xc8] sm:$0xff]  }
0x3171   : > { %15555 = vmatpush3.bf16.msra.mxu1 %v16990_v19  ;;  %v17000_v40 = vld [vmem:[%s20839_s9 + $0x88] sm:$0xff]  }
0x3172   : > { %15556 = vmatprep.subr.bf16.mxu1 %v16991_v16 }
0x3175   : > { %15557 = vmatpush3.bf16.msra.mxu1 %v16992_v21 }
0x3176   : > { %15558 = vmatprep.subr.bf16.mxu1 %v16993_v22 }
0x3179   : > { %15559 = vmatpush3.bf16.msra.mxu1 %v16995_v23 }
0x317a   : > { %15560 = vmatprep.subr.bf16.mxu1 %v16997_v51 }
0x317d   : > { %15561 = vmatpush3.bf16.msra.mxu1 %v16999_v26 }
0x317e   : > { %15562 = vmatprep.subr.bf16.mxu1 %v17001_v48 }
0x3181   : > { %15563 = vmatpush3.bf16.msra.mxu1 %v17003_v28  ;;  %v9215_v28 = vld [vmem:[%s20837_s7 + $0x90] sm:$0xff] }
0x3182   : > { %15564 = vmatprep.subr.bf16.mxu1 %v17005_v49  ;;  %v9217_v49 = vld [vmem:[%s20837_s7 + $0xd0] sm:$0xff] }
0x3183   : > { %v14714_v34 = vcombine.low %v9215_v28, %v9217_v49 }
0x3185   : > { %15565 = vmatpush3.bf16.msra.mxu1 %v17007_v24 }
0x3243   : > { %v8666_v20 = vpop.f32.mrb[140].mxu1 }
0x3244   : > { %v16567_v46 = vadd.f32 %v8666_v20, %v7384_v44  ;;  %v16411_v50 = vpop.f32.mrb[141].mxu1  ;;  %v17006_v44 = vld [vmem:[%s20839_s9 + $0xd8] sm:$0xff]  }
0x3245   : > { %v8669_v27 = vpop.f32.mrb[142].mxu1  ;;  %v17008_v20 = vld [vmem:[%s20839_s9 + $0x98] sm:$0xff]   ;;  %v17010_v50 = vld [vmem:[%s20839_s9 + $0xe0] sm:$0xff]  }
0x3246   : > { %v16412_v52 = vpop.f32.mrb[143].mxu1  ;;  %v8673_v55 = vsel %vm1813_vm7, %v16567_v46, 0.0  ;;  %v17011_v27 = vld [vmem:[%s20839_s9 + $0x30] sm:$0xff]  }
0x3247   : > { %8674 = vadd.xlane.f32.xlu1 %v8673_v55  ;;  %v17012_v52 = vld [vmem:[%s20839_s9 + $0xa0] sm:$0xff]   ;;  %v17013_v55 = vld [vmem:[%s20839_s9 + $0x78] sm:$0xff]  }
0x32d4   : > { %v8675_v56 = vpop.xlane.xlu1 %8674 }
0x32d5   : > { %v8676_v58 = vmul.f32 0.03125, %v8675_v56  ;;  %v17014_v56 = vld [vmem:[%s20839_s9 + $0xe8] sm:$0xff]  }
0x32d7   : > { %v8677_v59 = vsub.f32 %v16567_v46, %v8676_v58  ;;  %v17009_v46 = vld [vmem:[%s20839_s9 + $0x70] sm:$0xff]   ;;  %v17015_v58 = vld [vmem:[%s20839_s9 + $0x38] sm:$0xff]  }
0x32d8   : > { %15566 = vmatprep.subr.bf16.mxu1 %v17009_v46  ;;  %v17023_v46 = vld [vmem:[%s20839_s9 + $0x148] sm:$0xff]  }
0x32d9   : > { %v8678_v61 = vmul.f32 %v8677_v59, %v8677_v59  ;;  %15567 = vmatpush3.bf16.msra.mxu1 %v17011_v27  ;;  %v17024_v27 = vld [vmem:[%s20839_s9 + $0x108] sm:$0xff]  }
0x32da   : > { %15568 = vmatprep.subr.bf16.mxu1 %v17013_v55  ;;  %v17025_v55 = vld [vmem:[%s20839_s9 + $0x150] sm:$0xff]  }
0x32db   : > { %v8679_v63 = vsel %vm1813_vm7, %v8678_v61, 0.0  ;;  %v9211_v61 = vld [vmem:[%s20837_s7 + $0x10] sm:$0xff] }
0x32dc   : > { %8680 = vadd.xlane.f32.xlu0 %v8679_v63  ;;  %v9213_v63 = vld [vmem:[%s20837_s7 + $0x50] sm:$0xff] }
0x32dd   : > { %15569 = vmatpush3.bf16.msra.mxu1 %v17015_v58  ;;  %v14711_v6 = vcombine.high %v9211_v61, %v9213_v63  ;;  %v14710_v25 = vcombine.low %v9211_v61, %v9213_v63  ;;  %v17027_v58 = vld [vmem:[%s20839_s9 + $0x110] sm:$0xff]   ;;  %v17029_v61 = vld [vmem:[%s20839_s9 + $0x158] sm:$0xff]   ;;  %v17032_v63 = vld [vmem:[%s20839_s9 + $0x188] sm:$0xff]  }
0x32df   : > { %9281 = vmatprep.subr.bf16.mxu1 %v14711_v6  ;;  %v17033_v6 = vld [vmem:[%s20839_s9 + $0x160] sm:$0xff]  }
0x3369   : > { %v8681_v53 = vpop.xlane.xlu0 %8680 }
0x336a   : > { %v8682_v11 = vmul.f32 0.03125, %v8681_v53 }
0x336c   : > { %v8683_v29 = vadd.f32 1e-05, %v8682_v11 }
0x336e   : > { %17351 = vrsqrt.f32 %v8683_v29 }
0x3378   : > { %v17352_v30 = vpop.eup %17351 }
0x3379   : > { %v8685_v32 = vmul.f32 %v17352_v30, %v8677_v59  ;;  %v17016_v59 = vld [vmem:[%s20839_s9 + $0xa8] sm:$0xff]   ;;  %v14715_v30 = vcombine.high %v9215_v28, %v9217_v49  ;;  %v17050_v49 = vld [vmem:[%s20839_s9 + $0x1b0] sm:$0xff]  }
0x337b   : > { %v8693_v33 = vmul.f32 %v14665_v31, %v8685_v32 }
0x337d   : > { %v19469_v35 = vadd.f32 %v14666_v47, %v8693_v33 }
0x337f   : > { %v19473_v36 = vpack.c.bf16 %v19469_v35, %v19469_v35 }
0x3381   : > { %14676 = vmatmul.mubr.msk.bf16.vlgmr.msra.gmra.mrb[184].mxu0 %vm464_vm1, %v19473_v36 }
0x3382   : > { %8826 = vmatpush1.bf16.msra.mxu0 %v14670_v14  ;;  %8857 = vmatprep.mubr.bf16.mxu0 %v17429_v62  ;;  %v8719_v14 = vld [vmem:[%s20838_s8] sm:$0xf] }
0x3383   : > { %8827 = vmatprep.subr.bf16.mxu0 %v14675_v37  ;;  %v8724_v15 = vrot.slane %v8719_v14, %v17914_v60  ;;  %v8728_v17 = vrot.slane %v8719_v14, %v17919_v57  ;;  %v8732_v24 = vrot.slane %v8719_v14, %v17923_v5  ;;  %v8736_v11 = vrot.slane %v8719_v14, %v17925_v10  ;;  %v17042_v14 = vld [vmem:[%s20839_s9 + $0x1e0] sm:$0xff]  }
0x3386   : > { %8828 = vmatpush1.bf16.msra.mxu0 %v14674_v41 }
0x3387   : > { %15576 = vmatprep.subr.bf16.mxu0 %v16994_v7  ;;  %v17021_v7 = vld [vmem:[%s20839_s9 + $0x140] sm:$0xff]  }
0x3389   : > { %14677 = vmatmul.mubr.msk.bf16.vlgmr.msra.gmra.mrb[188].mxu0 %vm464_vm1, %v19473_v36 }
0x338a   : > { %15577 = vmatpush3.bf16.msra.mxu0 %v16996_v38 }
0x338b   : > { %15578 = vmatprep.subr.bf16.mxu0 %v16998_v39  ;;  %v9216_v39 = vld [vmem:[%s20837_s7 + $0x98] sm:$0xff] }
0x338e   : > { %15579 = vmatpush3.bf16.msra.mxu0 %v17000_v40  ;;  %v9218_v40 = vld [vmem:[%s20837_s7 + $0xd8] sm:$0xff] }
0x338f   : > { %15580 = vmatprep.subr.bf16.mxu0 %v17002_v42 }
0x3392   : > { %15581 = vmatpush3.bf16.msra.mxu0 %v17004_v43 }
0x3393   : > { %15582 = vmatprep.subr.bf16.mxu0 %v17006_v44  ;;  %v14717_v44 = vcombine.high %v9216_v39, %v9218_v40 }
0x3396   : > { %15583 = vmatpush3.bf16.msra.mxu0 %v17008_v20  ;;  %v17022_v20 = vld [vmem:[%s20839_s9 + $0x100] sm:$0xff]  }
0x3397   : > { %15584 = vmatprep.subr.bf16.mxu0 %v17010_v50  ;;  %v14716_v50 = vcombine.low %v9216_v39, %v9218_v40 }
0x339a   : > { %15585 = vmatpush3.bf16.msra.mxu0 %v17012_v52  ;;  %v17026_v52 = vld [vmem:[%s20839_s9 + $0x1c0] sm:$0xff]  }
0x339b   : > { %15586 = vmatprep.subr.bf16.mxu0 %v17014_v56  ;;  %v17028_v56 = vld [vmem:[%s20839_s9 + $0x180] sm:$0xff]  }
0x339e   : > { %15587 = vmatpush3.bf16.msra.mxu0 %v17016_v59  ;;  %v17030_v59 = vld [vmem:[%s20839_s9 + $0x1c8] sm:$0xff]  }
0x339f   : > { %15588 = vmatprep.subr.bf16.mxu0 %v17017_v54  ;;  %v17031_v54 = vld [vmem:[%s20839_s9 + $0x118] sm:$0xff]  }
0x33a2   : > { %15589 = vmatpush3.bf16.msra.mxu0 %v17018_v45  ;;  %v17035_v45 = vld [vmem:[%s20839_s9 + $0x120] sm:$0xff]  }
0x33a3   : > { %15590 = vmatprep.subr.bf16.mxu0 %v17019_v0  ;;  %v17036_v0 = vld [vmem:[%s20839_s9 + $0x190] sm:$0xff]  }
0x33a6   : > { %15591 = vmatpush3.bf16.msra.mxu0 %v17020_v2  ;;  %v17037_v2 = vld [vmem:[%s20839_s9 + $0x168] sm:$0xff]  }
0x33a7   : > { %9322 = vmatprep.subr.bf16.mxu0 %v14713_v12  ;;  %v17041_v12 = vld [vmem:[%s20839_s9 + $0x170] sm:$0xff]  }
0x3454   : > { %v8818_v19 = vpop.f32.mrb[184].mxu0 }
0x3455   : > { %v8819_v16 = vadd.f32 %v8818_v19, %v8724_v15  ;;  %v8820_v21 = vpop.f32.mrb[185].mxu0  ;;  %v17043_v15 = vld [vmem:[%s20839_s9 + $0x130] sm:$0xff]   ;;  %v17045_v19 = vld [vmem:[%s20839_s9 + $0x178] sm:$0xff]  }
0x3456   : > { %v8821_v22 = vadd.f32 %v8820_v21, %v8728_v17  ;;  %v8822_v23 = vpop.f32.mrb[186].mxu0  ;;  %v17044_v17 = vld [vmem:[%s20839_s9 + $0x1a0] sm:$0xff]   ;;  %v17047_v21 = vld [vmem:[%s20839_s9 + $0x138] sm:$0xff]  }
0x3457   : > { %v8866_v51 = vmax.f32 %v8819_v16, 0.0  ;;  %v8823_v26 = vpop.f32.mrb[187].mxu0  ;;  %v17046_v16 = vld [vmem:[%s20839_s9 + $0x1e8] sm:$0xff]   ;;  %v9708_v23 = vld [vmem:[%s20837_s7 + $0x20] sm:$0xff] }
0x3458   : > { %v8867_v48 = vmax.f32 %v8821_v22, 0.0  ;;  %v17048_v22 = vld [vmem:[%s20839_s9 + $0x1a8] sm:$0xff]   ;;  %v17049_v26 = vld [vmem:[%s20839_s9 + $0x1f0] sm:$0xff]  }
0x3459   : > { %v8870_v29 = vpack.c.bf16 %v8866_v51, %v8866_v51  ;;  %v9710_v51 = vld [vmem:[%s20837_s7 + $0x60] sm:$0xff] }
0x345a   : > { %v8871_v53 = vpack.c.bf16 %v8867_v48, %v8867_v48  ;;  %v14753_v48 = vcombine.high %v9708_v23, %v9710_v51  ;;  %v14752_v28 = vcombine.low %v9708_v23, %v9710_v51  ;;  %v9715_v23 = vld [vmem:[%s20837_s7 + $0xe8] sm:$0xff] }
0x345c   : > { %v8859_v31 = vpop.f32.mrb[188].mxu0  ;;  %9162 = vmatprep.mubr.bf16.mxu1 %v8871_v53  ;;  %v17052_v53 = vld [vmem:[%s20839_s9 + $0x1b8] sm:$0xff]  }
0x345d   : > { %v8860_v32 = vadd.f32 %v8859_v31, %v8732_v24  ;;  %v8861_v47 = vpop.f32.mrb[189].mxu0  ;;  %9163 = vmatmul.mubr.bf16.vlgmr.msra.gmra.mrb[160].mxu1 %v8870_v29  ;;  %v17051_v24 = vld [vmem:[%s20839_s9 + $0x1f8] sm:$0xff]   ;;  %v19687_v29 = vld [vmem:[%s20837_s7 + $0x68] sm:$0xff] }
0x345e   : > { %v8862_v33 = vadd.f32 %v8861_v47, %v8736_v11  ;;  %v8863_v9 = vpop.f32.mrb[190].mxu0  ;;  %9282 = vmatpush1.bf16.msra.mxu1 %v14710_v25  ;;  %9313 = vmatprep.mubr.bf16.mxu1 %v17429_v62  ;;  %v17034_v25 = vld [vmem:[%s20839_s9 + $0x1d0] sm:$0xff]   ;;  %v19682_v11 = vld [vmem:[%s20837_s7 + $0x28] sm:$0xff] }
0x345f   : > { %v8868_v37 = vmax.f32 %v8860_v32, 0.0  ;;  %v8864_v41 = vpop.f32.mrb[191].mxu0  ;;  %9283 = vmatprep.subr.bf16.mxu1 %v14715_v30  ;;  %v14754_v30 = vcombine.low %v19682_v11, %v19687_v29  ;;  %v14755_v31 = vcombine.high %v19682_v11, %v19687_v29  ;;  %v17058_v11 = vld [vmem:[%s20839_s9 + $0x2c0] sm:$0xff]   ;;  %v17057_v29 = vld [vmem:[%s20839_s9 + $0x250] sm:$0xff]  }
0x3460   : > { %v8869_v38 = vmax.f32 %v8862_v33, 0.0 }
0x3461   : > { %v8872_v43 = vpack.c.bf16 %v8868_v37, %v8868_v37 }
0x3462   : > { %v8873_v42 = vpack.c.bf16 %v8869_v38, %v8869_v38  ;;  %9284 = vmatpush1.bf16.msra.mxu1 %v14714_v34  ;;  %v9219_v34 = vld [vmem:[%s20838_s8 + $0x4] sm:$0xf] }
0x3463   : > { %15598 = vmatprep.subr.bf16.mxu1 %v17021_v7  ;;  %v9224_v41 = vrot.slane %v9219_v34, %v17914_v60  ;;  %v9228_v7 = vrot.slane %v9219_v34, %v17919_v57 }
0x3464   : > { %9202 = vmatprep.mubr.bf16.mxu0 %v8873_v42  ;;  %v14667_v42 = vld [vmem:[%s20840_s10] ss:$0 sm:$0xff] }
0x3465   : > { %9203 = vmatmul.mubr.bf16.vlgmr.msra.gmra.mrb[192].mxu0 %v8872_v43  ;;  %14718 = vmatmul.mubr.msk.bf16.vlgmr.msra.gmra.mrb[164].mxu1 %vm464_vm1, %v19473_v36 }
0x3466   : > { %9323 = vmatpush1.bf16.msra.mxu0 %v14712_v8  ;;  %9354 = vmatprep.mubr.bf16.mxu0 %v17429_v62  ;;  %v17040_v8 = vld [vmem:[%s20839_s9 + $0x198] sm:$0xff]  }
0x3467   : > { %9324 = vmatprep.subr.bf16.mxu0 %v14717_v44  ;;  %15599 = vmatpush3.bf16.msra.mxu1 %v17022_v20 }
0x3468   : > { %15600 = vmatprep.subr.bf16.mxu1 %v17023_v46 }
0x346a   : > { %9325 = vmatpush1.bf16.msra.mxu0 %v14716_v50 }
0x346b   : > { %15601 = vmatpush3.bf16.msra.mxu1 %v17024_v27  ;;  %15620 = vmatprep.subr.bf16.mxu0 %v17026_v52 }
0x346c   : > { %15602 = vmatprep.subr.bf16.mxu1 %v17025_v55 }
0x346d   : > { %14719 = vmatmul.mubr.msk.bf16.vlgmr.msra.gmra.mrb[196].mxu0 %vm464_vm1, %v19473_v36 }
0x346e   : > { %15621 = vmatpush3.bf16.msra.mxu0 %v17028_v56 }
0x346f   : > { %15603 = vmatpush3.bf16.msra.mxu1 %v17027_v58  ;;  %15622 = vmatprep.subr.bf16.mxu0 %v17030_v59  ;;  %v8710_v58 = vadd.f32 %v14667_v42, %v19469_v35  ;;  %v17072_v42 = vld [vmem:[%s20839_s9 + $0x298] sm:$0xff]  }
0x3470   : > { %15604 = vmatprep.subr.bf16.mxu1 %v17029_v61 }
0x3472   : > { %15623 = vmatpush3.bf16.msra.mxu0 %v17032_v63  ;;  %v9712_v63 = vld [vmem:[%s20837_s7 + $0xa0] sm:$0xff] }
0x3473   : > { %15605 = vmatpush3.bf16.msra.mxu1 %v17031_v54  ;;  %15624 = vmatprep.subr.bf16.mxu0 %v17034_v25  ;;  %v9714_v54 = vld [vmem:[%s20837_s7 + $0xe0] sm:$0xff] }
0x3474   : > { %15606 = vmatprep.subr.bf16.mxu1 %v17033_v6  ;;  %v9232_v6 = vrot.slane %v9219_v34, %v17923_v5 }
0x3476   : > { %15625 = vmatpush3.bf16.msra.mxu0 %v17036_v0  ;;  %v9236_v0 = vrot.slane %v9219_v34, %v17925_v10  ;;  %v17065_v34 = vld [vmem:[%s20839_s9 + $0x260] sm:$0xff]  }
0x3477   : > { %15607 = vmatpush3.bf16.msra.mxu1 %v17035_v45  ;;  %15626 = vmatprep.subr.bf16.mxu0 %v17038_v3  ;;  %v14757_v3 = vcombine.high %v9712_v63, %v9714_v54 }
0x3478   : > { %15608 = vmatprep.subr.bf16.mxu1 %v17037_v2 }
0x347a   : > { %15627 = vmatpush3.bf16.msra.mxu0 %v17040_v8 }
0x347b   : > { %15609 = vmatpush3.bf16.msra.mxu1 %v17039_v4  ;;  %15628 = vmatprep.subr.bf16.mxu0 %v17042_v14 }
0x347c   : > { %15610 = vmatprep.subr.bf16.mxu1 %v17041_v12 }
0x347e   : > { %15629 = vmatpush3.bf16.msra.mxu0 %v17044_v17 }
0x347f   : > { %15611 = vmatpush3.bf16.msra.mxu1 %v17043_v15  ;;  %15630 = vmatprep.subr.bf16.mxu0 %v17046_v16  ;;  %v14756_v15 = vcombine.low %v9712_v63, %v9714_v54  ;;  %v17053_v16 = vld [vmem:[%s20839_s9 + $0x240] sm:$0xff]   ;;  %v17082_v54 = vld [vmem:[%s20839_s9 + $0x2b0] sm:$0xff]  }
0x3480   : > { %15612 = vmatprep.subr.bf16.mxu1 %v17045_v19 }
0x3482   : > { %15631 = vmatpush3.bf16.msra.mxu0 %v17048_v22  ;;  %v9713_v22 = vld [vmem:[%s20837_s7 + $0xa8] sm:$0xff] }
0x3483   : > { %15613 = vmatpush3.bf16.msra.mxu1 %v17047_v21  ;;  %15632 = vmatprep.subr.bf16.mxu0 %v17049_v26 }
0x3484   : > { %9778 = vmatprep.subr.bf16.mxu1 %v14753_v48  ;;  %v14759_v48 = vcombine.high %v9713_v22, %v9715_v23 }
0x3486   : > { %15633 = vmatpush3.bf16.msra.mxu0 %v17050_v49  ;;  %v17055_v49 = vld [vmem:[%s20839_s9 + $0x248] sm:$0xff]  }
0x3487   : > { %15634 = vmatprep.subr.bf16.mxu0 %v17051_v24  ;;  %v14758_v24 = vcombine.low %v9713_v22, %v9715_v23 }
0x348a   : > { %15635 = vmatpush3.bf16.msra.mxu0 %v17052_v53  ;;  %v17056_v53 = vld [vmem:[%s20839_s9 + $0x208] sm:$0xff]  }
0x348b   : > { %9819 = vmatprep.subr.bf16.mxu0 %v14755_v31  ;;  %v17059_v31 = vld [vmem:[%s20839_s9 + $0x210] sm:$0xff]  }
0x3530   : > { %v15570_v32 = vpop.f32.mrb[160].mxu1 }
0x3531   : > { %v15571_v47 = vpop.f32.mrb[161].mxu1 }
0x3532   : > { %v15572_v33 = vadd.f32 %v15571_v47, %v15570_v32  ;;  %v15573_v9 = vpop.f32.mrb[162].mxu1  ;;  %v17062_v32 = vld [vmem:[%s20839_s9 + $0x2c8] sm:$0xff]   ;;  %v17061_v47 = vld [vmem:[%s20839_s9 + $0x258] sm:$0xff]  }
0x3533   : > { %v15574_v37 = vpop.f32.mrb[163].mxu1  ;;  %v17063_v9 = vld [vmem:[%s20839_s9 + $0x218] sm:$0xff]  }
0x3534   : > { %v17066_v37 = vld [vmem:[%s20839_s9 + $0x2d0] sm:$0xff]  }
0x3538   : > { %v15592_v38 = vpop.f32.mrb[192].mxu0  ;;  %v9315_v39 = vpop.f32.mrb[164].mxu1 }
0x3539   : > { %v9316_v40 = vadd.f32 %v9315_v39, %v9224_v41  ;;  %v15593_v43 = vpop.f32.mrb[193].mxu0  ;;  %v9317_v44 = vpop.f32.mrb[165].mxu1  ;;  %v17067_v41 = vld [vmem:[%s20839_s9 + $0x220] sm:$0xff]   ;;  %v17070_v39 = vld [vmem:[%s20839_s9 + $0x2d8] sm:$0xff]  }
0x353a   : > { %v15594_v20 = vadd.f32 %v15593_v43, %v15592_v38  ;;  %v9318_v46 = vadd.f32 %v9317_v44, %v9228_v7  ;;  %v15595_v50 = vpop.f32.mrb[194].mxu0  ;;  %v9319_v27 = vpop.f32.mrb[166].mxu1  ;;  %v17068_v7 = vld [vmem:[%s20839_s9 + $0x290] sm:$0xff]   ;;  %v17069_v38 = vld [vmem:[%s20839_s9 + $0x268] sm:$0xff]   ;;  %v17074_v44 = vld [vmem:[%s20839_s9 + $0x2e0] sm:$0xff]  }
0x353b   : > { %v9363_v52 = vmax.f32 %v9316_v40, 0.0  ;;  %v15596_v55 = vpop.f32.mrb[195].mxu0  ;;  %v9320_v56 = vpop.f32.mrb[167].mxu1  ;;  %v17071_v40 = vld [vmem:[%s20839_s9 + $0x228] sm:$0xff]   ;;  %v17073_v43 = vld [vmem:[%s20839_s9 + $0x270] sm:$0xff]   ;;  %v17077_v50 = vld [vmem:[%s20839_s9 + $0x278] sm:$0xff]  }
0x353c   : > { %v9205_v59 = vadd.f32 %v15594_v20, %v15572_v33  ;;  %v9364_v61 = vmax.f32 %v9318_v46, 0.0  ;;  %v17064_v33 = vld [vmem:[%s20839_s9 + $0x288] sm:$0xff]   ;;  %v17075_v20 = vld [vmem:[%s20839_s9 + $0x230] sm:$0xff]   ;;  %v17076_v46 = vld [vmem:[%s20839_s9 + $0x2a0] sm:$0xff]  }
0x353d   : > { %v9367_v2 = vpack.c.bf16 %v9363_v52, %v9363_v52  ;;  %v17078_v27 = vld [vmem:[%s20839_s9 + $0x2e8] sm:$0xff]   ;;  %v17079_v52 = vld [vmem:[%s20839_s9 + $0x238] sm:$0xff]   ;;  %v10205_v56 = vld [vmem:[%s20837_s7 + $0x30] sm:$0xff] }
0x353e   : > { %v19709_v25 = vadd.f32 %v9205_v59, %v8710_v58  ;;  %v9368_v45 = vpack.c.bf16 %v9364_v61, %v9364_v61  ;;  %v17080_v55 = vld [vmem:[%s20839_s9 + $0x2a8] sm:$0xff]   ;;  %v10207_v58 = vld [vmem:[%s20837_s7 + $0x70] sm:$0xff] }
0x353f   : > { %v17081_v59 = vld [vmem:[%s20839_s9 + $0x2f0] sm:$0xff]   ;;  %v14795_v61 = vcombine.high %v10205_v56, %v10207_v58  ;;  %v14794_v63 = vcombine.low %v10205_v56, %v10207_v58 }
0x3540   : > { %v9356_v35 = vpop.f32.mrb[196].mxu0  ;;  %9659 = vmatprep.mubr.bf16.mxu1 %v9368_v45  ;;  %v17084_v45 = vld [vmem:[%s20839_s9 + $0x2b8] sm:$0xff]  }
0x3541   : > { %v9357_v4 = vadd.f32 %v9356_v35, %v9232_v6  ;;  %v9358_v8 = vpop.f32.mrb[197].mxu0  ;;  %9660 = vmatmul.mubr.bf16.vlgmr.msra.gmra.mrb[168].mxu1 %v9367_v2  ;;  %v17083_v6 = vld [vmem:[%s20839_s9 + $0x2f8] sm:$0xff]  }
0x3542   : > { %v9359_v12 = vadd.f32 %v9358_v8, %v9236_v0  ;;  %v9360_v14 = vpop.f32.mrb[198].mxu0  ;;  %9779 = vmatpush1.bf16.msra.mxu1 %v14752_v28  ;;  %9810 = vmatprep.mubr.bf16.mxu1 %v17429_v62  ;;  %v17054_v28 = vld [vmem:[%s20839_s9 + $0x200] sm:$0xff]   ;;  %v10206_v0 = vld [vmem:[%s20837_s7 + $0x38] sm:$0xff] }
0x3543   : > { %v9365_v17 = vmax.f32 %v9357_v4, 0.0  ;;  %v9361_v19 = vpop.f32.mrb[199].mxu0  ;;  %9780 = vmatprep.subr.bf16.mxu1 %v14757_v3  ;;  %v10208_v2 = vld [vmem:[%s20837_s7 + $0x78] sm:$0xff] }
0x3544   : > { %v9366_v21 = vmax.f32 %v9359_v12, 0.0  ;;  %v14796_v3 = vcombine.low %v10206_v0, %v10208_v2  ;;  %v14797_v35 = vcombine.high %v10206_v0, %v10208_v2  ;;  %v17092_v0 = vld [vmem:[%s20839_s9 + $0x380] sm:$0xff]   ;;  %v17091_v2 = vld [vmem:[%s20839_s9 + $0x310] sm:$0xff]  }
0x3545   : > { %v9369_v26 = vpack.c.bf16 %v9365_v17, %v9365_v17 }
0x3546   : > { %v9370_v51 = vpack.c.bf16 %v9366_v21, %v9366_v21  ;;  %9781 = vmatpush1.bf16.msra.mxu1 %v14756_v15  ;;  %v9716_v15 = vld [vmem:[%s20838_s8 + $0x8] sm:$0xf] }
0x3547   : > { %15642 = vmatprep.subr.bf16.mxu1 %v17053_v16  ;;  %v9721_v19 = vrot.slane %v9716_v15, %v17914_v60  ;;  %v9725_v16 = vrot.slane %v9716_v15, %v17919_v57 }
0x3548   : > { %9699 = vmatprep.mubr.bf16.mxu0 %v9370_v51 }
0x3549   : > { %9700 = vmatmul.mubr.bf16.vlgmr.msra.gmra.mrb[200].mxu0 %v9369_v26  ;;  %14760 = vmatmul.mubr.msk.bf16.vlgmr.msra.gmra.mrb[172].mxu1 %vm464_vm1, %v19473_v36 }
0x354a   : > { %9820 = vmatpush1.bf16.msra.mxu0 %v14754_v30  ;;  %9851 = vmatprep.mubr.bf16.mxu0 %v17429_v62  ;;  %v17060_v30 = vld [vmem:[%s20839_s9 + $0x280] sm:$0xff]  }
0x354b   : > { %9821 = vmatprep.subr.bf16.mxu0 %v14759_v48  ;;  %15643 = vmatpush3.bf16.msra.mxu1 %v17054_v28 }
0x354c   : > { %15644 = vmatprep.subr.bf16.mxu1 %v17055_v49 }
0x354e   : > { %9822 = vmatpush1.bf16.msra.mxu0 %v14758_v24 }
0x354f   : > { %15645 = vmatpush3.bf16.msra.mxu1 %v17056_v53  ;;  %15664 = vmatprep.subr.bf16.mxu0 %v17058_v11 }
0x3550   : > { %15646 = vmatprep.subr.bf16.mxu1 %v17057_v29 }
0x3551   : > { %14761 = vmatmul.mubr.msk.bf16.vlgmr.msra.gmra.mrb[204].mxu0 %vm464_vm1, %v19473_v36 }
0x3552   : > { %15665 = vmatpush3.bf16.msra.mxu0 %v17060_v30 }
0x3553   : > { %15647 = vmatpush3.bf16.msra.mxu1 %v17059_v31  ;;  %15666 = vmatprep.subr.bf16.mxu0 %v17062_v32  ;;  %v10209_v32 = vld [vmem:[%s20837_s7 + $0xb0] sm:$0xff] }
0x3554   : > { %15648 = vmatprep.subr.bf16.mxu1 %v17061_v47  ;;  %v10211_v47 = vld [vmem:[%s20837_s7 + $0xf0] sm:$0xff] }
0x3556   : > { %15667 = vmatpush3.bf16.msra.mxu0 %v17064_v33  ;;  %v9729_v33 = vrot.slane %v9716_v15, %v17923_v5 }
0x3557   : > { %15649 = vmatpush3.bf16.msra.mxu1 %v17063_v9  ;;  %15668 = vmatprep.subr.bf16.mxu0 %v17066_v37  ;;  %v9733_v37 = vrot.slane %v9716_v15, %v17925_v10  ;;  %v17100_v15 = vld [vmem:[%s20839_s9 + $0x390] sm:$0xff]  }
0x3558   : > { %15650 = vmatprep.subr.bf16.mxu1 %v17065_v34 }
0x355a   : > { %15669 = vmatpush3.bf16.msra.mxu0 %v17068_v7  ;;  %v14799_v7 = vcombine.high %v10209_v32, %v10211_v47 }
0x355b   : > { %15651 = vmatpush3.bf16.msra.mxu1 %v17067_v41  ;;  %15670 = vmatprep.subr.bf16.mxu0 %v17070_v39 }
0x355c   : > { %15652 = vmatprep.subr.bf16.mxu1 %v17069_v38 }
0x355e   : > { %15671 = vmatpush3.bf16.msra.mxu0 %v17072_v42 }
0x355f   : > { %15653 = vmatpush3.bf16.msra.mxu1 %v17071_v40  ;;  %15672 = vmatprep.subr.bf16.mxu0 %v17074_v44  ;;  %v14798_v44 = vcombine.low %v10209_v32, %v10211_v47 }
0x3560   : > { %15654 = vmatprep.subr.bf16.mxu1 %v17073_v43 }
0x3562   : > { %15673 = vmatpush3.bf16.msra.mxu0 %v17076_v46 }
0x3563   : > { %15655 = vmatpush3.bf16.msra.mxu1 %v17075_v20  ;;  %15674 = vmatprep.subr.bf16.mxu0 %v17078_v27  ;;  %v10210_v27 = vld [vmem:[%s20837_s7 + $0xb8] sm:$0xff] }
0x3564   : > { %15656 = vmatprep.subr.bf16.mxu1 %v17077_v50 }
0x3566   : > { %15675 = vmatpush3.bf16.msra.mxu0 %v17080_v55 }
0x3567   : > { %15657 = vmatpush3.bf16.msra.mxu1 %v17079_v52  ;;  %15676 = vmatprep.subr.bf16.mxu0 %v17081_v59  ;;  %v10212_v52 = vld [vmem:[%s20837_s7 + $0xf8] sm:$0xff]  ;;  %v17086_v59 = vld [vmem:[%s20839_s9 + $0x300] sm:$0xff]  }
0x3568   : > { %10275 = vmatprep.subr.bf16.mxu1 %v14795_v61  ;;  %v14801_v58 = vcombine.high %v10210_v27, %v10212_v52  ;;  %v17087_v61 = vld [vmem:[%s20839_s9 + $0x348] sm:$0xff]  }
0x356a   : > { %15677 = vmatpush3.bf16.msra.mxu0 %v17082_v54  ;;  %v17088_v54 = vld [vmem:[%s20839_s9 + $0x308] sm:$0xff]  }
0x356b   : > { %15678 = vmatprep.subr.bf16.mxu0 %v17083_v6  ;;  %v17090_v6 = vld [vmem:[%s20839_s9 + $0x3c0] sm:$0xff]  }
0x356e   : > { %15679 = vmatpush3.bf16.msra.mxu0 %v17084_v45  ;;  %v17089_v45 = vld [vmem:[%s20839_s9 + $0x350] sm:$0xff]  }
0x356f   : > { %10316 = vmatprep.subr.bf16.mxu0 %v14797_v35  ;;  %v17093_v35 = vld [vmem:[%s20839_s9 + $0x358] sm:$0xff]  }
0x3614   : > { %v15614_v4 = vpop.f32.mrb[168].mxu1 }
0x3615   : > { %v15615_v8 = vpop.f32.mrb[169].mxu1 }
0x3616   : > { %v15616_v12 = vadd.f32 %v15615_v8, %v15614_v4  ;;  %v15617_v14 = vpop.f32.mrb[170].mxu1  ;;  %v17096_v4 = vld [vmem:[%s20839_s9 + $0x388] sm:$0xff]   ;;  %v17095_v8 = vld [vmem:[%s20839_s9 + $0x318] sm:$0xff]  }
0x3617   : > { %v15618_v17 = vpop.f32.mrb[171].mxu1  ;;  %v17099_v14 = vld [vmem:[%s20839_s9 + $0x320] sm:$0xff]  }
0x3618   : > { %v17101_v17 = vld [vmem:[%s20839_s9 + $0x368] sm:$0xff]  }
0x361c   : > { %v15636_v21 = vpop.f32.mrb[200].mxu0  ;;  %v9812_v22 = vpop.f32.mrb[172].mxu1 }
0x361d   : > { %v9813_v23 = vadd.f32 %v9812_v22, %v9721_v19  ;;  %v15637_v51 = vpop.f32.mrb[201].mxu0  ;;  %v9814_v26 = vpop.f32.mrb[173].mxu1  ;;  %v17102_v19 = vld [vmem:[%s20839_s9 + $0x3d8] sm:$0xff]   ;;  %v17105_v22 = vld [vmem:[%s20839_s9 + $0x370] sm:$0xff]  }
0x361e   : > { %v15638_v48 = vadd.f32 %v15637_v51, %v15636_v21  ;;  %v9815_v28 = vadd.f32 %v9814_v26, %v9725_v16  ;;  %v15639_v49 = vpop.f32.mrb[202].mxu0  ;;  %v9816_v24 = vpop.f32.mrb[174].mxu1  ;;  %v17103_v16 = vld [vmem:[%s20839_s9 + $0x328] sm:$0xff]   ;;  %v17104_v21 = vld [vmem:[%s20839_s9 + $0x398] sm:$0xff]   ;;  %v17107_v51 = vld [vmem:[%s20839_s9 + $0x330] sm:$0xff]  }
0x361f   : > { %v9860_v53 = vmax.f32 %v9813_v23, 0.0  ;;  %v15640_v11 = vpop.f32.mrb[203].mxu0  ;;  %v9817_v29 = vpop.f32.mrb[175].mxu1  ;;  %v17106_v23 = vld [vmem:[%s20839_s9 + $0x3e0] sm:$0xff]   ;;  %v17111_v49 = vld [vmem:[%s20839_s9 + $0x338] sm:$0xff]   ;;  %v17112_v24 = vld [vmem:[%s20839_s9 + $0x3a8] sm:$0xff]  }
0x3620   : > { %v9702_v30 = vadd.f32 %v15638_v48, %v15616_v12  ;;  %v9861_v31 = vmax.f32 %v9815_v28, 0.0  ;;  %v17097_v12 = vld [vmem:[%s20839_s9 + $0x360] sm:$0xff]   ;;  %v17109_v48 = vld [vmem:[%s20839_s9 + $0x378] sm:$0xff]   ;;  %v17110_v28 = vld [vmem:[%s20839_s9 + $0x3e8] sm:$0xff]  }
0x3621   : > { %v9864_v41 = vpack.c.bf16 %v9860_v53, %v9860_v53  ;;  %v17108_v26 = vld [vmem:[%s20839_s9 + $0x3a0] sm:$0xff]   ;;  %v17113_v53 = vld [vmem:[%s20839_s9 + $0x3f0] sm:$0xff]   ;;  %v17116_v29 = vld [vmem:[%s20839_s9 + $0x3f8] sm:$0xff]  }
0x3622   : > { %v19845_v9 = vadd.f32 %v9702_v30, %v19709_v25  ;;  %v9865_v34 = vpack.c.bf16 %v9861_v31, %v9861_v31  ;;  %v17085_v25 = vld [vmem:[%s20839_s9 + $0x340] sm:$0xff]   ;;  %v17114_v11 = vld [vmem:[%s20839_s9 + $0x3b0] sm:$0xff]   ;;  %v17117_v30 = vld [vmem:[%s20839_s9 + $0x3b8] sm:$0xff]  }
0x3624   : > { %v9853_v38 = vpop.f32.mrb[204].mxu0  ;;  %10156 = vmatprep.mubr.bf16.mxu1 %v9865_v34  ;;  %v10213_v34 = vld [vmem:[%s20838_s8 + $0xc] sm:$0xf] }
0x3625   : > { %v9854_v39 = vadd.f32 %v9853_v38, %v9729_v33  ;;  %v9855_v40 = vpop.f32.mrb[205].mxu0  ;;  %10157 = vmatmul.mubr.bf16.vlgmr.msra.gmra.mrb[176].mxu1 %v9864_v41  ;;  %v10218_v41 = vrot.slane %v10213_v34, %v17914_v60 }
0x3626   : > { %v9856_v42 = vadd.f32 %v9855_v40, %v9733_v37  ;;  %v9857_v43 = vpop.f32.mrb[206].mxu0  ;;  %10276 = vmatpush1.bf16.msra.mxu1 %v14794_v63  ;;  %10307 = vmatprep.mubr.bf16.mxu1 %v17429_v62  ;;  %v14800_v63 = vcombine.low %v10210_v27, %v10212_v52 }
0x3627   : > { %v9862_v20 = vmax.f32 %v9854_v39, 0.0  ;;  %v9858_v46 = vpop.f32.mrb[207].mxu0  ;;  %10277 = vmatprep.subr.bf16.mxu1 %v14799_v7  ;;  %v10222_v7 = vrot.slane %v10213_v34, %v17919_v57 }
0x3628   : > { %v9863_v50 = vmax.f32 %v9856_v42, 0.0 }
0x3629   : > { %v9866_v56 = vpack.c.bf16 %v9862_v20, %v9862_v20 }
0x362a   : > { %v9867_v55 = vpack.c.bf16 %v9863_v50, %v9863_v50  ;;  %10278 = vmatpush1.bf16.msra.mxu1 %v14798_v44 }
0x362b   : > { %15686 = vmatprep.subr.bf16.mxu1 %v17085_v25 }
0x362c   : > { %10196 = vmatprep.mubr.bf16.mxu0 %v9867_v55 }
0x362d   : > { %10197 = vmatmul.mubr.bf16.vlgmr.msra.gmra.mrb[208].mxu0 %v9866_v56  ;;  %14802 = vmatmul.mubr.msk.bf16.vlgmr.msra.gmra.mrb[180].mxu1 %vm464_vm1, %v19473_v36 }
0x362e   : > { %10317 = vmatpush1.bf16.msra.mxu0 %v14796_v3  ;;  %10348 = vmatprep.mubr.bf16.mxu0 %v17429_v62  ;;  %v17094_v3 = vld [vmem:[%s20839_s9 + $0x3c8] sm:$0xff]  }
0x362f   : > { %10318 = vmatprep.subr.bf16.mxu0 %v14801_v58  ;;  %15687 = vmatpush3.bf16.msra.mxu1 %v17086_v59  ;;  %v10226_v58 = vrot.slane %v10213_v34, %v17923_v5 }
0x3630   : > { %15688 = vmatprep.subr.bf16.mxu1 %v17087_v61 }
0x3632   : > { %10319 = vmatpush1.bf16.msra.mxu0 %v14800_v63  ;;  %v10230_v63 = vrot.slane %v10213_v34, %v17925_v10 }
0x3633   : > { %15689 = vmatpush3.bf16.msra.mxu1 %v17088_v54  ;;  %15708 = vmatprep.subr.bf16.mxu0 %v17090_v6  ;;  %v17115_v54 = vld [vmem:[%s20831_s1] sm:$0xff]  }
0x3634   : > { %15690 = vmatprep.subr.bf16.mxu1 %v17089_v45 }
0x3635   : > { %14803 = vmatmul.mubr.msk.bf16.vlgmr.msra.gmra.mrb[212].mxu0 %vm464_vm1, %v19473_v36  ;;  %v17098_v36 = vld [vmem:[%s20839_s9 + $0x3d0] sm:$0xff]  }
0x3636   : > { %15709 = vmatpush3.bf16.msra.mxu0 %v17092_v0 }
0x3637   : > { %15691 = vmatpush3.bf16.msra.mxu1 %v17091_v2  ;;  %15710 = vmatprep.subr.bf16.mxu0 %v17094_v3 }
0x3638   : > { %15692 = vmatprep.subr.bf16.mxu1 %v17093_v35 }
0x363a   : > { %15711 = vmatpush3.bf16.msra.mxu0 %v17096_v4 }
0x363b   : > { %15693 = vmatpush3.bf16.msra.mxu1 %v17095_v8  ;;  %15712 = vmatprep.subr.bf16.mxu0 %v17098_v36 }
0x363c   : > { %15694 = vmatprep.subr.bf16.mxu1 %v17097_v12 }
0x363e   : > { %15713 = vmatpush3.bf16.msra.mxu0 %v17100_v15 }
0x363f   : > { %15695 = vmatpush3.bf16.msra.mxu1 %v17099_v14  ;;  %15714 = vmatprep.subr.bf16.mxu0 %v17102_v19  ;;  %v19976_v14 = vld [vmem:[%s17527_s17 + $0x3] sm:$0x1]  ;;  %s20956_s17 = sld [smem:[#allocation8_spill]] }
0x3640   : > { %15696 = vmatprep.subr.bf16.mxu1 %v17101_v17 }
0x3642   : > { %15715 = vmatpush3.bf16.msra.mxu0 %v17104_v21 }
0x3643   : > { %15697 = vmatpush3.bf16.msra.mxu1 %v17103_v16  ;;  %15716 = vmatprep.subr.bf16.mxu0 %v17106_v23  ;;  %v14840_v23 = vld [vmem:[%s20832_s2] ss:$0 sm:$0xff] }
0x3644   : > { %15698 = vmatprep.subr.bf16.mxu1 %v17105_v22 }
0x3646   : > { %15717 = vmatpush3.bf16.msra.mxu0 %v17108_v26 }
0x3647   : > { %15699 = vmatpush3.bf16.msra.mxu1 %v17107_v51  ;;  %15718 = vmatprep.subr.bf16.mxu0 %v17110_v28 }
0x3648   : > { %15700 = vmatprep.subr.bf16.mxu1 %v17109_v48 }
0x364a   : > { %15719 = vmatpush3.bf16.msra.mxu0 %v17112_v24 }
0x364b   : > { %15701 = vmatpush3.bf16.msra.mxu1 %v17111_v49  ;;  %15720 = vmatprep.subr.bf16.mxu0 %v17113_v53 }
0x364c   : > { %16413 = vmatprep.subr.bf16.mxu1 %v17404_v1 }
0x364e   : > { %15721 = vmatpush3.bf16.msra.mxu0 %v17114_v11 }
0x364f   : > { %15722 = vmatprep.subr.bf16.mxu0 %v17116_v29 }
0x3652   : > { %15723 = vmatpush3.bf16.msra.mxu0 %v17117_v30 }
0x3653   : > { %16421 = vmatprep.subr.bf16.mxu0 %v17404_v1 }
0x36f8   : > { %v15658_v31 = vpop.f32.mrb[176].mxu1 }
0x36f9   : > { %v15659_v32 = vpop.f32.mrb[177].mxu1 }
0x36fa   : > { %v15660_v47 = vadd.f32 %v15659_v32, %v15658_v31  ;;  %v15661_v33 = vpop.f32.mrb[178].mxu1 }
0x36fb   : > { %v15662_v37 = vpop.f32.mrb[179].mxu1 }
0x3700   : > { %v15680_v38 = vpop.f32.mrb[208].mxu0  ;;  %v10309_v39 = vpop.f32.mrb[180].mxu1 }
0x3701   : > { %v10310_v40 = vadd.f32 %v10309_v39, %v10218_v41  ;;  %v15681_v42 = vpop.f32.mrb[209].mxu0  ;;  %v10311_v43 = vpop.f32.mrb[181].mxu1 }
0x3702   : > { %v15682_v44 = vadd.f32 %v15681_v42, %v15680_v38  ;;  %v10312_v20 = vadd.f32 %v10311_v43, %v10222_v7  ;;  %v15683_v46 = vpop.f32.mrb[210].mxu0  ;;  %v10313_v25 = vpop.f32.mrb[182].mxu1 }
0x3703   : > { %v10357_v50 = vmax.f32 %v10310_v40, 0.0  ;;  %v15684_v27 = vpop.f32.mrb[211].mxu0  ;;  %v10314_v52 = vpop.f32.mrb[183].mxu1 }
0x3704   : > { %v10199_v55 = vadd.f32 %v15682_v44, %v15660_v47  ;;  %v10358_v56 = vmax.f32 %v10312_v20, 0.0 }
0x3705   : > { %v10361_v6 = vpack.c.bf16 %v10357_v50, %v10357_v50 }
0x3706   : > { %v10204_v59 = vadd.f32 %v10199_v55, %v19845_v9  ;;  %v10362_v61 = vpack.c.bf16 %v10358_v56, %v10358_v56  ;;  %v17118_v9 = vld [vmem:[%s20831_s1 + $0x8] sm:$0xff]  }
0x3708   : > { %v10350_v45 = vpop.f32.mrb[212].mxu0  ;;  %10653 = vmatprep.mubr.bf16.mxu1 %v10362_v61 }
0x3709   : > { %v10351_v0 = vadd.f32 %v10350_v45, %v10226_v58  ;;  %v10352_v2 = vpop.f32.mrb[213].mxu0  ;;  %10654 = vmatmul.mubr.bf16.vlgmr.msra.gmra.mrb[184].mxu1 %v10361_v6 }
0x370a   : > { %v10353_v3 = vadd.f32 %v10352_v2, %v10230_v63  ;;  %v10354_v35 = vpop.f32.mrb[214].mxu0  ;;  %16414 = vmatpush3.bf16.msra.mxu1 %v17115_v54  ;;  %16417 = vmatprep.mubr.msk.bf16.mxu1 %vm17405_vm0, %v17404_v1 }
0x370b   : > { %v10359_v4 = vmax.f32 %v10351_v0, 0.0  ;;  %v10355_v8 = vpop.f32.mrb[215].mxu0  ;;  %16415 = vmatprep.subr.bf16.mxu1 %v17404_v1  ;;  %v10924_v0 = vld [vmem:[%s20833_s3] sm:$0x3] }
0x370c   : > { %v10360_v12 = vmax.f32 %v10353_v3, 0.0  ;;  %v10929_v2 = vsel %vm638_vm6, %v10924_v0, 0 }
0x370d   : > { %v10363_v15 = vpack.c.bf16 %v10359_v4, %v10359_v4 }
0x370e   : > { %v10364_v36 = vpack.c.bf16 %v10360_v12, %v10360_v12  ;;  %16416 = vmatpush3.bf16.msra.mxu1 %v17118_v9 }
0x370f   : > { %16427 = vmatprep.subr.bf16.mxu1 %v17404_v1 }
0x3710   : > { %10693 = vmatprep.mubr.bf16.mxu0 %v10364_v36 }
0x3711   : > { %10694 = vmatmul.mubr.bf16.vlgmr.msra.gmra.mrb[216].mxu0 %v10363_v15  ;;  %16418 = vmatmul.mubr.msk.bf16.vlgmr.msra.gmra.mrb[188].mxu1 %vm464_vm1, %v19976_v14 }
0x3712   : > { %16423 = vmatprep.mubr.msk.bf16.mxu0 %vm17405_vm0, %v17404_v1  ;;  %16429 = vmatprep.mubr.msk.bf16.mxu1 %vm17405_vm0, %v17404_v1 }
0x37dc   : > { %v15702_v17 = vpop.f32.mrb[184].mxu1 }
0x37dd   : > { %v15703_v19 = vpop.f32.mrb[185].mxu1 }
0x37de   : > { %v15704_v16 = vadd.f32 %v15703_v19, %v15702_v17  ;;  %v15705_v21 = vpop.f32.mrb[186].mxu1 }
0x37df   : > { %v15706_v22 = vpop.f32.mrb[187].mxu1 }
0x37e4   : > { %v15724_v51 = vpop.f32.mrb[216].mxu0  ;;  %v10796_v26 = vpop.f32.mrb[188].mxu1 }
0x37e5   : > { %v10797_v48 = vadd.f32 %v14840_v23, %v10796_v26  ;;  %v15725_v28 = vpop.f32.mrb[217].mxu0  ;;  %v16419_v49 = vpop.f32.mrb[189].mxu1 }
0x37e6   : > { %v15726_v24 = vadd.f32 %v15725_v28, %v15724_v51  ;;  %v15727_v53 = vpop.f32.mrb[218].mxu0  ;;  %v10799_v11 = vpop.f32.mrb[190].mxu1 }
0x37e7   : > { %v19988_v29 = vpack.c.bf16 %v10797_v48, %v10797_v48  ;;  %v15728_v30 = vpop.f32.mrb[219].mxu0  ;;  %v16420_v31 = vpop.f32.mrb[191].mxu1  ;;  %v10802_v37 = vmul.f32 0.5, %v10797_v48 }
0x37e8   : > { %v10696_v32 = vadd.f32 %v15726_v24, %v15704_v16 }
0x37e9   : > { %10815 = vrot.lane.b32.xlu1 %v19988_v29, %s20927_s14  ;;  %v19996_v41 = vpack.c.bf16 %v10802_v37, %v10802_v37  ;;  %s20945_s14 = smov 60  }
0x37ea   : > { %v19992_v47 = vadd.f32 %v10696_v32, %v10204_v59 }
0x385b   : > { %v10816_v33 = vpop.permute.xlu1 %10815 }
0x385c   : > { %v10821_v34 = vsel %vm523_vm3, %v10816_v33, 0 }
0x385d   : > { %16422 = vmatpush3.bf16.xpose.msra.mxu0 %v10821_v34 }
0x385e   : > { %16433 = vmatprep.subr.bf16.mxu0 %v17404_v1 }
0x3864   : > { %16424 = vmatmul.mubr.msk.bf16.vlgmr.msra.gmra.mrb[220].mxu0 %vm523_vm3, %v19996_v41 }
0x3865   : > { %16435 = vmatprep.mubr.msk.bf16.mxu0 %vm17405_vm0, %v17404_v1  ;;  %16434 = vmatpush3.bf16.msra.mxu0 %v10929_v2 }
0x3866   : > { %16445 = vmatprep.subr.bf16.mxu0 %v17404_v1 }
0x3937   : > { %v10857_v7 = vpop.f32.mrb[220].mxu0 }
0x3938   : > { %v16425_v38 = vpop.f32.mrb[221].mxu0  ;;  %v10863_v39 = vsel %vm570_vm4, %v10857_v7, -inf }
0x3939   : > { %10864 = vmax.xlane.f32.xlu0 %v10863_v39  ;;  %v10860_v40 = vpop.f32.mrb[222].mxu0 }
0x393a   : > { %v16426_v42 = vpop.f32.mrb[223].mxu0 }
0x394f   : > { %10875 = vrot.lane.b32.xlu0 %v19988_v29, %s20928_s11  ;;  %s20952_s11 = sld [smem:[#allocation5_spill]] }
0x3953   : > { %10975 = vrot.lane.b32.xlu0 %v19988_v29, %s20929_s4  ;;  %s20953_s4 = sld [smem:[#allocation3_spill]] }
0x3957   : > { %10973 = vrot.lane.b32.xlu0 %v19996_v41, %s20930_s25 }
0x3959   : > { %s20321_s13 = scalar_lea.vmem %s20956_s17, %s20953_s4 }
0x395b   : > { %11138 = vrot.lane.b32.xlu0 %v19988_v29, %s20908_s27 }
0x395f   : > { %11136 = vrot.lane.b32.xlu0 %v19996_v41, %s20909_s19 }
0x39c6   : > { %v10865_v43 = vpop.xlane.xlu0 %10864 }
0x39c7   : > { %v10866_v44 = vsub.f32 %v10857_v7, %v10865_v43 }
0x39c9   : > { %v10867_v20 = vmul.f32 1.442695, %v10866_v44 }
0x39ca   : > { %v10876_v46 = vpop.permute.xlu0 %10875 }
0x39cb   : > { %17353 = vpow2.f32 %v10867_v20  ;;  %v10881_v25 = vsel %vm589_vm2, %v10876_v46, 0 }
0x39cc   : > { %16428 = vmatpush3.bf16.msra.mxu1 %v10881_v25 }
0x39cd   : > { %16439 = vmatprep.subr.bf16.mxu1 %v17404_v1 }
0x39ce   : > { %v10976_v55 = vpop.permute.xlu0 %10975 }
0x39cf   : > { %v10981_v63 = vsel %vm523_vm3, %v10976_v55, 0 }
0x39d2   : > { %v10974_v61 = vpop.permute.xlu0 %10973 }
0x39d5   : > { %v17354_v50 = vpop.eup %17353 }
0x39d6   : > { %v10869_v27 = vsel %vm570_vm4, %v17354_v50, 0.0  ;;  %v11139_v54 = vpop.permute.xlu0 %11138 }
0x39d7   : > { %10870 = vadd.xlane.f32.xlu1 %v10869_v27  ;;  %v11144_v6 = vsel %vm523_vm3, %v11139_v54, 0 }
0x39da   : > { %v11137_v45 = vpop.permute.xlu0 %11136 }
0x3a64   : > { %v10871_v52 = vpop.xlane.xlu1 %10870 }
0x3a65   : > { %17355 = vrcp.f32 %v10871_v52 }
0x3a6f   : > { %v17356_v56 = vpop.eup %17355 }
0x3a70   : > { %v10873_v58 = vmul.f32 %v17356_v56, %v17354_v50 }
0x3a72   : > { %v10874_v59 = vpack.c.bf16 %v10873_v58, %v10873_v58 }
0x3a74   : > { %16430 = vmatmul.mubr.msk.bf16.vlgmr.msra.gmra.mrb[192].mxu1 %vm585_vm5, %v10874_v59 }
0x3a75   : > { %16440 = vmatpush3.bf16.xpose.msra.mxu1 %v10981_v63  ;;  %16441 = vmatprep.mubr.msk.bf16.mxu1 %vm17405_vm0, %v17404_v1 }
0x3a76   : > { %16457 = vmatprep.subr.bf16.mxu1 %v17404_v1 }
0x3a7c   : > { %16442 = vmatmul.mubr.msk.bf16.vlgmr.msra.gmra.mrb[196].mxu1 %vm523_vm3, %v10974_v61 }
0x3a7d   : > { %16458 = vmatpush3.bf16.xpose.msra.mxu1 %v11144_v6  ;;  %16459 = vmatprep.mubr.msk.bf16.mxu1 %vm17405_vm0, %v17404_v1 }
0x3a7e   : > { %16463 = vmatprep.subr.bf16.mxu1 %v17404_v1 }
0x3a84   : > { %16460 = vmatmul.mubr.msk.bf16.vlgmr.msra.gmra.mrb[200].mxu1 %vm523_vm3, %v11137_v45 }
0x3a85   : > { %16465 = vmatprep.mubr.msk.bf16.mxu1 %vm17405_vm0, %v17404_v1 }
0x3b47   : > { %v10917_v3 = vpop.f32.mrb[192].mxu1 }
0x3b48   : > { %v10923_v35 = vpack.c.bf16 %v10917_v3, %v10917_v3  ;;  %v16431_v9 = vpop.f32.mrb[193].mxu1 }
0x3b49   : > { %v10920_v4 = vpop.f32.mrb[194].mxu1 }
0x3b4a   : > { %v16432_v8 = vpop.f32.mrb[195].mxu1  ;;  %16436 = vmatmul.mubr.msk.bf16.vlgmr.msra.gmra.mrb[224].mxu0 %vm523_vm3, %v10923_v35 }
0x3b4b   : > { %16447 = vmatprep.mubr.msk.bf16.mxu0 %vm17405_vm0, %v17404_v1 }
0x3b4f   : > { %v20037_v12 = vpop.f32.mrb[196].mxu1 }
0x3b50   : > { %v16443_v36 = vpop.f32.mrb[197].mxu1  ;;  %v11023_v59 = vsel %vm570_vm4, %v20037_v12, -inf }
0x3b51   : > { %v11020_v15 = vpop.f32.mrb[198].mxu1 }
0x3b52   : > { %v16444_v17 = vpop.f32.mrb[199].mxu1 }
0x3b57   : > { %v11180_v19 = vpop.f32.mrb[200].mxu1 }
0x3b58   : > { %v16461_v16 = vpop.f32.mrb[201].mxu1  ;;  %v11186_v21 = vsel %vm570_vm4, %v11180_v19, -inf }
0x3b59   : > { %11187 = vmax.xlane.f32.xlu1 %v11186_v21  ;;  %v11183_v22 = vpop.f32.mrb[202].mxu1 }
0x3b5a   : > { %v16462_v23 = vpop.f32.mrb[203].mxu1 }
0x3b6a   : > { %11198 = vrot.lane.b32.xlu1 %v19988_v29, %s20910_s15  ;;  %s20940_s15 = smov 48  }
0x3b6e   : > { %11297 = vrot.lane.b32.xlu1 %v19988_v29, %s20911_s24  ;;  %s20941_s24 = smov 76  }
0x3b72   : > { %11295 = vrot.lane.b32.xlu1 %v19996_v41, %s20912_s26  ;;  %s20942_s26 = smov 108  }
0x3b76   : > { %11460 = vrot.lane.b32.xlu1 %v19988_v29, %s20913_s16  ;;  %s20943_s16 = smov 72  }
0x3b7a   : > { %11458 = vrot.lane.b32.xlu1 %v19996_v41, %s20914_s18  ;;  %s20944_s18 = smov 104  }
0x3be6   : > { %v11188_v51 = vpop.xlane.xlu1 %11187 }
0x3be7   : > { %v11189_v26 = vsub.f32 %v11180_v19, %v11188_v51 }
0x3be9   : > { %v11190_v48 = vmul.f32 1.442695, %v11189_v26 }
0x3bea   : > { %v11199_v28 = vpop.permute.xlu1 %11198 }
0x3beb   : > { %17357 = vpow2.f32 %v11190_v48  ;;  %v11204_v49 = vsel %vm589_vm2, %v11199_v28, 0 }
0x3bec   : > { %16464 = vmatpush3.bf16.msra.mxu1 %v11204_v49 }
0x3bed   : > { %16475 = vmatprep.subr.bf16.mxu1 %v17404_v1 }
0x3bee   : > { %v11298_v30 = vpop.permute.xlu1 %11297 }
0x3bef   : > { %v11303_v37 = vsel %vm523_vm3, %v11298_v30, 0  ;;  %v17119_v30 = vld [vmem:[%s20833_s3] ss:$0 sps:$4 sm:$0xcc]  }
0x3bf2   : > { %v11296_v34 = vpop.permute.xlu1 %11295 }
0x3bf5   : > { %v17358_v24 = vpop.eup %17357 }
0x3bf6   : > { %v11192_v53 = vsel %vm570_vm4, %v17358_v24, 0.0  ;;  %v11461_v7 = vpop.permute.xlu1 %11460 }
0x3bf7   : > { %11193 = vadd.xlane.f32.xlu0 %v11192_v53  ;;  %v11466_v38 = vsel %vm523_vm3, %v11461_v7, 0 }
0x3bfa   : > { %v11459_v39 = vpop.permute.xlu1 %11458 }
0x3c84   : > { %v11194_v11 = vpop.xlane.xlu0 %11193 }
0x3c85   : > { %17359 = vrcp.f32 %v11194_v11 }
0x3c8f   : > { %v17360_v31 = vpop.eup %17359 }
0x3c90   : > { %v11196_v32 = vmul.f32 %v17360_v31, %v17358_v24  ;;  %v11088_v31 = vrot.slane %v17119_v30, 2 }
0x3c92   : > { %v11197_v33 = vpack.c.bf16 %v11196_v32, %v11196_v32  ;;  %v11093_v32 = vsel %vm638_vm6, %v11088_v31, 0 }
0x3c94   : > { %16466 = vmatmul.mubr.msk.bf16.vlgmr.msra.gmra.mrb[204].mxu1 %vm585_vm5, %v11197_v33 }
0x3c95   : > { %16476 = vmatpush3.bf16.xpose.msra.mxu1 %v11303_v37  ;;  %16477 = vmatprep.mubr.msk.bf16.mxu1 %vm17405_vm0, %v17404_v1 }
0x3c96   : > { %16493 = vmatprep.subr.bf16.mxu1 %v17404_v1 }
0x3c9c   : > { %16478 = vmatmul.mubr.msk.bf16.vlgmr.msra.gmra.mrb[208].mxu1 %vm523_vm3, %v11296_v34 }
0x3c9d   : > { %16494 = vmatpush3.bf16.xpose.msra.mxu1 %v11466_v38  ;;  %16495 = vmatprep.mubr.msk.bf16.mxu1 %vm17405_vm0, %v17404_v1 }
0x3c9e   : > { %16499 = vmatprep.subr.bf16.mxu1 %v17404_v1 }
0x3ca4   : > { %16496 = vmatmul.mubr.msk.bf16.vlgmr.msra.gmra.mrb[212].mxu1 %vm523_vm3, %v11459_v39  ;;  %v11247_v39 = vld [vmem:[%s20833_s3 + $0x4] sm:$0x3] }
0x3ca5   : > { %16501 = vmatprep.mubr.msk.bf16.mxu1 %vm17405_vm0, %v17404_v1 }
0x3d67   : > { %v20066_v40 = vpop.f32.mrb[204].mxu1 }
0x3d68   : > { %v16467_v42 = vpop.f32.mrb[205].mxu1 }
0x3d69   : > { %v11243_v43 = vpop.f32.mrb[206].mxu1 }
0x3d6a   : > { %v16468_v44 = vpop.f32.mrb[207].mxu1 }
0x3d6f   : > { %v20068_v20 = vpop.f32.mrb[208].mxu1 }
0x3d70   : > { %v16479_v46 = vpop.f32.mrb[209].mxu1 }
0x3d71   : > { %v11342_v25 = vpop.f32.mrb[210].mxu1 }
0x3d72   : > { %v16480_v50 = vpop.f32.mrb[211].mxu1 }
0x3d73   : > { %v11252_v50 = vsel %vm638_vm6, %v11247_v39, 0 }
0x3d77   : > { %v11502_v27 = vpop.f32.mrb[212].mxu1 }
0x3d78   : > { %v16497_v52 = vpop.f32.mrb[213].mxu1  ;;  %v11508_v55 = vsel %vm570_vm4, %v11502_v27, -inf }
0x3d79   : > { %11509 = vmax.xlane.f32.xlu0 %v11508_v55  ;;  %v11505_v56 = vpop.f32.mrb[214].mxu1 }
0x3d7a   : > { %v16498_v58 = vpop.f32.mrb[215].mxu1 }
0x3d7d   : > { %11024 = vmax.xlane.f32.xlu0 %v11023_v59 }
0x3d93   : > { %11520 = vrot.lane.b32.xlu0 %v19988_v29, %s20940_s15 }
0x3d97   : > { %11619 = vrot.lane.b32.xlu0 %v19988_v29, %s20941_s24  ;;  %s20951_s24 = smov 36  }
0x3d9b   : > { %11617 = vrot.lane.b32.xlu0 %v19996_v41, %s20942_s26 }
0x3d9f   : > { %11782 = vrot.lane.b32.xlu0 %v19988_v29, %s20943_s16 }
0x3e06   : > { %v11510_v61 = vpop.xlane.xlu0 %11509 }
0x3e07   : > { %v11511_v63 = vsub.f32 %v11502_v27, %v11510_v61  ;;  %v11246_v61 = vpack.c.bf16 %v20066_v40, %v20066_v40 }
0x3e09   : > { %v11512_v54 = vmul.f32 1.442695, %v11511_v63 }
0x3e0a   : > { %v11025_v6 = vpop.xlane.xlu0 %11024 }
0x3e0b   : > { %17361 = vpow2.f32 %v11512_v54  ;;  %v11026_v45 = vsub.f32 %v20037_v12, %v11025_v6  ;;  %v11345_v12 = vsel %vm570_vm4, %v20068_v20, -inf }
0x3e0d   : > { %v11027_v0 = vmul.f32 1.442695, %v11026_v45 }
0x3e0e   : > { %v11521_v2 = vpop.permute.xlu0 %11520 }
0x3e0f   : > { %17363 = vpow2.f32 %v11027_v0  ;;  %v11526_v3 = vsel %vm589_vm2, %v11521_v2, 0 }
0x3e10   : > { %16500 = vmatpush3.bf16.msra.mxu1 %v11526_v3 }
0x3e11   : > { %16511 = vmatprep.subr.bf16.mxu1 %v17404_v1 }
0x3e12   : > { %v11620_v36 = vpop.permute.xlu0 %11619 }
0x3e13   : > { %v11625_v49 = vsel %vm523_vm3, %v11620_v36, 0 }
0x3e15   : > { %v17362_v35 = vpop.eup %17361 }
0x3e16   : > { %v11514_v9 = vsel %vm570_vm4, %v17362_v35, 0.0  ;;  %v11618_v15 = vpop.permute.xlu0 %11617 }
0x3e17   : > { %11515 = vadd.xlane.f32.xlu1 %v11514_v9 }
0x3e19   : > { %v17364_v4 = vpop.eup %17363 }
0x3e1a   : > { %v11029_v8 = vsel %vm570_vm4, %v17364_v4, 0.0  ;;  %v11783_v17 = vpop.permute.xlu0 %11782 }
0x3e1b   : > { %11030 = vadd.xlane.f32.xlu0 %v11029_v8  ;;  %v11788_v11 = vsel %vm523_vm3, %v11783_v17, 0 }
0x3e28   : > { %11780 = vrot.lane.b32.xlu1 %v19996_v41, %s20944_s18 }
0x3e2c   : > { %11035 = vrot.lane.b32.xlu1 %v19988_v29, %s20945_s14 }
0x3e50   : > { %11346 = vmax.xlane.f32.xlu1 %v11345_v12 }
0x3ea4   : > { %v11516_v19 = vpop.xlane.xlu1 %11515 }
0x3ea5   : > { %17365 = vrcp.f32 %v11516_v19 }
0x3ea8   : > { %v11781_v16 = vpop.permute.xlu1 %11780  ;;  %v11031_v21 = vpop.xlane.xlu0 %11030 }
0x3ea9   : > { %17367 = vrcp.f32 %v11031_v21 }
0x3eac   : > { %v11036_v22 = vpop.permute.xlu1 %11035 }
0x3ead   : > { %v11041_v23 = vsel %vm589_vm2, %v11036_v22, 0 }
0x3eae   : > { %16446 = vmatpush3.bf16.msra.mxu0 %v11041_v23 }
0x3eaf   : > { %v17366_v51 = vpop.eup %17365  ;;  %16451 = vmatprep.subr.bf16.mxu0 %v17404_v1 }
0x3eb0   : > { %v11518_v26 = vmul.f32 %v17366_v51, %v17362_v35 }
0x3eb2   : > { %v11519_v48 = vpack.c.bf16 %v11518_v26, %v11518_v26 }
0x3eb3   : > { %v17368_v28 = vpop.eup %17367 }
0x3eb4   : > { %v11033_v24 = vmul.f32 %v17368_v28, %v17364_v4  ;;  %16502 = vmatmul.mubr.msk.bf16.vlgmr.msra.gmra.mrb[216].mxu1 %vm585_vm5, %v11519_v48  ;;  %v17120_v28 = vld [vmem:[%s20833_s3 + $0x4] ss:$0 sps:$4 sm:$0xcc]  }
0x3eb5   : > { %16512 = vmatpush3.bf16.xpose.msra.mxu1 %v11625_v49  ;;  %16513 = vmatprep.mubr.msk.bf16.mxu1 %vm17405_vm0, %v17404_v1  ;;  %v11410_v49 = vrot.slane %v17120_v28, 2 }
0x3eb6   : > { %v11034_v53 = vpack.c.bf16 %v11033_v24, %v11033_v24  ;;  %16529 = vmatprep.subr.bf16.mxu1 %v17404_v1 }
0x3eb7   : > { %v11415_v24 = vsel %vm638_vm6, %v11410_v49, 0 }
0x3eb8   : > { %16448 = vmatmul.mubr.msk.bf16.vlgmr.msra.gmra.mrb[228].mxu0 %vm585_vm5, %v11034_v53 }
0x3eb9   : > { %16453 = vmatprep.mubr.msk.bf16.mxu0 %vm17405_vm0, %v17404_v1  ;;  %16452 = vmatpush3.bf16.msra.mxu0 %v11093_v32 }
0x3eba   : > { %16469 = vmatprep.subr.bf16.mxu0 %v17404_v1 }
0x3ebc   : > { %16514 = vmatmul.mubr.msk.bf16.vlgmr.msra.gmra.mrb[220].mxu1 %vm523_vm3, %v11618_v15 }
0x3ebd   : > { %16530 = vmatpush3.bf16.xpose.msra.mxu1 %v11788_v11  ;;  %16531 = vmatprep.mubr.msk.bf16.mxu1 %vm17405_vm0, %v17404_v1 }
0x3ebe   : > { %16535 = vmatprep.subr.bf16.mxu1 %v17404_v1 }
0x3ec4   : > { %16532 = vmatmul.mubr.msk.bf16.vlgmr.msra.gmra.mrb[224].mxu1 %vm523_vm3, %v11781_v16 }
0x3ec5   : > { %16537 = vmatprep.mubr.msk.bf16.mxu1 %vm17405_vm0, %v17404_v1 }
0x3edd   : > { %v11347_v33 = vpop.xlane.xlu1 %11346 }
0x3ede   : > { %v11348_v34 = vsub.f32 %v20068_v20, %v11347_v33 }
0x3ee0   : > { %v11349_v43 = vmul.f32 1.442695, %v11348_v34 }
0x3ee2   : > { %17369 = vpow2.f32 %v11349_v43 }
0x3eec   : > { %v17370_v6 = vpop.eup %17369 }
0x3eed   : > { %v11351_v2 = vsel %vm570_vm4, %v17370_v6, 0.0 }
0x3f87   : > { %v20116_v37 = vpop.f32.mrb[216].mxu1 }
0x3f88   : > { %v16503_v7 = vpop.f32.mrb[217].mxu1 }
0x3f89   : > { %v11565_v38 = vpop.f32.mrb[218].mxu1  ;;  %v11569_v7 = vld [vmem:[%s20833_s3 + $0x8] sm:$0x3] }
0x3f8a   : > { %v16504_v42 = vpop.f32.mrb[219].mxu1 }
0x3f8b   : > { %v11077_v44 = vpop.f32.mrb[228].mxu0 }
0x3f8c   : > { %v11083_v46 = vpack.c.bf16 %v11077_v44, %v11077_v44  ;;  %v16449_v25 = vpop.f32.mrb[229].mxu0  ;;  %v11574_v44 = vsel %vm638_vm6, %v11569_v7, 0  ;;  %v14844_v7 = vld [vmem:[%s20952_s11] ss:$0 sm:$0xff] }
0x3f8d   : > { %v11080_v27 = vpop.f32.mrb[230].mxu0 }
0x3f8e   : > { %v16450_v52 = vpop.f32.mrb[231].mxu0  ;;  %16454 = vmatmul.mubr.msk.bf16.vlgmr.msra.gmra.mrb[224].mxu0 %vm523_vm3, %v11083_v46  ;;  %v11568_v27 = vpack.c.bf16 %v20116_v37, %v20116_v37  ;;  %v17121_v37 = vld [vmem:[%s20833_s3 + $0x8] ss:$0 sps:$4 sm:$0xcc]  }
0x3f8f   : > { %v11661_v20 = vpop.f32.mrb[220].mxu1  ;;  %16470 = vmatpush3.bf16.msra.mxu0 %v11252_v50  ;;  %16471 = vmatprep.mubr.msk.bf16.mxu0 %vm17405_vm0, %v17404_v1 }
0x3f90   : > { %v16515_v55 = vpop.f32.mrb[221].mxu1  ;;  %16481 = vmatprep.subr.bf16.mxu0 %v17404_v1  ;;  %v11667_v40 = vsel %vm570_vm4, %v11661_v20, -inf }
0x3f91   : > { %v11664_v56 = vpop.f32.mrb[222].mxu1 }
0x3f92   : > { %v16516_v58 = vpop.f32.mrb[223].mxu1 }
0x3f93   : > { %v11732_v58 = vrot.slane %v17121_v37, 2 }
0x3f97   : > { %v11824_v59 = vpop.f32.mrb[224].mxu1 }
0x3f98   : > { %v16533_v63 = vpop.f32.mrb[225].mxu1  ;;  %v11830_v54 = vsel %vm570_vm4, %v11824_v59, -inf }
0x3f99   : > { %11831 = vmax.xlane.f32.xlu0 %v11830_v54  ;;  %v11827_v45 = vpop.f32.mrb[226].mxu1 }
0x3f9a   : > { %16472 = vmatmul.mubr.msk.bf16.vlgmr.msra.gmra.mrb[224].mxu0 %vm523_vm3, %v11246_v61  ;;  %v16534_v0 = vpop.f32.mrb[227].mxu1 }
0x3f9b   : > { %16483 = vmatprep.mubr.msk.bf16.mxu0 %vm17405_vm0, %v17404_v1 }
0x3f9d   : > { %11352 = vadd.xlane.f32.xlu0 %v11351_v2 }
0x3fb3   : > { %11357 = vrot.lane.b32.xlu0 %v19988_v29, %s20946_s0  ;;  %s20954_s0 = sld [smem:[#allocation6_spill]] }
0x3fb7   : > { %11941 = vrot.lane.b32.xlu0 %v19988_v29, %s20947_s12 }
0x3fbb   : > { %11939 = vrot.lane.b32.xlu0 %v19996_v41, %s20948_s22 }
0x3fda   : > { %11668 = vmax.xlane.f32.xlu0 %v11667_v40 }
0x3ff0   : > { %11679 = vrot.lane.b32.xlu0 %v19988_v29, %s20949_s20  ;;  %s20955_s20 = sld [smem:[#allocation7_spill]] }
0x4026   : > { %v11832_v3 = vpop.xlane.xlu0 %11831 }
0x4027   : > { %v11833_v35 = vsub.f32 %v11824_v59, %v11832_v3  ;;  %v11737_v59 = vsel %vm638_vm6, %v11732_v58, 0 }
0x4029   : > { %v11834_v9 = vmul.f32 1.442695, %v11833_v35  ;;  %v11891_v35 = vld [vmem:[%s20833_s3 + $0xc] sm:$0x3] }
0x402a   : > { %v11353_v4 = vpop.xlane.xlu0 %11352 }
0x402b   : > { %17371 = vpow2.f32 %v11834_v9 }
0x402c   : > { %17373 = vrcp.f32 %v11353_v4 }
0x402e   : > { %v11358_v8 = vpop.permute.xlu0 %11357 }
0x402f   : > { %v11363_v12 = vsel %vm589_vm2, %v11358_v8, 0 }
0x4030   : > { %16482 = vmatpush3.bf16.msra.mxu0 %v11363_v12  ;;  %v11896_v12 = vsel %vm638_vm6, %v11891_v35, 0 }
0x4031   : > { %16487 = vmatprep.subr.bf16.mxu0 %v17404_v1 }
0x4032   : > { %v11942_v16 = vpop.permute.xlu0 %11941 }
0x4033   : > { %v11947_v34 = vsel %vm523_vm3, %v11942_v16, 0 }
0x4035   : > { %v17372_v36 = vpop.eup %17371 }
0x4036   : > { %v17374_v41 = vpop.eup %17373  ;;  %v11836_v15 = vsel %vm570_vm4, %v17372_v36, 0.0  ;;  %v11940_v21 = vpop.permute.xlu0 %11939 }
0x4037   : > { %v11355_v17 = vmul.f32 %v17374_v41, %v17370_v6  ;;  %11837 = vadd.xlane.f32.xlu1 %v11836_v15 }
0x4039   : > { %v11356_v19 = vpack.c.bf16 %v11355_v17, %v11355_v17 }
0x403b   : > { %16484 = vmatmul.mubr.msk.bf16.vlgmr.msra.gmra.mrb[232].mxu0 %vm585_vm5, %v11356_v19 }
0x403c   : > { %16489 = vmatprep.mubr.msk.bf16.mxu0 %vm17405_vm0, %v17404_v1  ;;  %16488 = vmatpush3.bf16.msra.mxu0 %v11415_v24 }
0x403d   : > { %16505 = vmatprep.subr.bf16.mxu0 %v17404_v1 }
0x4048   : > { %11842 = vrot.lane.b32.xlu1 %v19988_v29, %s20950_s23 }
0x4067   : > { %v11669_v22 = vpop.xlane.xlu0 %11668 }
0x4068   : > { %v11670_v23 = vsub.f32 %v11661_v20, %v11669_v22 }
0x406a   : > { %v11671_v51 = vmul.f32 1.442695, %v11670_v23 }
0x406b   : > { %v11680_v50 = vpop.permute.xlu0 %11679 }
0x406c   : > { %17375 = vpow2.f32 %v11671_v51  ;;  %v11685_v20 = vsel %vm589_vm2, %v11680_v50, 0  ;;  %v10702_v50 = vsel %vm1813_vm7, %v19992_v47, 0.0 }
0x4076   : > { %v17376_v26 = vpop.eup %17375 }
0x4077   : > { %v11673_v48 = vsel %vm570_vm4, %v17376_v26, 0.0 }
0x4078   : > { %11674 = vadd.xlane.f32.xlu1 %v11673_v48  ;;  %v17122_v48 = vld [vmem:[%s20833_s3 + $0xc] ss:$0 sps:$4 sm:$0xcc]  }
0x4079   : > { %v12054_v28 = vrot.slane %v17122_v48, 2  ;;  %v17141_v48 = vld [vmem:[%s20839_s9 + $0x28] sm:$0xff]  }
0x40c4   : > { %v11838_v53 = vpop.xlane.xlu1 %11837 }
0x40c5   : > { %17377 = vrcp.f32 %v11838_v53 }
0x40c8   : > { %v11843_v11 = vpop.permute.xlu1 %11842 }
0x40c9   : > { %v11848_v30 = vsel %vm589_vm2, %v11843_v11, 0  ;;  %v12059_v11 = vsel %vm638_vm6, %v12054_v28, 0 }
0x40ca   : > { %16536 = vmatpush3.bf16.msra.mxu1 %v11848_v30 }
0x40cb   : > { %16547 = vmatprep.subr.bf16.mxu1 %v17404_v1 }
0x40cf   : > { %v17378_v31 = vpop.eup %17377 }
0x40d0   : > { %v11840_v32 = vmul.f32 %v17378_v31, %v17372_v36 }
0x40d2   : > { %v11841_v33 = vpack.c.bf16 %v11840_v32, %v11840_v32 }
0x40d4   : > { %16538 = vmatmul.mubr.msk.bf16.vlgmr.msra.gmra.mrb[228].mxu1 %vm585_vm5, %v11841_v33 }
0x40d5   : > { %16548 = vmatpush3.bf16.xpose.msra.mxu1 %v11947_v34  ;;  %16549 = vmatprep.mubr.msk.bf16.mxu1 %vm17405_vm0, %v17404_v1  ;;  %v10805_v34 = vunpack.c.l.bf16 %v19976_v14  ;;  %v7273_v14 = vsel %vm1813_vm7, %v19177_v18, 0.0 }
0x40dc   : > { %16550 = vmatmul.mubr.msk.bf16.vlgmr.msra.gmra.mrb[232].mxu1 %vm523_vm3, %v11940_v21 }
0x40dd   : > { %12245 = vmatprep.mubr.bf16.mxu1 %v17429_v62 }
0x4105   : > { %v11675_v39 = vpop.xlane.xlu1 %11674 }
0x4106   : > { %17379 = vrcp.f32 %v11675_v39 }
0x410e   : > { %v11399_v38 = vpop.f32.mrb[232].mxu0 }
0x410f   : > { %v11405_v42 = vpack.c.bf16 %v11399_v38, %v11399_v38  ;;  %v16485_v43 = vpop.f32.mrb[233].mxu0  ;;  %v10813_v38 = vadd.f32 %v14844_v7, %v10805_v34  ;;  %v12145_v7 = vld [vmem:[%s20837_s7 + $0x88] sm:$0xff] }
0x4110   : > { %v11402_v46 = vpop.f32.mrb[234].mxu0  ;;  %v17380_v52 = vpop.eup %17379 }
0x4111   : > { %v16486_v25 = vpop.f32.mrb[235].mxu0  ;;  %16490 = vmatmul.mubr.msk.bf16.vlgmr.msra.gmra.mrb[224].mxu0 %vm523_vm3, %v11405_v42  ;;  %v11677_v55 = vmul.f32 %v17380_v52, %v17376_v26 }
0x4112   : > { %16506 = vmatpush3.bf16.msra.mxu0 %v11574_v44  ;;  %16507 = vmatprep.mubr.msk.bf16.mxu0 %vm17405_vm0, %v17404_v1  ;;  %v3844_v25 = vsel %vm1813_vm7, %v18362_v13, 0.0 }
0x4113   : > { %16517 = vmatprep.subr.bf16.mxu0 %v17404_v1  ;;  %v11678_v56 = vpack.c.bf16 %v11677_v55, %v11677_v55 }
0x411d   : > { %16508 = vmatmul.mubr.msk.bf16.vlgmr.msra.gmra.mrb[224].mxu0 %vm523_vm3, %v11568_v27 }
0x411e   : > { %16518 = vmatpush3.bf16.msra.mxu0 %v11685_v20  ;;  %16519 = vmatprep.mubr.msk.bf16.mxu0 %vm17405_vm0, %v17404_v1 }
0x411f   : > { %16523 = vmatprep.subr.bf16.mxu0 %v17404_v1 }
0x4125   : > { %16520 = vmatmul.mubr.msk.bf16.vlgmr.msra.gmra.mrb[236].mxu0 %vm585_vm5, %v11678_v56 }
0x4126   : > { %16525 = vmatprep.mubr.msk.bf16.mxu0 %vm17405_vm0, %v17404_v1  ;;  %16524 = vmatpush3.bf16.msra.mxu0 %v11737_v59 }
0x4127   : > { %16541 = vmatprep.subr.bf16.mxu0 %v17404_v1 }
0x41a7   : > { %v11884_v61 = vpop.f32.mrb[228].mxu1 }
0x41a8   : > { %v16539_v63 = vpop.f32.mrb[229].mxu1  ;;  %v11890_v15 = vpack.c.bf16 %v11884_v61, %v11884_v61 }
0x41a9   : > { %v11887_v54 = vpop.f32.mrb[230].mxu1 }
0x41aa   : > { %v16540_v6 = vpop.f32.mrb[231].mxu1 }
0x41ab   : > { %v12140_v6 = vld [vmem:[%s20837_s7] sm:$0xff] }
0x41af   : > { %v11983_v45 = vpop.f32.mrb[232].mxu1 }
0x41b0   : > { %v16551_v0 = vpop.f32.mrb[233].mxu1  ;;  %v11989_v2 = vsel %vm570_vm4, %v11983_v45, -inf }
0x41b1   : > { %11990 = vmax.xlane.f32.xlu1 %v11989_v2  ;;  %v11986_v40 = vpop.f32.mrb[234].mxu1 }
0x41b2   : > { %v16552_v3 = vpop.f32.mrb[235].mxu1  ;;  %v12146_v40 = vld [vmem:[%s20837_s7 + $0xc0] sm:$0xff] }
0x41f8   : > { %v11721_v9 = vpop.f32.mrb[236].mxu0 }
0x41f9   : > { %v11727_v4 = vpack.c.bf16 %v11721_v9, %v11721_v9  ;;  %v16521_v8 = vpop.f32.mrb[237].mxu0  ;;  %v12141_v9 = vld [vmem:[%s20837_s7 + $0x8] sm:$0xff] }
0x41fa   : > { %v11724_v36 = vpop.f32.mrb[238].mxu0 }
0x41fb   : > { %v16522_v41 = vpop.f32.mrb[239].mxu0  ;;  %16526 = vmatmul.mubr.msk.bf16.vlgmr.msra.gmra.mrb[224].mxu0 %vm523_vm3, %v11727_v4  ;;  %v12143_v4 = vld [vmem:[%s20837_s7 + $0x48] sm:$0xff]  ;;  %v17123_v36 = vld [vmem:[%s20839_s9 + $0x40] sm:$0xff]  }
0x41fc   : > { %16542 = vmatpush3.bf16.msra.mxu0 %v11896_v12  ;;  %16543 = vmatprep.mubr.msk.bf16.mxu0 %vm17405_vm0, %v17404_v1  ;;  %v14879_v8 = vcombine.high %v12141_v9, %v12143_v4  ;;  %v14878_v12 = vcombine.low %v12141_v9, %v12143_v4  ;;  %v17124_v41 = vld [vmem:[%s20839_s9] sm:$0xff]   ;;  %v12640_v9 = vld [vmem:[%s20837_s7 + $0x10] sm:$0xff] }
0x41fd   : > { %16553 = vmatprep.subr.bf16.mxu0 %v17404_v1  ;;  %v12642_v4 = vld [vmem:[%s20837_s7 + $0x50] sm:$0xff] }
0x4207   : > { %16544 = vmatmul.mubr.msk.bf16.vlgmr.msra.gmra.mrb[224].mxu0 %vm523_vm3, %v11890_v15  ;;  %v17125_v15 = vld [vmem:[%s20839_s9 + $0x48] sm:$0xff]  }
0x4208   : > { %16555 = vmatprep.mubr.msk.bf16.mxu0 %vm17405_vm0, %v17404_v1 }
0x423e   : > { %v11991_v17 = vpop.xlane.xlu1 %11990 }
0x423f   : > { %v11992_v19 = vsub.f32 %v11983_v45, %v11991_v17  ;;  %v12142_v45 = vld [vmem:[%s20837_s7 + $0x40] sm:$0xff]  ;;  %v17126_v17 = vld [vmem:[%s20839_s9 + $0x8] sm:$0xff]  }
0x4240   : > { %v14877_v0 = vcombine.high %v12140_v6, %v12142_v45  ;;  %v14876_v2 = vcombine.low %v12140_v6, %v12142_v45  ;;  %v17143_v6 = vld [vmem:[%s20839_s9 + $0x70] sm:$0xff]   ;;  %v17144_v45 = vld [vmem:[%s20839_s9 + $0xe0] sm:$0xff]  }
0x4241   : > { %v11993_v16 = vmul.f32 1.442695, %v11992_v19  ;;  %v17127_v19 = vld [vmem:[%s20839_s9 + $0x50] sm:$0xff]  }
0x4242   : > { %12213 = vmatprep.subr.bf16.mxu1 %v14877_v0  ;;  %v17145_v0 = vld [vmem:[%s20839_s9 + $0x30] sm:$0xff]  }
0x4243   : > { %17381 = vpow2.f32 %v11993_v16  ;;  %12214 = vmatpush1.bf16.msra.mxu1 %v14876_v2  ;;  %v17129_v16 = vld [vmem:[%s20839_s9 + $0x10] sm:$0xff]   ;;  %v17146_v2 = vld [vmem:[%s20839_s9 + $0xa0] sm:$0xff]  }
0x424d   : > { %v17382_v21 = vpop.eup %17381 }
0x424e   : > { %v11995_v22 = vsel %vm570_vm4, %v17382_v21, 0.0 }
0x424f   : > { %11996 = vadd.xlane.f32.xlu1 %v11995_v22  ;;  %v17133_v22 = vld [vmem:[%s20839_s9 + $0x18] sm:$0xff]  }
0x4260   : > { %12001 = vrot.lane.b32.xlu1 %v19988_v29, %s20951_s24 }
0x42dc   : > { %v11997_v23 = vpop.xlane.xlu1 %11996 }
0x42dd   : > { %17383 = vrcp.f32 %v11997_v23  ;;  %v17135_v23 = vld [vmem:[%s20839_s9 + $0x60] sm:$0xff]  }
0x42e0   : > { %v12002_v51 = vpop.permute.xlu1 %12001 }
0x42e1   : > { %v12007_v26 = vsel %vm589_vm2, %v12002_v51, 0  ;;  %v17137_v51 = vld [vmem:[%s20839_s9 + $0x20] sm:$0xff]  }
0x42e2   : > { %16554 = vmatpush3.bf16.msra.mxu0 %v12007_v26  ;;  %v17139_v26 = vld [vmem:[%s20839_s9 + $0x68] sm:$0xff]  }
0x42e3   : > { %16559 = vmatprep.subr.bf16.mxu0 %v17404_v1 }
0x42e7   : > { %v17384_v49 = vpop.eup %17383 }
0x42e8   : > { %v11999_v24 = vmul.f32 %v17384_v49, %v17382_v21  ;;  %v17131_v21 = vld [vmem:[%s20839_s9 + $0x58] sm:$0xff]  }
0x42ea   : > { %v12000_v53 = vpack.c.bf16 %v11999_v24, %v11999_v24 }
0x42ec   : > { %16556 = vmatmul.mubr.msk.bf16.vlgmr.msra.gmra.mrb[240].mxu0 %vm585_vm5, %v12000_v53 }
0x42ed   : > { %16560 = vmatpush3.bf16.msra.mxu0 %v12059_v11  ;;  %16561 = vmatprep.mubr.msk.bf16.mxu0 %vm17405_vm0, %v17404_v1 }
0x42ee   : > { %15781 = vmatprep.subr.bf16.mxu0 %v17123_v36  ;;  %v14918_v36 = vcombine.low %v12640_v9, %v12642_v4 }
0x43bf   : > { %v12043_v29 = vpop.f32.mrb[240].mxu0 }
0x43c0   : > { %v12049_v30 = vpack.c.bf16 %v12043_v29, %v12043_v29  ;;  %v16557_v31 = vpop.f32.mrb[241].mxu0 }
0x43c1   : > { %v12046_v32 = vpop.f32.mrb[242].mxu0  ;;  %v14873_v31 = vld [vmem:[%s20835_s5] ss:$0 sm:$0xff] }
0x43c2   : > { %v16558_v33 = vpop.f32.mrb[243].mxu0  ;;  %16562 = vmatmul.mubr.msk.bf16.vlgmr.msra.gmra.mrb[224].mxu0 %vm523_vm3, %v12049_v30 }
0x43c3   : > { %15782 = vmatpush3.bf16.msra.mxu0 %v17124_v41  ;;  %v14874_v33 = vld [vmem:[%s20836_s6] ss:$0 sm:$0xff]  ;;  %v17152_v41 = vld [vmem:[%s20839_s9 + $0xb0] sm:$0xff]  }
0x43c4   : > { %15783 = vmatprep.subr.bf16.mxu0 %v17125_v15  ;;  %v17153_v15 = vld [vmem:[%s20839_s9 + $0xf8] sm:$0xff]  }
0x43c7   : > { %15784 = vmatpush3.bf16.msra.mxu0 %v17126_v17  ;;  %v17154_v17 = vld [vmem:[%s20839_s9 + $0xb8] sm:$0xff]  }
0x43c8   : > { %15785 = vmatprep.subr.bf16.mxu0 %v17127_v19  ;;  %v12641_v19 = vld [vmem:[%s20837_s7 + $0x18] sm:$0xff] }
0x43cb   : > { %15786 = vmatpush3.bf16.msra.mxu0 %v17129_v16  ;;  %v12643_v16 = vld [vmem:[%s20837_s7 + $0x58] sm:$0xff] }
0x43cc   : > { %15787 = vmatprep.subr.bf16.mxu0 %v17131_v21  ;;  %v14920_v21 = vcombine.low %v12641_v19, %v12643_v16 }
0x43cf   : > { %15788 = vmatpush3.bf16.msra.mxu0 %v17133_v22  ;;  %v14921_v22 = vcombine.high %v12641_v19, %v12643_v16  ;;  %v17172_v19 = vld [vmem:[%s20839_s9 + $0x1d8] sm:$0xff]   ;;  %v17173_v16 = vld [vmem:[%s20839_s9 + $0x128] sm:$0xff]  }
0x43d0   : > { %15789 = vmatprep.subr.bf16.mxu0 %v17135_v23  ;;  %v12148_v23 = vld [vmem:[%s20838_s8] sm:$0xf] }
0x43d3   : > { %15790 = vmatpush3.bf16.msra.mxu0 %v17137_v51  ;;  %v12153_v51 = vrot.slane %v12148_v23, %v17914_v60 }
0x43d4   : > { %15791 = vmatprep.subr.bf16.mxu0 %v17139_v26  ;;  %v12157_v26 = vrot.slane %v12148_v23, %v17919_v57 }
0x43d7   : > { %15792 = vmatpush3.bf16.msra.mxu0 %v17141_v48 }
0x43d8   : > { %15793 = vmatprep.subr.bf16.mxu0 %v17143_v6  ;;  %v17157_v6 = vld [vmem:[%s20839_s9 + $0x148] sm:$0xff]  }
0x43db   : > { %15794 = vmatpush3.bf16.msra.mxu0 %v17145_v0  ;;  %v17158_v0 = vld [vmem:[%s20839_s9 + $0x108] sm:$0xff]  }
0x4495   : > { %v12095_v39 = vpop.f32.mrb[224].mxu0 }
0x4496   : > { %v16568_v42 = vadd.f32 %v12095_v39, %v10813_v38  ;;  %v16563_v43 = vpop.f32.mrb[225].mxu0  ;;  %v12147_v38 = vld [vmem:[%s20837_s7 + $0xc8] sm:$0xff] }
0x4497   : > { %v12098_v44 = vpop.f32.mrb[226].mxu0  ;;  %v14883_v43 = vcombine.high %v12145_v7, %v12147_v38 }
0x4498   : > { %v16564_v46 = vpop.f32.mrb[227].mxu0  ;;  %v12102_v1 = vsel %vm1813_vm7, %v16568_v42, 0.0 }
0x4499   : > { %12103 = vadd.xlane.f32.xlu0 %v12102_v1  ;;  %v14628_v46 = vld [vmem:[%s20954_s0] ss:$0 sm:$0xff] }
0x449d   : > { %3845 = vadd.xlane.f32.xlu0 %v3844_v25  ;;  %v14629_v25 = vld [vmem:[%s20955_s20] ss:$0 sm:$0xff] }
0x44a1   : > { %7274 = vadd.xlane.f32.xlu0 %v7273_v14  ;;  %v14882_v14 = vcombine.low %v12145_v7, %v12147_v38  ;;  %v12165_v7 = vrot.slane %v12148_v23, %v17925_v10 }
0x44a5   : > { %10703 = vadd.xlane.f32.xlu0 %v10702_v50 }
0x4526   : > { %v12104_v27 = vpop.xlane.xlu0 %12103 }
0x4527   : > { %v12105_v52 = vmul.f32 0.03125, %v12104_v27  ;;  %v17128_v27 = vld [vmem:[%s20839_s9 + $0xc0] sm:$0xff]  }
0x4529   : > { %v12106_v20 = vsub.f32 %v16568_v42, %v12105_v52 }
0x452a   : > { %v20223_v55 = vpop.xlane.xlu0 %3845 }
0x452b   : > { %v12107_v56 = vmul.f32 %v12106_v20, %v12106_v20 }
0x452d   : > { %v12108_v37 = vsel %vm1813_vm7, %v12107_v56, 0.0 }
0x452e   : > { %12109 = vadd.xlane.f32.xlu1 %v12108_v37  ;;  %v7275_v58 = vpop.xlane.xlu0 %7274  ;;  %v17132_v37 = vld [vmem:[%s20839_s9 + $0xc8] sm:$0xff]  }
0x452f   : > { %v7276_v59 = vmul.f32 0.03125, %v7275_v58  ;;  %v17134_v58 = vld [vmem:[%s20839_s9 + $0x88] sm:$0xff]  }
0x4531   : > { %v20227_v61 = vsub.f32 %v19177_v18, %v7276_v59  ;;  %v12144_v18 = vld [vmem:[%s20837_s7 + $0x80] sm:$0xff]  ;;  %v17136_v59 = vld [vmem:[%s20839_s9 + $0xd0] sm:$0xff]  }
0x4532   : > { %v14881_v3 = vcombine.high %v12144_v18, %v12146_v40  ;;  %v14880_v35 = vcombine.low %v12144_v18, %v12146_v40  ;;  %v17147_v18 = vld [vmem:[%s20839_s9 + $0x78] sm:$0xff]   ;;  %v17148_v40 = vld [vmem:[%s20839_s9 + $0xe8] sm:$0xff]  }
0x4533   : > { %v7278_v63 = vmul.f32 %v20227_v61, %v20227_v61  ;;  %15795 = vmatprep.subr.bf16.mxu0 %v17147_v18  ;;  %v17159_v18 = vld [vmem:[%s20839_s9 + $0x150] sm:$0xff]  }
0x4534   : > { %12215 = vmatprep.subr.bf16.mxu1 %v14881_v3  ;;  %v17149_v3 = vld [vmem:[%s20839_s9 + $0x38] sm:$0xff]  }
0x4535   : > { %v7279_v54 = vsel %vm1813_vm7, %v7278_v63, 0.0  ;;  %12216 = vmatpush1.bf16.msra.mxu1 %v14880_v35  ;;  %v17140_v63 = vld [vmem:[%s20839_s9 + $0xd8] sm:$0xff]   ;;  %v17150_v35 = vld [vmem:[%s20839_s9 + $0xa8] sm:$0xff]   ;;  %15796 = vmatpush3.bf16.msra.mxu0 %v17149_v3  ;;  %v17161_v3 = vld [vmem:[%s20839_s9 + $0x110] sm:$0xff]  }
0x4536   : > { %7280 = vadd.xlane.f32.xlu1 %v7279_v54  ;;  %12254 = vmatprep.subr.bf16.mxu1 %v14879_v8  ;;  %v17142_v54 = vld [vmem:[%s20839_s9 + $0x98] sm:$0xff]   ;;  %v17151_v8 = vld [vmem:[%s20839_s9 + $0xf0] sm:$0xff]  }
0x45bb   : > { %v12110_v28 = vpop.xlane.xlu1 %12109 }
0x45bc   : > { %v12111_v49 = vmul.f32 0.03125, %v12110_v28 }
0x45be   : > { %v12112_v24 = vadd.f32 1e-05, %v12111_v49 }
0x45c0   : > { %17385 = vrsqrt.f32 %v12112_v24 }
0x45c3   : > { %v7281_v53 = vpop.xlane.xlu1 %7280 }
0x45c4   : > { %v7282_v11 = vmul.f32 0.03125, %v7281_v53 }
0x45c6   : > { %v7283_v29 = vadd.f32 1e-05, %v7282_v11 }
0x45c8   : > { %17387 = vrsqrt.f32 %v7283_v29 }
0x45ca   : > { %v17386_v30 = vpop.eup %17385 }
0x45cb   : > { %v12114_v32 = vmul.f32 %v17386_v30, %v12106_v20  ;;  %v17130_v20 = vld [vmem:[%s20839_s9 + $0x80] sm:$0xff]  }
0x45cd   : > { %v12122_v34 = vmul.f32 %v14873_v31, %v12114_v32  ;;  %v12644_v31 = vld [vmem:[%s20837_s7 + $0x90] sm:$0xff] }
0x45ce   : > { %v12646_v32 = vld [vmem:[%s20837_s7 + $0xd0] sm:$0xff] }
0x45cf   : > { %v20298_v39 = vadd.f32 %v14874_v33, %v12122_v34  ;;  %v12161_v33 = vrot.slane %v12148_v23, %v17923_v5  ;;  %v17176_v23 = vld [vmem:[%s20839_s9 + $0x1e0] sm:$0xff]  }
0x45d1   : > { %v20302_v42 = vpack.c.bf16 %v20298_v39, %v20298_v39 }
0x45d2   : > { %v17388_v44 = vpop.eup %17387 }
0x45d3   : > { %v7285_v1 = vmul.f32 %v17388_v44, %v20227_v61  ;;  %14884 = vmatmul.mubr.msk.bf16.vlgmr.msra.gmra.mrb[236].mxu1 %vm464_vm1, %v20302_v42  ;;  %v17138_v61 = vld [vmem:[%s20839_s9 + $0x90] sm:$0xff]  }
0x45d4   : > { %12255 = vmatpush1.bf16.msra.mxu1 %v14878_v12  ;;  %12286 = vmatprep.mubr.bf16.mxu1 %v17429_v62  ;;  %v14919_v12 = vcombine.high %v12640_v9, %v12642_v4  ;;  %v17163_v9 = vld [vmem:[%s20839_s9 + $0x158] sm:$0xff]   ;;  %v17166_v4 = vld [vmem:[%s20839_s9 + $0x188] sm:$0xff]  }
0x45d5   : > { %v7293_v50 = vmul.f32 %v14628_v46, %v7285_v1  ;;  %12256 = vmatprep.subr.bf16.mxu1 %v14883_v43  ;;  %v14923_v43 = vcombine.high %v12644_v31, %v12646_v32 }
0x45d6   : > { %12710 = vmatprep.subr.bf16.mxu0 %v14919_v12  ;;  %v17167_v12 = vld [vmem:[%s20839_s9 + $0x160] sm:$0xff]  }
0x45d7   : > { %v7301_v52 = vadd.f32 %v14629_v25, %v7293_v50  ;;  %v14922_v50 = vcombine.low %v12644_v31, %v12646_v32  ;;  %v17184_v32 = vld [vmem:[%s20839_s9 + $0x1b0] sm:$0xff]  }
0x45d8   : > { %12257 = vmatpush1.bf16.msra.mxu1 %v14882_v14 }
0x45d9   : > { %v7302_v56 = vpack.c.bf16 %v7301_v52, %v7301_v52  ;;  %15803 = vmatprep.subr.bf16.mxu1 %v17128_v27 }
0x45db   : > { %14630 = vst.msk [vmem:[%s20321_s13 + $0x1] sm:$0x1] %vm3874_vm8, %v7302_v56  ;;  %14885 = vmatmul.mubr.msk.bf16.vlgmr.msra.gmra.mrb[240].mxu1 %vm464_vm1, %v20302_v42 }
0x45dc   : > { %15804 = vmatpush3.bf16.msra.mxu1 %v17130_v20  ;;  %v17155_v20 = vld [vmem:[%s20839_s9 + $0x140] sm:$0xff]  }
0x45dd   : > { %15805 = vmatprep.subr.bf16.mxu1 %v17132_v37  ;;  %v12645_v37 = vld [vmem:[%s20837_s7 + $0x98] sm:$0xff] }
0x45e0   : > { %15806 = vmatpush3.bf16.msra.mxu1 %v17134_v58  ;;  %v12647_v58 = vld [vmem:[%s20837_s7 + $0xd8] sm:$0xff] }
0x45e1   : > { %15807 = vmatprep.subr.bf16.mxu1 %v17136_v59 }
0x45e4   : > { %15808 = vmatpush3.bf16.msra.mxu1 %v17138_v61 }
0x45e5   : > { %15809 = vmatprep.subr.bf16.mxu1 %v17140_v63  ;;  %v14925_v63 = vcombine.high %v12645_v37, %v12647_v58 }
0x45e8   : > { %15810 = vmatpush3.bf16.msra.mxu1 %v17142_v54  ;;  %v17156_v54 = vld [vmem:[%s20839_s9 + $0x100] sm:$0xff]  }
0x45e9   : > { %15811 = vmatprep.subr.bf16.mxu1 %v17144_v45  ;;  %v14924_v45 = vcombine.low %v12645_v37, %v12647_v58 }
0x45ec   : > { %15812 = vmatpush3.bf16.msra.mxu1 %v17146_v2  ;;  %v17160_v2 = vld [vmem:[%s20839_s9 + $0x1c0] sm:$0xff]  }
0x45ed   : > { %15813 = vmatprep.subr.bf16.mxu1 %v17148_v40  ;;  %v17162_v40 = vld [vmem:[%s20839_s9 + $0x180] sm:$0xff]  }
0x45f0   : > { %15814 = vmatpush3.bf16.msra.mxu1 %v17150_v35  ;;  %v17164_v35 = vld [vmem:[%s20839_s9 + $0x1c8] sm:$0xff]  }
0x45f1   : > { %15815 = vmatprep.subr.bf16.mxu1 %v17151_v8  ;;  %v17165_v8 = vld [vmem:[%s20839_s9 + $0x118] sm:$0xff]  }
0x45f4   : > { %15816 = vmatpush3.bf16.msra.mxu1 %v17152_v41  ;;  %v17169_v41 = vld [vmem:[%s20839_s9 + $0x120] sm:$0xff]  }
0x45f5   : > { %15817 = vmatprep.subr.bf16.mxu1 %v17153_v15  ;;  %v17170_v15 = vld [vmem:[%s20839_s9 + $0x190] sm:$0xff]  }
0x45f8   : > { %15818 = vmatpush3.bf16.msra.mxu1 %v17154_v17  ;;  %v17171_v17 = vld [vmem:[%s20839_s9 + $0x168] sm:$0xff]  }
0x45f9   : > { %12751 = vmatprep.subr.bf16.mxu1 %v14921_v22  ;;  %v17175_v22 = vld [vmem:[%s20839_s9 + $0x170] sm:$0xff]  }
0x46a6   : > { %v12247_v48 = vpop.f32.mrb[236].mxu1 }
0x46a7   : > { %v12248_v28 = vadd.f32 %v12247_v48, %v12153_v51  ;;  %v12249_v49 = vpop.f32.mrb[237].mxu1  ;;  %v17177_v51 = vld [vmem:[%s20839_s9 + $0x130] sm:$0xff]   ;;  %v17179_v48 = vld [vmem:[%s20839_s9 + $0x178] sm:$0xff]  }
0x46a8   : > { %v12250_v24 = vadd.f32 %v12249_v49, %v12157_v26  ;;  %v12251_v53 = vpop.f32.mrb[238].mxu1  ;;  %v17178_v26 = vld [vmem:[%s20839_s9 + $0x1a0] sm:$0xff]   ;;  %v17181_v49 = vld [vmem:[%s20839_s9 + $0x138] sm:$0xff]  }
0x46a9   : > { %v12295_v11 = vmax.f32 %v12248_v28, 0.0  ;;  %v12252_v29 = vpop.f32.mrb[239].mxu1  ;;  %v17180_v28 = vld [vmem:[%s20839_s9 + $0x1e8] sm:$0xff]   ;;  %v13137_v53 = vld [vmem:[%s20837_s7 + $0x20] sm:$0xff] }
0x46aa   : > { %v12296_v30 = vmax.f32 %v12250_v24, 0.0  ;;  %v17182_v24 = vld [vmem:[%s20839_s9 + $0x1a8] sm:$0xff]   ;;  %v17183_v29 = vld [vmem:[%s20839_s9 + $0x1f0] sm:$0xff]  }
0x46ab   : > { %v12299_v38 = vpack.c.bf16 %v12295_v11, %v12295_v11  ;;  %v13139_v11 = vld [vmem:[%s20837_s7 + $0x60] sm:$0xff] }
0x46ac   : > { %v12300_v34 = vpack.c.bf16 %v12296_v30, %v12296_v30  ;;  %v14961_v30 = vcombine.high %v13137_v53, %v13139_v11  ;;  %v14960_v31 = vcombine.low %v13137_v53, %v13139_v11  ;;  %v13144_v53 = vld [vmem:[%s20837_s7 + $0xe8] sm:$0xff] }
0x46ae   : > { %v12288_v44 = vpop.f32.mrb[240].mxu1  ;;  %12591 = vmatprep.mubr.bf16.mxu0 %v12300_v34  ;;  %v17186_v34 = vld [vmem:[%s20839_s9 + $0x1b8] sm:$0xff]  }
0x46af   : > { %v12289_v46 = vadd.f32 %v12288_v44, %v12161_v33  ;;  %v12290_v1 = vpop.f32.mrb[241].mxu1  ;;  %12592 = vmatmul.mubr.bf16.vlgmr.msra.gmra.mrb[244].mxu0 %v12299_v38  ;;  %v17185_v33 = vld [vmem:[%s20839_s9 + $0x1f8] sm:$0xff]   ;;  %v20531_v38 = vld [vmem:[%s20837_s7 + $0x68] sm:$0xff] }
0x46b0   : > { %v12291_v25 = vadd.f32 %v12290_v1, %v12165_v7  ;;  %v12292_v14 = vpop.f32.mrb[242].mxu1  ;;  %12711 = vmatpush1.bf16.msra.mxu0 %v14918_v36  ;;  %12742 = vmatprep.mubr.bf16.mxu0 %v17429_v62  ;;  %v17168_v36 = vld [vmem:[%s20839_s9 + $0x1d0] sm:$0xff]   ;;  %v20526_v7 = vld [vmem:[%s20837_s7 + $0x28] sm:$0xff] }
0x46b1   : > { %v12297_v27 = vmax.f32 %v12289_v46, 0.0  ;;  %v12293_v52 = vpop.f32.mrb[243].mxu1  ;;  %12712 = vmatprep.subr.bf16.mxu0 %v14923_v43  ;;  %v14962_v43 = vcombine.low %v20526_v7, %v20531_v38  ;;  %v14963_v44 = vcombine.high %v20526_v7, %v20531_v38  ;;  %v17192_v7 = vld [vmem:[%s20839_s9 + $0x2c0] sm:$0xff]   ;;  %v17191_v38 = vld [vmem:[%s20839_s9 + $0x250] sm:$0xff]  }
0x46b2   : > { %v12298_v56 = vmax.f32 %v12291_v25, 0.0 }
0x46b3   : > { %v12301_v61 = vpack.c.bf16 %v12297_v27, %v12297_v27 }
0x46b4   : > { %v12302_v59 = vpack.c.bf16 %v12298_v56, %v12298_v56  ;;  %12713 = vmatpush1.bf16.msra.mxu0 %v14922_v50  ;;  %v12648_v50 = vld [vmem:[%s20838_s8 + $0x4] sm:$0xf] }
0x46b5   : > { %15825 = vmatprep.subr.bf16.mxu0 %v17155_v20  ;;  %v12653_v52 = vrot.slane %v12648_v50, %v17914_v60  ;;  %v12657_v20 = vrot.slane %v12648_v50, %v17919_v57 }
0x46b6   : > { %12631 = vmatprep.mubr.bf16.mxu1 %v12302_v59  ;;  %v14875_v59 = vld [vmem:[%s20840_s10] ss:$0 sm:$0xff] }
0x46b7   : > { %12632 = vmatmul.mubr.bf16.vlgmr.msra.gmra.mrb[244].mxu1 %v12301_v61  ;;  %14926 = vmatmul.mubr.msk.bf16.vlgmr.msra.gmra.mrb[248].mxu0 %vm464_vm1, %v20302_v42 }
0x46b8   : > { %12752 = vmatpush1.bf16.msra.mxu1 %v14920_v21  ;;  %12783 = vmatprep.mubr.bf16.mxu1 %v17429_v62  ;;  %v17174_v21 = vld [vmem:[%s20839_s9 + $0x198] sm:$0xff]  }
0x46b9   : > { %12753 = vmatprep.subr.bf16.mxu1 %v14925_v63  ;;  %15826 = vmatpush3.bf16.msra.mxu0 %v17156_v54 }
0x46ba   : > { %15827 = vmatprep.subr.bf16.mxu0 %v17157_v6 }
0x46bc   : > { %12754 = vmatpush1.bf16.msra.mxu1 %v14924_v45 }
0x46bd   : > { %15828 = vmatpush3.bf16.msra.mxu0 %v17158_v0  ;;  %15847 = vmatprep.subr.bf16.mxu1 %v17160_v2 }
0x46be   : > { %15829 = vmatprep.subr.bf16.mxu0 %v17159_v18 }
0x46bf   : > { %14927 = vmatmul.mubr.msk.bf16.vlgmr.msra.gmra.mrb[248].mxu1 %vm464_vm1, %v20302_v42 }
0x46c0   : > { %15848 = vmatpush3.bf16.msra.mxu1 %v17162_v40 }
0x46c1   : > { %15830 = vmatpush3.bf16.msra.mxu0 %v17161_v3  ;;  %15849 = vmatprep.subr.bf16.mxu1 %v17164_v35  ;;  %v12139_v3 = vadd.f32 %v14875_v59, %v20298_v39  ;;  %v17206_v59 = vld [vmem:[%s20839_s9 + $0x298] sm:$0xff]  }
0x46c2   : > { %15831 = vmatprep.subr.bf16.mxu0 %v17163_v9 }
0x46c4   : > { %15850 = vmatpush3.bf16.msra.mxu1 %v17166_v4  ;;  %v13141_v4 = vld [vmem:[%s20837_s7 + $0xa0] sm:$0xff] }
0x46c5   : > { %15832 = vmatpush3.bf16.msra.mxu0 %v17165_v8  ;;  %15851 = vmatprep.subr.bf16.mxu1 %v17168_v36  ;;  %v13143_v8 = vld [vmem:[%s20837_s7 + $0xe0] sm:$0xff] }
0x46c6   : > { %15833 = vmatprep.subr.bf16.mxu0 %v17167_v12  ;;  %v12661_v12 = vrot.slane %v12648_v50, %v17923_v5 }
0x46c8   : > { %15852 = vmatpush3.bf16.msra.mxu1 %v17170_v15  ;;  %v12665_v15 = vrot.slane %v12648_v50, %v17925_v10  ;;  %v17199_v50 = vld [vmem:[%s20839_s9 + $0x260] sm:$0xff]  }
0x46c9   : > { %15834 = vmatpush3.bf16.msra.mxu0 %v17169_v41  ;;  %15853 = vmatprep.subr.bf16.mxu1 %v17172_v19  ;;  %v14965_v19 = vcombine.high %v13141_v4, %v13143_v8 }
0x46ca   : > { %15835 = vmatprep.subr.bf16.mxu0 %v17171_v17 }
0x46cc   : > { %15854 = vmatpush3.bf16.msra.mxu1 %v17174_v21 }
0x46cd   : > { %15836 = vmatpush3.bf16.msra.mxu0 %v17173_v16  ;;  %15855 = vmatprep.subr.bf16.mxu1 %v17176_v23 }
0x46ce   : > { %15837 = vmatprep.subr.bf16.mxu0 %v17175_v22 }
0x46d0   : > { %15856 = vmatpush3.bf16.msra.mxu1 %v17178_v26 }
0x46d1   : > { %15838 = vmatpush3.bf16.msra.mxu0 %v17177_v51  ;;  %15857 = vmatprep.subr.bf16.mxu1 %v17180_v28  ;;  %v14964_v51 = vcombine.low %v13141_v4, %v13143_v8  ;;  %v17187_v28 = vld [vmem:[%s20839_s9 + $0x240] sm:$0xff]   ;;  %v17216_v8 = vld [vmem:[%s20839_s9 + $0x2b0] sm:$0xff]  }
0x46d2   : > { %15839 = vmatprep.subr.bf16.mxu0 %v17179_v48 }
0x46d4   : > { %15858 = vmatpush3.bf16.msra.mxu1 %v17182_v24  ;;  %v13142_v24 = vld [vmem:[%s20837_s7 + $0xa8] sm:$0xff] }
0x46d5   : > { %15840 = vmatpush3.bf16.msra.mxu0 %v17181_v49  ;;  %15859 = vmatprep.subr.bf16.mxu1 %v17183_v29 }
0x46d6   : > { %13207 = vmatprep.subr.bf16.mxu0 %v14961_v30  ;;  %v14967_v30 = vcombine.high %v13142_v24, %v13144_v53 }
0x46d8   : > { %15860 = vmatpush3.bf16.msra.mxu1 %v17184_v32  ;;  %v17189_v32 = vld [vmem:[%s20839_s9 + $0x248] sm:$0xff]  }
0x46d9   : > { %15861 = vmatprep.subr.bf16.mxu1 %v17185_v33  ;;  %v14966_v33 = vcombine.low %v13142_v24, %v13144_v53 }
0x46dc   : > { %15862 = vmatpush3.bf16.msra.mxu1 %v17186_v34  ;;  %v17190_v34 = vld [vmem:[%s20839_s9 + $0x208] sm:$0xff]  }
0x46dd   : > { %13248 = vmatprep.subr.bf16.mxu1 %v14963_v44  ;;  %v17193_v44 = vld [vmem:[%s20839_s9 + $0x210] sm:$0xff]  }
0x4782   : > { %v15797_v46 = vpop.f32.mrb[244].mxu0 }
0x4783   : > { %v15798_v1 = vpop.f32.mrb[245].mxu0 }
0x4784   : > { %v15799_v25 = vadd.f32 %v15798_v1, %v15797_v46  ;;  %v15800_v14 = vpop.f32.mrb[246].mxu0  ;;  %v17196_v46 = vld [vmem:[%s20839_s9 + $0x2c8] sm:$0xff]   ;;  %v17195_v1 = vld [vmem:[%s20839_s9 + $0x258] sm:$0xff]  }
0x4785   : > { %v15801_v27 = vpop.f32.mrb[247].mxu0  ;;  %v17197_v14 = vld [vmem:[%s20839_s9 + $0x218] sm:$0xff]  }
0x4786   : > { %v17200_v27 = vld [vmem:[%s20839_s9 + $0x2d0] sm:$0xff]  }
0x478a   : > { %v15819_v56 = vpop.f32.mrb[244].mxu1  ;;  %v12744_v37 = vpop.f32.mrb[248].mxu0 }
0x478b   : > { %v12745_v58 = vadd.f32 %v12744_v37, %v12653_v52  ;;  %v15820_v61 = vpop.f32.mrb[245].mxu1  ;;  %v12746_v63 = vpop.f32.mrb[249].mxu0  ;;  %v17201_v52 = vld [vmem:[%s20839_s9 + $0x220] sm:$0xff]   ;;  %v17204_v37 = vld [vmem:[%s20839_s9 + $0x2d8] sm:$0xff]  }
0x478c   : > { %v15821_v54 = vadd.f32 %v15820_v61, %v15819_v56  ;;  %v12747_v6 = vadd.f32 %v12746_v63, %v12657_v20  ;;  %v15822_v45 = vpop.f32.mrb[246].mxu1  ;;  %v12748_v0 = vpop.f32.mrb[250].mxu0  ;;  %v17202_v20 = vld [vmem:[%s20839_s9 + $0x290] sm:$0xff]   ;;  %v17203_v56 = vld [vmem:[%s20839_s9 + $0x268] sm:$0xff]   ;;  %v17208_v63 = vld [vmem:[%s20839_s9 + $0x2e0] sm:$0xff]  }
0x478d   : > { %v12792_v2 = vmax.f32 %v12745_v58, 0.0  ;;  %v15823_v18 = vpop.f32.mrb[247].mxu1  ;;  %v12749_v40 = vpop.f32.mrb[251].mxu0  ;;  %v17205_v58 = vld [vmem:[%s20839_s9 + $0x228] sm:$0xff]   ;;  %v17207_v61 = vld [vmem:[%s20839_s9 + $0x270] sm:$0xff]   ;;  %v17211_v45 = vld [vmem:[%s20839_s9 + $0x278] sm:$0xff]  }
0x478e   : > { %v12634_v35 = vadd.f32 %v15821_v54, %v15799_v25  ;;  %v12793_v9 = vmax.f32 %v12747_v6, 0.0  ;;  %v17198_v25 = vld [vmem:[%s20839_s9 + $0x288] sm:$0xff]   ;;  %v17209_v54 = vld [vmem:[%s20839_s9 + $0x230] sm:$0xff]   ;;  %v17210_v6 = vld [vmem:[%s20839_s9 + $0x2a0] sm:$0xff]  }
0x478f   : > { %v12796_v17 = vpack.c.bf16 %v12792_v2, %v12792_v2  ;;  %v17212_v0 = vld [vmem:[%s20839_s9 + $0x2e8] sm:$0xff]   ;;  %v17213_v2 = vld [vmem:[%s20839_s9 + $0x238] sm:$0xff]   ;;  %v13634_v40 = vld [vmem:[%s20837_s7 + $0x30] sm:$0xff] }
0x4790   : > { %v20553_v36 = vadd.f32 %v12634_v35, %v12139_v3  ;;  %v12797_v41 = vpack.c.bf16 %v12793_v9, %v12793_v9  ;;  %v17214_v18 = vld [vmem:[%s20839_s9 + $0x2a8] sm:$0xff]   ;;  %v13636_v3 = vld [vmem:[%s20837_s7 + $0x70] sm:$0xff] }
0x4791   : > { %v17215_v35 = vld [vmem:[%s20839_s9 + $0x2f0] sm:$0xff]   ;;  %v15003_v9 = vcombine.high %v13634_v40, %v13636_v3  ;;  %v15002_v4 = vcombine.low %v13634_v40, %v13636_v3 }
0x4792   : > { %v12785_v39 = vpop.f32.mrb[248].mxu1  ;;  %13088 = vmatprep.mubr.bf16.mxu0 %v12797_v41  ;;  %v17218_v41 = vld [vmem:[%s20839_s9 + $0x2b8] sm:$0xff]  }
0x4793   : > { %v12786_v16 = vadd.f32 %v12785_v39, %v12661_v12  ;;  %v12787_v21 = vpop.f32.mrb[249].mxu1  ;;  %13089 = vmatmul.mubr.bf16.vlgmr.msra.gmra.mrb[252].mxu0 %v12796_v17  ;;  %v17217_v12 = vld [vmem:[%s20839_s9 + $0x2f8] sm:$0xff]  }
0x4794   : > { %v12788_v22 = vadd.f32 %v12787_v21, %v12665_v15  ;;  %v12789_v23 = vpop.f32.mrb[250].mxu1  ;;  %13208 = vmatpush1.bf16.msra.mxu0 %v14960_v31  ;;  %13239 = vmatprep.mubr.bf16.mxu0 %v17429_v62  ;;  %v17188_v31 = vld [vmem:[%s20839_s9 + $0x200] sm:$0xff]   ;;  %v13635_v15 = vld [vmem:[%s20837_s7 + $0x38] sm:$0xff] }
0x4795   : > { %v12794_v26 = vmax.f32 %v12786_v16, 0.0  ;;  %v12790_v48 = vpop.f32.mrb[251].mxu1  ;;  %13209 = vmatprep.subr.bf16.mxu0 %v14965_v19  ;;  %v13637_v17 = vld [vmem:[%s20837_s7 + $0x78] sm:$0xff] }
0x4796   : > { %v12795_v49 = vmax.f32 %v12788_v22, 0.0  ;;  %v15004_v19 = vcombine.low %v13635_v15, %v13637_v17  ;;  %v15005_v39 = vcombine.high %v13635_v15, %v13637_v17  ;;  %v17225_v15 = vld [vmem:[%s20839_s9 + $0x310] sm:$0xff]   ;;  %v17228_v17 = vld [vmem:[%s20839_s9 + $0x3c8] sm:$0xff]  }
0x4797   : > { %v12798_v29 = vpack.c.bf16 %v12794_v26, %v12794_v26 }
0x4798   : > { %v12799_v11 = vpack.c.bf16 %v12795_v49, %v12795_v49  ;;  %13210 = vmatpush1.bf16.msra.mxu0 %v14964_v51  ;;  %v13145_v51 = vld [vmem:[%s20838_s8 + $0x8] sm:$0xf] }
0x4799   : > { %15869 = vmatprep.subr.bf16.mxu0 %v17187_v28  ;;  %v13150_v48 = vrot.slane %v13145_v51, %v17914_v60  ;;  %v13154_v28 = vrot.slane %v13145_v51, %v17919_v57 }
0x479a   : > { %13128 = vmatprep.mubr.bf16.mxu1 %v12799_v11 }
0x479b   : > { %13129 = vmatmul.mubr.bf16.vlgmr.msra.gmra.mrb[252].mxu1 %v12798_v29  ;;  %14968 = vmatmul.mubr.msk.bf16.vlgmr.msra.gmra.mrb[0].mxu0 %vm464_vm1, %v20302_v42 }
0x479c   : > { %13249 = vmatpush1.bf16.msra.mxu1 %v14962_v43  ;;  %13280 = vmatprep.mubr.bf16.mxu1 %v17429_v62  ;;  %v17194_v43 = vld [vmem:[%s20839_s9 + $0x280] sm:$0xff]  }
0x479d   : > { %13250 = vmatprep.subr.bf16.mxu1 %v14967_v30  ;;  %15870 = vmatpush3.bf16.msra.mxu0 %v17188_v31 }
0x479e   : > { %15871 = vmatprep.subr.bf16.mxu0 %v17189_v32 }
0x47a0   : > { %13251 = vmatpush1.bf16.msra.mxu1 %v14966_v33 }
0x47a1   : > { %15872 = vmatpush3.bf16.msra.mxu0 %v17190_v34  ;;  %15891 = vmatprep.subr.bf16.mxu1 %v17192_v7 }
0x47a2   : > { %15873 = vmatprep.subr.bf16.mxu0 %v17191_v38 }
0x47a3   : > { %14969 = vmatmul.mubr.msk.bf16.vlgmr.msra.gmra.mrb[0].mxu1 %vm464_vm1, %v20302_v42 }
0x47a4   : > { %15892 = vmatpush3.bf16.msra.mxu1 %v17194_v43 }
0x47a5   : > { %15874 = vmatpush3.bf16.msra.mxu0 %v17193_v44  ;;  %15893 = vmatprep.subr.bf16.mxu1 %v17196_v46  ;;  %v13638_v46 = vld [vmem:[%s20837_s7 + $0xb0] sm:$0xff] }
0x47a6   : > { %15875 = vmatprep.subr.bf16.mxu0 %v17195_v1  ;;  %v13640_v1 = vld [vmem:[%s20837_s7 + $0xf0] sm:$0xff] }
0x47a8   : > { %15894 = vmatpush3.bf16.msra.mxu1 %v17198_v25  ;;  %v13158_v25 = vrot.slane %v13145_v51, %v17923_v5 }
0x47a9   : > { %15876 = vmatpush3.bf16.msra.mxu0 %v17197_v14  ;;  %15895 = vmatprep.subr.bf16.mxu1 %v17200_v27  ;;  %v13162_v27 = vrot.slane %v13145_v51, %v17925_v10  ;;  %v17235_v51 = vld [vmem:[%s20839_s9 + $0x368] sm:$0xff]  }
0x47aa   : > { %15877 = vmatprep.subr.bf16.mxu0 %v17199_v50 }
0x47ac   : > { %15896 = vmatpush3.bf16.msra.mxu1 %v17202_v20  ;;  %v15007_v20 = vcombine.high %v13638_v46, %v13640_v1 }
0x47ad   : > { %15878 = vmatpush3.bf16.msra.mxu0 %v17201_v52  ;;  %15897 = vmatprep.subr.bf16.mxu1 %v17204_v37 }
0x47ae   : > { %15879 = vmatprep.subr.bf16.mxu0 %v17203_v56 }
0x47b0   : > { %15898 = vmatpush3.bf16.msra.mxu1 %v17206_v59 }
0x47b1   : > { %15880 = vmatpush3.bf16.msra.mxu0 %v17205_v58  ;;  %15899 = vmatprep.subr.bf16.mxu1 %v17208_v63  ;;  %v15006_v63 = vcombine.low %v13638_v46, %v13640_v1 }
0x47b2   : > { %15881 = vmatprep.subr.bf16.mxu0 %v17207_v61 }
0x47b4   : > { %15900 = vmatpush3.bf16.msra.mxu1 %v17210_v6 }
0x47b5   : > { %15882 = vmatpush3.bf16.msra.mxu0 %v17209_v54  ;;  %15901 = vmatprep.subr.bf16.mxu1 %v17212_v0  ;;  %v13639_v0 = vld [vmem:[%s20837_s7 + $0xb8] sm:$0xff] }
0x47b6   : > { %15883 = vmatprep.subr.bf16.mxu0 %v17211_v45 }
0x47b8   : > { %15902 = vmatpush3.bf16.msra.mxu1 %v17214_v18 }
0x47b9   : > { %15884 = vmatpush3.bf16.msra.mxu0 %v17213_v2  ;;  %15903 = vmatprep.subr.bf16.mxu1 %v17215_v35  ;;  %v13641_v2 = vld [vmem:[%s20837_s7 + $0xf8] sm:$0xff]  ;;  %v17220_v35 = vld [vmem:[%s20839_s9 + $0x300] sm:$0xff]  }
0x47ba   : > { %13704 = vmatprep.subr.bf16.mxu0 %v15003_v9  ;;  %v15009_v3 = vcombine.high %v13639_v0, %v13641_v2  ;;  %v17221_v9 = vld [vmem:[%s20839_s9 + $0x348] sm:$0xff]  }
0x47bc   : > { %15904 = vmatpush3.bf16.msra.mxu1 %v17216_v8  ;;  %v17222_v8 = vld [vmem:[%s20839_s9 + $0x308] sm:$0xff]  }
0x47bd   : > { %15905 = vmatprep.subr.bf16.mxu1 %v17217_v12  ;;  %v17224_v12 = vld [vmem:[%s20839_s9 + $0x3c0] sm:$0xff]  }
0x47c0   : > { %15906 = vmatpush3.bf16.msra.mxu1 %v17218_v41  ;;  %v17223_v41 = vld [vmem:[%s20839_s9 + $0x350] sm:$0xff]  }
0x47c1   : > { %13745 = vmatprep.subr.bf16.mxu1 %v15005_v39  ;;  %v17230_v39 = vld [vmem:[%s20839_s9 + $0x388] sm:$0xff]  }
0x4866   : > { %v15841_v16 = vpop.f32.mrb[252].mxu0 }
0x4867   : > { %v15842_v21 = vpop.f32.mrb[253].mxu0 }
0x4868   : > { %v15843_v22 = vadd.f32 %v15842_v21, %v15841_v16  ;;  %v15844_v23 = vpop.f32.mrb[254].mxu0  ;;  %v17229_v16 = vld [vmem:[%s20839_s9 + $0x318] sm:$0xff]   ;;  %v17231_v21 = vld [vmem:[%s20839_s9 + $0x360] sm:$0xff]  }
0x4869   : > { %v15845_v26 = vpop.f32.mrb[255].mxu0  ;;  %v17234_v23 = vld [vmem:[%s20839_s9 + $0x390] sm:$0xff]  }
0x486a   : > { %v17236_v26 = vld [vmem:[%s20839_s9 + $0x3d8] sm:$0xff]  }
0x486e   : > { %v15863_v49 = vpop.f32.mrb[252].mxu1  ;;  %v13241_v24 = vpop.f32.mrb[0].mxu0 }
0x486f   : > { %v13242_v53 = vadd.f32 %v13241_v24, %v13150_v48  ;;  %v15864_v11 = vpop.f32.mrb[253].mxu1  ;;  %v13243_v29 = vpop.f32.mrb[1].mxu0  ;;  %v17237_v48 = vld [vmem:[%s20839_s9 + $0x328] sm:$0xff]   ;;  %v17240_v24 = vld [vmem:[%s20839_s9 + $0x3e0] sm:$0xff]  }
0x4870   : > { %v15865_v30 = vadd.f32 %v15864_v11, %v15863_v49  ;;  %v13244_v31 = vadd.f32 %v13243_v29, %v13154_v28  ;;  %v15866_v32 = vpop.f32.mrb[254].mxu1  ;;  %v13245_v33 = vpop.f32.mrb[2].mxu0  ;;  %v17238_v28 = vld [vmem:[%s20839_s9 + $0x398] sm:$0xff]   ;;  %v17239_v49 = vld [vmem:[%s20839_s9 + $0x370] sm:$0xff]   ;;  %v17242_v11 = vld [vmem:[%s20839_s9 + $0x3a0] sm:$0xff]  }
0x4871   : > { %v13289_v34 = vmax.f32 %v13242_v53, 0.0  ;;  %v15867_v7 = vpop.f32.mrb[255].mxu1  ;;  %v13246_v38 = vpop.f32.mrb[3].mxu0  ;;  %v17241_v53 = vld [vmem:[%s20839_s9 + $0x330] sm:$0xff]   ;;  %v17243_v29 = vld [vmem:[%s20839_s9 + $0x378] sm:$0xff]   ;;  %v17246_v32 = vld [vmem:[%s20839_s9 + $0x3a8] sm:$0xff]  }
0x4872   : > { %v13131_v43 = vadd.f32 %v15865_v30, %v15843_v22  ;;  %v13290_v44 = vmax.f32 %v13244_v31, 0.0  ;;  %v17233_v22 = vld [vmem:[%s20839_s9 + $0x320] sm:$0xff]   ;;  %v17244_v30 = vld [vmem:[%s20839_s9 + $0x3e8] sm:$0xff]   ;;  %v17245_v31 = vld [vmem:[%s20839_s9 + $0x338] sm:$0xff]  }
0x4873   : > { %v13293_v52 = vpack.c.bf16 %v13289_v34, %v13289_v34  ;;  %v17247_v33 = vld [vmem:[%s20839_s9 + $0x3f0] sm:$0xff]   ;;  %v17249_v7 = vld [vmem:[%s20839_s9 + $0x3f8] sm:$0xff]  }
0x4874   : > { %v20689_v14 = vadd.f32 %v13131_v43, %v20553_v36  ;;  %v13294_v50 = vpack.c.bf16 %v13290_v44, %v13290_v44  ;;  %v17219_v36 = vld [vmem:[%s20839_s9 + $0x340] sm:$0xff]   ;;  %v17248_v34 = vld [vmem:[%s20839_s9 + $0x3b0] sm:$0xff]   ;;  %v17250_v38 = vld [vmem:[%s20839_s9 + $0x3b8] sm:$0xff]  }
0x4876   : > { %v13282_v56 = vpop.f32.mrb[0].mxu1  ;;  %13585 = vmatprep.mubr.bf16.mxu0 %v13294_v50 }
0x4877   : > { %v13283_v37 = vadd.f32 %v13282_v56, %v13158_v25  ;;  %v13284_v58 = vpop.f32.mrb[1].mxu1  ;;  %13586 = vmatmul.mubr.bf16.vlgmr.msra.gmra.mrb[4].mxu0 %v13293_v52  ;;  %v13642_v25 = vld [vmem:[%s20838_s8 + $0xc] sm:$0xf] }
0x4878   : > { %v13285_v59 = vadd.f32 %v13284_v58, %v13162_v27  ;;  %v13286_v61 = vpop.f32.mrb[2].mxu1  ;;  %13705 = vmatpush1.bf16.msra.mxu0 %v15002_v4  ;;  %13736 = vmatprep.mubr.bf16.mxu0 %v17429_v62  ;;  %v15008_v4 = vcombine.low %v13639_v0, %v13641_v2  ;;  %v13647_v27 = vrot.slane %v13642_v25, %v17914_v60 }
0x4879   : > { %v13291_v54 = vmax.f32 %v13283_v37, 0.0  ;;  %v13287_v6 = vpop.f32.mrb[3].mxu1  ;;  %13706 = vmatprep.subr.bf16.mxu0 %v15007_v20  ;;  %v13651_v52 = vrot.slane %v13642_v25, %v17919_v57  ;;  %v13659_v57 = vrot.slane %v13642_v25, %v17925_v10 }
0x487a   : > { %v13292_v45 = vmax.f32 %v13285_v59, 0.0 }
0x487b   : > { %v13295_v40 = vpack.c.bf16 %v13291_v54, %v13291_v54 }
0x487c   : > { %v13296_v18 = vpack.c.bf16 %v13292_v45, %v13292_v45  ;;  %13707 = vmatpush1.bf16.msra.mxu0 %v15006_v63 }
0x487d   : > { %15913 = vmatprep.subr.bf16.mxu0 %v17219_v36 }
0x487e   : > { %13625 = vmatprep.mubr.bf16.mxu1 %v13296_v18 }
0x487f   : > { %13626 = vmatmul.mubr.bf16.vlgmr.msra.gmra.mrb[8].mxu1 %v13295_v40  ;;  %15010 = vmatmul.mubr.msk.bf16.vlgmr.msra.gmra.mrb[8].mxu0 %vm464_vm1, %v20302_v42  ;;  %v13655_v40 = vrot.slane %v13642_v25, %v17923_v5 }
0x4880   : > { %13746 = vmatpush1.bf16.msra.mxu1 %v15004_v19  ;;  %13777 = vmatprep.mubr.bf16.mxu1 %v17429_v62  ;;  %v17226_v62 = vld [vmem:[%s20839_s9 + $0x380] sm:$0xff]   ;;  %v17227_v19 = vld [vmem:[%s20839_s9 + $0x358] sm:$0xff]  }
0x4881   : > { %13747 = vmatprep.subr.bf16.mxu1 %v15009_v3  ;;  %15914 = vmatpush3.bf16.msra.mxu0 %v17220_v35 }
0x4882   : > { %15915 = vmatprep.subr.bf16.mxu0 %v17221_v9 }
0x4884   : > { %13748 = vmatpush1.bf16.msra.mxu1 %v15008_v4 }
0x4885   : > { %15916 = vmatpush3.bf16.msra.mxu0 %v17222_v8  ;;  %15935 = vmatprep.subr.bf16.mxu1 %v17224_v12 }
0x4886   : > { %15917 = vmatprep.subr.bf16.mxu0 %v17223_v41 }
0x4887   : > { %15011 = vmatmul.mubr.msk.bf16.vlgmr.msra.gmra.mrb[12].mxu1 %vm464_vm1, %v20302_v42  ;;  %v17232_v42 = vld [vmem:[%s20839_s9 + $0x3d0] sm:$0xff]  }
0x4888   : > { %15936 = vmatpush3.bf16.msra.mxu1 %v17226_v62 }
0x4889   : > { %15918 = vmatpush3.bf16.msra.mxu0 %v17225_v15  ;;  %15937 = vmatprep.subr.bf16.mxu1 %v17228_v17 }
0x488a   : > { %15919 = vmatprep.subr.bf16.mxu0 %v17227_v19 }
0x488c   : > { %15938 = vmatpush3.bf16.msra.mxu1 %v17230_v39 }
0x488d   : > { %15920 = vmatpush3.bf16.msra.mxu0 %v17229_v16  ;;  %15939 = vmatprep.subr.bf16.mxu1 %v17232_v42  ;;  %v3847_v42 = vmul.f32 0.03125, %v20223_v55 }
0x488e   : > { %15921 = vmatprep.subr.bf16.mxu0 %v17231_v21 }
0x4890   : > { %15940 = vmatpush3.bf16.msra.mxu1 %v17234_v23  ;;  %v10704_v23 = vpop.xlane.xlu0 %10703 }
0x4891   : > { %15922 = vmatpush3.bf16.msra.mxu0 %v17233_v22  ;;  %15941 = vmatprep.subr.bf16.mxu1 %v17236_v26 }
0x4892   : > { %15923 = vmatprep.subr.bf16.mxu0 %v17235_v51 }
0x4894   : > { %15942 = vmatpush3.bf16.msra.mxu1 %v17238_v28 }
0x4895   : > { %15924 = vmatpush3.bf16.msra.mxu0 %v17237_v48  ;;  %15943 = vmatprep.subr.bf16.mxu1 %v17240_v24  ;;  %v10705_v24 = vmul.f32 0.03125, %v10704_v23 }
0x4896   : > { %15925 = vmatprep.subr.bf16.mxu0 %v17239_v49  ;;  %v3848_v49 = vsub.f32 %v18362_v13, %v3847_v42 }
0x4898   : > { %15944 = vmatpush3.bf16.msra.mxu1 %v17242_v11 }
0x4899   : > { %15926 = vmatpush3.bf16.msra.mxu0 %v17241_v53  ;;  %15945 = vmatprep.subr.bf16.mxu1 %v17244_v30 }
0x489a   : > { %15927 = vmatprep.subr.bf16.mxu0 %v17243_v29  ;;  %v10706_v29 = vsub.f32 %v19992_v47, %v10705_v24 }
0x489c   : > { %15946 = vmatpush3.bf16.msra.mxu1 %v17246_v32  ;;  %v10707_v55 = vmul.f32 %v10706_v29, %v10706_v29 }
0x489d   : > { %15928 = vmatpush3.bf16.msra.mxu0 %v17245_v31  ;;  %15947 = vmatprep.subr.bf16.mxu1 %v17247_v33  ;;  %v3849_v31 = vmul.f32 %v3848_v49, %v3848_v49 }
0x489e   : > { %v10708_v33 = vsel %vm1813_vm7, %v10707_v55, 0.0 }
0x489f   : > { %v3850_v32 = vsel %vm1813_vm7, %v3849_v31, 0.0 }
0x48a0   : > { %15948 = vmatpush3.bf16.msra.mxu1 %v17248_v34 }
0x48a1   : > { %15949 = vmatprep.subr.bf16.mxu1 %v17249_v7 }
0x48a4   : > { %15950 = vmatpush3.bf16.msra.mxu1 %v17250_v38 }
0x494a   : > { %v15885_v43 = vpop.f32.mrb[4].mxu0 }
0x494b   : > { %v15886_v44 = vpop.f32.mrb[5].mxu0 }
0x494c   : > { %v15887_v46 = vadd.f32 %v15886_v44, %v15885_v43  ;;  %v15888_v1 = vpop.f32.mrb[6].mxu0 }
0x494d   : > { %v15889_v50 = vpop.f32.mrb[7].mxu0 }
0x4952   : > { %v15907_v20 = vpop.f32.mrb[8].mxu1  ;;  %v13738_v56 = vpop.f32.mrb[8].mxu0 }
0x4953   : > { %v13739_v37 = vadd.f32 %v13738_v56, %v13647_v27  ;;  %v15908_v58 = vpop.f32.mrb[9].mxu1  ;;  %v13740_v59 = vpop.f32.mrb[9].mxu0  ;;  %v14422_v56 = vld [vmem:[%s20955_s20] ss:$0 sm:$0xff] }
0x4954   : > { %v15909_v61 = vadd.f32 %v15908_v58, %v15907_v20  ;;  %v13741_v63 = vadd.f32 %v13740_v59, %v13651_v52  ;;  %v15910_v54 = vpop.f32.mrb[10].mxu1  ;;  %v13742_v6 = vpop.f32.mrb[10].mxu0  ;;  %v14421_v52 = vld [vmem:[%s20954_s0] ss:$0 sm:$0xff] }
0x4955   : > { %v13786_v36 = vmax.f32 %v13739_v37, 0.0  ;;  %v15911_v45 = vpop.f32.mrb[11].mxu1  ;;  %v13743_v0 = vpop.f32.mrb[11].mxu0 }
0x4956   : > { %v13628_v2 = vadd.f32 %v15909_v61, %v15887_v46  ;;  %v13787_v18 = vmax.f32 %v13741_v63, 0.0 }
0x4957   : > { %v13790_v35 = vpack.c.bf16 %v13786_v36, %v13786_v36 }
0x4958   : > { %v13633_v60 = vadd.f32 %v13628_v2, %v20689_v14  ;;  %v13791_v3 = vpack.c.bf16 %v13787_v18, %v13787_v18 }
0x495a   : > { %v13779_v9 = vpop.f32.mrb[12].mxu1  ;;  %14082 = vmatprep.mubr.bf16.mxu0 %v13791_v3 }
0x495b   : > { %v13780_v4 = vadd.f32 %v13779_v9, %v13655_v40  ;;  %v13781_v8 = vpop.f32.mrb[13].mxu1  ;;  %14083 = vmatmul.mubr.bf16.vlgmr.msra.gmra.mrb[12].mxu0 %v13790_v35 }
0x495c   : > { %v13782_v12 = vadd.f32 %v13781_v8, %v13659_v57  ;;  %v13783_v41 = vpop.f32.mrb[14].mxu1 }
0x495d   : > { %v13788_v62 = vmax.f32 %v13780_v4, 0.0  ;;  %v13784_v15 = vpop.f32.mrb[15].mxu1 }
0x495e   : > { %v13789_v17 = vmax.f32 %v13782_v12, 0.0 }
0x495f   : > { %v13792_v39 = vpack.c.bf16 %v13788_v62, %v13788_v62 }
0x4960   : > { %v13793_v19 = vpack.c.bf16 %v13789_v17, %v13789_v17 }
0x4962   : > { %14122 = vmatprep.mubr.bf16.mxu1 %v13793_v19 }
0x4963   : > { %14123 = vmatmul.mubr.bf16.vlgmr.msra.gmra.mrb[16].mxu1 %v13792_v39 }
0x4a2e   : > { %v15929_v5 = vpop.f32.mrb[12].mxu0 }
0x4a2f   : > { %v15930_v14 = vpop.f32.mrb[13].mxu0 }
0x4a30   : > { %v15931_v16 = vadd.f32 %v15930_v14, %v15929_v5  ;;  %v15932_v21 = vpop.f32.mrb[14].mxu0 }
0x4a31   : > { %v15933_v10 = vpop.f32.mrb[15].mxu0 }
0x4a36   : > { %v15951_v22 = vpop.f32.mrb[16].mxu1 }
0x4a37   : > { %v15952_v51 = vpop.f32.mrb[17].mxu1 }
0x4a38   : > { %v15953_v26 = vadd.f32 %v15952_v51, %v15951_v22  ;;  %v15954_v48 = vpop.f32.mrb[18].mxu1 }
0x4a39   : > { %v15955_v28 = vpop.f32.mrb[19].mxu1 }
0x4a3a   : > { %v14125_v53 = vadd.f32 %v15953_v26, %v15931_v16 }
0x4a3c   : > { %v14130_v11 = vadd.f32 %v14125_v53, %v13633_v60 }
0x4a3e   : > { %v14131_v30 = vsel %vm1813_vm7, %v14130_v11, 0.0 }
0x4a3f   : > { %14132 = vadd.xlane.f32.xlu0 %v14131_v30 }
0x4a43   : > { %3851 = vadd.xlane.f32.xlu0 %v3850_v32 }
0x4a47   : > { %10709 = vadd.xlane.f32.xlu0 %v10708_v33 }
0x4acc   : > { %v14133_v34 = vpop.xlane.xlu0 %14132 }
0x4acd   : > { %v14134_v7 = vmul.f32 0.03125, %v14133_v34 }
0x4acf   : > { %v14135_v38 = vsub.f32 %v14130_v11, %v14134_v7 }
0x4ad0   : > { %v3852_v13 = vpop.xlane.xlu0 %3851 }
0x4ad1   : > { %v3853_v43 = vmul.f32 0.03125, %v3852_v13  ;;  %v14136_v44 = vmul.f32 %v14135_v38, %v14135_v38 }
0x4ad3   : > { %v3854_v46 = vadd.f32 1e-05, %v3853_v43  ;;  %v14137_v47 = vsel %vm1813_vm7, %v14136_v44, 0.0 }
0x4ad4   : > { %14138 = vadd.xlane.f32.xlu1 %v14137_v47  ;;  %v10710_v1 = vpop.xlane.xlu0 %10709 }
0x4ad5   : > { %17389 = vrsqrt.f32 %v3854_v46  ;;  %v10711_v25 = vmul.f32 0.03125, %v10710_v1 }
0x4ad7   : > { %v10712_v50 = vadd.f32 1e-05, %v10711_v25 }
0x4ad9   : > { %17391 = vrsqrt.f32 %v10712_v50 }
0x4adf   : > { %v17390_v27 = vpop.eup %17389 }
0x4ae0   : > { %v3856_v20 = vmul.f32 %v17390_v27, %v3848_v49 }
0x4ae2   : > { %v3864_v37 = vmul.f32 %v14421_v52, %v3856_v20 }
0x4ae3   : > { %v17392_v58 = vpop.eup %17391 }
0x4ae4   : > { %v3872_v59 = vadd.f32 %v14422_v56, %v3864_v37  ;;  %v10714_v61 = vmul.f32 %v17392_v58, %v10706_v29 }
0x4ae6   : > { %v3873_v63 = vpack.c.bf16 %v3872_v59, %v3872_v59  ;;  %v10722_v54 = vmul.f32 %v14421_v52, %v10714_v61 }
0x4ae8   : > { %3875 = vst.msk [vmem:[%s20321_s13] sm:$0x1] %vm3874_vm8, %v3873_v63  ;;  %v10730_v6 = vadd.f32 %v14422_v56, %v10722_v54 }
0x4aea   : > { %v10731_v36 = vpack.c.bf16 %v10730_v6, %v10730_v6 }
0x4aec   : > { %14838 = vst.msk [vmem:[%s20321_s13 + $0x2] sm:$0x1] %vm3874_vm8, %v10731_v36 }
0x4b61   : > { %v14139_v45 = vpop.xlane.xlu1 %14138 }
0x4b62   : > { %v14140_v0 = vmul.f32 0.03125, %v14139_v45 }
0x4b64   : > { %v14141_v2 = vadd.f32 1e-05, %v14140_v0 }
0x4b66   : > { %17393 = vrsqrt.f32 %v14141_v2 }
0x4b70   : > { %v17394_v18 = vpop.eup %17393 }
0x4b71   : > { %v14143_v40 = vmul.f32 %v17394_v18, %v14135_v38 }
0x4b73   : > { %v14151_v60 = vmul.f32 %v14421_v52, %v14143_v40 }
0x4b75   : > { %v14159_v3 = vadd.f32 %v14422_v56, %v14151_v60 }
0x4b77   : > { %v14160_v57 = vpack.c.bf16 %v14159_v3, %v14159_v3 }
0x4b79   : > { %15046 = vst.msk [vmem:[%s20321_s13 + $0x3] sm:$0x1] %vm3874_vm8, %v14160_v57 }
0x4b7a PF: > { %s20957_s14 = sld [smem:[#allocation2_spill]] }
0x4b80   : > { %s23_s25 = sadd.s32 1, %s20957_s14  }
0x4b81   : > { %p20_p4 = scmp.ge.s32.totalorder %s23_s25, 6  }
0x4b83   :  { %22 = sbr.rel (!%p20_p4) target bundleno = 6 (0x6), region = 108 }

</bundles_post_ra>
